<compile_context>
chip_gen: v6e
topology: v6e:2x2x1
jax: 0.10.0
libtpu: 0.0.40
codegen_flags: <defaults>
</compile_context>

<pallas_src>
import functools

import jax
import jax.numpy as jnp
from jax import lax
from jax.experimental import pallas as pl
from jax.experimental.pallas import tpu as pltpu

EPS = 0.0003  # nn.BatchNorm2d(depth, momentum) -> second positional arg is eps


def _vmem_limit_bytes():
    """Derive the scoped-VMEM limit from the actual chip (v5e/v6e: 128 MiB, v7x: 64)."""
    try:
        info = pltpu.get_tpu_info()
        cap = int(getattr(info, "vmem_capacity_bytes", 0)) or 64 * 1024 * 1024
    except Exception:
        cap = 64 * 1024 * 1024
    return max(16 * 1024 * 1024, min(cap * 3 // 4, 112 * 1024 * 1024))


def _mosaic_params(*sems):
    return pltpu.CompilerParams(dimension_semantics=sems,
                                vmem_limit_bytes=_vmem_limit_bytes())


def _pick_strip(H, Wp, target_rows=512):
    """Largest divisor SH of H with SH*Wp <= target_rows (MXU M-dim target)."""
    sh = 1
    for cand in range(1, H + 1):
        if H % cand == 0 and cand * Wp <= target_rows:
            sh = cand
    return sh


def _pick_row_tile(total, max_tile=512):
    """Row tile: multiple-of-8 divisor <= max_tile, else the full extent (legal)."""
    if total <= max_tile:
        return total
    start = max_tile - max_tile % 8
    for cand in range(start, 7, -8):
        if total % cand == 0:
            return cand
    # TODO(synk): pad rows + mask the tail tile for totals with no mult-of-8 divisor.
    return total


def _bn_scale_shift(stats, gamma, beta, count):
    """Fold training-mode BN (batch stats) into per-channel scale/shift."""
    mean = stats[0] / count
    var = jnp.maximum(stats[1] / count - mean * mean, 0.0)   # clamp cancellation
    scale = gamma * lax.rsqrt(var + EPS)
    shift = beta - mean * scale
    return (scale.reshape(1, -1).astype(jnp.float32),
            shift.reshape(1, -1).astype(jnp.float32))


# ----------------------------------------------------------------------------
# Fused branches: aspp1 (1x1) + three dilated 3x3 convs + BN partial stats +
# global-average-pool partial sums.  One grid step = one (sample, row-strip).
# ----------------------------------------------------------------------------
def _branches_kernel(x_ref, w_ref, y_ref, st_ref, pool_ref, *,
                     W, Wp, P, SH, dils, depth):
    """x_ref : (1, (Hp+1)*Wp, C)  f32, fully zero-padded input (flattened)
       w_ref : (1 + 9*len(dils), C, depth)  bf16 tap weights
       y_ref : (1, SH, W, 4*depth) bf16   branch-packed conv outputs (this strip)
       st_ref: (1, 1, 2, 4*depth)  f32    per-strip [sum, sum_sq]
       pool_ref: (1, 1, 1, C)      f32    per-strip channel sums of x (interior)
    """
    C = x_ref.shape[-1]
    s = pl.program_id(1)
    h0 = s * SH                       # first output row of this strip
    slab = SH * Wp                    # M of every tap GEMM (halo columns included)
    nb = 1 + len(dils)

    def tap(off_h, off_w):
        start = (h0 + P + off_h) * Wp + (P + off_w)
        return x_ref[0, pl.ds(start, slab), :].astype(jnp.bfloat16)

    # branch 0: 1x1 conv == single tap at the image origin.
    accs = [jnp.dot(tap(0, 0), w_ref[0], preferred_element_type=jnp.float32)]
    # branches 1..3: dilated 3x3 convs by tap accumulation over 9 slab GEMMs.
    # (For small C a further win is stacking the 9 taps along K into one GEMM;
    #  skipped here -- only pays off when C is a multiple of 128.)
    for bi, d in enumerate(dils):
        acc = jnp.zeros((slab, depth), jnp.float32)
        for ky in range(3):
            for kx in range(3):
                acc += jnp.dot(tap((ky - 1) * d, (kx - 1) * d),
                               w_ref[1 + bi * 9 + ky * 3 + kx],
                               preferred_element_type=jnp.float32)
        accs.append(acc)
    acc_all = jnp.concatenate(accs, axis=-1)                 # (slab, 4*depth)

    s0 = jnp.zeros((1, nb * depth), jnp.float32)
    s1 = jnp.zeros((1, nb * depth), jnp.float32)
    ps = jnp.zeros((1, C), jnp.float32)
    for r in range(SH):
        row = acc_all[r * Wp:r * Wp + W, :]                  # discard halo columns
        y_ref[0, r, :, :] = row.astype(y_ref.dtype)
        s0 += jnp.sum(row, axis=0, keepdims=True)
        s1 += jnp.sum(row * row, axis=0, keepdims=True)
        # fused global average pool: sum the un-padded interior of x.
        xr = x_ref[0, pl.ds((h0 + r + P) * Wp + P, W), :]
        ps += jnp.sum(xr, axis=0, keepdims=True)
    st_ref[0, 0, 0:1, :] = s0
    st_ref[0, 0, 1:2, :] = s1
    pool_ref[0, 0, 0:1, :] = ps


def fused_branches(x_nhwc, w_all, dils):
    N, H, W, C = x_nhwc.shape
    n_w, _, depth = w_all.shape
    P = max(dils)
    Hp, Wp = H + 2 * P, W + 2 * P
    # One extra zero row so every SH*Wp tap slab stays in bounds (2P <= Wp).
    xp = jnp.pad(x_nhwc, ((0, 0), (P, P + 1), (P, P), (0, 0)))
    Lp = (Hp + 1) * Wp
    xp = xp.reshape(N, Lp, C)
    SH = _pick_strip(H, Wp)
    ns = H // SH
    nb = 1 + len(dils)

    y, st, pool = pl.pallas_call(
        functools.partial(_branches_kernel, W=W, Wp=Wp, P=P, SH=SH,
                          dils=tuple(dils), depth=depth),
        out_shape=(jax.ShapeDtypeStruct((N, H, W, nb * depth), jnp.bfloat16),
                   jax.ShapeDtypeStruct((N, ns, 2, nb * depth), jnp.float32),
                   jax.ShapeDtypeStruct((N, ns, 1, C), jnp.float32)),
        grid=(N, ns),
        in_specs=[pl.BlockSpec((1, Lp, C), lambda n, s: (n, 0, 0)),
                  pl.BlockSpec((n_w, C, depth), lambda n, s: (0, 0, 0))],
        out_specs=(pl.BlockSpec((1, SH, W, nb * depth), lambda n, s: (n, s, 0, 0)),
                   pl.BlockSpec((1, 1, 2, nb * depth), lambda n, s: (n, s, 0, 0)),
                   pl.BlockSpec((1, 1, 1, C), lambda n, s: (n, s, 0, 0))),
        compiler_params=_mosaic_params("parallel", "parallel"),
    )(xp, w_all)
    return y, jnp.sum(st, axis=(0, 1)), jnp.sum(pool, axis=1)[:, 0, :]


# ----------------------------------------------------------------------------
# aspp5 path: pooled x -> 1x1 conv -> BN (over N) -> ReLU -> its conv2 row.
# Tiny single-block kernel (everything per-sample, kept in f32).
# ----------------------------------------------------------------------------
def _aspp5_kernel(pool_ref, w5_ref, wc5_ref, g_ref, b_ref, out_ref, *, eps):
    y = jnp.dot(pool_ref[...], w5_ref[...], preferred_element_type=jnp.float32)
    mean = jnp.mean(y, axis=0, keepdims=True)
    var = jnp.maximum(jnp.mean(y * y, axis=0, keepdims=True) - mean * mean, 0.0)
    x5 = jnp.maximum((y - mean) * lax.rsqrt(var + eps) * g_ref[...] + b_ref[...], 0.0)
    row = jnp.dot(x5, wc5_ref[...], preferred_element_type=jnp.float32)
    out_ref[...] = row[:, None, :]


def aspp5_pooled_row(pooled, w5m, wc5, g5, b5):
    N, C = pooled.shape
    depth = w5m.shape[1]
    return pl.pallas_call(
        functools.partial(_aspp5_kernel, eps=EPS),
        out_shape=jax.ShapeDtypeStruct((N, 1, depth), jnp.float32),
        grid=(1,),
        in_specs=[pl.BlockSpec((N, C), lambda i: (0, 0)),
                  pl.BlockSpec((C, depth), lambda i: (0, 0)),
                  pl.BlockSpec((depth, depth), lambda i: (0, 0)),
                  pl.BlockSpec((1, depth), lambda i: (0, 0)),
                  pl.BlockSpec((1, depth), lambda i: (0, 0))],
        out_specs=pl.BlockSpec((N, 1, depth), lambda i: (0, 0, 0)),
        compiler_params=_mosaic_params("arbitrary"),
    )(pooled, w5m, wc5, g5, b5)


# ----------------------------------------------------------------------------
# Final 1x1 conv (conv2) over the never-materialised 5-way concat, with the
# branch BN+ReLU fused in (scale/shift) and BN2 partial stats emitted.
# ----------------------------------------------------------------------------
def _final_kernel(xb_ref, sc_ref, sh_ref, wc_ref, pr_ref, y_ref, st_ref):
    xb = xb_ref[0].astype(jnp.float32)                       # (TR, 4*depth)
    xb = jnp.maximum(xb * sc_ref[...] + sh_ref[...], 0.0)    # fused branch BN + ReLU
    y = jnp.dot(xb.astype(jnp.bfloat16), wc_ref[...],
                preferred_element_type=jnp.float32)
    y = y + pr_ref[0]                                        # pooled-branch row (broadcast)
    y_ref[0] = y
    st_ref[0, 0, 0:1, :] = jnp.sum(y, axis=0, keepdims=True)
    st_ref[0, 0, 1:2, :] = jnp.sum(y * y, axis=0, keepdims=True)


def fused_final_conv(xb, scale, shift, wc_main, prow):
    N, HW, K = xb.shape
    depth = wc_main.shape[1]
    TR = _pick_row_tile(HW)
    nj = HW // TR
    y, st = pl.pallas_call(
        _final_kernel,
        out_shape=(jax.ShapeDtypeStruct((N, HW, depth), jnp.float32),
                   jax.ShapeDtypeStruct((N, nj, 2, depth), jnp.float32)),
        grid=(N, nj),
        in_specs=[pl.BlockSpec((1, TR, K), lambda n, j: (n, j, 0)),
                  pl.BlockSpec((1, K), lambda n, j: (0, 0)),
                  pl.BlockSpec((1, K), lambda n, j: (0, 0)),
                  pl.BlockSpec((K, depth), lambda n, j: (0, 0)),
                  pl.BlockSpec((1, 1, depth), lambda n, j: (n, 0, 0))],
        out_specs=(pl.BlockSpec((1, TR, depth), lambda n, j: (n, j, 0)),
                   pl.BlockSpec((1, 1, 2, depth), lambda n, j: (n, j, 0, 0))),
        compiler_params=_mosaic_params("parallel", "parallel"),
    )(xb, scale, shift, wc_main, prow)
    return y, jnp.sum(st, axis=(0, 1))


# ----------------------------------------------------------------------------
# Final BN2 + ReLU (needs the global stats, hence a second, row-tiled pass).
# ----------------------------------------------------------------------------
def _bn_relu_kernel(y_ref, sc_ref, sh_ref, o_ref):
    o_ref[0] = jnp.maximum(y_ref[0] * sc_ref[...] + sh_ref[...], 0.0)


def bn_relu_apply(y3, scale, shift):
    N, HW, D = y3.shape
    TR = _pick_row_tile(HW)
    nj = HW // TR
    return pl.pallas_call(
        _bn_relu_kernel,
        out_shape=jax.ShapeDtypeStruct((N, HW, D), jnp.float32),
        grid=(N, nj),
        in_specs=[pl.BlockSpec((1, TR, D), lambda n, j: (n, j, 0)),
                  pl.BlockSpec((1, D), lambda n, j: (0, 0)),
                  pl.BlockSpec((1, D), lambda n, j: (0, 0))],
        out_specs=pl.BlockSpec((1, TR, D), lambda n, j: (n, j, 0)),
        compiler_params=_mosaic_params("parallel", "parallel"),
    )(y3, scale, shift)


# ----------------------------------------------------------------------------
# Full ASPP forward
# ----------------------------------------------------------------------------
def aspp_forward_pallas(x_nchw, params, mult=1):
    N, C, H, W = x_nchw.shape
    depth = params["w1"].shape[0]
    HW = H * W
    dils = (int(6 * mult), int(12 * mult), int(18 * mult))

    x_nhwc = jnp.transpose(x_nchw, (0, 2, 3, 1)).astype(jnp.float32)

    # branch conv weights packed as (1 + 9*3, C, depth) taps, bf16 for the MXU.
    w1m = params["w1"][:, :, 0, 0].T                                  # (C, depth)
    w3 = jnp.stack([params["w2"], params["w3"], params["w4"]])        # (3, depth, C, 3, 3)
    w3 = jnp.transpose(w3, (0, 3, 4, 2, 1)).reshape(27, C, depth)     # (branch,ky,kx) taps
    w_all = jnp.concatenate([w1m[None], w3], axis=0).astype(jnp.bfloat16)

    # aspp1..aspp4 convs + BN partial stats + global pool, all in one kernel.
    y_br, st_br, pool_sum = fused_branches(x_nhwc, w_all, dils)
    g_pack = jnp.concatenate([params["g1"], params["g2"], params["g3"], params["g4"]])
    b_pack = jnp.concatenate([params["b1"], params["b2"], params["b3"], params["b4"]])
    sc_br, sh_br = _bn_scale_shift(st_br, g_pack, b_pack, N * HW)

    # aspp5: pooled -> 1x1 conv -> BN -> ReLU, folded through conv2's pooled rows.
    pooled = pool_sum * (1.0 / HW)                                    # (N, C)
    wc2d = params["wc"][:, :, 0, 0].T                                 # (5*depth, depth)
    prow = aspp5_pooled_row(pooled, params["w5"][:, :, 0, 0].T,
                            wc2d[4 * depth:],
                            params["g5"].reshape(1, depth),
                            params["b5"].reshape(1, depth))           # (N, 1, depth)

    # conv2 over the 5-way concat (never materialised) with fused branch BN/ReLU.
    wc_main = wc2d[:4 * depth].astype(jnp.bfloat16)
    y2, st2 = fused_final_conv(y_br.reshape(N, HW, 4 * depth),
                               sc_br, sh_br, wc_main, prow)
    sc_f, sh_f = _bn_scale_shift(st2, params["gc"], params["bc"], N * HW)
    out = bn_relu_apply(y2, sc_f, sh_f)
    return out.reshape(N, H, W, depth).transpose(0, 3, 1, 2)          # NCHW out


# ----------------------------------------------------------------------------
# Pure-JAX reference (correctness cross-check)
# ----------------------------------------------------------------------------
def aspp_forward_ref(x, params, mult=1):
    def conv(inp, w, d, p):
        return lax.conv_general_dilated(
            inp, w, window_strides=(1, 1), padding=((p, p), (p, p)),
            rhs_dilation=(d, d), dimension_numbers=("NCHW", "OIHW", "NCHW"),
            precision=lax.Precision.HIGHEST)

    def bn_relu(y, g, b):
        g = g.reshape(1, -1, 1, 1)
        b = b.reshape(1, -1, 1, 1)
        mean = y.mean(axis=(0, 2, 3), keepdims=True)
        var = ((y - mean) ** 2).mean(axis=(0, 2, 3), keepdims=True)
        return jnp.maximum((y - mean) / jnp.sqrt(var + EPS) * g + b, 0.0)

    N, C, H, W = x.shape
    depth = params["w1"].shape[0]
    d1, d2, d3 = int(6 * mult), int(12 * mult), int(18 * mult)
    x1 = bn_relu(conv(x, params["w1"], 1, 0), params["g1"], params["b1"])
    x2 = bn_relu(conv(x, params["w2"], d1, d1), params["g2"], params["b2"])
    x3 = bn_relu(conv(x, params["w3"], d2, d2), params["g3"], params["b3"])
    x4 = bn_relu(conv(x, params["w4"], d3, d3), params["g4"], params["b4"])
    x5 = x.mean(axis=(2, 3), keepdims=True)
    x5 = bn_relu(conv(x5, params["w5"], 1, 0), params["g5"], params["b5"])
    x5 = jnp.broadcast_to(x5, (N, depth, H, W))
    xc = jnp.concatenate([x1, x2, x3, x4, x5], axis=1)
    return bn_relu(conv(xc, params["wc"], 1, 0), params["gc"], params["bc"])


# ----------------------------------------------------------------------------
if __name__ == "__main__":
    # Small shapes consistent with the module: N=2, C=4, H=W=16, depth=8.
    N, C, H, W, depth = 2, 4, 16, 16, 8

    key = jax.random.PRNGKey(0)
    ks = jax.random.split(key, 20)
    params = {
        "w1": jax.random.normal(ks[0], (depth, C, 1, 1), jnp.float32) * 0.2,
        "w2": jax.random.normal(ks[1], (depth, C, 3, 3), jnp.float32) * 0.2,
        "w3": jax.random.normal(ks[2], (depth, C, 3, 3), jnp.float32) * 0.2,
        "w4": jax.random.normal(ks[3], (depth, C, 3, 3), jnp.float32) * 0.2,
        "w5": jax.random.normal(ks[4], (depth, C, 1, 1), jnp.float32) * 0.2,
        "wc": jax.random.normal(ks[5], (depth, depth * 5, 1, 1), jnp.float32) * 0.2,
    }
    # Per-layer BatchNorm affine params (exercised beyond the ones/zeros defaults).
    for i, name in enumerate(("1", "2", "3", "4", "5", "c")):
        params["g" + name] = 1.0 + 0.1 * jax.random.normal(ks[6 + i], (depth,), jnp.float32)
        params["b" + name] = 0.1 * jax.random.normal(ks[12 + i], (depth,), jnp.float32)

    x = jax.random.normal(ks[18], (N, C, H, W), jnp.float32)

    out = jax.block_until_ready(jax.jit(aspp_forward_pallas)(x, params))
    assert out.shape == (N, depth, H, W), out.shape
    assert bool(jnp.all(jnp.isfinite(out)))

    ref = jax.block_until_ready(aspp_forward_ref(x, params))
    max_err = float(jnp.max(jnp.abs(out - ref)))
    # bf16 MXU operands with f32 accumulation vs. an f32 HIGHEST-precision reference.
    assert jnp.allclose(out, ref, atol=5e-2, rtol=5e-2), max_err

    print("KERNEL_OK")
</pallas_src>

<mosaic_0001>
module attributes {stable_mosaic.version = 11 : i64} {
  func.func @_aspp5_kernel(%arg0: i32, %arg1: memref<2x4xf32, #tpu.memory_space<vmem>>, %arg2: memref<4x8xf32, #tpu.memory_space<vmem>>, %arg3: memref<8x8xf32, #tpu.memory_space<vmem>>, %arg4: memref<1x8xf32, #tpu.memory_space<vmem>>, %arg5: memref<1x8xf32, #tpu.memory_space<vmem>>, %arg6: memref<2x1x8xf32, #tpu.memory_space<vmem>>) attributes {dimension_semantics = [#tpu.dimension_semantics<arbitrary>], iteration_bounds = array<i64: 1>, scalar_prefetch = 0 : i64, scratch_operands = 0 : i64, tpu.core_type = #tpu.core_type<tc>, window_params = [{pipeline_mode = #tpu.pipeline_mode<synchronous>, transform_indices = @transform_0, window_bounds = array<i64: 2, 4>}, {pipeline_mode = #tpu.pipeline_mode<synchronous>, transform_indices = @transform_1, window_bounds = array<i64: 4, 8>}, {pipeline_mode = #tpu.pipeline_mode<synchronous>, transform_indices = @transform_2, window_bounds = array<i64: 8, 8>}, {pipeline_mode = #tpu.pipeline_mode<synchronous>, transform_indices = @transform_3, window_bounds = array<i64: 1, 8>}, {pipeline_mode = #tpu.pipeline_mode<synchronous>, transform_indices = @transform_4, window_bounds = array<i64: 1, 8>}, {pipeline_mode = #tpu.pipeline_mode<synchronous>, transform_indices = @transform_5, window_bounds = array<i64: 2, 1, 8>}]} {
    %c0 = arith.constant 0 : index
    %c0_0 = arith.constant 0 : index
    %0 = vector.load %arg1[%c0, %c0_0] : memref<2x4xf32, #tpu.memory_space<vmem>>, vector<2x4xf32>
    %c0_1 = arith.constant 0 : index
    %c0_2 = arith.constant 0 : index
    %1 = vector.load %arg2[%c0_1, %c0_2] : memref<4x8xf32, #tpu.memory_space<vmem>>, vector<4x8xf32>
    %cst = arith.constant dense<0.000000e+00> : vector<2x8xf32>
    %2 = tpu.matmul %0, %1, %cst {dimension_numbers = #tpu.dot_dimension_numbers<[1], [0], [0], [1], [0, 0, 1, 1], [], []>} : vector<2x4xf32>, vector<4x8xf32>, vector<2x8xf32> -> vector<2x8xf32>
    %cst_3 = arith.constant dense<0.000000e+00> : vector<8xf32>
    %3 = vector.multi_reduction <add>, %2, %cst_3 [0] : vector<2x8xf32> to vector<8xf32>
    %4 = vector.shape_cast %3 : vector<8xf32> to vector<1x8xf32>
    %cst_4 = arith.constant 2.000000e+00 : f32
    %5 = vector.broadcast %cst_4 : f32 to vector<1x8xf32>
    %6 = arith.divf %4, %5 : vector<1x8xf32>
    %7 = arith.mulf %2, %2 : vector<2x8xf32>
    %cst_5 = arith.constant dense<0.000000e+00> : vector<8xf32>
    %8 = vector.multi_reduction <add>, %7, %cst_5 [0] : vector<2x8xf32> to vector<8xf32>
    %9 = vector.shape_cast %8 : vector<8xf32> to vector<1x8xf32>
    %cst_6 = arith.constant 2.000000e+00 : f32
    %10 = vector.broadcast %cst_6 : f32 to vector<1x8xf32>
    %11 = arith.divf %9, %10 : vector<1x8xf32>
    %12 = arith.mulf %6, %6 : vector<1x8xf32>
    %13 = arith.subf %11, %12 : vector<1x8xf32>
    %cst_7 = arith.constant 0.000000e+00 : f32
    %14 = vector.broadcast %cst_7 : f32 to vector<1x8xf32>
    %15 = arith.maximumf %13, %14 : vector<1x8xf32>
    %16 = vector.broadcast %6 : vector<1x8xf32> to vector<2x8xf32>
    %17 = arith.subf %2, %16 : vector<2x8xf32>
    %cst_8 = arith.constant 3.000000e-04 : f32
    %18 = vector.broadcast %cst_8 : f32 to vector<1x8xf32>
    %19 = arith.addf %15, %18 : vector<1x8xf32>
    %20 = math.rsqrt %19 : vector<1x8xf32>
    %21 = vector.broadcast %20 : vector<1x8xf32> to vector<2x8xf32>
    %22 = arith.mulf %17, %21 : vector<2x8xf32>
    %c0_9 = arith.constant 0 : index
    %c0_10 = arith.constant 0 : index
    %23 = vector.load %arg4[%c0_9, %c0_10] : memref<1x8xf32, #tpu.memory_space<vmem>>, vector<1x8xf32>
    %24 = vector.broadcast %23 : vector<1x8xf32> to vector<2x8xf32>
    %25 = arith.mulf %22, %24 : vector<2x8xf32>
    %c0_11 = arith.constant 0 : index
    %c0_12 = arith.constant 0 : index
    %26 = vector.load %arg5[%c0_11, %c0_12] : memref<1x8xf32, #tpu.memory_space<vmem>>, vector<1x8xf32>
    %27 = vector.broadcast %26 : vector<1x8xf32> to vector<2x8xf32>
    %28 = arith.addf %25, %27 : vector<2x8xf32>
    %cst_13 = arith.constant 0.000000e+00 : f32
    %29 = vector.broadcast %cst_13 : f32 to vector<2x8xf32>
    %30 = arith.maximumf %28, %29 : vector<2x8xf32>
    %c0_14 = arith.constant 0 : index
    %c0_15 = arith.constant 0 : index
    %31 = vector.load %arg3[%c0_14, %c0_15] : memref<8x8xf32, #tpu.memory_space<vmem>>, vector<8x8xf32>
    %cst_16 = arith.constant dense<0.000000e+00> : vector<2x8xf32>
    %32 = tpu.matmul %30, %31, %cst_16 {dimension_numbers = #tpu.dot_dimension_numbers<[1], [0], [0], [1], [0, 0, 1, 1], [], []>} : vector<2x8xf32>, vector<8x8xf32>, vector<2x8xf32> -> vector<2x8xf32>
    %33 = vector.shape_cast %32 : vector<2x8xf32> to vector<2x1x8xf32>
    %c0_17 = arith.constant 0 : index
    %c0_18 = arith.constant 0 : index
    %c0_19 = arith.constant 0 : index
    %34 = vector.load %arg6[%c0_17, %c0_18, %c0_19] : memref<2x1x8xf32, #tpu.memory_space<vmem>>, vector<2x1x8xf32>
    tpu.vector_store %arg6[%c0_17, %c0_18, %c0_19], %33 {strides = array<i32>} : memref<2x1x8xf32, #tpu.memory_space<vmem>>, vector<2x1x8xf32>,
    return
  }
  func.func @transform_0(%arg0: i32) -> (i32, i32) {
    %c0_i32 = arith.constant 0 : i32
    %c0_i32_0 = arith.constant 0 : i32
    %c0_i32_1 = arith.constant 0 : i32
    return %c0_i32, %c0_i32_0 : i32, i32
  }
  func.func @transform_1(%arg0: i32) -> (i32, i32) {
    %c0_i32 = arith.constant 0 : i32
    %c0_i32_0 = arith.constant 0 : i32
    %c0_i32_1 = arith.constant 0 : i32
    return %c0_i32, %c0_i32_0 : i32, i32
  }
  func.func @transform_2(%arg0: i32) -> (i32, i32) {
    %c0_i32 = arith.constant 0 : i32
    %c0_i32_0 = arith.constant 0 : i32
    %c0_i32_1 = arith.constant 0 : i32
    return %c0_i32, %c0_i32_0 : i32, i32
  }
  func.func @transform_3(%arg0: i32) -> (i32, i32) {
    %c0_i32 = arith.constant 0 : i32
    %c0_i32_0 = arith.constant 0 : i32
    %c0_i32_1 = arith.constant 0 : i32
    return %c0_i32, %c0_i32_0 : i32, i32
  }
  func.func @transform_4(%arg0: i32) -> (i32, i32) {
    %c0_i32 = arith.constant 0 : i32
    %c0_i32_0 = arith.constant 0 : i32
    %c0_i32_1 = arith.constant 0 : i32
    return %c0_i32, %c0_i32_0 : i32, i32
  }
  func.func @transform_5(%arg0: i32) -> (i32, i32, i32) {
    %c0_i32 = arith.constant 0 : i32
    %c0_i32_0 = arith.constant 0 : i32
    %c0_i32_1 = arith.constant 0 : i32
    %c0_i32_2 = arith.constant 0 : i32
    return %c0_i32, %c0_i32_0, %c0_i32_1 : i32, i32, i32
  }
}

module attributes {stable_mosaic.version = 11 : i64} {
  func.func @_branches_kernel(%arg0: i32, %arg1: i32, %arg2: memref<1x2756x4xf32, #tpu.memory_space<vmem>>, %arg3: memref<28x4x8xbf16, #tpu.memory_space<vmem>>, %arg4: memref<1x8x16x32xbf16, #tpu.memory_space<vmem>>, %arg5: memref<1x1x2x32xf32, #tpu.memory_space<vmem>>, %arg6: memref<1x1x1x4xf32, #tpu.memory_space<vmem>>) attributes {dimension_semantics = [#tpu.dimension_semantics<parallel>, #tpu.dimension_semantics<parallel>], iteration_bounds = array<i64: 2, 2>, scalar_prefetch = 0 : i64, scratch_operands = 0 : i64, tpu.core_type = #tpu.core_type<tc>, window_params = [{transform_indices = @transform_0, window_bounds = array<i64: 1, 2756, 4>}, {pipeline_mode = #tpu.pipeline_mode<synchronous>, transform_indices = @transform_1, window_bounds = array<i64: 28, 4, 8>}, {transform_indices = @transform_2, window_bounds = array<i64: 1, 8, 16, 32>}, {transform_indices = @transform_3, window_bounds = array<i64: 1, 1, 2, 32>}, {transform_indices = @transform_4, window_bounds = array<i64: 1, 1, 1, 4>}]} {
    %c8_i32 = arith.constant 8 : i32
    %0 = arith.muli %arg1, %c8_i32 : i32
    %c18_i32 = arith.constant 18 : i32
    %1 = arith.addi %0, %c18_i32 : i32
    %c0_i32 = arith.constant 0 : i32
    %2 = arith.addi %1, %c0_i32 : i32
    %c52_i32 = arith.constant 52 : i32
    %3 = arith.muli %2, %c52_i32 : i32
    %c18_i32_0 = arith.constant 18 : i32
    %4 = arith.addi %3, %c18_i32_0 : i32
    %c0 = arith.constant 0 : index
    %5 = arith.index_cast %4 : i32 to index
    %c0_1 = arith.constant 0 : index
    %6 = vector.load %arg2[%c0, %5, %c0_1] : memref<1x2756x4xf32, #tpu.memory_space<vmem>>, vector<1x416x4xf32>
    %7 = vector.shape_cast %6 : vector<1x416x4xf32> to vector<416x4xf32>
    %8 = arith.truncf %7 : vector<416x4xf32> to vector<416x4xbf16>
    %c0_2 = arith.constant 0 : index
    %c0_3 = arith.constant 0 : index
    %c0_4 = arith.constant 0 : index
    %9 = vector.load %arg3[%c0_2, %c0_3, %c0_4] : memref<28x4x8xbf16, #tpu.memory_space<vmem>>, vector<1x4x8xbf16>
    %10 = vector.shape_cast %9 : vector<1x4x8xbf16> to vector<4x8xbf16>
    %cst = arith.constant dense<0.000000e+00> : vector<416x8xf32>
    %11 = tpu.matmul %8, %10, %cst {dimension_numbers = #tpu.dot_dimension_numbers<[1], [0], [0], [1], [0, 0, 1, 1], [], []>} : vector<416x4xbf16>, vector<4x8xbf16>, vector<416x8xf32> -> vector<416x8xf32>
    %cst_5 = arith.constant 0.000000e+00 : f32
    %12 = vector.broadcast %cst_5 : f32 to vector<416x8xf32>
    %c18_i32_6 = arith.constant 18 : i32
    %13 = arith.addi %0, %c18_i32_6 : i32
    %c-6_i32 = arith.constant -6 : i32
    %14 = arith.addi %13, %c-6_i32 : i32
    %c52_i32_7 = arith.constant 52 : i32
    %15 = arith.muli %14, %c52_i32_7 : i32
    %c12_i32 = arith.constant 12 : i32
    %16 = arith.addi %15, %c12_i32 : i32
    %c0_8 = arith.constant 0 : index
    %17 = arith.index_cast %16 : i32 to index
    %c0_9 = arith.constant 0 : index
    %18 = vector.load %arg2[%c0_8, %17, %c0_9] : memref<1x2756x4xf32, #tpu.memory_space<vmem>>, vector<1x416x4xf32>
    %19 = vector.shape_cast %18 : vector<1x416x4xf32> to vector<416x4xf32>
    %20 = arith.truncf %19 : vector<416x4xf32> to vector<416x4xbf16>
    %c1 = arith.constant 1 : index
    %c0_10 = arith.constant 0 : index
    %c0_11 = arith.constant 0 : index
    %21 = vector.load %arg3[%c1, %c0_10, %c0_11] : memref<28x4x8xbf16, #tpu.memory_space<vmem>>, vector<1x4x8xbf16>
    %22 = vector.shape_cast %21 : vector<1x4x8xbf16> to vector<4x8xbf16>
    %cst_12 = arith.constant dense<0.000000e+00> : vector<416x8xf32>
    %23 = tpu.matmul %20, %22, %cst_12 {dimension_numbers = #tpu.dot_dimension_numbers<[1], [0], [0], [1], [0, 0, 1, 1], [], []>} : vector<416x4xbf16>, vector<4x8xbf16>, vector<416x8xf32> -> vector<416x8xf32>
    %24 = arith.addf %12, %23 : vector<416x8xf32>
    %c18_i32_13 = arith.constant 18 : i32
    %25 = arith.addi %0, %c18_i32_13 : i32
    %c-6_i32_14 = arith.constant -6 : i32
    %26 = arith.addi %25, %c-6_i32_14 : i32
    %c52_i32_15 = arith.constant 52 : i32
    %27 = arith.muli %26, %c52_i32_15 : i32
    %c18_i32_16 = arith.constant 18 : i32
    %28 = arith.addi %27, %c18_i32_16 : i32
    %c0_17 = arith.constant 0 : index
    %29 = arith.index_cast %28 : i32 to index
    %c0_18 = arith.constant 0 : index
    %30 = vector.load %arg2[%c0_17, %29, %c0_18] : memref<1x2756x4xf32, #tpu.memory_space<vmem>>, vector<1x416x4xf32>
    %31 = vector.shape_cast %30 : vector<1x416x4xf32> to vector<416x4xf32>
    %32 = arith.truncf %31 : vector<416x4xf32> to vector<416x4xbf16>
    %c2 = arith.constant 2 : index
    %c0_19 = arith.constant 0 : index
    %c0_20 = arith.constant 0 : index
    %33 = vector.load %arg3[%c2, %c0_19, %c0_20] : memref<28x4x8xbf16, #tpu.memory_space<vmem>>, vector<1x4x8xbf16>
    %34 = vector.shape_cast %33 : vector<1x4x8xbf16> to vector<4x8xbf16>
    %cst_21 = arith.constant dense<0.000000e+00> : vector<416x8xf32>
    %35 = tpu.matmul %32, %34, %cst_21 {dimension_numbers = #tpu.dot_dimension_numbers<[1], [0], [0], [1], [0, 0, 1, 1], [], []>} : vector<416x4xbf16>, vector<4x8xbf16>, vector<416x8xf32> -> vector<416x8xf32>
    %36 = arith.addf %24, %35 : vector<416x8xf32>
    %c18_i32_22 = arith.constant 18 : i32
    %37 = arith.addi %0, %c18_i32_22 : i32
    %c-6_i32_23 = arith.constant -6 : i32
    %38 = arith.addi %37, %c-6_i32_23 : i32
    %c52_i32_24 = arith.constant 52 : i32
    %39 = arith.muli %38, %c52_i32_24 : i32
    %c24_i32 = arith.constant 24 : i32
    %40 = arith.addi %39, %c24_i32 : i32
    %c0_25 = arith.constant 0 : index
    %41 = arith.index_cast %40 : i32 to index
    %c0_26 = arith.constant 0 : index
    %42 = vector.load %arg2[%c0_25, %41, %c0_26] : memref<1x2756x4xf32, #tpu.memory_space<vmem>>, vector<1x416x4xf32>
    %43 = vector.shape_cast %42 : vector<1x416x4xf32> to vector<416x4xf32>
    %44 = arith.truncf %43 : vector<416x4xf32> to vector<416x4xbf16>
    %c3 = arith.constant 3 : index
    %c0_27 = arith.constant 0 : index
    %c0_28 = arith.constant 0 : index
    %45 = vector.load %arg3[%c3, %c0_27, %c0_28] : memref<28x4x8xbf16, #tpu.memory_space<vmem>>, vector<1x4x8xbf16>
    %46 = vector.shape_cast %45 : vector<1x4x8xbf16> to vector<4x8xbf16>
    %cst_29 = arith.constant dense<0.000000e+00> : vector<416x8xf32>
    %47 = tpu.matmul %44, %46, %cst_29 {dimension_numbers = #tpu.dot_dimension_numbers<[1], [0], [0], [1], [0, 0, 1, 1], [], []>} : vector<416x4xbf16>, vector<4x8xbf16>, vector<416x8xf32> -> vector<416x8xf32>
    %48 = arith.addf %36, %47 : vector<416x8xf32>
    %c18_i32_30 = arith.constant 18 : i32
    %49 = arith.addi %0, %c18_i32_30 : i32
    %c0_i32_31 = arith.constant 0 : i32
    %50 = arith.addi %49, %c0_i32_31 : i32
    %c52_i32_32 = arith.constant 52 : i32
    %51 = arith.muli %50, %c52_i32_32 : i32
    %c12_i32_33 = arith.constant 12 : i32
    %52 = arith.addi %51, %c12_i32_33 : i32
    %c0_34 = arith.constant 0 : index
    %53 = arith.index_cast %52 : i32 to index
    %c0_35 = arith.constant 0 : index
    %54 = vector.load %arg2[%c0_34, %53, %c0_35] : memref<1x2756x4xf32, #tpu.memory_space<vmem>>, vector<1x416x4xf32>
    %55 = vector.shape_cast %54 : vector<1x416x4xf32> to vector<416x4xf32>
    %56 = arith.truncf %55 : vector<416x4xf32> to vector<416x4xbf16>
    %c4 = arith.constant 4 : index
    %c0_36 = arith.constant 0 : index
    %c0_37 = arith.constant 0 : index
    %57 = vector.load %arg3[%c4, %c0_36, %c0_37] : memref<28x4x8xbf16, #tpu.memory_space<vmem>>, vector<1x4x8xbf16>
    %58 = vector.shape_cast %57 : vector<1x4x8xbf16> to vector<4x8xbf16>
    %cst_38 = arith.constant dense<0.000000e+00> : vector<416x8xf32>
    %59 = tpu.matmul %56, %58, %cst_38 {dimension_numbers = #tpu.dot_dimension_numbers<[1], [0], [0], [1], [0, 0, 1, 1], [], []>} : vector<416x4xbf16>, vector<4x8xbf16>, vector<416x8xf32> -> vector<416x8xf32>
    %60 = arith.addf %48, %59 : vector<416x8xf32>
    %c18_i32_39 = arith.constant 18 : i32
    %61 = arith.addi %0, %c18_i32_39 : i32
    %c0_i32_40 = arith.constant 0 : i32
    %62 = arith.addi %61, %c0_i32_40 : i32
    %c52_i32_41 = arith.constant 52 : i32
    %63 = arith.muli %62, %c52_i32_41 : i32
    %c18_i32_42 = arith.constant 18 : i32
    %64 = arith.addi %63, %c18_i32_42 : i32
    %c0_43 = arith.constant 0 : index
    %65 = arith.index_cast %64 : i32 to index
    %c0_44 = arith.constant 0 : index
    %66 = vector.load %arg2[%c0_43, %65, %c0_44] : memref<1x2756x4xf32, #tpu.memory_space<vmem>>, vector<1x416x4xf32>
    %67 = vector.shape_cast %66 : vector<1x416x4xf32> to vector<416x4xf32>
    %68 = arith.truncf %67 : vector<416x4xf32> to vector<416x4xbf16>
    %c5 = arith.constant 5 : index
    %c0_45 = arith.constant 0 : index
    %c0_46 = arith.constant 0 : index
    %69 = vector.load %arg3[%c5, %c0_45, %c0_46] : memref<28x4x8xbf16, #tpu.memory_space<vmem>>, vector<1x4x8xbf16>
    %70 = vector.shape_cast %69 : vector<1x4x8xbf16> to vector<4x8xbf16>
    %cst_47 = arith.constant dense<0.000000e+00> : vector<416x8xf32>
    %71 = tpu.matmul %68, %70, %cst_47 {dimension_numbers = #tpu.dot_dimension_numbers<[1], [0], [0], [1], [0, 0, 1, 1], [], []>} : vector<416x4xbf16>, vector<4x8xbf16>, vector<416x8xf32> -> vector<416x8xf32>
    %72 = arith.addf %60, %71 : vector<416x8xf32>
    %c18_i32_48 = arith.constant 18 : i32
    %73 = arith.addi %0, %c18_i32_48 : i32
    %c0_i32_49 = arith.constant 0 : i32
    %74 = arith.addi %73, %c0_i32_49 : i32
    %c52_i32_50 = arith.constant 52 : i32
    %75 = arith.muli %74, %c52_i32_50 : i32
    %c24_i32_51 = arith.constant 24 : i32
    %76 = arith.addi %75, %c24_i32_51 : i32
    %c0_52 = arith.constant 0 : index
    %77 = arith.index_cast %76 : i32 to index
    %c0_53 = arith.constant 0 : index
    %78 = vector.load %arg2[%c0_52, %77, %c0_53] : memref<1x2756x4xf32, #tpu.memory_space<vmem>>, vector<1x416x4xf32>
    %79 = vector.shape_cast %78 : vector<1x416x4xf32> to vector<416x4xf32>
    %80 = arith.truncf %79 : vector<416x4xf32> to vector<416x4xbf16>
    %c6 = arith.constant 6 : index
    %c0_54 = arith.constant 0 : index
    %c0_55 = arith.constant 0 : index
    %81 = vector.load %arg3[%c6, %c0_54, %c0_55] : memref<28x4x8xbf16, #tpu.memory_space<vmem>>, vector<1x4x8xbf16>
    %82 = vector.shape_cast %81 : vector<1x4x8xbf16> to vector<4x8xbf16>
    %cst_56 = arith.constant dense<0.000000e+00> : vector<416x8xf32>
    %83 = tpu.matmul %80, %82, %cst_56 {dimension_numbers = #tpu.dot_dimension_numbers<[1], [0], [0], [1], [0, 0, 1, 1], [], []>} : vector<416x4xbf16>, vector<4x8xbf16>, vector<416x8xf32> -> vector<416x8xf32>
    %84 = arith.addf %72, %83 : vector<416x8xf32>
    %c18_i32_57 = arith.constant 18 : i32
    %85 = arith.addi %0, %c18_i32_57 : i32
    %c6_i32 = arith.constant 6 : i32
    %86 = arith.addi %85, %c6_i32 : i32
    %c52_i32_58 = arith.constant 52 : i32
    %87 = arith.muli %86, %c52_i32_58 : i32
    %c12_i32_59 = arith.constant 12 : i32
    %88 = arith.addi %87, %c12_i32_59 : i32
    %c0_60 = arith.constant 0 : index
    %89 = arith.index_cast %88 : i32 to index
    %c0_61 = arith.constant 0 : index
    %90 = vector.load %arg2[%c0_60, %89, %c0_61] : memref<1x2756x4xf32, #tpu.memory_space<vmem>>, vector<1x416x4xf32>
    %91 = vector.shape_cast %90 : vector<1x416x4xf32> to vector<416x4xf32>
    %92 = arith.truncf %91 : vector<416x4xf32> to vector<416x4xbf16>
    %c7 = arith.constant 7 : index
    %c0_62 = arith.constant 0 : index
    %c0_63 = arith.constant 0 : index
    %93 = vector.load %arg3[%c7, %c0_62, %c0_63] : memref<28x4x8xbf16, #tpu.memory_space<vmem>>, vector<1x4x8xbf16>
    %94 = vector.shape_cast %93 : vector<1x4x8xbf16> to vector<4x8xbf16>
    %cst_64 = arith.constant dense<0.000000e+00> : vector<416x8xf32>
    %95 = tpu.matmul %92, %94, %cst_64 {dimension_numbers = #tpu.dot_dimension_numbers<[1], [0], [0], [1], [0, 0, 1, 1], [], []>} : vector<416x4xbf16>, vector<4x8xbf16>, vector<416x8xf32> -> vector<416x8xf32>
    %96 = arith.addf %84, %95 : vector<416x8xf32>
    %c18_i32_65 = arith.constant 18 : i32
    %97 = arith.addi %0, %c18_i32_65 : i32
    %c6_i32_66 = arith.constant 6 : i32
    %98 = arith.addi %97, %c6_i32_66 : i32
    %c52_i32_67 = arith.constant 52 : i32
    %99 = arith.muli %98, %c52_i32_67 : i32
    %c18_i32_68 = arith.constant 18 : i32
    %100 = arith.addi %99, %c18_i32_68 : i32
    %c0_69 = arith.constant 0 : index
    %101 = arith.index_cast %100 : i32 to index
    %c0_70 = arith.constant 0 : index
    %102 = vector.load %arg2[%c0_69, %101, %c0_70] : memref<1x2756x4xf32, #tpu.memory_space<vmem>>, vector<1x416x4xf32>
    %103 = vector.shape_cast %102 : vector<1x416x4xf32> to vector<416x4xf32>
    %104 = arith.truncf %103 : vector<416x4xf32> to vector<416x4xbf16>
    %c8 = arith.constant 8 : index
    %c0_71 = arith.constant 0 : index
    %c0_72 = arith.constant 0 : index
    %105 = vector.load %arg3[%c8, %c0_71, %c0_72] : memref<28x4x8xbf16, #tpu.memory_space<vmem>>, vector<1x4x8xbf16>
    %106 = vector.shape_cast %105 : vector<1x4x8xbf16> to vector<4x8xbf16>
    %cst_73 = arith.constant dense<0.000000e+00> : vector<416x8xf32>
    %107 = tpu.matmul %104, %106, %cst_73 {dimension_numbers = #tpu.dot_dimension_numbers<[1], [0], [0], [1], [0, 0, 1, 1], [], []>} : vector<416x4xbf16>, vector<4x8xbf16>, vector<416x8xf32> -> vector<416x8xf32>
    %108 = arith.addf %96, %107 : vector<416x8xf32>
    %c18_i32_74 = arith.constant 18 : i32
    %109 = arith.addi %0, %c18_i32_74 : i32
    %c6_i32_75 = arith.constant 6 : i32
    %110 = arith.addi %109, %c6_i32_75 : i32
    %c52_i32_76 = arith.constant 52 : i32
    %111 = arith.muli %110, %c52_i32_76 : i32
    %c24_i32_77 = arith.constant 24 : i32
    %112 = arith.addi %111, %c24_i32_77 : i32
    %c0_78 = arith.constant 0 : index
    %113 = arith.index_cast %112 : i32 to index
    %c0_79 = arith.constant 0 : index
    %114 = vector.load %arg2[%c0_78, %113, %c0_79] : memref<1x2756x4xf32, #tpu.memory_space<vmem>>, vector<1x416x4xf32>
    %115 = vector.shape_cast %114 : vector<1x416x4xf32> to vector<416x4xf32>
    %116 = arith.truncf %115 : vector<416x4xf32> to vector<416x4xbf16>
    %c9 = arith.constant 9 : index
    %c0_80 = arith.constant 0 : index
    %c0_81 = arith.constant 0 : index
    %117 = vector.load %arg3[%c9, %c0_80, %c0_81] : memref<28x4x8xbf16, #tpu.memory_space<vmem>>, vector<1x4x8xbf16>
    %118 = vector.shape_cast %117 : vector<1x4x8xbf16> to vector<4x8xbf16>
    %cst_82 = arith.constant dense<0.000000e+00> : vector<416x8xf32>
    %119 = tpu.matmul %116, %118, %cst_82 {dimension_numbers = #tpu.dot_dimension_numbers<[1], [0], [0], [1], [0, 0, 1, 1], [], []>} : vector<416x4xbf16>, vector<4x8xbf16>, vector<416x8xf32> -> vector<416x8xf32>
    %120 = arith.addf %108, %119 : vector<416x8xf32>
    %cst_83 = arith.constant 0.000000e+00 : f32
    %121 = vector.broadcast %cst_83 : f32 to vector<416x8xf32>
    %c18_i32_84 = arith.constant 18 : i32
    %122 = arith.addi %0, %c18_i32_84 : i32
    %c-12_i32 = arith.constant -12 : i32
    %123 = arith.addi %122, %c-12_i32 : i32
    %c52_i32_85 = arith.constant 52 : i32
    %124 = arith.muli %123, %c52_i32_85 : i32
    %c6_i32_86 = arith.constant 6 : i32
    %125 = arith.addi %124, %c6_i32_86 : i32
    %c0_87 = arith.constant 0 : index
    %126 = arith.index_cast %125 : i32 to index
    %c0_88 = arith.constant 0 : index
    %127 = vector.load %arg2[%c0_87, %126, %c0_88] : memref<1x2756x4xf32, #tpu.memory_space<vmem>>, vector<1x416x4xf32>
    %128 = vector.shape_cast %127 : vector<1x416x4xf32> to vector<416x4xf32>
    %129 = arith.truncf %128 : vector<416x4xf32> to vector<416x4xbf16>
    %c10 = arith.constant 10 : index
    %c0_89 = arith.constant 0 : index
    %c0_90 = arith.constant 0 : index
    %130 = vector.load %arg3[%c10, %c0_89, %c0_90] : memref<28x4x8xbf16, #tpu.memory_space<vmem>>, vector<1x4x8xbf16>
    %131 = vector.shape_cast %130 : vector<1x4x8xbf16> to vector<4x8xbf16>
    %cst_91 = arith.constant dense<0.000000e+00> : vector<416x8xf32>
    %132 = tpu.matmul %129, %131, %cst_91 {dimension_numbers = #tpu.dot_dimension_numbers<[1], [0], [0], [1], [0, 0, 1, 1], [], []>} : vector<416x4xbf16>, vector<4x8xbf16>, vector<416x8xf32> -> vector<416x8xf32>
    %133 = arith.addf %121, %132 : vector<416x8xf32>
    %c18_i32_92 = arith.constant 18 : i32
    %134 = arith.addi %0, %c18_i32_92 : i32
    %c-12_i32_93 = arith.constant -12 : i32
    %135 = arith.addi %134, %c-12_i32_93 : i32
    %c52_i32_94 = arith.constant 52 : i32
    %136 = arith.muli %135, %c52_i32_94 : i32
    %c18_i32_95 = arith.constant 18 : i32
    %137 = arith.addi %136, %c18_i32_95 : i32
    %c0_96 = arith.constant 0 : index
    %138 = arith.index_cast %137 : i32 to index
    %c0_97 = arith.constant 0 : index
    %139 = vector.load %arg2[%c0_96, %138, %c0_97] : memref<1x2756x4xf32, #tpu.memory_space<vmem>>, vector<1x416x4xf32>
    %140 = vector.shape_cast %139 : vector<1x416x4xf32> to vector<416x4xf32>
    %141 = arith.truncf %140 : vector<416x4xf32> to vector<416x4xbf16>
    %c11 = arith.constant 11 : index
    %c0_98 = arith.constant 0 : index
    %c0_99 = arith.constant 0 : index
    %142 = vector.load %arg3[%c11, %c0_98, %c0_99] : memref<28x4x8xbf16, #tpu.memory_space<vmem>>, vector<1x4x8xbf16>
    %143 = vector.shape_cast %142 : vector<1x4x8xbf16> to vector<4x8xbf16>
    %cst_100 = arith.constant dense<0.000000e+00> : vector<416x8xf32>
    %144 = tpu.matmul %141, %143, %cst_100 {dimension_numbers = #tpu.dot_dimension_numbers<[1], [0], [0], [1], [0, 0, 1, 1], [], []>} : vector<416x4xbf16>, vector<4x8xbf16>, vector<416x8xf32> -> vector<416x8xf32>
    %145 = arith.addf %133, %144 : vector<416x8xf32>
    %c18_i32_101 = arith.constant 18 : i32
    %146 = arith.addi %0, %c18_i32_101 : i32
    %c-12_i32_102 = arith.constant -12 : i32
    %147 = arith.addi %146, %c-12_i32_102 : i32
    %c52_i32_103 = arith.constant 52 : i32
    %148 = arith.muli %147, %c52_i32_103 : i32
    %c30_i32 = arith.constant 30 : i32
    %149 = arith.addi %148, %c30_i32 : i32
    %c0_104 = arith.constant 0 : index
    %150 = arith.index_cast %149 : i32 to index
    %c0_105 = arith.constant 0 : index
    %151 = vector.load %arg2[%c0_104, %150, %c0_105] : memref<1x2756x4xf32, #tpu.memory_space<vmem>>, vector<1x416x4xf32>
    %152 = vector.shape_cast %151 : vector<1x416x4xf32> to vector<416x4xf32>
    %153 = arith.truncf %152 : vector<416x4xf32> to vector<416x4xbf16>
    %c12 = arith.constant 12 : index
    %c0_106 = arith.constant 0 : index
    %c0_107 = arith.constant 0 : index
    %154 = vector.load %arg3[%c12, %c0_106, %c0_107] : memref<28x4x8xbf16, #tpu.memory_space<vmem>>, vector<1x4x8xbf16>
    %155 = vector.shape_cast %154 : vector<1x4x8xbf16> to vector<4x8xbf16>
    %cst_108 = arith.constant dense<0.000000e+00> : vector<416x8xf32>
    %156 = tpu.matmul %153, %155, %cst_108 {dimension_numbers = #tpu.dot_dimension_numbers<[1], [0], [0], [1], [0, 0, 1, 1], [], []>} : vector<416x4xbf16>, vector<4x8xbf16>, vector<416x8xf32> -> vector<416x8xf32>
    %157 = arith.addf %145, %156 : vector<416x8xf32>
    %c18_i32_109 = arith.constant 18 : i32
    %158 = arith.addi %0, %c18_i32_109 : i32
    %c0_i32_110 = arith.constant 0 : i32
    %159 = arith.addi %158, %c0_i32_110 : i32
    %c52_i32_111 = arith.constant 52 : i32
    %160 = arith.muli %159, %c52_i32_111 : i32
    %c6_i32_112 = arith.constant 6 : i32
    %161 = arith.addi %160, %c6_i32_112 : i32
    %c0_113 = arith.constant 0 : index
    %162 = arith.index_cast %161 : i32 to index
    %c0_114 = arith.constant 0 : index
    %163 = vector.load %arg2[%c0_113, %162, %c0_114] : memref<1x2756x4xf32, #tpu.memory_space<vmem>>, vector<1x416x4xf32>
    %164 = vector.shape_cast %163 : vector<1x416x4xf32> to vector<416x4xf32>
    %165 = arith.truncf %164 : vector<416x4xf32> to vector<416x4xbf16>
    %c13 = arith.constant 13 : index
    %c0_115 = arith.constant 0 : index
    %c0_116 = arith.constant 0 : index
    %166 = vector.load %arg3[%c13, %c0_115, %c0_116] : memref<28x4x8xbf16, #tpu.memory_space<vmem>>, vector<1x4x8xbf16>
    %167 = vector.shape_cast %166 : vector<1x4x8xbf16> to vector<4x8xbf16>
    %cst_117 = arith.constant dense<0.000000e+00> : vector<416x8xf32>
    %168 = tpu.matmul %165, %167, %cst_117 {dimension_numbers = #tpu.dot_dimension_numbers<[1], [0], [0], [1], [0, 0, 1, 1], [], []>} : vector<416x4xbf16>, vector<4x8xbf16>, vector<416x8xf32> -> vector<416x8xf32>
    %169 = arith.addf %157, %168 : vector<416x8xf32>
    %c18_i32_118 = arith.constant 18 : i32
    %170 = arith.addi %0, %c18_i32_118 : i32
    %c0_i32_119 = arith.constant 0 : i32
    %171 = arith.addi %170, %c0_i32_119 : i32
    %c52_i32_120 = arith.constant 52 : i32
    %172 = arith.muli %171, %c52_i32_120 : i32
    %c18_i32_121 = arith.constant 18 : i32
    %173 = arith.addi %172, %c18_i32_121 : i32
    %c0_122 = arith.constant 0 : index
    %174 = arith.index_cast %173 : i32 to index
    %c0_123 = arith.constant 0 : index
    %175 = vector.load %arg2[%c0_122, %174, %c0_123] : memref<1x2756x4xf32, #tpu.memory_space<vmem>>, vector<1x416x4xf32>
    %176 = vector.shape_cast %175 : vector<1x416x4xf32> to vector<416x4xf32>
    %177 = arith.truncf %176 : vector<416x4xf32> to vector<416x4xbf16>
    %c14 = arith.constant 14 : index
    %c0_124 = arith.constant 0 : index
    %c0_125 = arith.constant 0 : index
    %178 = vector.load %arg3[%c14, %c0_124, %c0_125] : memref<28x4x8xbf16, #tpu.memory_space<vmem>>, vector<1x4x8xbf16>
    %179 = vector.shape_cast %178 : vector<1x4x8xbf16> to vector<4x8xbf16>
    %cst_126 = arith.constant dense<0.000000e+00> : vector<416x8xf32>
    %180 = tpu.matmul %177, %179, %cst_126 {dimension_numbers = #tpu.dot_dimension_numbers<[1], [0], [0], [1], [0, 0, 1, 1], [], []>} : vector<416x4xbf16>, vector<4x8xbf16>, vector<416x8xf32> -> vector<416x8xf32>
    %181 = arith.addf %169, %180 : vector<416x8xf32>
    %c18_i32_127 = arith.constant 18 : i32
    %182 = arith.addi %0, %c18_i32_127 : i32
    %c0_i32_128 = arith.constant 0 : i32
    %183 = arith.addi %182, %c0_i32_128 : i32
    %c52_i32_129 = arith.constant 52 : i32
    %184 = arith.muli %183, %c52_i32_129 : i32
    %c30_i32_130 = arith.constant 30 : i32
    %185 = arith.addi %184, %c30_i32_130 : i32
    %c0_131 = arith.constant 0 : index
    %186 = arith.index_cast %185 : i32 to index
    %c0_132 = arith.constant 0 : index
    %187 = vector.load %arg2[%c0_131, %186, %c0_132] : memref<1x2756x4xf32, #tpu.memory_space<vmem>>, vector<1x416x4xf32>
    %188 = vector.shape_cast %187 : vector<1x416x4xf32> to vector<416x4xf32>
    %189 = arith.truncf %188 : vector<416x4xf32> to vector<416x4xbf16>
    %c15 = arith.constant 15 : index
    %c0_133 = arith.constant 0 : index
    %c0_134 = arith.constant 0 : index
    %190 = vector.load %arg3[%c15, %c0_133, %c0_134] : memref<28x4x8xbf16, #tpu.memory_space<vmem>>, vector<1x4x8xbf16>
    %191 = vector.shape_cast %190 : vector<1x4x8xbf16> to vector<4x8xbf16>
    %cst_135 = arith.constant dense<0.000000e+00> : vector<416x8xf32>
    %192 = tpu.matmul %189, %191, %cst_135 {dimension_numbers = #tpu.dot_dimension_numbers<[1], [0], [0], [1], [0, 0, 1, 1], [], []>} : vector<416x4xbf16>, vector<4x8xbf16>, vector<416x8xf32> -> vector<416x8xf32>
    %193 = arith.addf %181, %192 : vector<416x8xf32>
    %c18_i32_136 = arith.constant 18 : i32
    %194 = arith.addi %0, %c18_i32_136 : i32
    %c12_i32_137 = arith.constant 12 : i32
    %195 = arith.addi %194, %c12_i32_137 : i32
    %c52_i32_138 = arith.constant 52 : i32
    %196 = arith.muli %195, %c52_i32_138 : i32
    %c6_i32_139 = arith.constant 6 : i32
    %197 = arith.addi %196, %c6_i32_139 : i32
    %c0_140 = arith.constant 0 : index
    %198 = arith.index_cast %197 : i32 to index
    %c0_141 = arith.constant 0 : index
    %199 = vector.load %arg2[%c0_140, %198, %c0_141] : memref<1x2756x4xf32, #tpu.memory_space<vmem>>, vector<1x416x4xf32>
    %200 = vector.shape_cast %199 : vector<1x416x4xf32> to vector<416x4xf32>
    %201 = arith.truncf %200 : vector<416x4xf32> to vector<416x4xbf16>
    %c16 = arith.constant 16 : index
    %c0_142 = arith.constant 0 : index
    %c0_143 = arith.constant 0 : index
    %202 = vector.load %arg3[%c16, %c0_142, %c0_143] : memref<28x4x8xbf16, #tpu.memory_space<vmem>>, vector<1x4x8xbf16>
    %203 = vector.shape_cast %202 : vector<1x4x8xbf16> to vector<4x8xbf16>
    %cst_144 = arith.constant dense<0.000000e+00> : vector<416x8xf32>
    %204 = tpu.matmul %201, %203, %cst_144 {dimension_numbers = #tpu.dot_dimension_numbers<[1], [0], [0], [1], [0, 0, 1, 1], [], []>} : vector<416x4xbf16>, vector<4x8xbf16>, vector<416x8xf32> -> vector<416x8xf32>
    %205 = arith.addf %193, %204 : vector<416x8xf32>
    %c18_i32_145 = arith.constant 18 : i32
    %206 = arith.addi %0, %c18_i32_145 : i32
    %c12_i32_146 = arith.constant 12 : i32
    %207 = arith.addi %206, %c12_i32_146 : i32
    %c52_i32_147 = arith.constant 52 : i32
    %208 = arith.muli %207, %c52_i32_147 : i32
    %c18_i32_148 = arith.constant 18 : i32
    %209 = arith.addi %208, %c18_i32_148 : i32
    %c0_149 = arith.constant 0 : index
    %210 = arith.index_cast %209 : i32 to index
    %c0_150 = arith.constant 0 : index
    %211 = vector.load %arg2[%c0_149, %210, %c0_150] : memref<1x2756x4xf32, #tpu.memory_space<vmem>>, vector<1x416x4xf32>
    %212 = vector.shape_cast %211 : vector<1x416x4xf32> to vector<416x4xf32>
    %213 = arith.truncf %212 : vector<416x4xf32> to vector<416x4xbf16>
    %c17 = arith.constant 17 : index
    %c0_151 = arith.constant 0 : index
    %c0_152 = arith.constant 0 : index
    %214 = vector.load %arg3[%c17, %c0_151, %c0_152] : memref<28x4x8xbf16, #tpu.memory_space<vmem>>, vector<1x4x8xbf16>
    %215 = vector.shape_cast %214 : vector<1x4x8xbf16> to vector<4x8xbf16>
    %cst_153 = arith.constant dense<0.000000e+00> : vector<416x8xf32>
    %216 = tpu.matmul %213, %215, %cst_153 {dimension_numbers = #tpu.dot_dimension_numbers<[1], [0], [0], [1], [0, 0, 1, 1], [], []>} : vector<416x4xbf16>, vector<4x8xbf16>, vector<416x8xf32> -> vector<416x8xf32>
    %217 = arith.addf %205, %216 : vector<416x8xf32>
    %c18_i32_154 = arith.constant 18 : i32
    %218 = arith.addi %0, %c18_i32_154 : i32
    %c12_i32_155 = arith.constant 12 : i32
    %219 = arith.addi %218, %c12_i32_155 : i32
    %c52_i32_156 = arith.constant 52 : i32
    %220 = arith.muli %219, %c52_i32_156 : i32
    %c30_i32_157 = arith.constant 30 : i32
    %221 = arith.addi %220, %c30_i32_157 : i32
    %c0_158 = arith.constant 0 : index
    %222 = arith.index_cast %221 : i32 to index
    %c0_159 = arith.constant 0 : index
    %223 = vector.load %arg2[%c0_158, %222, %c0_159] : memref<1x2756x4xf32, #tpu.memory_space<vmem>>, vector<1x416x4xf32>
    %224 = vector.shape_cast %223 : vector<1x416x4xf32> to vector<416x4xf32>
    %225 = arith.truncf %224 : vector<416x4xf32> to vector<416x4xbf16>
    %c18 = arith.constant 18 : index
    %c0_160 = arith.constant 0 : index
    %c0_161 = arith.constant 0 : index
    %226 = vector.load %arg3[%c18, %c0_160, %c0_161] : memref<28x4x8xbf16, #tpu.memory_space<vmem>>, vector<1x4x8xbf16>
    %227 = vector.shape_cast %226 : vector<1x4x8xbf16> to vector<4x8xbf16>
    %cst_162 = arith.constant dense<0.000000e+00> : vector<416x8xf32>
    %228 = tpu.matmul %225, %227, %cst_162 {dimension_numbers = #tpu.dot_dimension_numbers<[1], [0], [0], [1], [0, 0, 1, 1], [], []>} : vector<416x4xbf16>, vector<4x8xbf16>, vector<416x8xf32> -> vector<416x8xf32>
    %229 = arith.addf %217, %228 : vector<416x8xf32>
    %cst_163 = arith.constant 0.000000e+00 : f32
    %230 = vector.broadcast %cst_163 : f32 to vector<416x8xf32>
    %c18_i32_164 = arith.constant 18 : i32
    %231 = arith.addi %0, %c18_i32_164 : i32
    %c-18_i32 = arith.constant -18 : i32
    %232 = arith.addi %231, %c-18_i32 : i32
    %c52_i32_165 = arith.constant 52 : i32
    %233 = arith.muli %232, %c52_i32_165 : i32
    %c0_i32_166 = arith.constant 0 : i32
    %234 = arith.addi %233, %c0_i32_166 : i32
    %c0_167 = arith.constant 0 : index
    %235 = arith.index_cast %234 : i32 to index
    %c0_168 = arith.constant 0 : index
    %236 = vector.load %arg2[%c0_167, %235, %c0_168] : memref<1x2756x4xf32, #tpu.memory_space<vmem>>, vector<1x416x4xf32>
    %237 = vector.shape_cast %236 : vector<1x416x4xf32> to vector<416x4xf32>
    %238 = arith.truncf %237 : vector<416x4xf32> to vector<416x4xbf16>
    %c19 = arith.constant 19 : index
    %c0_169 = arith.constant 0 : index
    %c0_170 = arith.constant 0 : index
    %239 = vector.load %arg3[%c19, %c0_169, %c0_170] : memref<28x4x8xbf16, #tpu.memory_space<vmem>>, vector<1x4x8xbf16>
    %240 = vector.shape_cast %239 : vector<1x4x8xbf16> to vector<4x8xbf16>
    %cst_171 = arith.constant dense<0.000000e+00> : vector<416x8xf32>
    %241 = tpu.matmul %238, %240, %cst_171 {dimension_numbers = #tpu.dot_dimension_numbers<[1], [0], [0], [1], [0, 0, 1, 1], [], []>} : vector<416x4xbf16>, vector<4x8xbf16>, vector<416x8xf32> -> vector<416x8xf32>
    %242 = arith.addf %230, %241 : vector<416x8xf32>
    %c18_i32_172 = arith.constant 18 : i32
    %243 = arith.addi %0, %c18_i32_172 : i32
    %c-18_i32_173 = arith.constant -18 : i32
    %244 = arith.addi %243, %c-18_i32_173 : i32
    %c52_i32_174 = arith.constant 52 : i32
    %245 = arith.muli %244, %c52_i32_174 : i32
    %c18_i32_175 = arith.constant 18 : i32
    %246 = arith.addi %245, %c18_i32_175 : i32
    %c0_176 = arith.constant 0 : index
    %247 = arith.index_cast %246 : i32 to index
    %c0_177 = arith.constant 0 : index
    %248 = vector.load %arg2[%c0_176, %247, %c0_177] : memref<1x2756x4xf32, #tpu.memory_space<vmem>>, vector<1x416x4xf32>
    %249 = vector.shape_cast %248 : vector<1x416x4xf32> to vector<416x4xf32>
    %250 = arith.truncf %249 : vector<416x4xf32> to vector<416x4xbf16>
    %c20 = arith.constant 20 : index
    %c0_178 = arith.constant 0 : index
    %c0_179 = arith.constant 0 : index
    %251 = vector.load %arg3[%c20, %c0_178, %c0_179] : memref<28x4x8xbf16, #tpu.memory_space<vmem>>, vector<1x4x8xbf16>
    %252 = vector.shape_cast %251 : vector<1x4x8xbf16> to vector<4x8xbf16>
    %cst_180 = arith.constant dense<0.000000e+00> : vector<416x8xf32>
    %253 = tpu.matmul %250, %252, %cst_180 {dimension_numbers = #tpu.dot_dimension_numbers<[1], [0], [0], [1], [0, 0, 1, 1], [], []>} : vector<416x4xbf16>, vector<4x8xbf16>, vector<416x8xf32> -> vector<416x8xf32>
    %254 = arith.addf %242, %253 : vector<416x8xf32>
    %c18_i32_181 = arith.constant 18 : i32
    %255 = arith.addi %0, %c18_i32_181 : i32
    %c-18_i32_182 = arith.constant -18 : i32
    %256 = arith.addi %255, %c-18_i32_182 : i32
    %c52_i32_183 = arith.constant 52 : i32
    %257 = arith.muli %256, %c52_i32_183 : i32
    %c36_i32 = arith.constant 36 : i32
    %258 = arith.addi %257, %c36_i32 : i32
    %c0_184 = arith.constant 0 : index
    %259 = arith.index_cast %258 : i32 to index
    %c0_185 = arith.constant 0 : index
    %260 = vector.load %arg2[%c0_184, %259, %c0_185] : memref<1x2756x4xf32, #tpu.memory_space<vmem>>, vector<1x416x4xf32>
    %261 = vector.shape_cast %260 : vector<1x416x4xf32> to vector<416x4xf32>
    %262 = arith.truncf %261 : vector<416x4xf32> to vector<416x4xbf16>
    %c21 = arith.constant 21 : index
    %c0_186 = arith.constant 0 : index
    %c0_187 = arith.constant 0 : index
    %263 = vector.load %arg3[%c21, %c0_186, %c0_187] : memref<28x4x8xbf16, #tpu.memory_space<vmem>>, vector<1x4x8xbf16>
    %264 = vector.shape_cast %263 : vector<1x4x8xbf16> to vector<4x8xbf16>
    %cst_188 = arith.constant dense<0.000000e+00> : vector<416x8xf32>
    %265 = tpu.matmul %262, %264, %cst_188 {dimension_numbers = #tpu.dot_dimension_numbers<[1], [0], [0], [1], [0, 0, 1, 1], [], []>} : vector<416x4xbf16>, vector<4x8xbf16>, vector<416x8xf32> -> vector<416x8xf32>
    %266 = arith.addf %254, %265 : vector<416x8xf32>
    %c18_i32_189 = arith.constant 18 : i32
    %267 = arith.addi %0, %c18_i32_189 : i32
    %c0_i32_190 = arith.constant 0 : i32
    %268 = arith.addi %267, %c0_i32_190 : i32
    %c52_i32_191 = arith.constant 52 : i32
    %269 = arith.muli %268, %c52_i32_191 : i32
    %c0_i32_192 = arith.constant 0 : i32
    %270 = arith.addi %269, %c0_i32_192 : i32
    %c0_193 = arith.constant 0 : index
    %271 = arith.index_cast %270 : i32 to index
    %c0_194 = arith.constant 0 : index
    %272 = vector.load %arg2[%c0_193, %271, %c0_194] : memref<1x2756x4xf32, #tpu.memory_space<vmem>>, vector<1x416x4xf32>
    %273 = vector.shape_cast %272 : vector<1x416x4xf32> to vector<416x4xf32>
    %274 = arith.truncf %273 : vector<416x4xf32> to vector<416x4xbf16>
    %c22 = arith.constant 22 : index
    %c0_195 = arith.constant 0 : index
    %c0_196 = arith.constant 0 : index
    %275 = vector.load %arg3[%c22, %c0_195, %c0_196] : memref<28x4x8xbf16, #tpu.memory_space<vmem>>, vector<1x4x8xbf16>
    %276 = vector.shape_cast %275 : vector<1x4x8xbf16> to vector<4x8xbf16>
    %cst_197 = arith.constant dense<0.000000e+00> : vector<416x8xf32>
    %277 = tpu.matmul %274, %276, %cst_197 {dimension_numbers = #tpu.dot_dimension_numbers<[1], [0], [0], [1], [0, 0, 1, 1], [], []>} : vector<416x4xbf16>, vector<4x8xbf16>, vector<416x8xf32> -> vector<416x8xf32>
    %278 = arith.addf %266, %277 : vector<416x8xf32>
    %c18_i32_198 = arith.constant 18 : i32
    %279 = arith.addi %0, %c18_i32_198 : i32
    %c0_i32_199 = arith.constant 0 : i32
    %280 = arith.addi %279, %c0_i32_199 : i32
    %c52_i32_200 = arith.constant 52 : i32
    %281 = arith.muli %280, %c52_i32_200 : i32
    %c18_i32_201 = arith.constant 18 : i32
    %282 = arith.addi %281, %c18_i32_201 : i32
    %c0_202 = arith.constant 0 : index
    %283 = arith.index_cast %282 : i32 to index
    %c0_203 = arith.constant 0 : index
    %284 = vector.load %arg2[%c0_202, %283, %c0_203] : memref<1x2756x4xf32, #tpu.memory_space<vmem>>, vector<1x416x4xf32>
    %285 = vector.shape_cast %284 : vector<1x416x4xf32> to vector<416x4xf32>
    %286 = arith.truncf %285 : vector<416x4xf32> to vector<416x4xbf16>
    %c23 = arith.constant 23 : index
    %c0_204 = arith.constant 0 : index
    %c0_205 = arith.constant 0 : index
    %287 = vector.load %arg3[%c23, %c0_204, %c0_205] : memref<28x4x8xbf16, #tpu.memory_space<vmem>>, vector<1x4x8xbf16>
    %288 = vector.shape_cast %287 : vector<1x4x8xbf16> to vector<4x8xbf16>
    %cst_206 = arith.constant dense<0.000000e+00> : vector<416x8xf32>
    %289 = tpu.matmul %286, %288, %cst_206 {dimension_numbers = #tpu.dot_dimension_numbers<[1], [0], [0], [1], [0, 0, 1, 1], [], []>} : vector<416x4xbf16>, vector<4x8xbf16>, vector<416x8xf32> -> vector<416x8xf32>
    %290 = arith.addf %278, %289 : vector<416x8xf32>
    %c18_i32_207 = arith.constant 18 : i32
    %291 = arith.addi %0, %c18_i32_207 : i32
    %c0_i32_208 = arith.constant 0 : i32
    %292 = arith.addi %291, %c0_i32_208 : i32
    %c52_i32_209 = arith.constant 52 : i32
    %293 = arith.muli %292, %c52_i32_209 : i32
    %c36_i32_210 = arith.constant 36 : i32
    %294 = arith.addi %293, %c36_i32_210 : i32
    %c0_211 = arith.constant 0 : index
    %295 = arith.index_cast %294 : i32 to index
    %c0_212 = arith.constant 0 : index
    %296 = vector.load %arg2[%c0_211, %295, %c0_212] : memref<1x2756x4xf32, #tpu.memory_space<vmem>>, vector<1x416x4xf32>
    %297 = vector.shape_cast %296 : vector<1x416x4xf32> to vector<416x4xf32>
    %298 = arith.truncf %297 : vector<416x4xf32> to vector<416x4xbf16>
    %c24 = arith.constant 24 : index
    %c0_213 = arith.constant 0 : index
    %c0_214 = arith.constant 0 : index
    %299 = vector.load %arg3[%c24, %c0_213, %c0_214] : memref<28x4x8xbf16, #tpu.memory_space<vmem>>, vector<1x4x8xbf16>
    %300 = vector.shape_cast %299 : vector<1x4x8xbf16> to vector<4x8xbf16>
    %cst_215 = arith.constant dense<0.000000e+00> : vector<416x8xf32>
    %301 = tpu.matmul %298, %300, %cst_215 {dimension_numbers = #tpu.dot_dimension_numbers<[1], [0], [0], [1], [0, 0, 1, 1], [], []>} : vector<416x4xbf16>, vector<4x8xbf16>, vector<416x8xf32> -> vector<416x8xf32>
    %302 = arith.addf %290, %301 : vector<416x8xf32>
    %c18_i32_216 = arith.constant 18 : i32
    %303 = arith.addi %0, %c18_i32_216 : i32
    %c18_i32_217 = arith.constant 18 : i32
    %304 = arith.addi %303, %c18_i32_217 : i32
    %c52_i32_218 = arith.constant 52 : i32
    %305 = arith.muli %304, %c52_i32_218 : i32
    %c0_i32_219 = arith.constant 0 : i32
    %306 = arith.addi %305, %c0_i32_219 : i32
    %c0_220 = arith.constant 0 : index
    %307 = arith.index_cast %306 : i32 to index
    %c0_221 = arith.constant 0 : index
    %308 = vector.load %arg2[%c0_220, %307, %c0_221] : memref<1x2756x4xf32, #tpu.memory_space<vmem>>, vector<1x416x4xf32>
    %309 = vector.shape_cast %308 : vector<1x416x4xf32> to vector<416x4xf32>
    %310 = arith.truncf %309 : vector<416x4xf32> to vector<416x4xbf16>
    %c25 = arith.constant 25 : index
    %c0_222 = arith.constant 0 : index
    %c0_223 = arith.constant 0 : index
    %311 = vector.load %arg3[%c25, %c0_222, %c0_223] : memref<28x4x8xbf16, #tpu.memory_space<vmem>>, vector<1x4x8xbf16>
    %312 = vector.shape_cast %311 : vector<1x4x8xbf16> to vector<4x8xbf16>
    %cst_224 = arith.constant dense<0.000000e+00> : vector<416x8xf32>
    %313 = tpu.matmul %310, %312, %cst_224 {dimension_numbers = #tpu.dot_dimension_numbers<[1], [0], [0], [1], [0, 0, 1, 1], [], []>} : vector<416x4xbf16>, vector<4x8xbf16>, vector<416x8xf32> -> vector<416x8xf32>
    %314 = arith.addf %302, %313 : vector<416x8xf32>
    %c18_i32_225 = arith.constant 18 : i32
    %315 = arith.addi %0, %c18_i32_225 : i32
    %c18_i32_226 = arith.constant 18 : i32
    %316 = arith.addi %315, %c18_i32_226 : i32
    %c52_i32_227 = arith.constant 52 : i32
    %317 = arith.muli %316, %c52_i32_227 : i32
    %c18_i32_228 = arith.constant 18 : i32
    %318 = arith.addi %317, %c18_i32_228 : i32
    %c0_229 = arith.constant 0 : index
    %319 = arith.index_cast %318 : i32 to index
    %c0_230 = arith.constant 0 : index
    %320 = vector.load %arg2[%c0_229, %319, %c0_230] : memref<1x2756x4xf32, #tpu.memory_space<vmem>>, vector<1x416x4xf32>
    %321 = vector.shape_cast %320 : vector<1x416x4xf32> to vector<416x4xf32>
    %322 = arith.truncf %321 : vector<416x4xf32> to vector<416x4xbf16>
    %c26 = arith.constant 26 : index
    %c0_231 = arith.constant 0 : index
    %c0_232 = arith.constant 0 : index
    %323 = vector.load %arg3[%c26, %c0_231, %c0_232] : memref<28x4x8xbf16, #tpu.memory_space<vmem>>, vector<1x4x8xbf16>
    %324 = vector.shape_cast %323 : vector<1x4x8xbf16> to vector<4x8xbf16>
    %cst_233 = arith.constant dense<0.000000e+00> : vector<416x8xf32>
    %325 = tpu.matmul %322, %324, %cst_233 {dimension_numbers = #tpu.dot_dimension_numbers<[1], [0], [0], [1], [0, 0, 1, 1], [], []>} : vector<416x4xbf16>, vector<4x8xbf16>, vector<416x8xf32> -> vector<416x8xf32>
    %326 = arith.addf %314, %325 : vector<416x8xf32>
    %c18_i32_234 = arith.constant 18 : i32
    %327 = arith.addi %0, %c18_i32_234 : i32
    %c18_i32_235 = arith.constant 18 : i32
    %328 = arith.addi %327, %c18_i32_235 : i32
    %c52_i32_236 = arith.constant 52 : i32
    %329 = arith.muli %328, %c52_i32_236 : i32
    %c36_i32_237 = arith.constant 36 : i32
    %330 = arith.addi %329, %c36_i32_237 : i32
    %c0_238 = arith.constant 0 : index
    %331 = arith.index_cast %330 : i32 to index
    %c0_239 = arith.constant 0 : index
    %332 = vector.load %arg2[%c0_238, %331, %c0_239] : memref<1x2756x4xf32, #tpu.memory_space<vmem>>, vector<1x416x4xf32>
    %333 = vector.shape_cast %332 : vector<1x416x4xf32> to vector<416x4xf32>
    %334 = arith.truncf %333 : vector<416x4xf32> to vector<416x4xbf16>
    %c27 = arith.constant 27 : index
    %c0_240 = arith.constant 0 : index
    %c0_241 = arith.constant 0 : index
    %335 = vector.load %arg3[%c27, %c0_240, %c0_241] : memref<28x4x8xbf16, #tpu.memory_space<vmem>>, vector<1x4x8xbf16>
    %336 = vector.shape_cast %335 : vector<1x4x8xbf16> to vector<4x8xbf16>
    %cst_242 = arith.constant dense<0.000000e+00> : vector<416x8xf32>
    %337 = tpu.matmul %334, %336, %cst_242 {dimension_numbers = #tpu.dot_dimension_numbers<[1], [0], [0], [1], [0, 0, 1, 1], [], []>} : vector<416x4xbf16>, vector<4x8xbf16>, vector<416x8xf32> -> vector<416x8xf32>
    %338 = arith.addf %326, %337 : vector<416x8xf32>
    %339 = tpu.concatenate %11, %120, %229, %338 in 1 : vector<416x8xf32>, vector<416x8xf32>, vector<416x8xf32>, vector<416x8xf32> -> vector<416x32xf32>
    %cst_243 = arith.constant 0.000000e+00 : f32
    %340 = vector.broadcast %cst_243 : f32 to vector<1x32xf32>
    %cst_244 = arith.constant 0.000000e+00 : f32
    %341 = vector.broadcast %cst_244 : f32 to vector<1x32xf32>
    %cst_245 = arith.constant 0.000000e+00 : f32
    %342 = vector.broadcast %cst_245 : f32 to vector<1x4xf32>
    %343 = vector.extract_strided_slice %339 {offsets = [0, 0], sizes = [16, 32], strides = [1, 1]} : vector<416x32xf32> to vector<16x32xf32>
    %344 = arith.truncf %343 : vector<16x32xf32> to vector<16x32xbf16>
    %c0_246 = arith.constant 0 : index
    %c0_247 = arith.constant 0 : index
    %c0_248 = arith.constant 0 : index
    %c0_249 = arith.constant 0 : index
    %345 = vector.load %arg4[%c0_246, %c0_247, %c0_248, %c0_249] : memref<1x8x16x32xbf16, #tpu.memory_space<vmem>>, vector<1x1x16x32xbf16>
    %346 = vector.shape_cast %345 : vector<1x1x16x32xbf16> to vector<16x32xbf16>
    %347 = vector.shape_cast %344 : vector<16x32xbf16> to vector<1x1x16x32xbf16>
    tpu.vector_store %arg4[%c0_246, %c0_247, %c0_248, %c0_249], %347 {strides = array<i32>} : memref<1x8x16x32xbf16, #tpu.memory_space<vmem>>, vector<1x1x16x32xbf16>,
    %cst_250 = arith.constant dense<0.000000e+00> : vector<32xf32>
    %348 = vector.multi_reduction <add>, %343, %cst_250 [0] : vector<16x32xf32> to vector<32xf32>
    %349 = vector.shape_cast %348 : vector<32xf32> to vector<1x32xf32>
    %350 = arith.addf %340, %349 : vector<1x32xf32>
    %351 = arith.mulf %343, %343 : vector<16x32xf32>
    %cst_251 = arith.constant dense<0.000000e+00> : vector<32xf32>
    %352 = vector.multi_reduction <add>, %351, %cst_251 [0] : vector<16x32xf32> to vector<32xf32>
    %353 = vector.shape_cast %352 : vector<32xf32> to vector<1x32xf32>
    %354 = arith.addf %341, %353 : vector<1x32xf32>
    %c0_i32_252 = arith.constant 0 : i32
    %355 = arith.addi %0, %c0_i32_252 : i32
    %c18_i32_253 = arith.constant 18 : i32
    %356 = arith.addi %355, %c18_i32_253 : i32
    %c52_i32_254 = arith.constant 52 : i32
    %357 = arith.muli %356, %c52_i32_254 : i32
    %c18_i32_255 = arith.constant 18 : i32
    %358 = arith.addi %357, %c18_i32_255 : i32
    %c0_256 = arith.constant 0 : index
    %359 = arith.index_cast %358 : i32 to index
    %c0_257 = arith.constant 0 : index
    %360 = vector.load %arg2[%c0_256, %359, %c0_257] : memref<1x2756x4xf32, #tpu.memory_space<vmem>>, vector<1x16x4xf32>
    %361 = vector.shape_cast %360 : vector<1x16x4xf32> to vector<16x4xf32>
    %cst_258 = arith.constant dense<0.000000e+00> : vector<4xf32>
    %362 = vector.multi_reduction <add>, %361, %cst_258 [0] : vector<16x4xf32> to vector<4xf32>
    %363 = vector.shape_cast %362 : vector<4xf32> to vector<1x4xf32>
    %364 = arith.addf %342, %363 : vector<1x4xf32>
    %365 = vector.extract_strided_slice %339 {offsets = [52, 0], sizes = [16, 32], strides = [1, 1]} : vector<416x32xf32> to vector<16x32xf32>
    %366 = arith.truncf %365 : vector<16x32xf32> to vector<16x32xbf16>
    %c0_259 = arith.constant 0 : index
    %c1_260 = arith.constant 1 : index
    %c0_261 = arith.constant 0 : index
    %c0_262 = arith.constant 0 : index
    %367 = vector.load %arg4[%c0_259, %c1_260, %c0_261, %c0_262] : memref<1x8x16x32xbf16, #tpu.memory_space<vmem>>, vector<1x1x16x32xbf16>
    %368 = vector.shape_cast %367 : vector<1x1x16x32xbf16> to vector<16x32xbf16>
    %369 = vector.shape_cast %366 : vector<16x32xbf16> to vector<1x1x16x32xbf16>
    tpu.vector_store %arg4[%c0_259, %c1_260, %c0_261, %c0_262], %369 {strides = array<i32>} : memref<1x8x16x32xbf16, #tpu.memory_space<vmem>>, vector<1x1x16x32xbf16>,
    %cst_263 = arith.constant dense<0.000000e+00> : vector<32xf32>
    %370 = vector.multi_reduction <add>, %365, %cst_263 [0] : vector<16x32xf32> to vector<32xf32>
    %371 = vector.shape_cast %370 : vector<32xf32> to vector<1x32xf32>
    %372 = arith.addf %350, %371 : vector<1x32xf32>
    %373 = arith.mulf %365, %365 : vector<16x32xf32>
    %cst_264 = arith.constant dense<0.000000e+00> : vector<32xf32>
    %374 = vector.multi_reduction <add>, %373, %cst_264 [0] : vector<16x32xf32> to vector<32xf32>
    %375 = vector.shape_cast %374 : vector<32xf32> to vector<1x32xf32>
    %376 = arith.addf %354, %375 : vector<1x32xf32>
    %c1_i32 = arith.constant 1 : i32
    %377 = arith.addi %0, %c1_i32 : i32
    %c18_i32_265 = arith.constant 18 : i32
    %378 = arith.addi %377, %c18_i32_265 : i32
    %c52_i32_266 = arith.constant 52 : i32
    %379 = arith.muli %378, %c52_i32_266 : i32
    %c18_i32_267 = arith.constant 18 : i32
    %380 = arith.addi %379, %c18_i32_267 : i32
    %c0_268 = arith.constant 0 : index
    %381 = arith.index_cast %380 : i32 to index
    %c0_269 = arith.constant 0 : index
    %382 = vector.load %arg2[%c0_268, %381, %c0_269] : memref<1x2756x4xf32, #tpu.memory_space<vmem>>, vector<1x16x4xf32>
    %383 = vector.shape_cast %382 : vector<1x16x4xf32> to vector<16x4xf32>
    %cst_270 = arith.constant dense<0.000000e+00> : vector<4xf32>
    %384 = vector.multi_reduction <add>, %383, %cst_270 [0] : vector<16x4xf32> to vector<4xf32>
    %385 = vector.shape_cast %384 : vector<4xf32> to vector<1x4xf32>
    %386 = arith.addf %364, %385 : vector<1x4xf32>
    %387 = vector.extract_strided_slice %339 {offsets = [104, 0], sizes = [16, 32], strides = [1, 1]} : vector<416x32xf32> to vector<16x32xf32>
    %388 = arith.truncf %387 : vector<16x32xf32> to vector<16x32xbf16>
    %c0_271 = arith.constant 0 : index
    %c2_272 = arith.constant 2 : index
    %c0_273 = arith.constant 0 : index
    %c0_274 = arith.constant 0 : index
    %389 = vector.load %arg4[%c0_271, %c2_272, %c0_273, %c0_274] : memref<1x8x16x32xbf16, #tpu.memory_space<vmem>>, vector<1x1x16x32xbf16>
    %390 = vector.shape_cast %389 : vector<1x1x16x32xbf16> to vector<16x32xbf16>
    %391 = vector.shape_cast %388 : vector<16x32xbf16> to vector<1x1x16x32xbf16>
    tpu.vector_store %arg4[%c0_271, %c2_272, %c0_273, %c0_274], %391 {strides = array<i32>} : memref<1x8x16x32xbf16, #tpu.memory_space<vmem>>, vector<1x1x16x32xbf16>,
    %cst_275 = arith.constant dense<0.000000e+00> : vector<32xf32>
    %392 = vector.multi_reduction <add>, %387, %cst_275 [0] : vector<16x32xf32> to vector<32xf32>
    %393 = vector.shape_cast %392 : vector<32xf32> to vector<1x32xf32>
    %394 = arith.addf %372, %393 : vector<1x32xf32>
    %395 = arith.mulf %387, %387 : vector<16x32xf32>
    %cst_276 = arith.constant dense<0.000000e+00> : vector<32xf32>
    %396 = vector.multi_reduction <add>, %395, %cst_276 [0] : vector<16x32xf32> to vector<32xf32>
    %397 = vector.shape_cast %396 : vector<32xf32> to vector<1x32xf32>
    %398 = arith.addf %376, %397 : vector<1x32xf32>
    %c2_i32 = arith.constant 2 : i32
    %399 = arith.addi %0, %c2_i32 : i32
    %c18_i32_277 = arith.constant 18 : i32
    %400 = arith.addi %399, %c18_i32_277 : i32
    %c52_i32_278 = arith.constant 52 : i32
    %401 = arith.muli %400, %c52_i32_278 : i32
    %c18_i32_279 = arith.constant 18 : i32
    %402 = arith.addi %401, %c18_i32_279 : i32
    %c0_280 = arith.constant 0 : index
    %403 = arith.index_cast %402 : i32 to index
    %c0_281 = arith.constant 0 : index
    %404 = vector.load %arg2[%c0_280, %403, %c0_281] : memref<1x2756x4xf32, #tpu.memory_space<vmem>>, vector<1x16x4xf32>
    %405 = vector.shape_cast %404 : vector<1x16x4xf32> to vector<16x4xf32>
    %cst_282 = arith.constant dense<0.000000e+00> : vector<4xf32>
    %406 = vector.multi_reduction <add>, %405, %cst_282 [0] : vector<16x4xf32> to vector<4xf32>
    %407 = vector.shape_cast %406 : vector<4xf32> to vector<1x4xf32>
    %408 = arith.addf %386, %407 : vector<1x4xf32>
    %409 = vector.extract_strided_slice %339 {offsets = [156, 0], sizes = [16, 32], strides = [1, 1]} : vector<416x32xf32> to vector<16x32xf32>
    %410 = arith.truncf %409 : vector<16x32xf32> to vector<16x32xbf16>
    %c0_283 = arith.constant 0 : index
    %c3_284 = arith.constant 3 : index
    %c0_285 = arith.constant 0 : index
    %c0_286 = arith.constant 0 : index
    %411 = vector.load %arg4[%c0_283, %c3_284, %c0_285, %c0_286] : memref<1x8x16x32xbf16, #tpu.memory_space<vmem>>, vector<1x1x16x32xbf16>
    %412 = vector.shape_cast %411 : vector<1x1x16x32xbf16> to vector<16x32xbf16>
    %413 = vector.shape_cast %410 : vector<16x32xbf16> to vector<1x1x16x32xbf16>
    tpu.vector_store %arg4[%c0_283, %c3_284, %c0_285, %c0_286], %413 {strides = array<i32>} : memref<1x8x16x32xbf16, #tpu.memory_space<vmem>>, vector<1x1x16x32xbf16>,
    %cst_287 = arith.constant dense<0.000000e+00> : vector<32xf32>
    %414 = vector.multi_reduction <add>, %409, %cst_287 [0] : vector<16x32xf32> to vector<32xf32>
    %415 = vector.shape_cast %414 : vector<32xf32> to vector<1x32xf32>
    %416 = arith.addf %394, %415 : vector<1x32xf32>
    %417 = arith.mulf %409, %409 : vector<16x32xf32>
    %cst_288 = arith.constant dense<0.000000e+00> : vector<32xf32>
    %418 = vector.multi_reduction <add>, %417, %cst_288 [0] : vector<16x32xf32> to vector<32xf32>
    %419 = vector.shape_cast %418 : vector<32xf32> to vector<1x32xf32>
    %420 = arith.addf %398, %419 : vector<1x32xf32>
    %c3_i32 = arith.constant 3 : i32
    %421 = arith.addi %0, %c3_i32 : i32
    %c18_i32_289 = arith.constant 18 : i32
    %422 = arith.addi %421, %c18_i32_289 : i32
    %c52_i32_290 = arith.constant 52 : i32
    %423 = arith.muli %422, %c52_i32_290 : i32
    %c18_i32_291 = arith.constant 18 : i32
    %424 = arith.addi %423, %c18_i32_291 : i32
    %c0_292 = arith.constant 0 : index
    %425 = arith.index_cast %424 : i32 to index
    %c0_293 = arith.constant 0 : index
    %426 = vector.load %arg2[%c0_292, %425, %c0_293] : memref<1x2756x4xf32, #tpu.memory_space<vmem>>, vector<1x16x4xf32>
    %427 = vector.shape_cast %426 : vector<1x16x4xf32> to vector<16x4xf32>
    %cst_294 = arith.constant dense<0.000000e+00> : vector<4xf32>
    %428 = vector.multi_reduction <add>, %427, %cst_294 [0] : vector<16x4xf32> to vector<4xf32>
    %429 = vector.shape_cast %428 : vector<4xf32> to vector<1x4xf32>
    %430 = arith.addf %408, %429 : vector<1x4xf32>
    %431 = vector.extract_strided_slice %339 {offsets = [208, 0], sizes = [16, 32], strides = [1, 1]} : vector<416x32xf32> to vector<16x32xf32>
    %432 = arith.truncf %431 : vector<16x32xf32> to vector<16x32xbf16>
    %c0_295 = arith.constant 0 : index
    %c4_296 = arith.constant 4 : index
    %c0_297 = arith.constant 0 : index
    %c0_298 = arith.constant 0 : index
    %433 = vector.load %arg4[%c0_295, %c4_296, %c0_297, %c0_298] : memref<1x8x16x32xbf16, #tpu.memory_space<vmem>>, vector<1x1x16x32xbf16>
    %434 = vector.shape_cast %433 : vector<1x1x16x32xbf16> to vector<16x32xbf16>
    %435 = vector.shape_cast %432 : vector<16x32xbf16> to vector<1x1x16x32xbf16>
    tpu.vector_store %arg4[%c0_295, %c4_296, %c0_297, %c0_298], %435 {strides = array<i32>} : memref<1x8x16x32xbf16, #tpu.memory_space<vmem>>, vector<1x1x16x32xbf16>,
    %cst_299 = arith.constant dense<0.000000e+00> : vector<32xf32>
    %436 = vector.multi_reduction <add>, %431, %cst_299 [0] : vector<16x32xf32> to vector<32xf32>
    %437 = vector.shape_cast %436 : vector<32xf32> to vector<1x32xf32>
    %438 = arith.addf %416, %437 : vector<1x32xf32>
    %439 = arith.mulf %431, %431 : vector<16x32xf32>
    %cst_300 = arith.constant dense<0.000000e+00> : vector<32xf32>
    %440 = vector.multi_reduction <add>, %439, %cst_300 [0] : vector<16x32xf32> to vector<32xf32>
    %441 = vector.shape_cast %440 : vector<32xf32> to vector<1x32xf32>
    %442 = arith.addf %420, %441 : vector<1x32xf32>
    %c4_i32 = arith.constant 4 : i32
    %443 = arith.addi %0, %c4_i32 : i32
    %c18_i32_301 = arith.constant 18 : i32
    %444 = arith.addi %443, %c18_i32_301 : i32
    %c52_i32_302 = arith.constant 52 : i32
    %445 = arith.muli %444, %c52_i32_302 : i32
    %c18_i32_303 = arith.constant 18 : i32
    %446 = arith.addi %445, %c18_i32_303 : i32
    %c0_304 = arith.constant 0 : index
    %447 = arith.index_cast %446 : i32 to index
    %c0_305 = arith.constant 0 : index
    %448 = vector.load %arg2[%c0_304, %447, %c0_305] : memref<1x2756x4xf32, #tpu.memory_space<vmem>>, vector<1x16x4xf32>
    %449 = vector.shape_cast %448 : vector<1x16x4xf32> to vector<16x4xf32>
    %cst_306 = arith.constant dense<0.000000e+00> : vector<4xf32>
    %450 = vector.multi_reduction <add>, %449, %cst_306 [0] : vector<16x4xf32> to vector<4xf32>
    %451 = vector.shape_cast %450 : vector<4xf32> to vector<1x4xf32>
    %452 = arith.addf %430, %451 : vector<1x4xf32>
    %453 = vector.extract_strided_slice %339 {offsets = [260, 0], sizes = [16, 32], strides = [1, 1]} : vector<416x32xf32> to vector<16x32xf32>
    %454 = arith.truncf %453 : vector<16x32xf32> to vector<16x32xbf16>
    %c0_307 = arith.constant 0 : index
    %c5_308 = arith.constant 5 : index
    %c0_309 = arith.constant 0 : index
    %c0_310 = arith.constant 0 : index
    %455 = vector.load %arg4[%c0_307, %c5_308, %c0_309, %c0_310] : memref<1x8x16x32xbf16, #tpu.memory_space<vmem>>, vector<1x1x16x32xbf16>
    %456 = vector.shape_cast %455 : vector<1x1x16x32xbf16> to vector<16x32xbf16>
    %457 = vector.shape_cast %454 : vector<16x32xbf16> to vector<1x1x16x32xbf16>
    tpu.vector_store %arg4[%c0_307, %c5_308, %c0_309, %c0_310], %457 {strides = array<i32>} : memref<1x8x16x32xbf16, #tpu.memory_space<vmem>>, vector<1x1x16x32xbf16>,
    %cst_311 = arith.constant dense<0.000000e+00> : vector<32xf32>
    %458 = vector.multi_reduction <add>, %453, %cst_311 [0] : vector<16x32xf32> to vector<32xf32>
    %459 = vector.shape_cast %458 : vector<32xf32> to vector<1x32xf32>
    %460 = arith.addf %438, %459 : vector<1x32xf32>
    %461 = arith.mulf %453, %453 : vector<16x32xf32>
    %cst_312 = arith.constant dense<0.000000e+00> : vector<32xf32>
    %462 = vector.multi_reduction <add>, %461, %cst_312 [0] : vector<16x32xf32> to vector<32xf32>
    %463 = vector.shape_cast %462 : vector<32xf32> to vector<1x32xf32>
    %464 = arith.addf %442, %463 : vector<1x32xf32>
    %c5_i32 = arith.constant 5 : i32
    %465 = arith.addi %0, %c5_i32 : i32
    %c18_i32_313 = arith.constant 18 : i32
    %466 = arith.addi %465, %c18_i32_313 : i32
    %c52_i32_314 = arith.constant 52 : i32
    %467 = arith.muli %466, %c52_i32_314 : i32
    %c18_i32_315 = arith.constant 18 : i32
    %468 = arith.addi %467, %c18_i32_315 : i32
    %c0_316 = arith.constant 0 : index
    %469 = arith.index_cast %468 : i32 to index
    %c0_317 = arith.constant 0 : index
    %470 = vector.load %arg2[%c0_316, %469, %c0_317] : memref<1x2756x4xf32, #tpu.memory_space<vmem>>, vector<1x16x4xf32>
    %471 = vector.shape_cast %470 : vector<1x16x4xf32> to vector<16x4xf32>
    %cst_318 = arith.constant dense<0.000000e+00> : vector<4xf32>
    %472 = vector.multi_reduction <add>, %471, %cst_318 [0] : vector<16x4xf32> to vector<4xf32>
    %473 = vector.shape_cast %472 : vector<4xf32> to vector<1x4xf32>
    %474 = arith.addf %452, %473 : vector<1x4xf32>
    %475 = vector.extract_strided_slice %339 {offsets = [312, 0], sizes = [16, 32], strides = [1, 1]} : vector<416x32xf32> to vector<16x32xf32>
    %476 = arith.truncf %475 : vector<16x32xf32> to vector<16x32xbf16>
    %c0_319 = arith.constant 0 : index
    %c6_320 = arith.constant 6 : index
    %c0_321 = arith.constant 0 : index
    %c0_322 = arith.constant 0 : index
    %477 = vector.load %arg4[%c0_319, %c6_320, %c0_321, %c0_322] : memref<1x8x16x32xbf16, #tpu.memory_space<vmem>>, vector<1x1x16x32xbf16>
    %478 = vector.shape_cast %477 : vector<1x1x16x32xbf16> to vector<16x32xbf16>
    %479 = vector.shape_cast %476 : vector<16x32xbf16> to vector<1x1x16x32xbf16>
    tpu.vector_store %arg4[%c0_319, %c6_320, %c0_321, %c0_322], %479 {strides = array<i32>} : memref<1x8x16x32xbf16, #tpu.memory_space<vmem>>, vector<1x1x16x32xbf16>,
    %cst_323 = arith.constant dense<0.000000e+00> : vector<32xf32>
    %480 = vector.multi_reduction <add>, %475, %cst_323 [0] : vector<16x32xf32> to vector<32xf32>
    %481 = vector.shape_cast %480 : vector<32xf32> to vector<1x32xf32>
    %482 = arith.addf %460, %481 : vector<1x32xf32>
    %483 = arith.mulf %475, %475 : vector<16x32xf32>
    %cst_324 = arith.constant dense<0.000000e+00> : vector<32xf32>
    %484 = vector.multi_reduction <add>, %483, %cst_324 [0] : vector<16x32xf32> to vector<32xf32>
    %485 = vector.shape_cast %484 : vector<32xf32> to vector<1x32xf32>
    %486 = arith.addf %464, %485 : vector<1x32xf32>
    %c6_i32_325 = arith.constant 6 : i32
    %487 = arith.addi %0, %c6_i32_325 : i32
    %c18_i32_326 = arith.constant 18 : i32
    %488 = arith.addi %487, %c18_i32_326 : i32
    %c52_i32_327 = arith.constant 52 : i32
    %489 = arith.muli %488, %c52_i32_327 : i32
    %c18_i32_328 = arith.constant 18 : i32
    %490 = arith.addi %489, %c18_i32_328 : i32
    %c0_329 = arith.constant 0 : index
    %491 = arith.index_cast %490 : i32 to index
    %c0_330 = arith.constant 0 : index
    %492 = vector.load %arg2[%c0_329, %491, %c0_330] : memref<1x2756x4xf32, #tpu.memory_space<vmem>>, vector<1x16x4xf32>
    %493 = vector.shape_cast %492 : vector<1x16x4xf32> to vector<16x4xf32>
    %cst_331 = arith.constant dense<0.000000e+00> : vector<4xf32>
    %494 = vector.multi_reduction <add>, %493, %cst_331 [0] : vector<16x4xf32> to vector<4xf32>
    %495 = vector.shape_cast %494 : vector<4xf32> to vector<1x4xf32>
    %496 = arith.addf %474, %495 : vector<1x4xf32>
    %497 = vector.extract_strided_slice %339 {offsets = [364, 0], sizes = [16, 32], strides = [1, 1]} : vector<416x32xf32> to vector<16x32xf32>
    %498 = arith.truncf %497 : vector<16x32xf32> to vector<16x32xbf16>
    %c0_332 = arith.constant 0 : index
    %c7_333 = arith.constant 7 : index
    %c0_334 = arith.constant 0 : index
    %c0_335 = arith.constant 0 : index
    %499 = vector.load %arg4[%c0_332, %c7_333, %c0_334, %c0_335] : memref<1x8x16x32xbf16, #tpu.memory_space<vmem>>, vector<1x1x16x32xbf16>
    %500 = vector.shape_cast %499 : vector<1x1x16x32xbf16> to vector<16x32xbf16>
    %501 = vector.shape_cast %498 : vector<16x32xbf16> to vector<1x1x16x32xbf16>
    tpu.vector_store %arg4[%c0_332, %c7_333, %c0_334, %c0_335], %501 {strides = array<i32>} : memref<1x8x16x32xbf16, #tpu.memory_space<vmem>>, vector<1x1x16x32xbf16>,
    %cst_336 = arith.constant dense<0.000000e+00> : vector<32xf32>
    %502 = vector.multi_reduction <add>, %497, %cst_336 [0] : vector<16x32xf32> to vector<32xf32>
    %503 = vector.shape_cast %502 : vector<32xf32> to vector<1x32xf32>
    %504 = arith.addf %482, %503 : vector<1x32xf32>
    %505 = arith.mulf %497, %497 : vector<16x32xf32>
    %cst_337 = arith.constant dense<0.000000e+00> : vector<32xf32>
    %506 = vector.multi_reduction <add>, %505, %cst_337 [0] : vector<16x32xf32> to vector<32xf32>
    %507 = vector.shape_cast %506 : vector<32xf32> to vector<1x32xf32>
    %508 = arith.addf %486, %507 : vector<1x32xf32>
    %c7_i32 = arith.constant 7 : i32
    %509 = arith.addi %0, %c7_i32 : i32
    %c18_i32_338 = arith.constant 18 : i32
    %510 = arith.addi %509, %c18_i32_338 : i32
    %c52_i32_339 = arith.constant 52 : i32
    %511 = arith.muli %510, %c52_i32_339 : i32
    %c18_i32_340 = arith.constant 18 : i32
    %512 = arith.addi %511, %c18_i32_340 : i32
    %c0_341 = arith.constant 0 : index
    %513 = arith.index_cast %512 : i32 to index
    %c0_342 = arith.constant 0 : index
    %514 = vector.load %arg2[%c0_341, %513, %c0_342] : memref<1x2756x4xf32, #tpu.memory_space<vmem>>, vector<1x16x4xf32>
    %515 = vector.shape_cast %514 : vector<1x16x4xf32> to vector<16x4xf32>
    %cst_343 = arith.constant dense<0.000000e+00> : vector<4xf32>
    %516 = vector.multi_reduction <add>, %515, %cst_343 [0] : vector<16x4xf32> to vector<4xf32>
    %517 = vector.shape_cast %516 : vector<4xf32> to vector<1x4xf32>
    %518 = arith.addf %496, %517 : vector<1x4xf32>
    %c0_344 = arith.constant 0 : index
    %c0_345 = arith.constant 0 : index
    %c0_346 = arith.constant 0 : index
    %c0_347 = arith.constant 0 : index
    %519 = vector.load %arg5[%c0_344, %c0_345, %c0_346, %c0_347] : memref<1x1x2x32xf32, #tpu.memory_space<vmem>>, vector<1x1x1x32xf32>
    %520 = vector.shape_cast %519 : vector<1x1x1x32xf32> to vector<1x32xf32>
    %521 = vector.shape_cast %504 : vector<1x32xf32> to vector<1x1x1x32xf32>
    tpu.vector_store %arg5[%c0_344, %c0_345, %c0_346, %c0_347], %521 {strides = array<i32>} : memref<1x1x2x32xf32, #tpu.memory_space<vmem>>, vector<1x1x1x32xf32>,
    %c0_348 = arith.constant 0 : index
    %c0_349 = arith.constant 0 : index
    %c1_350 = arith.constant 1 : index
    %c0_351 = arith.constant 0 : index
    %522 = vector.load %arg5[%c0_348, %c0_349, %c1_350, %c0_351] : memref<1x1x2x32xf32, #tpu.memory_space<vmem>>, vector<1x1x1x32xf32>
    %523 = vector.shape_cast %522 : vector<1x1x1x32xf32> to vector<1x32xf32>
    %524 = vector.shape_cast %508 : vector<1x32xf32> to vector<1x1x1x32xf32>
    tpu.vector_store %arg5[%c0_348, %c0_349, %c1_350, %c0_351], %524 {strides = array<i32>} : memref<1x1x2x32xf32, #tpu.memory_space<vmem>>, vector<1x1x1x32xf32>,
    %c0_352 = arith.constant 0 : index
    %c0_353 = arith.constant 0 : index
    %c0_354 = arith.constant 0 : index
    %c0_355 = arith.constant 0 : index
    %525 = vector.load %arg6[%c0_352, %c0_353, %c0_354, %c0_355] : memref<1x1x1x4xf32, #tpu.memory_space<vmem>>, vector<1x1x1x4xf32>
    %526 = vector.shape_cast %525 : vector<1x1x1x4xf32> to vector<1x4xf32>
    %527 = vector.shape_cast %518 : vector<1x4xf32> to vector<1x1x1x4xf32>
    tpu.vector_store %arg6[%c0_352, %c0_353, %c0_354, %c0_355], %527 {strides = array<i32>} : memref<1x1x1x4xf32, #tpu.memory_space<vmem>>, vector<1x1x1x4xf32>,
    return
  }
  func.func @transform_0(%arg0: i32, %arg1: i32) -> (i32, i32, i32) {
    %c0_i32 = arith.constant 0 : i32
    %c0_i32_0 = arith.constant 0 : i32
    %c0_i32_1 = arith.constant 0 : i32
    return %arg0, %c0_i32, %c0_i32_0 : i32, i32, i32
  }
  func.func @transform_1(%arg0: i32, %arg1: i32) -> (i32, i32, i32) {
    %c0_i32 = arith.constant 0 : i32
    %c0_i32_0 = arith.constant 0 : i32
    %c0_i32_1 = arith.constant 0 : i32
    %c0_i32_2 = arith.constant 0 : i32
    return %c0_i32, %c0_i32_0, %c0_i32_1 : i32, i32, i32
  }
  func.func @transform_2(%arg0: i32, %arg1: i32) -> (i32, i32, i32, i32) {
    %c0_i32 = arith.constant 0 : i32
    %c0_i32_0 = arith.constant 0 : i32
    %c0_i32_1 = arith.constant 0 : i32
    return %arg0, %arg1, %c0_i32, %c0_i32_0 : i32, i32, i32, i32
  }
  func.func @transform_3(%arg0: i32, %arg1: i32) -> (i32, i32, i32, i32) {
    %c0_i32 = arith.constant 0 : i32
    %c0_i32_0 = arith.constant 0 : i32
    %c0_i32_1 = arith.constant 0 : i32
    return %arg0, %arg1, %c0_i32, %c0_i32_0 : i32, i32, i32, i32
  }
  func.func @transform_4(%arg0: i32, %arg1: i32) -> (i32, i32, i32, i32) {
    %c0_i32 = arith.constant 0 : i32
    %c0_i32_0 = arith.constant 0 : i32
    %c0_i32_1 = arith.constant 0 : i32
    return %arg0, %arg1, %c0_i32, %c0_i32_0 : i32, i32, i32, i32
  }
}

module attributes {stable_mosaic.version = 11 : i64} {
  func.func @_final_kernel(%arg0: i32, %arg1: i32, %arg2: memref<1x256x32xbf16, #tpu.memory_space<vmem>>, %arg3: memref<1x32xf32, #tpu.memory_space<vmem>>, %arg4: memref<1x32xf32, #tpu.memory_space<vmem>>, %arg5: memref<32x8xbf16, #tpu.memory_space<vmem>>, %arg6: memref<1x1x8xf32, #tpu.memory_space<vmem>>, %arg7: memref<1x256x8xf32, #tpu.memory_space<vmem>>, %arg8: memref<1x1x2x8xf32, #tpu.memory_space<vmem>>) attributes {dimension_semantics = [#tpu.dimension_semantics<parallel>, #tpu.dimension_semantics<parallel>], iteration_bounds = array<i64: 2, 1>, scalar_prefetch = 0 : i64, scratch_operands = 0 : i64, tpu.core_type = #tpu.core_type<tc>, window_params = [{transform_indices = @transform_0, window_bounds = array<i64: 1, 256, 32>}, {pipeline_mode = #tpu.pipeline_mode<synchronous>, transform_indices = @transform_1, window_bounds = array<i64: 1, 32>}, {pipeline_mode = #tpu.pipeline_mode<synchronous>, transform_indices = @transform_2, window_bounds = array<i64: 1, 32>}, {pipeline_mode = #tpu.pipeline_mode<synchronous>, transform_indices = @transform_3, window_bounds = array<i64: 32, 8>}, {transform_indices = @transform_4, window_bounds = array<i64: 1, 1, 8>}, {transform_indices = @transform_5, window_bounds = array<i64: 1, 256, 8>}, {transform_indices = @transform_6, window_bounds = array<i64: 1, 1, 2, 8>}]} {
    %c0 = arith.constant 0 : index
    %c0_0 = arith.constant 0 : index
    %c0_1 = arith.constant 0 : index
    %0 = vector.load %arg2[%c0, %c0_0, %c0_1] : memref<1x256x32xbf16, #tpu.memory_space<vmem>>, vector<1x256x32xbf16>
    %1 = vector.shape_cast %0 : vector<1x256x32xbf16> to vector<256x32xbf16>
    %2 = arith.extf %1 : vector<256x32xbf16> to vector<256x32xf32>
    %c0_2 = arith.constant 0 : index
    %c0_3 = arith.constant 0 : index
    %3 = vector.load %arg3[%c0_2, %c0_3] : memref<1x32xf32, #tpu.memory_space<vmem>>, vector<1x32xf32>
    %4 = vector.broadcast %3 : vector<1x32xf32> to vector<256x32xf32>
    %5 = arith.mulf %2, %4 : vector<256x32xf32>
    %c0_4 = arith.constant 0 : index
    %c0_5 = arith.constant 0 : index
    %6 = vector.load %arg4[%c0_4, %c0_5] : memref<1x32xf32, #tpu.memory_space<vmem>>, vector<1x32xf32>
    %7 = vector.broadcast %6 : vector<1x32xf32> to vector<256x32xf32>
    %8 = arith.addf %5, %7 : vector<256x32xf32>
    %cst = arith.constant 0.000000e+00 : f32
    %9 = vector.broadcast %cst : f32 to vector<256x32xf32>
    %10 = arith.maximumf %8, %9 : vector<256x32xf32>
    %11 = arith.truncf %10 : vector<256x32xf32> to vector<256x32xbf16>
    %c0_6 = arith.constant 0 : index
    %c0_7 = arith.constant 0 : index
    %12 = vector.load %arg5[%c0_6, %c0_7] : memref<32x8xbf16, #tpu.memory_space<vmem>>, vector<32x8xbf16>
    %cst_8 = arith.constant dense<0.000000e+00> : vector<256x8xf32>
    %13 = tpu.matmul %11, %12, %cst_8 {dimension_numbers = #tpu.dot_dimension_numbers<[1], [0], [0], [1], [0, 0, 1, 1], [], []>} : vector<256x32xbf16>, vector<32x8xbf16>, vector<256x8xf32> -> vector<256x8xf32>
    %c0_9 = arith.constant 0 : index
    %c0_10 = arith.constant 0 : index
    %c0_11 = arith.constant 0 : index
    %14 = vector.load %arg6[%c0_9, %c0_10, %c0_11] : memref<1x1x8xf32, #tpu.memory_space<vmem>>, vector<1x1x8xf32>
    %15 = vector.shape_cast %14 : vector<1x1x8xf32> to vector<1x8xf32>
    %16 = vector.broadcast %15 : vector<1x8xf32> to vector<256x8xf32>
    %17 = arith.addf %13, %16 : vector<256x8xf32>
    %c0_12 = arith.constant 0 : index
    %c0_13 = arith.constant 0 : index
    %c0_14 = arith.constant 0 : index
    %18 = vector.load %arg7[%c0_12, %c0_13, %c0_14] : memref<1x256x8xf32, #tpu.memory_space<vmem>>, vector<1x256x8xf32>
    %19 = vector.shape_cast %18 : vector<1x256x8xf32> to vector<256x8xf32>
    %20 = vector.shape_cast %17 : vector<256x8xf32> to vector<1x256x8xf32>
    tpu.vector_store %arg7[%c0_12, %c0_13, %c0_14], %20 {strides = array<i32>} : memref<1x256x8xf32, #tpu.memory_space<vmem>>, vector<1x256x8xf32>,
    %cst_15 = arith.constant dense<0.000000e+00> : vector<8xf32>
    %21 = vector.multi_reduction <add>, %17, %cst_15 [0] : vector<256x8xf32> to vector<8xf32>
    %22 = vector.shape_cast %21 : vector<8xf32> to vector<1x8xf32>
    %c0_16 = arith.constant 0 : index
    %c0_17 = arith.constant 0 : index
    %c0_18 = arith.constant 0 : index
    %c0_19 = arith.constant 0 : index
    %23 = vector.load %arg8[%c0_16, %c0_17, %c0_18, %c0_19] : memref<1x1x2x8xf32, #tpu.memory_space<vmem>>, vector<1x1x1x8xf32>
    %24 = vector.shape_cast %23 : vector<1x1x1x8xf32> to vector<1x8xf32>
    %25 = vector.shape_cast %22 : vector<1x8xf32> to vector<1x1x1x8xf32>
    tpu.vector_store %arg8[%c0_16, %c0_17, %c0_18, %c0_19], %25 {strides = array<i32>} : memref<1x1x2x8xf32, #tpu.memory_space<vmem>>, vector<1x1x1x8xf32>,
    %26 = arith.mulf %17, %17 : vector<256x8xf32>
    %cst_20 = arith.constant dense<0.000000e+00> : vector<8xf32>
    %27 = vector.multi_reduction <add>, %26, %cst_20 [0] : vector<256x8xf32> to vector<8xf32>
    %28 = vector.shape_cast %27 : vector<8xf32> to vector<1x8xf32>
    %c0_21 = arith.constant 0 : index
    %c0_22 = arith.constant 0 : index
    %c1 = arith.constant 1 : index
    %c0_23 = arith.constant 0 : index
    %29 = vector.load %arg8[%c0_21, %c0_22, %c1, %c0_23] : memref<1x1x2x8xf32, #tpu.memory_space<vmem>>, vector<1x1x1x8xf32>
    %30 = vector.shape_cast %29 : vector<1x1x1x8xf32> to vector<1x8xf32>
    %31 = vector.shape_cast %28 : vector<1x8xf32> to vector<1x1x1x8xf32>
    tpu.vector_store %arg8[%c0_21, %c0_22, %c1, %c0_23], %31 {strides = array<i32>} : memref<1x1x2x8xf32, #tpu.memory_space<vmem>>, vector<1x1x1x8xf32>,
    return
  }
  func.func @transform_0(%arg0: i32, %arg1: i32) -> (i32, i32, i32) {
    %c0_i32 = arith.constant 0 : i32
    %c0_i32_0 = arith.constant 0 : i32
    return %arg0, %arg1, %c0_i32 : i32, i32, i32
  }
  func.func @transform_1(%arg0: i32, %arg1: i32) -> (i32, i32) {
    %c0_i32 = arith.constant 0 : i32
    %c0_i32_0 = arith.constant 0 : i32
    %c0_i32_1 = arith.constant 0 : i32
    return %c0_i32, %c0_i32_0 : i32, i32
  }
  func.func @transform_2(%arg0: i32, %arg1: i32) -> (i32, i32) {
    %c0_i32 = arith.constant 0 : i32
    %c0_i32_0 = arith.constant 0 : i32
    %c0_i32_1 = arith.constant 0 : i32
    return %c0_i32, %c0_i32_0 : i32, i32
  }
  func.func @transform_3(%arg0: i32, %arg1: i32) -> (i32, i32) {
    %c0_i32 = arith.constant 0 : i32
    %c0_i32_0 = arith.constant 0 : i32
    %c0_i32_1 = arith.constant 0 : i32
    return %c0_i32, %c0_i32_0 : i32, i32
  }
  func.func @transform_4(%arg0: i32, %arg1: i32) -> (i32, i32, i32) {
    %c0_i32 = arith.constant 0 : i32
    %c0_i32_0 = arith.constant 0 : i32
    %c0_i32_1 = arith.constant 0 : i32
    return %arg0, %c0_i32, %c0_i32_0 : i32, i32, i32
  }
  func.func @transform_5(%arg0: i32, %arg1: i32) -> (i32, i32, i32) {
    %c0_i32 = arith.constant 0 : i32
    %c0_i32_0 = arith.constant 0 : i32
    return %arg0, %arg1, %c0_i32 : i32, i32, i32
  }
  func.func @transform_6(%arg0: i32, %arg1: i32) -> (i32, i32, i32, i32) {
    %c0_i32 = arith.constant 0 : i32
    %c0_i32_0 = arith.constant 0 : i32
    %c0_i32_1 = arith.constant 0 : i32
    return %arg0, %arg1, %c0_i32, %c0_i32_0 : i32, i32, i32, i32
  }
}

module attributes {stable_mosaic.version = 11 : i64} {
  func.func @_bn_relu_kernel(%arg0: i32, %arg1: i32, %arg2: memref<1x256x8xf32, #tpu.memory_space<vmem>>, %arg3: memref<1x8xf32, #tpu.memory_space<vmem>>, %arg4: memref<1x8xf32, #tpu.memory_space<vmem>>, %arg5: memref<1x256x8xf32, #tpu.memory_space<vmem>>) attributes {dimension_semantics = [#tpu.dimension_semantics<parallel>, #tpu.dimension_semantics<parallel>], iteration_bounds = array<i64: 2, 1>, scalar_prefetch = 0 : i64, scratch_operands = 0 : i64, tpu.core_type = #tpu.core_type<tc>, window_params = [{transform_indices = @transform_0, window_bounds = array<i64: 1, 256, 8>}, {pipeline_mode = #tpu.pipeline_mode<synchronous>, transform_indices = @transform_1, window_bounds = array<i64: 1, 8>}, {pipeline_mode = #tpu.pipeline_mode<synchronous>, transform_indices = @transform_2, window_bounds = array<i64: 1, 8>}, {transform_indices = @transform_3, window_bounds = array<i64: 1, 256, 8>}]} {
    %c0 = arith.constant 0 : index
    %c0_0 = arith.constant 0 : index
    %c0_1 = arith.constant 0 : index
    %0 = vector.load %arg2[%c0, %c0_0, %c0_1] : memref<1x256x8xf32, #tpu.memory_space<vmem>>, vector<1x256x8xf32>
    %1 = vector.shape_cast %0 : vector<1x256x8xf32> to vector<256x8xf32>
    %c0_2 = arith.constant 0 : index
    %c0_3 = arith.constant 0 : index
    %2 = vector.load %arg3[%c0_2, %c0_3] : memref<1x8xf32, #tpu.memory_space<vmem>>, vector<1x8xf32>
    %3 = vector.broadcast %2 : vector<1x8xf32> to vector<256x8xf32>
    %4 = arith.mulf %1, %3 : vector<256x8xf32>
    %c0_4 = arith.constant 0 : index
    %c0_5 = arith.constant 0 : index
    %5 = vector.load %arg4[%c0_4, %c0_5] : memref<1x8xf32, #tpu.memory_space<vmem>>, vector<1x8xf32>
    %6 = vector.broadcast %5 : vector<1x8xf32> to vector<256x8xf32>
    %7 = arith.addf %4, %6 : vector<256x8xf32>
    %cst = arith.constant 0.000000e+00 : f32
    %8 = vector.broadcast %cst : f32 to vector<256x8xf32>
    %9 = arith.maximumf %7, %8 : vector<256x8xf32>
    %c0_6 = arith.constant 0 : index
    %c0_7 = arith.constant 0 : index
    %c0_8 = arith.constant 0 : index
    %10 = vector.load %arg5[%c0_6, %c0_7, %c0_8] : memref<1x256x8xf32, #tpu.memory_space<vmem>>, vector<1x256x8xf32>
    %11 = vector.shape_cast %10 : vector<1x256x8xf32> to vector<256x8xf32>
    %12 = vector.shape_cast %9 : vector<256x8xf32> to vector<1x256x8xf32>
    tpu.vector_store %arg5[%c0_6, %c0_7, %c0_8], %12 {strides = array<i32>} : memref<1x256x8xf32, #tpu.memory_space<vmem>>, vector<1x256x8xf32>,
    return
  }
  func.func @transform_0(%arg0: i32, %arg1: i32) -> (i32, i32, i32) {
    %c0_i32 = arith.constant 0 : i32
    %c0_i32_0 = arith.constant 0 : i32
    return %arg0, %arg1, %c0_i32 : i32, i32, i32
  }
  func.func @transform_1(%arg0: i32, %arg1: i32) -> (i32, i32) {
    %c0_i32 = arith.constant 0 : i32
    %c0_i32_0 = arith.constant 0 : i32
    %c0_i32_1 = arith.constant 0 : i32
    return %c0_i32, %c0_i32_0 : i32, i32
  }
  func.func @transform_2(%arg0: i32, %arg1: i32) -> (i32, i32) {
    %c0_i32 = arith.constant 0 : i32
    %c0_i32_0 = arith.constant 0 : i32
    %c0_i32_1 = arith.constant 0 : i32
    return %c0_i32, %c0_i32_0 : i32, i32
  }
  func.func @transform_3(%arg0: i32, %arg1: i32) -> (i32, i32, i32) {
    %c0_i32 = arith.constant 0 : i32
    %c0_i32_0 = arith.constant 0 : i32
    return %arg0, %arg1, %c0_i32 : i32, i32, i32
  }
}

</mosaic_0001>

<bundles_post_ra>
// kernel: aspp_forward_pallas.5
= control target key start
LH: loop header
LB: loop body
LE: loop exit
PB: predicated region body
PF: predicated region fallthrough
CT: control target
= control target key end

     0   :  { %vm26_vm0 = vcmask 1043456   ;;  %vm22_vm1 = vcmask 31744   ;;  %v274_v0 = vmov 0.0   ;;  %vm275_vm2 = vmmov 0   ;;  %s328_s1 = inlined_call_operand.vmem [shape: f32[4,8], index: 1, kind: input, shape index: {}]   ;;  %s329_s0 = inlined_call_operand.vmem [shape: f32[2,4], index: 0, kind: input, shape index: {}]   ;;  %s330_s2 = inlined_call_operand.vmem [shape: f32[8,8], index: 2, kind: input, shape index: {}]   ;;  %s331_s3 = inlined_call_operand.vmem [shape: f32[1,8], index: 3, kind: input, shape index: {}]   ;;  %s332_s4 = inlined_call_operand.vmem [shape: f32[1,8], index: 4, kind: input, shape index: {}]   ;;  %s333_s5 = inlined_call_operand.vmem [shape: f32[2,1,8], index: 5, kind: output, shape index: {}]  }
   0x1   :  { %259 = vmatprep.subr.mxu0 %v274_v0  ;;  %v21_v1 = vld [vmem:[%s328_s1] sm:$0xf]  ;;  %261 = vmatprep.mubr.msk.f32.mxu0 %vm275_vm2, %v274_v0  ;;  %vm100_vm3 = vcmask 58368   ;;  %vm144_vm4 = vcmask 64512   ;;  %v276_v35 = vmov 1966171168   ;;  %v222_v37 = vlaneseq }
   0x2   :  { %v20_v2 = vld [vmem:[%s329_s0] sm:$0x3]  ;;  %260 = vmatpush3.msk.msra.mxu0 %vm26_vm0, %v21_v1  ;;  %264 = vmatprep.subr.mxu1 %v274_v0  ;;  %v220_v36 = vunpack.c.l.s4 %v276_v35  ;;  %vm243_vm5 = vcmask 57344  }
   0x3   :  { %262 = vmatmul.mubr.msk.f32.vlgmr.msra.gmra.mxu0 %vm22_vm1, %v20_v2  ;;  %266 = vmatprep.mubr.msk.f32.mxu1 %vm275_vm2, %v274_v0  ;;  %v143_v3 = vld [vmem:[%s330_s2] sm:$0xff]  ;;  %v223_v39 = vshrl.u32 %v222_v37, 7 }
   0x4   :  { %265 = vmatpush3.msra.mxu1 %v143_v3  ;;  %v252_v29 = vld [vmem:[%s331_s3] ss:$0 sm:$0xff]  ;;  %v221_v38 = vunpack.c.0.s8 %v220_v36 }
   0x5   :  { %v253_v31 = vld [vmem:[%s332_s4] ss:$0 sm:$0xff] }
   0x6   :  { %v224_v40 = vsub.s32 %v221_v38, %v223_v39 }
  0xc3   :  { %v96_v4 = vpop.f32.mrf.mxu0 }
  0xc4   :  { %v101_v5 = vsel %vm100_vm3, %v96_v4, 0.0  ;;  %v110_v6 = vmul.f32 %v96_v4, %v96_v4 }
  0xc5   :  { %v102_v7 = vrot.slane %v101_v5, 4  ;;  %v263_v8 = vpop.f32.mrf.mxu0 }
  0xc6   :  { %v111_v9 = vsel %vm100_vm3, %v110_v6, 0.0 }
  0xc7   :  { %v103_v10 = vadd.f32 %v102_v7, %v101_v5  ;;  %v112_v11 = vrot.slane %v111_v9, 4 }
  0xc9   :  { %v104_v12 = vrot.slane %v103_v10, 2  ;;  %v113_v13 = vadd.f32 %v112_v11, %v111_v9 }
  0xcb   :  { %v105_v14 = vadd.f32 %v104_v12, %v103_v10  ;;  %v114_v15 = vrot.slane %v113_v13, 2 }
  0xcd   :  { %v106_v16 = vrot.slane %v105_v14, 1  ;;  %v115_v17 = vadd.f32 %v114_v15, %v113_v13 }
  0xcf   :  { %v107_v18 = vadd.f32 %v106_v16, %v105_v14  ;;  %v116_v19 = vrot.slane %v115_v17, 1 }
  0xd1   :  { %v109_v20 = vmul.f32 0.5, %v107_v18  ;;  %v117_v21 = vadd.f32 %v116_v19, %v115_v17 }
  0xd3   :  { %v118_v22 = vmul.f32 0.5, %v117_v21  ;;  %v119_v23 = vmul.f32 %v109_v20, %v109_v20  ;;  %v122_v27 = vsub.f32 %v96_v4, %v109_v20 }
  0xd5   :  { %v120_v24 = vsub.f32 %v118_v22, %v119_v23 }
  0xd7   :  { %v121_v25 = vmax.f32 %v120_v24, 0.0 }
  0xd9   :  { %v123_v26 = vadd.f32 0.0003, %v121_v25 }
  0xdb   :  { %272 = vrsqrt.f32 %v123_v26 }
  0xe8   :  { %v273_v28 = vpop.eup %272 }
  0xe9   :  { %v125_v30 = vmul.f32 %v273_v28, %v122_v27 }
  0xeb   :  { %v133_v32 = vmul.f32 %v252_v29, %v125_v30 }
  0xed   :  { %v141_v33 = vadd.f32 %v253_v31, %v133_v32 }
  0xef   :  { %v142_v34 = vmax.f32 %v141_v33, 0.0 }
  0xf1   :  { %267 = vmatmul.mubr.msk.f32.vlgmr.msra.gmra.mxu1 %vm144_vm4, %v142_v34 }
 0x1b1   :  { %v214_v41 = vpop.f32.mrf.mxu1 }
 0x1b2   :  { %v225_v42 = vrot.slane %v214_v41, %v224_v40 }
 0x1b3   :  { %v268_v43 = vpop.f32.mrf.mxu1 }
 0x1b4   :  { %v226_v44 = vcombine.high %v225_v42, %v225_v42  ;;  %v233_v45 = vrot.slane %v225_v42, %v224_v40 }
 0x1b6   :  { %v240_v46 = vrot.slane %v226_v44, %v224_v40  ;;  %244 = vst.msk [vmem:[%s333_s5] sm:$0x1] %vm243_vm5, %v233_v45 }
 0x1b8   :  { %245 = vst.msk [vmem:[%s333_s5 + $0x1] sm:$0x1] %vm243_vm5, %v240_v46 }

// kernel: aspp_forward_pallas.7
= control target key start
LH: loop header
LB: loop body
LE: loop exit
PB: predicated region body
PF: predicated region fallthrough
CT: control target
= control target key end

     0   :  { %s555_s12 = smov 0   ;;  %s557_s13 = smov 0   ;;  %s762_s0 = inlined_call_operand.vmem [shape: f32[2,256,8], index: 0, kind: input, shape index: {}]   ;;  %s763_s1 = inlined_call_operand.vmem [shape: f32[1,8], index: 1, kind: input, shape index: {}]   ;;  %s764_s2 = inlined_call_operand.vmem [shape: f32[1,8], index: 2, kind: input, shape index: {}]   ;;  %s765_s3 = inlined_call_operand.vmem [shape: f32[2,256,8], index: 3, kind: output, shape index: {}]  }
   0x1   :  { %s559_s14 = smov 0  }
   0x2 LB: > { %s25_s15 = sadd.s32 1, %s529_s13  ;;  %p476_p0 = scmp.ge.s32.totalorder %s533_s14, 1  ;;  %s533_s14 = sphi %s559_s14, %s13_s14   ;;  %s529_s13 = sphi %s557_s13, %s767_s13   ;;  %s525_s12 = sphi %s555_s12, %s766_s12  }
   0x3   : > { %p27_p1 = scmp.ge.s32.totalorder %s25_s15, 2  ;;  %p158_p2 = scmp.lt.s32.totalorder %s533_s14, 3 }
   0x5   : > { %s769_s15 = smov (%p27_p1, %s25_s15), 0  ;;  %p159_p3 = pnand %p476_p0, %p158_p2 }
   0x6   : > { %p191_p4 = scmp.lt.s32.totalorder (!%p159_p3), %s525_s12, 1 }
   0x7   : > { %162 = sbr.rel (%p159_p3) target bundleno = 45 (0x2d), region = 32 }
   0xc   : > { %s771_s12 = smov (!%p191_p4, %s525_s12), 1  ;;  %v576_v0 = vld [vmem:[%s763_s1] ss:$0 sm:$0xff]  ;;  %vm352_vm0 = vcmask 64512  }
   0xd   : > { %s485_s16 = sshll.u32 %s771_s12, 8  ;;  %v586_v1 = vld [vmem:[%s764_s2] ss:$0 sm:$0xff] }
   0xe   : > { %s581_s21 = scalar_lea.vmem %s762_s0, %s485_s16  ;;  %s609_s26 = scalar_lea.vmem %s765_s3, %s485_s16 }
   0xf   : > { %v210_v2 = vld [vmem:[%s581_s21] sm:$0xff]  ;;  %v211_v3 = vld [vmem:[%s581_s21 + $0x8] sm:$0xff]  ;;  %v212_v4 = vld [vmem:[%s581_s21 + $0x10] sm:$0xff] }
  0x10   : > { %v249_v5 = vmul.f32 %v576_v0, %v210_v2  ;;  %v250_v6 = vmul.f32 %v576_v0, %v211_v3  ;;  %v251_v7 = vmul.f32 %v576_v0, %v212_v4  ;;  %v213_v8 = vld [vmem:[%s581_s21 + $0x18] sm:$0xff]  ;;  %v214_v9 = vld [vmem:[%s581_s21 + $0x20] sm:$0xff]  ;;  %v215_v10 = vld [vmem:[%s581_s21 + $0x28] sm:$0xff] }
  0x11   : > { %v252_v11 = vmul.f32 %v576_v0, %v213_v8  ;;  %v253_v12 = vmul.f32 %v576_v0, %v214_v9  ;;  %v254_v13 = vmul.f32 %v576_v0, %v215_v10  ;;  %v216_v14 = vld [vmem:[%s581_s21 + $0x30] sm:$0xff]  ;;  %v217_v15 = vld [vmem:[%s581_s21 + $0x38] sm:$0xff]  ;;  %v218_v24 = vld [vmem:[%s581_s21 + $0x40] sm:$0xff] }
  0x12   : > { %v288_v16 = vadd.f32 %v586_v1, %v249_v5  ;;  %v289_v17 = vadd.f32 %v586_v1, %v250_v6  ;;  %v290_v18 = vadd.f32 %v586_v1, %v251_v7  ;;  %v255_v19 = vmul.f32 %v576_v0, %v216_v14  ;;  %v219_v25 = vld [vmem:[%s581_s21 + $0x48] sm:$0xff]  ;;  %v220_v26 = vld [vmem:[%s581_s21 + $0x50] sm:$0xff]  ;;  %v221_v31 = vld [vmem:[%s581_s21 + $0x58] sm:$0xff] }
  0x13   : > { %v291_v20 = vadd.f32 %v586_v1, %v252_v11  ;;  %v292_v21 = vadd.f32 %v586_v1, %v253_v12  ;;  %v293_v22 = vadd.f32 %v586_v1, %v254_v13  ;;  %v256_v23 = vmul.f32 %v576_v0, %v217_v15  ;;  %v222_v32 = vld [vmem:[%s581_s21 + $0x60] sm:$0xff]  ;;  %v223_v33 = vld [vmem:[%s581_s21 + $0x68] sm:$0xff]  ;;  %v224_v38 = vld [vmem:[%s581_s21 + $0x70] sm:$0xff] }
  0x14   : > { %v320_v27 = vmax.f32 %v288_v16, 0.0  ;;  %v321_v28 = vmax.f32 %v289_v17, 0.0  ;;  %v322_v29 = vmax.f32 %v290_v18, 0.0  ;;  %v294_v30 = vadd.f32 %v586_v1, %v255_v19  ;;  %v225_v43 = vld [vmem:[%s581_s21 + $0x78] sm:$0xff]  ;;  %v226_v56 = vld [vmem:[%s581_s21 + $0x80] sm:$0xff]  ;;  %v227_v57 = vld [vmem:[%s581_s21 + $0x88] sm:$0xff] }
  0x15   : > { %v323_v34 = vmax.f32 %v291_v20, 0.0  ;;  %v324_v35 = vmax.f32 %v292_v21, 0.0  ;;  %v325_v36 = vmax.f32 %v293_v22, 0.0  ;;  %v295_v37 = vadd.f32 %v586_v1, %v256_v23  ;;  %v228_v58 = vld [vmem:[%s581_s21 + $0x90] sm:$0xff]  ;;  %v229_v63 = vld [vmem:[%s581_s21 + $0x98] sm:$0xff]  ;;  %v230_v2 = vld [vmem:[%s581_s21 + $0xa0] sm:$0xff] }
  0x16   : > { %353 = vst.msk [vmem:[%s609_s26] sm:$0xff] %vm352_vm0, %v320_v27  ;;  %354 = vst.msk [vmem:[%s609_s26 + $0x8] sm:$0xff] %vm352_vm0, %v321_v28  ;;  %v326_v39 = vmax.f32 %v294_v30, 0.0  ;;  %v257_v40 = vmul.f32 %v576_v0, %v218_v24  ;;  %v258_v41 = vmul.f32 %v576_v0, %v219_v25  ;;  %v259_v42 = vmul.f32 %v576_v0, %v220_v26  ;;  %v231_v3 = vld [vmem:[%s581_s21 + $0xa8] sm:$0xff]  ;;  %v232_v8 = vld [vmem:[%s581_s21 + $0xb0] sm:$0xff] }
  0x17   : > { %355 = vst.msk [vmem:[%s609_s26 + $0x10] sm:$0xff] %vm352_vm0, %v322_v29  ;;  %356 = vst.msk [vmem:[%s609_s26 + $0x18] sm:$0xff] %vm352_vm0, %v323_v34  ;;  %v327_v44 = vmax.f32 %v295_v37, 0.0  ;;  %v260_v45 = vmul.f32 %v576_v0, %v221_v31  ;;  %v261_v46 = vmul.f32 %v576_v0, %v222_v32  ;;  %v262_v47 = vmul.f32 %v576_v0, %v223_v33  ;;  %v233_v13 = vld [vmem:[%s581_s21 + $0xb8] sm:$0xff]  ;;  %v234_v26 = vld [vmem:[%s581_s21 + $0xc0] sm:$0xff] }
  0x18   : > { %357 = vst.msk [vmem:[%s609_s26 + $0x20] sm:$0xff] %vm352_vm0, %v324_v35  ;;  %358 = vst.msk [vmem:[%s609_s26 + $0x28] sm:$0xff] %vm352_vm0, %v325_v36  ;;  %v296_v48 = vadd.f32 %v586_v1, %v257_v40  ;;  %v297_v49 = vadd.f32 %v586_v1, %v258_v41  ;;  %v298_v50 = vadd.f32 %v586_v1, %v259_v42  ;;  %v235_v27 = vld [vmem:[%s581_s21 + $0xc8] sm:$0xff]  ;;  %v236_v28 = vld [vmem:[%s581_s21 + $0xd0] sm:$0xff] }
  0x19   : > { %359 = vst.msk [vmem:[%s609_s26 + $0x30] sm:$0xff] %vm352_vm0, %v326_v39  ;;  %v263_v51 = vmul.f32 %v576_v0, %v224_v38  ;;  %360 = vst.msk [vmem:[%s609_s26 + $0x38] sm:$0xff] %vm352_vm0, %v327_v44  ;;  %v299_v52 = vadd.f32 %v586_v1, %v260_v45  ;;  %v300_v53 = vadd.f32 %v586_v1, %v261_v46  ;;  %v237_v33 = vld [vmem:[%s581_s21 + $0xd8] sm:$0xff]  ;;  %v238_v34 = vld [vmem:[%s581_s21 + $0xe0] sm:$0xff] }
  0x1a   : > { %v301_v54 = vadd.f32 %v586_v1, %v262_v47  ;;  %v264_v55 = vmul.f32 %v576_v0, %v225_v43  ;;  %v328_v59 = vmax.f32 %v296_v48, 0.0  ;;  %v329_v60 = vmax.f32 %v297_v49, 0.0  ;;  %v239_v35 = vld [vmem:[%s581_s21 + $0xe8] sm:$0xff]  ;;  %v240_v40 = vld [vmem:[%s581_s21 + $0xf0] sm:$0xff]  ;;  %v241_v45 = vld [vmem:[%s581_s21 + $0xf8] sm:$0xff] }
  0x1b   : > { %v330_v61 = vmax.f32 %v298_v50, 0.0  ;;  %v302_v62 = vadd.f32 %v586_v1, %v263_v51  ;;  %v331_v4 = vmax.f32 %v299_v52, 0.0  ;;  %v332_v5 = vmax.f32 %v300_v53, 0.0 }
  0x1c   : > { %v333_v6 = vmax.f32 %v301_v54, 0.0  ;;  %v303_v7 = vadd.f32 %v586_v1, %v264_v55  ;;  %361 = vst.msk [vmem:[%s609_s26 + $0x40] sm:$0xff] %vm352_vm0, %v328_v59  ;;  %362 = vst.msk [vmem:[%s609_s26 + $0x48] sm:$0xff] %vm352_vm0, %v329_v60  ;;  %v265_v10 = vmul.f32 %v576_v0, %v226_v56  ;;  %v266_v11 = vmul.f32 %v576_v0, %v227_v57 }
  0x1d   : > { %363 = vst.msk [vmem:[%s609_s26 + $0x50] sm:$0xff] %vm352_vm0, %v330_v61  ;;  %v334_v9 = vmax.f32 %v302_v62, 0.0  ;;  %v267_v12 = vmul.f32 %v576_v0, %v228_v58  ;;  %364 = vst.msk [vmem:[%s609_s26 + $0x58] sm:$0xff] %vm352_vm0, %v331_v4  ;;  %v268_v15 = vmul.f32 %v576_v0, %v229_v63  ;;  %v269_v16 = vmul.f32 %v576_v0, %v230_v2 }
  0x1e   : > { %365 = vst.msk [vmem:[%s609_s26 + $0x60] sm:$0xff] %vm352_vm0, %v332_v5  ;;  %366 = vst.msk [vmem:[%s609_s26 + $0x68] sm:$0xff] %vm352_vm0, %v333_v6  ;;  %v335_v14 = vmax.f32 %v303_v7, 0.0  ;;  %v270_v17 = vmul.f32 %v576_v0, %v231_v3  ;;  %v304_v18 = vadd.f32 %v586_v1, %v265_v10  ;;  %v305_v19 = vadd.f32 %v586_v1, %v266_v11 }
  0x1f   : > { %367 = vst.msk [vmem:[%s609_s26 + $0x70] sm:$0xff] %vm352_vm0, %v334_v9  ;;  %v306_v20 = vadd.f32 %v586_v1, %v267_v12  ;;  %v271_v21 = vmul.f32 %v576_v0, %v232_v8  ;;  %v307_v22 = vadd.f32 %v586_v1, %v268_v15  ;;  %v308_v23 = vadd.f32 %v586_v1, %v269_v16 }
  0x20   : > { %368 = vst.msk [vmem:[%s609_s26 + $0x78] sm:$0xff] %vm352_vm0, %v335_v14  ;;  %v309_v24 = vadd.f32 %v586_v1, %v270_v17  ;;  %v272_v25 = vmul.f32 %v576_v0, %v233_v13  ;;  %v336_v29 = vmax.f32 %v304_v18, 0.0  ;;  %v337_v30 = vmax.f32 %v305_v19, 0.0 }
  0x21   : > { %v338_v31 = vmax.f32 %v306_v20, 0.0  ;;  %v310_v32 = vadd.f32 %v586_v1, %v271_v21  ;;  %v339_v36 = vmax.f32 %v307_v22, 0.0  ;;  %v340_v37 = vmax.f32 %v308_v23, 0.0 }
  0x22   : > { %v341_v38 = vmax.f32 %v309_v24, 0.0  ;;  %v311_v39 = vadd.f32 %v586_v1, %v272_v25  ;;  %369 = vst.msk [vmem:[%s609_s26 + $0x80] sm:$0xff] %vm352_vm0, %v336_v29  ;;  %370 = vst.msk [vmem:[%s609_s26 + $0x88] sm:$0xff] %vm352_vm0, %v337_v30  ;;  %v273_v42 = vmul.f32 %v576_v0, %v234_v26  ;;  %v274_v43 = vmul.f32 %v576_v0, %v235_v27 }
  0x23   : > { %371 = vst.msk [vmem:[%s609_s26 + $0x90] sm:$0xff] %vm352_vm0, %v338_v31  ;;  %v342_v41 = vmax.f32 %v310_v32, 0.0  ;;  %v275_v44 = vmul.f32 %v576_v0, %v236_v28  ;;  %372 = vst.msk [vmem:[%s609_s26 + $0x98] sm:$0xff] %vm352_vm0, %v339_v36  ;;  %v276_v47 = vmul.f32 %v576_v0, %v237_v33  ;;  %v277_v48 = vmul.f32 %v576_v0, %v238_v34 }
  0x24   : > { %373 = vst.msk [vmem:[%s609_s26 + $0xa0] sm:$0xff] %vm352_vm0, %v340_v37  ;;  %374 = vst.msk [vmem:[%s609_s26 + $0xa8] sm:$0xff] %vm352_vm0, %v341_v38  ;;  %v343_v46 = vmax.f32 %v311_v39, 0.0  ;;  %v278_v49 = vmul.f32 %v576_v0, %v239_v35  ;;  %v312_v50 = vadd.f32 %v586_v1, %v273_v42  ;;  %v313_v51 = vadd.f32 %v586_v1, %v274_v43 }
  0x25   : > { %375 = vst.msk [vmem:[%s609_s26 + $0xb0] sm:$0xff] %vm352_vm0, %v342_v41  ;;  %v314_v52 = vadd.f32 %v586_v1, %v275_v44  ;;  %v279_v53 = vmul.f32 %v576_v0, %v240_v40  ;;  %v315_v54 = vadd.f32 %v586_v1, %v276_v47  ;;  %v316_v55 = vadd.f32 %v586_v1, %v277_v48 }
  0x26   : > { %376 = vst.msk [vmem:[%s609_s26 + $0xb8] sm:$0xff] %vm352_vm0, %v343_v46  ;;  %v317_v56 = vadd.f32 %v586_v1, %v278_v49  ;;  %v280_v57 = vmul.f32 %v576_v0, %v241_v45  ;;  %v344_v58 = vmax.f32 %v312_v50, 0.0  ;;  %v345_v59 = vmax.f32 %v313_v51, 0.0 }
  0x27   : > { %v346_v60 = vmax.f32 %v314_v52, 0.0  ;;  %v318_v61 = vadd.f32 %v586_v1, %v279_v53  ;;  %v347_v62 = vmax.f32 %v315_v54, 0.0  ;;  %v348_v63 = vmax.f32 %v316_v55, 0.0 }
  0x28   : > { %v349_v2 = vmax.f32 %v317_v56, 0.0  ;;  %v319_v3 = vadd.f32 %v586_v1, %v280_v57  ;;  %377 = vst.msk [vmem:[%s609_s26 + $0xc0] sm:$0xff] %vm352_vm0, %v344_v58  ;;  %378 = vst.msk [vmem:[%s609_s26 + $0xc8] sm:$0xff] %vm352_vm0, %v345_v59 }
  0x29   : > { %379 = vst.msk [vmem:[%s609_s26 + $0xd0] sm:$0xff] %vm352_vm0, %v346_v60  ;;  %v350_v4 = vmax.f32 %v318_v61, 0.0  ;;  %380 = vst.msk [vmem:[%s609_s26 + $0xd8] sm:$0xff] %vm352_vm0, %v347_v62 }
  0x2a   : > { %381 = vst.msk [vmem:[%s609_s26 + $0xe0] sm:$0xff] %vm352_vm0, %v348_v63  ;;  %382 = vst.msk [vmem:[%s609_s26 + $0xe8] sm:$0xff] %vm352_vm0, %v349_v2  ;;  %v351_v0 = vmax.f32 %v319_v3, 0.0 }
  0x2b   : > { %383 = vst.msk [vmem:[%s609_s26 + $0xf0] sm:$0xff] %vm352_vm0, %v350_v4 }
  0x2c   : > { %384 = vst.msk [vmem:[%s609_s26 + $0xf8] sm:$0xff] %vm352_vm0, %v351_v0 }
  0x2d PF: > { %s13_s14 = sadd.s32 1, %s533_s14   ;;  %s766_s12 = smov %s529_s13 }
  0x2e   : > { %p10_p5 = scmp.ge.s32.totalorder %s13_s14, 4   ;;  %s767_s13 = smov %s769_s15 }
  0x30   :  { %12 = sbr.rel (!%p10_p5) target bundleno = 2 (0x2), region = 62 }

// kernel: aspp_forward_pallas.6
= control target key start
LH: loop header
LB: loop body
LE: loop exit
PB: predicated region body
PF: predicated region fallthrough
CT: control target
= control target key end

     0   :  { %s1348_s21 = smov 0   ;;  %s1350_s22 = smov 0   ;;  %s1727_s0 = inlined_call_operand.vmem [shape: bf16[2,256,32], index: 0, kind: input, shape index: {}]   ;;  %s1728_s1 = inlined_call_operand.vmem [shape: f32[1,32], index: 1, kind: input, shape index: {}]   ;;  %s1729_s2 = inlined_call_operand.vmem [shape: f32[1,32], index: 2, kind: input, shape index: {}]   ;;  %s1730_s3 = inlined_call_operand.vmem [shape: bf16[32,8], index: 3, kind: input, shape index: {}]   ;;  %s1731_s4 = inlined_call_operand.vmem [shape: f32[2,1,8], index: 4, kind: input, shape index: {}]   ;;  %s1732_s5 = inlined_call_operand.vmem [shape: f32[2,256,8], index: 5, kind: output, shape index: {0}]   ;;  %s1733_s6 = inlined_call_operand.vmem [shape: f32[2,1,2,8], index: 6, kind: output, shape index: {1}]  }
   0x1   :  { %s1352_s23 = smov 0  }
   0x2 LB: > { %s29_s24 = sadd.s32 1, %s1307_s22  ;;  %p1095_p0 = scmp.ge.s32.totalorder %s1311_s23, 1  ;;  %s1311_s23 = sphi %s1352_s23, %s17_s23   ;;  %s1307_s22 = sphi %s1350_s22, %s1735_s22   ;;  %s1303_s21 = sphi %s1348_s21, %s1734_s21  }
   0x3   : > { %p31_p1 = scmp.ge.s32.totalorder %s29_s24, 2  ;;  %p246_p2 = scmp.lt.s32.totalorder %s1311_s23, 3 }
   0x5   : > { %s1737_s24 = smov (%p31_p1, %s29_s24), 0  ;;  %p247_p3 = pnand %p1095_p0, %p246_p2 }
   0x6   : > { %p295_p4 = scmp.lt.s32.totalorder (!%p247_p3), %s1303_s21, 1 }
   0x7   : > { %250 = sbr.rel (%p247_p3) target bundleno = 306 (0x132), region = 40 }
   0xc   : > { %v1287_v0 = vld [vmem:[%s1730_s3 + $0x8] sm:$0xff]   ;;  %v1288_v1 = vld [vmem:[%s1730_s3] sm:$0xff]   ;;  %s1739_s21 = smov (!%p295_p4, %s1303_s21), 1  ;;  %vm538_vm0 = vcmask 261120   ;;  %vm748_vm1 = vcmask 64512   ;;  %vm850_vm2 = vcmask 57344  }
   0xd   : > { %1223 = vmatprep.subr.bf16.mxu0 %v1287_v0  ;;  %1259 = vmatprep.subr.bf16.mxu1 %v1287_v0  ;;  %s1124_s29 = sshll.u32 %s1739_s21, 7  ;;  %v1383_v2 = vld [vmem:[%s1728_s1] ss:$0 sm:$0xff]  ;;  %s306_s15 = scalar_lea.vmem %s1731_s4, %s1739_s21 }
   0xe   : > { %1224 = vmatpush3.bf16.msra.mxu0 %v1287_v0  ;;  %1261 = vmatpush3.bf16.msra.mxu1 %v1287_v0  ;;  %s1378_s8 = scalar_lea.vmem %s1727_s0, %s1124_s29  ;;  %v1392_v11 = vld [vmem:[%s1729_s2] ss:$0 sm:$0xff]  ;;  %s1125_s16 = sshll.u32 %s1739_s21, 8 }
   0xf   : > { %1225 = vmatprep.subr.bf16.mxu0 %v1288_v1  ;;  %1260 = vmatprep.subr.bf16.mxu1 %v1288_v1  ;;  %v1127_v3 = vld [vmem:[%s1378_s8] sm:$0xff]   ;;  %v1190_v4 = vld [vmem:[%s1378_s8 + $0x8] sm:$0xff]   ;;  %v1191_v5 = vld [vmem:[%s1378_s8 + $0x10] sm:$0xff]   ;;  %s1504_s19 = scalar_lea.vmem %s1732_s5, %s1125_s16  ;;  %s1100_s20 = sshll.u32 %s1739_s21, 1 }
  0x10   : > { %v1128_v6 = vunpack.c.l.bf16 %v1127_v3  ;;  %v1129_v7 = vunpack.c.h.bf16 %v1127_v3  ;;  %v1132_v8 = vunpack.c.l.bf16 %v1190_v4  ;;  %v1133_v9 = vunpack.c.h.bf16 %v1190_v4  ;;  %v1192_v10 = vld [vmem:[%s1378_s8 + $0x18] sm:$0xff]   ;;  %v1193_v32 = vld [vmem:[%s1378_s8 + $0x20] sm:$0xff]   ;;  %v1194_v37 = vld [vmem:[%s1378_s8 + $0x28] sm:$0xff]   ;;  %s323_s27 = scalar_lea.vmem %s1733_s6, %s1100_s20 }
  0x11   : > { %v1136_v12 = vunpack.c.l.bf16 %v1191_v5  ;;  %v1137_v13 = vunpack.c.h.bf16 %v1191_v5  ;;  %v1140_v14 = vunpack.c.l.bf16 %v1192_v10  ;;  %v1141_v15 = vunpack.c.h.bf16 %v1192_v10  ;;  %v1195_v42 = vld [vmem:[%s1378_s8 + $0x30] sm:$0xff]   ;;  %v1196_v47 = vld [vmem:[%s1378_s8 + $0x38] sm:$0xff]   ;;  %v1197_v5 = vld [vmem:[%s1378_s8 + $0x40] sm:$0xff]  }
  0x12   : > { %1226 = vmatpush3.bf16.msra.mxu0 %v1288_v1  ;;  %1262 = vmatpush3.bf16.msra.mxu1 %v1288_v1  ;;  %v396_v16 = vmul.f32 %v1128_v6, %v1383_v2  ;;  %v397_v17 = vmul.f32 %v1129_v7, %v1383_v2  ;;  %v398_v18 = vmul.f32 %v1132_v8, %v1383_v2  ;;  %v1144_v45 = vunpack.c.l.bf16 %v1193_v32 }
  0x13   : > { %v399_v19 = vmul.f32 %v1133_v9, %v1383_v2  ;;  %v400_v20 = vmul.f32 %v1136_v12, %v1383_v2  ;;  %v401_v21 = vmul.f32 %v1137_v13, %v1383_v2  ;;  %v402_v22 = vmul.f32 %v1140_v14, %v1383_v2 }
  0x14   : > { %v403_v23 = vmul.f32 %v1141_v15, %v1383_v2  ;;  %v435_v24 = vadd.f32 %v1392_v11, %v396_v16  ;;  %v436_v25 = vadd.f32 %v1392_v11, %v397_v17  ;;  %v437_v26 = vadd.f32 %v1392_v11, %v398_v18  ;;  %v1198_v15 = vld [vmem:[%s1378_s8 + $0x48] sm:$0xff]  }
  0x15   : > { %v438_v27 = vadd.f32 %v1392_v11, %v399_v19  ;;  %v439_v28 = vadd.f32 %v1392_v11, %v400_v20  ;;  %v440_v29 = vadd.f32 %v1392_v11, %v401_v21  ;;  %v441_v30 = vadd.f32 %v1392_v11, %v402_v22  ;;  %v1199_v20 = vld [vmem:[%s1378_s8 + $0x50] sm:$0xff]  }
  0x16   : > { %v442_v31 = vadd.f32 %v1392_v11, %v403_v23  ;;  %v467_v33 = vmax.f32 %v435_v24, 0.0  ;;  %v468_v34 = vmax.f32 %v436_v25, 0.0  ;;  %v469_v35 = vmax.f32 %v437_v26, 0.0  ;;  %v1200_v24 = vld [vmem:[%s1378_s8 + $0x58] sm:$0xff]  }
  0x17   : > { %v470_v36 = vmax.f32 %v438_v27, 0.0  ;;  %v471_v38 = vmax.f32 %v439_v28, 0.0  ;;  %v472_v39 = vmax.f32 %v440_v29, 0.0  ;;  %v473_v40 = vmax.f32 %v441_v30, 0.0 }
  0x18   : > { %v474_v41 = vmax.f32 %v442_v31, 0.0  ;;  %v499_v43 = vpack.c.bf16 %v468_v34, %v467_v33  ;;  %v1145_v46 = vunpack.c.h.bf16 %v1193_v32  ;;  %v1148_v50 = vunpack.c.l.bf16 %v1194_v37 }
  0x19   : > { %v500_v44 = vpack.c.bf16 %v470_v36, %v469_v35  ;;  %v501_v48 = vpack.c.bf16 %v472_v39, %v471_v38  ;;  %v1149_v51 = vunpack.c.h.bf16 %v1194_v37  ;;  %v404_v52 = vmul.f32 %v1144_v45, %v1383_v2 }
  0x1a   : > { %v502_v49 = vpack.c.bf16 %v474_v41, %v473_v40  ;;  %1227 = vmatprep.mubr.msk.bf16.mxu0 %vm538_vm0, %v499_v43  ;;  %v405_v53 = vmul.f32 %v1145_v46, %v1383_v2  ;;  %v1152_v54 = vunpack.c.l.bf16 %v1195_v42  ;;  %v1153_v55 = vunpack.c.h.bf16 %v1195_v42  ;;  %v1201_v41 = vld [vmem:[%s1378_s8 + $0x60] sm:$0xff]  }
  0x1b   : > { %1228 = vmatmul.mubr.msk.bf16.vlgmr.msra.gmra.mxu0 %vm538_vm0, %v500_v44  ;;  %v406_v56 = vmul.f32 %v1148_v50, %v1383_v2  ;;  %v407_v57 = vmul.f32 %v1149_v51, %v1383_v2  ;;  %v1156_v58 = vunpack.c.l.bf16 %v1196_v47  ;;  %v1157_v59 = vunpack.c.h.bf16 %v1196_v47 }
  0x1c   : > { %1231 = vmatprep.mubr.msk.bf16.mxu0 %vm538_vm0, %v501_v48  ;;  %v443_v60 = vadd.f32 %v1392_v11, %v404_v52  ;;  %v444_v61 = vadd.f32 %v1392_v11, %v405_v53  ;;  %v408_v62 = vmul.f32 %v1152_v54, %v1383_v2  ;;  %v409_v63 = vmul.f32 %v1153_v55, %v1383_v2  ;;  %v1202_v54 = vld [vmem:[%s1378_s8 + $0x68] sm:$0xff]  }
  0x1d   : > { %v445_v0 = vadd.f32 %v1392_v11, %v406_v56  ;;  %v446_v1 = vadd.f32 %v1392_v11, %v407_v57  ;;  %v410_v3 = vmul.f32 %v1156_v58, %v1383_v2  ;;  %v411_v4 = vmul.f32 %v1157_v59, %v1383_v2  ;;  %v1203_v59 = vld [vmem:[%s1378_s8 + $0x70] sm:$0xff]  }
  0x1e   : > { %v475_v6 = vmax.f32 %v443_v60, 0.0  ;;  %v476_v7 = vmax.f32 %v444_v61, 0.0  ;;  %v447_v8 = vadd.f32 %v1392_v11, %v408_v62  ;;  %v448_v9 = vadd.f32 %v1392_v11, %v409_v63 }
  0x1f   : > { %v477_v10 = vmax.f32 %v445_v0, 0.0  ;;  %v478_v12 = vmax.f32 %v446_v1, 0.0  ;;  %v1433_v13 = vadd.f32 %v1392_v11, %v410_v3  ;;  %v1436_v14 = vadd.f32 %v1392_v11, %v411_v4 }
  0x20   : > { %v503_v16 = vpack.c.bf16 %v476_v7, %v475_v6  ;;  %v479_v17 = vmax.f32 %v447_v8, 0.0  ;;  %v480_v18 = vmax.f32 %v448_v9, 0.0  ;;  %v1160_v19 = vunpack.c.l.bf16 %v1197_v5  ;;  %v1204_v9 = vld [vmem:[%s1378_s8 + $0x78] sm:$0xff]  }
  0x21   : > { %v504_v21 = vpack.c.bf16 %v478_v12, %v477_v10  ;;  %v481_v22 = vmax.f32 %v1433_v13, 0.0  ;;  %v1161_v23 = vunpack.c.h.bf16 %v1197_v5  ;;  %v482_v25 = vmax.f32 %v1436_v14, 0.0 }
  0x22   : > { %v412_v26 = vmul.f32 %v1160_v19, %v1383_v2  ;;  %v1164_v27 = vunpack.c.l.bf16 %v1198_v15  ;;  %v1165_v28 = vunpack.c.h.bf16 %v1198_v15  ;;  %v505_v29 = vpack.c.bf16 %v480_v18, %v479_v17 }
  0x23   : > { %1232 = vmatmul.mubr.msk.bf16.gmra.mxu0 %vm538_vm0, %v502_v49  ;;  %v413_v30 = vmul.f32 %v1161_v23, %v1383_v2  ;;  %v1168_v31 = vunpack.c.l.bf16 %v1199_v20  ;;  %v1169_v32 = vunpack.c.h.bf16 %v1199_v20  ;;  %v1172_v36 = vunpack.c.l.bf16 %v1200_v24 }
  0x24   : > { %1235 = vmatprep.mubr.msk.bf16.mxu0 %vm538_vm0, %v503_v16  ;;  %v451_v33 = vadd.f32 %v1392_v11, %v412_v26  ;;  %v414_v34 = vmul.f32 %v1164_v27, %v1383_v2  ;;  %v415_v35 = vmul.f32 %v1165_v28, %v1383_v2  ;;  %v1173_v40 = vunpack.c.h.bf16 %v1200_v24 }
  0x25   : > { %v452_v37 = vadd.f32 %v1392_v11, %v413_v30  ;;  %v416_v38 = vmul.f32 %v1168_v31, %v1383_v2  ;;  %v417_v39 = vmul.f32 %v1169_v32, %v1383_v2  ;;  %v418_v45 = vmul.f32 %v1172_v36, %v1383_v2 }
  0x26   : > { %v483_v42 = vmax.f32 %v451_v33, 0.0  ;;  %v453_v43 = vadd.f32 %v1392_v11, %v414_v34  ;;  %v454_v44 = vadd.f32 %v1392_v11, %v415_v35  ;;  %v419_v49 = vmul.f32 %v1173_v40, %v1383_v2 }
  0x27   : > { %v484_v46 = vmax.f32 %v452_v37, 0.0  ;;  %v455_v47 = vadd.f32 %v1392_v11, %v416_v38  ;;  %v456_v48 = vadd.f32 %v1392_v11, %v417_v39  ;;  %v457_v52 = vadd.f32 %v1392_v11, %v418_v45 }
  0x28   : > { %v485_v50 = vmax.f32 %v453_v43, 0.0  ;;  %v486_v51 = vmax.f32 %v454_v44, 0.0  ;;  %v1176_v53 = vunpack.c.l.bf16 %v1201_v41  ;;  %v458_v58 = vadd.f32 %v1392_v11, %v419_v49 }
  0x29   : > { %v507_v55 = vpack.c.bf16 %v484_v46, %v483_v42  ;;  %v487_v56 = vmax.f32 %v455_v47, 0.0  ;;  %v488_v57 = vmax.f32 %v456_v48, 0.0  ;;  %v489_v61 = vmax.f32 %v457_v52, 0.0 }
  0x2a   : > { %v508_v60 = vpack.c.bf16 %v486_v51, %v485_v50  ;;  %v1177_v62 = vunpack.c.h.bf16 %v1201_v41  ;;  %v420_v63 = vmul.f32 %v1176_v53, %v1383_v2  ;;  %v490_v1 = vmax.f32 %v458_v58, 0.0 }
  0x2b   : > { %1236 = vmatmul.mubr.msk.bf16.gmra.mxu0 %vm538_vm0, %v504_v21  ;;  %1243 = vmatprep.mubr.msk.bf16.mxu1 %vm538_vm0, %v507_v55  ;;  %v509_v0 = vpack.c.bf16 %v488_v57, %v487_v56  ;;  %v1180_v3 = vunpack.c.l.bf16 %v1202_v54  ;;  %v1181_v4 = vunpack.c.h.bf16 %v1202_v54  ;;  %v1184_v7 = vunpack.c.l.bf16 %v1203_v59 }
  0x2c   : > { %1239 = vmatprep.mubr.msk.bf16.mxu0 %vm538_vm0, %v505_v29  ;;  %1244 = vmatmul.mubr.msk.bf16.vlgmr.msra.gmra.mxu1 %vm538_vm0, %v508_v60  ;;  %v421_v5 = vmul.f32 %v1177_v62, %v1383_v2  ;;  %v459_v6 = vadd.f32 %v1392_v11, %v420_v63  ;;  %v1185_v8 = vunpack.c.h.bf16 %v1203_v59  ;;  %v506_v18 = vpack.c.bf16 %v482_v25, %v481_v22 }
  0x2d   : > { %1247 = vmatprep.mubr.msk.bf16.mxu1 %vm538_vm0, %v509_v0  ;;  %v422_v10 = vmul.f32 %v1180_v3, %v1383_v2  ;;  %v423_v12 = vmul.f32 %v1181_v4, %v1383_v2  ;;  %v424_v16 = vmul.f32 %v1184_v7, %v1383_v2  ;;  %v510_v19 = vpack.c.bf16 %v490_v1, %v489_v61 }
  0x2e   : > { %v460_v14 = vadd.f32 %v1392_v11, %v421_v5  ;;  %v491_v15 = vmax.f32 %v459_v6, 0.0  ;;  %v425_v17 = vmul.f32 %v1185_v8, %v1383_v2  ;;  %v1188_v20 = vunpack.c.l.bf16 %v1204_v9 }
  0x2f   : > { %v461_v23 = vadd.f32 %v1392_v11, %v422_v10  ;;  %v462_v24 = vadd.f32 %v1392_v11, %v423_v12  ;;  %v1189_v26 = vunpack.c.h.bf16 %v1204_v9  ;;  %v463_v27 = vadd.f32 %v1392_v11, %v424_v16 }
  0x30   : > { %v492_v21 = vmax.f32 %v460_v14, 0.0  ;;  %v464_v28 = vadd.f32 %v1392_v11, %v425_v17  ;;  %v426_v22 = vmul.f32 %v1188_v20, %v1383_v2 }
  0x31   : > { %v493_v30 = vmax.f32 %v461_v23, 0.0  ;;  %v494_v13 = vmax.f32 %v462_v24, 0.0  ;;  %v427_v25 = vmul.f32 %v1189_v26, %v1383_v2  ;;  %v495_v31 = vmax.f32 %v463_v27, 0.0  ;;  %v1499_v2 = vld [vmem:[%s306_s15] ss:$0 sm:$0xff] }
  0x32   : > { %v511_v29 = vpack.c.bf16 %v492_v21, %v491_v15  ;;  %v496_v32 = vmax.f32 %v464_v28, 0.0  ;;  %v465_v34 = vadd.f32 %v1392_v11, %v426_v22 }
  0x33   : > { %1240 = vmatmul.mubr.msk.bf16.gmra.mxu0 %vm538_vm0, %v506_v18  ;;  %v512_v33 = vpack.c.bf16 %v494_v13, %v493_v30  ;;  %v466_v35 = vadd.f32 %v1392_v11, %v427_v25 }
  0x34   : > { %1248 = vmatmul.mubr.msk.bf16.gmra.mxu1 %vm538_vm0, %v510_v19  ;;  %v513_v36 = vpack.c.bf16 %v496_v32, %v495_v31  ;;  %v497_v37 = vmax.f32 %v465_v34, 0.0 }
  0x35   : > { %1251 = vmatprep.mubr.msk.bf16.mxu1 %vm538_vm0, %v511_v29  ;;  %v498_v38 = vmax.f32 %v466_v35, 0.0 }
  0x37   : > { %v514_v39 = vpack.c.bf16 %v498_v38, %v497_v37 }
  0x3c   : > { %1252 = vmatmul.mubr.msk.bf16.gmra.mxu1 %vm538_vm0, %v512_v33 }
  0x3d   : > { %1255 = vmatprep.mubr.msk.bf16.mxu1 %vm538_vm0, %v513_v36 }
  0x44   : > { %1256 = vmatmul.mubr.msk.bf16.gmra.mxu1 %vm538_vm0, %v514_v39 }
  0xdb   : > { %v1229_v11 = vpop.f32.mrf.mxu0 }
  0xdc   : > { %v630_v40 = vadd.f32 %v1229_v11, %v1499_v2 }
  0xdd   : > { %v621_v41 = vpop.f32.mrf.mxu0 }
  0xde   : > { %751 = vst.msk [vmem:[%s1504_s19 + $0x10] sm:$0xff] %vm748_vm1, %v630_v40  ;;  %v622_v42 = vadd.f32 %v1499_v2, %v621_v41  ;;  %v854_v48 = vmul.f32 %v630_v40, %v630_v40  ;;  %v784_v54 = vsel %vm748_vm1, %v630_v40, 0.0 }
  0xdf   : > { %v1230_v43 = vpop.f32.mrf.mxu0 }
  0xe0   : > { %749 = vst.msk [vmem:[%s1504_s19] sm:$0xff] %vm748_vm1, %v622_v42  ;;  %v633_v44 = vadd.f32 %v1230_v43, %v1499_v2  ;;  %v852_v46 = vmul.f32 %v622_v42, %v622_v42  ;;  %v781_v50 = vsel %vm748_vm1, %v622_v42, 0.0  ;;  %v887_v0 = vsel %vm748_vm1, %v854_v48, 0.0 }
  0xe1   : > { %v624_v45 = vpop.f32.mrf.mxu0 }
  0xe2   : > { %752 = vst.msk [vmem:[%s1504_s19 + $0x18] sm:$0xff] %vm748_vm1, %v633_v44  ;;  %v625_v47 = vadd.f32 %v1499_v2, %v624_v45  ;;  %v884_v57 = vsel %vm748_vm1, %v852_v46, 0.0  ;;  %v855_v58 = vmul.f32 %v633_v44, %v633_v44  ;;  %v786_v1 = vsel %vm748_vm1, %v633_v44, 0.0 }
  0xe3   : > { %v1233_v49 = vpop.f32.mrf.mxu0 }
  0xe4   : > { %750 = vst.msk [vmem:[%s1504_s19 + $0x8] sm:$0xff] %vm748_vm1, %v625_v47  ;;  %v782_v51 = vsel %vm748_vm1, %v625_v47, 0.0  ;;  %v853_v52 = vmul.f32 %v625_v47, %v625_v47  ;;  %v646_v53 = vadd.f32 %v1233_v49, %v1499_v2  ;;  %v889_v8 = vsel %vm748_vm1, %v855_v58, 0.0 }
  0xe5   : > { %v783_v55 = vadd.f32 %v782_v51, %v781_v50  ;;  %v637_v56 = vpop.f32.mrf.mxu0 }
  0xe6   : > { %v885_v59 = vsel %vm748_vm1, %v853_v52, 0.0  ;;  %755 = vst.msk [vmem:[%s1504_s19 + $0x30] sm:$0xff] %vm748_vm1, %v646_v53  ;;  %v638_v60 = vadd.f32 %v1499_v2, %v637_v56  ;;  %v858_v12 = vmul.f32 %v646_v53, %v646_v53  ;;  %v792_v28 = vsel %vm748_vm1, %v646_v53, 0.0 }
  0xe7   : > { %v785_v61 = vadd.f32 %v784_v54, %v783_v55  ;;  %v886_v62 = vadd.f32 %v885_v59, %v884_v57  ;;  %v1234_v63 = vpop.f32.mrf.mxu0 }
  0xe8   : > { %753 = vst.msk [vmem:[%s1504_s19 + $0x20] sm:$0xff] %vm748_vm1, %v638_v60  ;;  %v856_v3 = vmul.f32 %v638_v60, %v638_v60  ;;  %v649_v4 = vadd.f32 %v1234_v63, %v1499_v2  ;;  %v788_v9 = vsel %vm748_vm1, %v638_v60, 0.0  ;;  %v895_v33 = vsel %vm748_vm1, %v858_v12, 0.0 }
  0xe9   : > { %v888_v5 = vadd.f32 %v887_v0, %v886_v62  ;;  %v787_v6 = vadd.f32 %v786_v1, %v785_v61  ;;  %v640_v7 = vpop.f32.mrf.mxu0 }
  0xea   : > { %756 = vst.msk [vmem:[%s1504_s19 + $0x38] sm:$0xff] %vm748_vm1, %v649_v4  ;;  %v641_v10 = vadd.f32 %v1499_v2, %v640_v7  ;;  %v891_v17 = vsel %vm748_vm1, %v856_v3, 0.0  ;;  %v859_v29 = vmul.f32 %v649_v4, %v649_v4  ;;  %v794_v34 = vsel %vm748_vm1, %v649_v4, 0.0 }
  0xeb   : > { %v789_v14 = vadd.f32 %v788_v9, %v787_v6  ;;  %v890_v15 = vadd.f32 %v889_v8, %v888_v5  ;;  %v1237_v16 = vpop.f32.mrf.mxu0 }
  0xec   : > { %754 = vst.msk [vmem:[%s1504_s19 + $0x28] sm:$0xff] %vm748_vm1, %v641_v10  ;;  %v790_v18 = vsel %vm748_vm1, %v641_v10, 0.0  ;;  %v857_v19 = vmul.f32 %v641_v10, %v641_v10  ;;  %v662_v20 = vadd.f32 %v1237_v16, %v1499_v2  ;;  %v1245_v21 = vpop.f32.mrf.mxu1  ;;  %v897_v41 = vsel %vm748_vm1, %v859_v29, 0.0 }
  0xed   : > { %v892_v23 = vadd.f32 %v891_v17, %v890_v15  ;;  %v791_v24 = vadd.f32 %v790_v18, %v789_v14  ;;  %v653_v26 = vpop.f32.mrf.mxu0  ;;  %v1543_v27 = vadd.f32 %v1245_v21, %v1499_v2 }
  0xee   : > { %v893_v30 = vsel %vm748_vm1, %v857_v19, 0.0  ;;  %759 = vst.msk [vmem:[%s1504_s19 + $0x50] sm:$0xff] %vm748_vm1, %v662_v20  ;;  %v654_v13 = vadd.f32 %v1499_v2, %v653_v26  ;;  %v685_v22 = vpop.f32.mrf.mxu1  ;;  %v862_v45 = vmul.f32 %v662_v20, %v662_v20  ;;  %v800_v58 = vsel %vm748_vm1, %v662_v20, 0.0 }
  0xef   : > { %v793_v25 = vadd.f32 %v792_v28, %v791_v24  ;;  %v894_v31 = vadd.f32 %v893_v30, %v892_v23  ;;  %v1238_v32 = vpop.f32.mrf.mxu0  ;;  %767 = vst.msk [vmem:[%s1504_s19 + $0x90] sm:$0xff] %vm748_vm1, %v1543_v27  ;;  %v1559_v40 = vadd.f32 %v1499_v2, %v685_v22 }
  0xf0   : > { %757 = vst.msk [vmem:[%s1504_s19 + $0x40] sm:$0xff] %vm748_vm1, %v654_v13  ;;  %v860_v35 = vmul.f32 %v654_v13, %v654_v13  ;;  %v665_v36 = vadd.f32 %v1238_v32, %v1499_v2  ;;  %v1246_v37 = vpop.f32.mrf.mxu1  ;;  %v796_v42 = vsel %vm748_vm1, %v654_v13, 0.0  ;;  %v903_v3 = vsel %vm748_vm1, %v862_v45, 0.0 }
  0xf1   : > { %v896_v38 = vadd.f32 %v895_v33, %v894_v31  ;;  %v795_v39 = vadd.f32 %v794_v34, %v793_v25  ;;  %v656_v11 = vpop.f32.mrf.mxu0  ;;  %765 = vst.msk [vmem:[%s1504_s19 + $0x80] sm:$0xff] %vm748_vm1, %v1559_v40  ;;  %v1575_v57 = vadd.f32 %v1246_v37, %v1499_v2  ;;  %v812_v45 = vsel %vm748_vm1, %v1559_v40, 0.0 }
  0xf2   : > { %760 = vst.msk [vmem:[%s1504_s19 + $0x58] sm:$0xff] %vm748_vm1, %v665_v36  ;;  %v657_v43 = vadd.f32 %v1499_v2, %v656_v11  ;;  %v688_v44 = vpop.f32.mrf.mxu1  ;;  %v899_v49 = vsel %vm748_vm1, %v860_v35, 0.0  ;;  %v863_v59 = vmul.f32 %v665_v36, %v665_v36  ;;  %v802_v4 = vsel %vm748_vm1, %v665_v36, 0.0 }
  0xf3   : > { %v797_v46 = vadd.f32 %v796_v42, %v795_v39  ;;  %v898_v47 = vadd.f32 %v897_v41, %v896_v38  ;;  %v1241_v48 = vpop.f32.mrf.mxu0  ;;  %768 = vst.msk [vmem:[%s1504_s19 + $0x98] sm:$0xff] %vm748_vm1, %v1575_v57  ;;  %v689_v12 = vadd.f32 %v1499_v2, %v688_v44  ;;  %v868_v38 = vmul.f32 %v1559_v40, %v1559_v40 }
  0xf4   : > { %758 = vst.msk [vmem:[%s1504_s19 + $0x48] sm:$0xff] %vm748_vm1, %v657_v43  ;;  %v798_v50 = vsel %vm748_vm1, %v657_v43, 0.0  ;;  %v861_v51 = vmul.f32 %v657_v43, %v657_v43  ;;  %v678_v52 = vadd.f32 %v1241_v48, %v1499_v2  ;;  %v1249_v53 = vpop.f32.mrf.mxu1  ;;  %v905_v14 = vsel %vm748_vm1, %v863_v59, 0.0 }
  0xf5   : > { %v900_v54 = vadd.f32 %v899_v49, %v898_v47  ;;  %v799_v55 = vadd.f32 %v798_v50, %v797_v46  ;;  %v669_v56 = vpop.f32.mrf.mxu0  ;;  %766 = vst.msk [vmem:[%s1504_s19 + $0x88] sm:$0xff] %vm748_vm1, %v689_v12  ;;  %v1603_v26 = vadd.f32 %v1249_v53, %v1499_v2  ;;  %v869_v46 = vmul.f32 %v689_v12, %v689_v12 }
  0xf6   : > { %v901_v60 = vsel %vm748_vm1, %v861_v51, 0.0  ;;  %763 = vst.msk [vmem:[%s1504_s19 + $0x70] sm:$0xff] %vm748_vm1, %v678_v52  ;;  %v670_v61 = vadd.f32 %v1499_v2, %v669_v56  ;;  %v701_v62 = vpop.f32.mrf.mxu1  ;;  %v866_v18 = vmul.f32 %v678_v52, %v678_v52  ;;  %v808_v22 = vsel %vm748_vm1, %v678_v52, 0.0 }
  0xf7   : > { %v801_v63 = vadd.f32 %v800_v58, %v799_v55  ;;  %v902_v0 = vadd.f32 %v901_v60, %v900_v54  ;;  %v1242_v1 = vpop.f32.mrf.mxu0  ;;  %v702_v13 = vadd.f32 %v1499_v2, %v701_v62  ;;  %771 = vst.msk [vmem:[%s1504_s19 + $0xb0] sm:$0xff] %vm748_vm1, %v1603_v26  ;;  %v870_v51 = vmul.f32 %v1543_v27, %v1543_v27 }
  0xf8   : > { %761 = vst.msk [vmem:[%s1504_s19 + $0x60] sm:$0xff] %vm748_vm1, %v670_v61  ;;  %v864_v5 = vmul.f32 %v670_v61, %v670_v61  ;;  %v681_v6 = vadd.f32 %v1242_v1, %v1499_v2  ;;  %v1250_v7 = vpop.f32.mrf.mxu1  ;;  %v804_v15 = vsel %vm748_vm1, %v670_v61, 0.0  ;;  %v911_v36 = vsel %vm748_vm1, %v866_v18, 0.0 }
  0xf9   : > { %v904_v8 = vadd.f32 %v903_v3, %v902_v0  ;;  %v803_v9 = vadd.f32 %v802_v4, %v801_v63  ;;  %v672_v10 = vpop.f32.mrf.mxu0  ;;  %v1612_v32 = vadd.f32 %v1250_v7, %v1499_v2  ;;  %769 = vst.msk [vmem:[%s1504_s19 + $0xa0] sm:$0xff] %vm748_vm1, %v702_v13  ;;  %v915_v52 = vsel %vm748_vm1, %v868_v38, 0.0 }
  0xfa   : > { %764 = vst.msk [vmem:[%s1504_s19 + $0x78] sm:$0xff] %vm748_vm1, %v681_v6  ;;  %v673_v16 = vadd.f32 %v1499_v2, %v672_v10  ;;  %v704_v17 = vpop.f32.mrf.mxu1  ;;  %v907_v21 = vsel %vm748_vm1, %v864_v5, 0.0  ;;  %v867_v25 = vmul.f32 %v681_v6, %v681_v6  ;;  %v810_v37 = vsel %vm748_vm1, %v681_v6, 0.0 }
  0xfb   : > { %v805_v19 = vadd.f32 %v804_v15, %v803_v9  ;;  %v906_v20 = vadd.f32 %v905_v14, %v904_v8  ;;  %772 = vst.msk [vmem:[%s1504_s19 + $0xb8] sm:$0xff] %vm748_vm1, %v1612_v32  ;;  %v705_v39 = vadd.f32 %v1499_v2, %v704_v17  ;;  %v814_v40 = vsel %vm748_vm1, %v689_v12, 0.0 }
  0xfc   : > { %762 = vst.msk [vmem:[%s1504_s19 + $0x68] sm:$0xff] %vm748_vm1, %v673_v16  ;;  %v806_v23 = vsel %vm748_vm1, %v673_v16, 0.0  ;;  %v865_v24 = vmul.f32 %v673_v16, %v673_v16  ;;  %v1253_v28 = vpop.f32.mrf.mxu1  ;;  %v913_v44 = vsel %vm748_vm1, %v867_v25, 0.0  ;;  %v816_v59 = vsel %vm748_vm1, %v1543_v27, 0.0 }
  0xfd   : > { %v908_v29 = vadd.f32 %v907_v21, %v906_v20  ;;  %v807_v30 = vadd.f32 %v806_v23, %v805_v19  ;;  %v1625_v43 = vadd.f32 %v1253_v28, %v1499_v2  ;;  %770 = vst.msk [vmem:[%s1504_s19 + $0xa8] sm:$0xff] %vm748_vm1, %v705_v39  ;;  %v871_v60 = vmul.f32 %v1575_v57, %v1575_v57 }
  0xfe   : > { %v909_v31 = vsel %vm748_vm1, %v865_v24, 0.0  ;;  %v717_v33 = vpop.f32.mrf.mxu1  ;;  %v917_v61 = vsel %vm748_vm1, %v869_v46, 0.0  ;;  %v919_v3 = vsel %vm748_vm1, %v870_v51, 0.0  ;;  %v818_v27 = vsel %vm748_vm1, %v1575_v57, 0.0 }
  0xff   : > { %v809_v34 = vadd.f32 %v808_v22, %v807_v30  ;;  %v910_v35 = vadd.f32 %v909_v31, %v908_v29  ;;  %v718_v47 = vadd.f32 %v1499_v2, %v717_v33  ;;  %775 = vst.msk [vmem:[%s1504_s19 + $0xd0] sm:$0xff] %vm748_vm1, %v1625_v43  ;;  %v872_v4 = vmul.f32 %v702_v13, %v702_v13 }
 0x100   : > { %v1254_v11 = vpop.f32.mrf.mxu1  ;;  %v921_v10 = vsel %vm748_vm1, %v871_v60, 0.0  ;;  %v820_v12 = vsel %vm748_vm1, %v702_v13, 0.0  ;;  %v873_v14 = vmul.f32 %v705_v39, %v705_v39  ;;  %v874_v17 = vmul.f32 %v1603_v26, %v1603_v26 }
 0x101   : > { %v912_v41 = vadd.f32 %v911_v36, %v910_v35  ;;  %v811_v42 = vadd.f32 %v810_v37, %v809_v34  ;;  %773 = vst.msk [vmem:[%s1504_s19 + $0xc0] sm:$0xff] %vm748_vm1, %v718_v47  ;;  %v1643_v53 = vadd.f32 %v1254_v11, %v1499_v2  ;;  %v923_v18 = vsel %vm748_vm1, %v872_v4, 0.0 }
 0x102   : > { %v720_v48 = vpop.f32.mrf.mxu1  ;;  %v822_v19 = vsel %vm748_vm1, %v705_v39, 0.0  ;;  %v824_v24 = vsel %vm748_vm1, %v1603_v26, 0.0  ;;  %v875_v28 = vmul.f32 %v1612_v32, %v1612_v32  ;;  %v925_v29 = vsel %vm748_vm1, %v873_v14, 0.0 }
 0x103   : > { %v813_v49 = vadd.f32 %v812_v45, %v811_v42  ;;  %v914_v50 = vadd.f32 %v913_v44, %v912_v41  ;;  %v721_v58 = vadd.f32 %v1499_v2, %v720_v48  ;;  %776 = vst.msk [vmem:[%s1504_s19 + $0xd8] sm:$0xff] %vm748_vm1, %v1643_v53  ;;  %v927_v22 = vsel %vm748_vm1, %v874_v17, 0.0 }
 0x104   : > { %v1257_v54 = vpop.f32.mrf.mxu1  ;;  %v826_v25 = vsel %vm748_vm1, %v1612_v32, 0.0  ;;  %v929_v34 = vsel %vm748_vm1, %v875_v28, 0.0  ;;  %v828_v26 = vsel %vm748_vm1, %v718_v47, 0.0  ;;  %v878_v38 = vmul.f32 %v1625_v43, %v1625_v43 }
 0x105   : > { %v815_v55 = vadd.f32 %v814_v40, %v813_v49  ;;  %v916_v56 = vadd.f32 %v915_v52, %v914_v50  ;;  %v1655_v62 = vadd.f32 %v1257_v54, %v1499_v2  ;;  %774 = vst.msk [vmem:[%s1504_s19 + $0xc8] sm:$0xff] %vm748_vm1, %v721_v58  ;;  %v877_v35 = vmul.f32 %v721_v58, %v721_v58 }
 0x106   : > { %v733_v63 = vpop.f32.mrf.mxu1  ;;  %v830_v11 = vsel %vm748_vm1, %v721_v58, 0.0  ;;  %v832_v32 = vsel %vm748_vm1, %v1625_v43, 0.0  ;;  %v879_v44 = vmul.f32 %v1643_v53, %v1643_v53  ;;  %v935_v48 = vsel %vm748_vm1, %v878_v38, 0.0 }
 0x107   : > { %v817_v0 = vadd.f32 %v816_v59, %v815_v55  ;;  %v918_v1 = vadd.f32 %v917_v61, %v916_v56  ;;  %779 = vst.msk [vmem:[%s1504_s19 + $0xf0] sm:$0xff] %vm748_vm1, %v1655_v62  ;;  %v734_v5 = vadd.f32 %v1499_v2, %v733_v63  ;;  %v933_v45 = vsel %vm748_vm1, %v877_v35, 0.0 }
 0x108   : > { %v1258_v6 = vpop.f32.mrf.mxu1  ;;  %v834_v49 = vsel %vm748_vm1, %v1643_v53, 0.0  ;;  %v937_v40 = vsel %vm748_vm1, %v879_v44, 0.0  ;;  %v882_v58 = vmul.f32 %v1655_v62, %v1655_v62  ;;  %v840_v53 = vsel %vm748_vm1, %v1655_v62, 0.0 }
 0x109   : > { %v920_v7 = vadd.f32 %v919_v3, %v918_v1  ;;  %v819_v8 = vadd.f32 %v818_v27, %v817_v0  ;;  %v745_v9 = vadd.f32 %v1258_v6, %v1499_v2  ;;  %777 = vst.msk [vmem:[%s1504_s19 + $0xe0] sm:$0xff] %vm748_vm1, %v734_v5  ;;  %v880_v50 = vmul.f32 %v734_v5, %v734_v5 }
 0x10a   : > { %v736_v57 = vpop.f32.mrf.mxu1  ;;  %v836_v54 = vsel %vm748_vm1, %v734_v5, 0.0  ;;  %v943_v4 = vsel %vm748_vm1, %v882_v58, 0.0 }
 0x10b   : > { %v821_v15 = vadd.f32 %v820_v12, %v819_v8  ;;  %v922_v16 = vadd.f32 %v921_v10, %v920_v7  ;;  %780 = vst.msk [vmem:[%s1504_s19 + $0xf8] sm:$0xff] %vm748_vm1, %v745_v9  ;;  %v737_v20 = vadd.f32 %v1499_v2, %v736_v57  ;;  %v876_v2 = vmul.f32 %v718_v47, %v718_v47 }
 0x10c   : > { %v939_v59 = vsel %vm748_vm1, %v880_v50, 0.0  ;;  %v883_v0 = vmul.f32 %v745_v9, %v745_v9  ;;  %v842_v5 = vsel %vm748_vm1, %v745_v9, 0.0 }
 0x10d   : > { %v924_v21 = vadd.f32 %v923_v18, %v922_v16  ;;  %v823_v23 = vadd.f32 %v822_v19, %v821_v15  ;;  %778 = vst.msk [vmem:[%s1504_s19 + $0xe8] sm:$0xff] %vm748_vm1, %v737_v20  ;;  %v931_v39 = vsel %vm748_vm1, %v876_v2, 0.0  ;;  %v881_v43 = vmul.f32 %v737_v20, %v737_v20 }
 0x10e   : > { %v838_v60 = vsel %vm748_vm1, %v737_v20, 0.0  ;;  %v945_v8 = vsel %vm748_vm1, %v883_v0, 0.0 }
 0x10f   : > { %v825_v30 = vadd.f32 %v824_v24, %v823_v23  ;;  %v926_v13 = vadd.f32 %v925_v29, %v924_v21  ;;  %v941_v1 = vsel %vm748_vm1, %v881_v43, 0.0 }
 0x111   : > { %v928_v31 = vadd.f32 %v927_v22, %v926_v13  ;;  %v827_v33 = vadd.f32 %v826_v25, %v825_v30 }
 0x113   : > { %v829_v36 = vadd.f32 %v828_v26, %v827_v33  ;;  %v930_v37 = vadd.f32 %v929_v34, %v928_v31 }
 0x115   : > { %v932_v41 = vadd.f32 %v931_v39, %v930_v37  ;;  %v831_v42 = vadd.f32 %v830_v11, %v829_v36 }
 0x117   : > { %v833_v46 = vadd.f32 %v832_v32, %v831_v42  ;;  %v934_v47 = vadd.f32 %v933_v45, %v932_v41 }
 0x119   : > { %v936_v51 = vadd.f32 %v935_v48, %v934_v47  ;;  %v835_v52 = vadd.f32 %v834_v49, %v833_v46 }
 0x11b   : > { %v837_v55 = vadd.f32 %v836_v54, %v835_v52  ;;  %v938_v56 = vadd.f32 %v937_v40, %v936_v51 }
 0x11d   : > { %v940_v61 = vadd.f32 %v939_v59, %v938_v56  ;;  %v839_v63 = vadd.f32 %v838_v60, %v837_v55 }
 0x11f   : > { %v841_v3 = vadd.f32 %v840_v53, %v839_v63  ;;  %v942_v27 = vadd.f32 %v941_v1, %v940_v61 }
 0x121   : > { %v843_v6 = vadd.f32 %v842_v5, %v841_v3  ;;  %v944_v7 = vadd.f32 %v943_v4, %v942_v27 }
 0x123   : > { %v844_v10 = vrot.slane %v843_v6, 4  ;;  %v946_v12 = vadd.f32 %v945_v8, %v944_v7 }
 0x125   : > { %v845_v14 = vadd.f32 %v844_v10, %v843_v6  ;;  %v947_v57 = vrot.slane %v946_v12, 4 }
 0x127   : > { %v846_v15 = vrot.slane %v845_v14, 2  ;;  %v948_v62 = vadd.f32 %v947_v57, %v946_v12 }
 0x129   : > { %v847_v16 = vadd.f32 %v846_v15, %v845_v14  ;;  %v949_v17 = vrot.slane %v948_v62, 2 }
 0x12b   : > { %v848_v18 = vrot.slane %v847_v16, 1  ;;  %v950_v19 = vadd.f32 %v949_v17, %v948_v62 }
 0x12d   : > { %v849_v9 = vadd.f32 %v848_v18, %v847_v16  ;;  %v951_v20 = vrot.slane %v950_v19, 1 }
 0x12f   : > { %851 = vst.msk [vmem:[%s323_s27] sm:$0x1] %vm850_vm2, %v849_v9  ;;  %v952_v21 = vadd.f32 %v951_v20, %v950_v19 }
 0x131   : > { %953 = vst.msk [vmem:[%s323_s27 + $0x1] sm:$0x1] %vm850_vm2, %v952_v21 }
 0x132 PF: > { %s17_s23 = sadd.s32 1, %s1311_s23   ;;  %s1734_s21 = smov %s1307_s22 }
 0x133   : > { %p14_p5 = scmp.ge.s32.totalorder %s17_s23, 4   ;;  %s1735_s22 = smov %s1737_s24 }
 0x135   :  { %16 = sbr.rel (!%p14_p5) target bundleno = 2 (0x2), region = 85 }

// kernel: aspp_forward_pallas.4
= control target key start
LH: loop header
LB: loop body
LE: loop exit
PB: predicated region body
PF: predicated region fallthrough
CT: control target
= control target key end

     0   :  { %s16316_s15 = smov 0   ;;  %s16318_s16 = smov 0   ;;  %s20640_s0 = inlined_call_operand.vmem [shape: f32[2,2756,4], index: 0, kind: input, shape index: {}]   ;;  %s20641_s1 = inlined_call_operand.vmem [shape: bf16[28,4,8], index: 1, kind: input, shape index: {}]   ;;  %s20642_s2 = inlined_call_operand.vmem [shape: bf16[2,16,16,32], index: 2, kind: output, shape index: {0}]   ;;  %s20643_s3 = inlined_call_operand.vmem [shape: f32[2,2,2,32], index: 3, kind: output, shape index: {1}]   ;;  %s20644_s4 = inlined_call_operand.vmem [shape: f32[2,2,1,4], index: 4, kind: output, shape index: {2}]  }
   0x1   :  { %s16320_s17 = smov 0   ;;  %s16322_s18 = smov 0  }
   0x2   :  { %s16324_s19 = smov 0  }
   0x3 LB: > { %s24_s20 = sadd.s32 1, %s16278_s17  ;;  %s27_s21 = sadd.s32 1, %s16282_s18  ;;  %s16286_s19 = sphi %s16324_s19, %s15_s19   ;;  %s16282_s18 = sphi %s16322_s18, %s20961_s18   ;;  %s16278_s17 = sphi %s16320_s17, %s20960_s17   ;;  %s16274_s16 = sphi %s16318_s16, %s20959_s16   ;;  %s16270_s15 = sphi %s16316_s15, %s20958_s15  }
   0x4   : > { %p25_p0 = scmp.ge.s32.totalorder %s24_s20, 2  ;;  %p11764_p1 = scmp.ge.s32.totalorder %s16286_s19, 1 }
   0x5   : > { %p185_p2 = scmp.lt.s32.totalorder %s16286_s19, 5 }
   0x6   : > { %s20963_s20 = smov (%p25_p0, %s24_s20), 0  ;;  %s20965_s21 = smov (!%p25_p0, %s27_s21), %s16282_s18 }
   0x7   : > { %p186_p3 = pnand %p11764_p1, %p185_p2  ;;  %p29_p4 = scmp.ge.s32.totalorder %s20965_s21, 2 }
   0x9   : > { %s20967_s21 = smov (%p29_p4, %s20965_s21), 0  ;;  %189 = sbr.rel (%p186_p3) target bundleno = 1813 (0x715), region = 28 }
   0xe   : > { %v346_v0 = vld [vmem:[%s20641_s1] sm:$0x3]  ;;  %vm426_vm0 = vcmask 1041408   ;;  %v11962_v1 = vld [vmem:[%s20641_s1 + $0x4] sm:$0x3]  ;;  %p231_p5 = scmp.lt.s32.totalorder %s16274_s16, 1 }
   0xf   : > { %16176 = vmatprep.subr.msk.bf16.mxu0 %vm426_vm0, %v346_v0  ;;  %v428_v2 = vsel %vm426_vm0, %v346_v0, 0  ;;  %16177 = vmatprep.subr.msk.bf16.mxu1 %vm426_vm0, %v11962_v1  ;;  %v884_v3 = vsel %vm426_vm0, %v11962_v1, 0  ;;  %v11907_v4 = vld [vmem:[%s20641_s1 + $0x2] sm:$0x3]  ;;  %v12069_v5 = vld [vmem:[%s20641_s1 + $0x6] sm:$0x3] }
  0x10   : > { %14665 = vmatpush3.bf16.msra.mxu0 %v428_v2  ;;  %14719 = vmatpush3.bf16.msra.mxu1 %v884_v3  ;;  %s20969_s16 = smov (!%p231_p5, %s16274_s16), 1  ;;  %s11774_s30 = smul.u32 416, %s16270_s15  ;;  %vm347_vm1 = vcmask 31744   ;;  %v1174_v17 = vsel %vm426_vm0, %v11907_v4, 0  ;;  %v1546_v21 = vsel %vm426_vm0, %v12069_v5, 0  ;;  %vm10877_vm2 = vcmask 64512  }
  0x11   : > { %16178 = vmatprep.subr.msk.bf16.mxu0 %vm426_vm0, %v11907_v4  ;;  %16179 = vmatprep.subr.msk.bf16.mxu1 %vm426_vm0, %v12069_v5  ;;  %s16204_s5 = smul.u32 2760, %s20969_s16  ;;  %v16428_v29 = vld [vmem:[%s20641_s1 + $0x8] sm:$0x3]  ;;  %v16433_v30 = vld [vmem:[%s20641_s1 + $0xa] sm:$0x3]  ;;  %s16288_s23 = smov 8  }
  0x12   : > { %s16289_s26 = smov 16   ;;  %vm10898_vm3 = vcmask 130048   ;;  %s11766_s6 = sshll.u32 %s16270_s15, 3  ;;  %vm11460_vm4 = vcmask 24576   ;;  %vm10919_vm5 = vcmask 195584   ;;  %vm10948_vm6 = vcmask 257024  }
  0x13   : > { %s235_s8 = scalar_lea.vmem %s20640_s0, %s16204_s5  ;;  %s16290_s5 = smov 24   ;;  %vm10951_vm7 = vcmask 261120   ;;  %vm10997_vm8 = vcmask 1045508   ;;  %vm11014_vm9 = vcmask 1043456   ;;  %vm11457_vm11 = vcmask 253952  }
  0x14   : > { %s16373_s9 = scalar_lea.vmem %s235_s8, %s11774_s30  ;;  %p20401_p6 = scmp.lt.s32.totalorder %s11766_s6, 15  ;;  %vm20463_vm10 = vmor %vm426_vm0, %vm10997_vm8 }
  0x15   : > { %v16376_v6 = vld [vmem:[%s16373_s9 + $0x3ba] sm:$0xff]  ;;  %v16379_v7 = vld [vmem:[%s16373_s9 + $0x3c2] sm:$0xff]  ;;  %v11911_v10 = vld [vmem:[%s16373_s9 + $0x28a] sm:$0xff]  ;;  %p249_p7 = scmp.lt.s32.totalorder %s16270_s15, 1  ;;  %s11770_s7 = sshll.u32 %s20969_s16, 1 }
  0x16   : > { %v11910_v8 = vld [vmem:[%s16373_s9 + $0x282] sm:$0xff]  ;;  %v16384_v9 = vpack.c.bf16 %v16379_v7, %v16376_v6  ;;  %v16388_v11 = vld [vmem:[%s16373_s9 + $0x3ca] sm:$0xff]  ;;  %v16391_v12 = vld [vmem:[%s16373_s9 + $0x3d2] sm:$0xff]  ;;  %s20971_s6 = smov (!%p20401_p6, %s11766_s6), 15  ;;  %s11768_s10 = sshll.u32 %s20969_s16, 5 }
  0x17   : > { %v777_v13 = vpack.c.bf16 %v11911_v10, %v11910_v8  ;;  %v16395_v14 = vpack.c.bf16 %v16391_v12, %v16388_v11  ;;  %v11912_v15 = vld [vmem:[%s16373_s9 + $0x292] sm:$0xff]  ;;  %v11913_v16 = vld [vmem:[%s16373_s9 + $0x29a] sm:$0xff]  ;;  %v797_v19 = vpack.c.bf16 %v16388_v11, %v16379_v7  ;;  %v16409_v22 = vld [vmem:[%s16373_s9 + $0x3e2] sm:$0xff]  ;;  %s20973_s15 = smov (!%p249_p7, %s16270_s15), 1  ;;  %s11767_s8 = sshll.u32 %s20971_s6, 1 }
  0x18   : > { %20729 = vst [vmem:[#allocation2_spill] sm:$0xff] %v16384_v9  ;;  %v16401_v18 = vld [vmem:[%s16373_s9 + $0x3da] sm:$0xff]  ;;  %14666 = vmatprep.mubr.msk.bf16.mxu0 %vm347_vm1, %v16384_v9  ;;  %v778_v20 = vpack.c.bf16 %v11913_v16, %v11912_v15  ;;  %v11914_v23 = vld [vmem:[%s16373_s9 + $0x2a2] sm:$0xff]  ;;  %v11915_v24 = vld [vmem:[%s16373_s9 + $0x2aa] sm:$0xff]  ;;  %s20415_s11 = sadd.s32 %s11770_s7, %s20973_s15  ;;  %s243_s12 = sadd.s32 %s11768_s10, %s11767_s8 }
  0x19   : > { %20730 = vst [vmem:[#allocation3_spill] sm:$0xff] %v16395_v14  ;;  %v798_v25 = vpack.c.bf16 %v16401_v18, %v16391_v12  ;;  %14720 = vmatprep.mubr.msk.bf16.mxu1 %vm347_vm1, %v777_v13  ;;  %14667 = vmatmul.mubr.msk.bf16.vlgmr.msra.gmra.mxu0 %vm347_vm1, %v16395_v14  ;;  %v16420_v26 = vpack.c.bf16 %v16409_v22, %v16401_v18  ;;  %v16423_v28 = vld [vmem:[%s16373_s9 + $0x3ea] sm:$0xff]  ;;  %v16437_v31 = vld [vmem:[%s16373_s9 + $0x3f2] sm:$0xff]  ;;  %v16441_v33 = vld [vmem:[%s16373_s9 + $0x3fa] sm:$0xff]  ;;  %s261_s22 = scalar_lea.vmem %s20644_s4, %s20415_s11  ;;  %s11771_s25 = sshll.u32 %s20415_s11, 1 }
  0x1a   : > { %v779_v27 = vpack.c.bf16 %v11915_v24, %v11914_v23  ;;  %14721 = vmatmul.mubr.msk.bf16.vlgmr.msra.gmra.mxu1 %vm347_vm1, %v778_v20  ;;  %14773 = vmatpush3.bf16.msra.mxu0 %v1174_v17  ;;  %v11916_v32 = vld [vmem:[%s16373_s9 + $0x2b2] sm:$0xff]  ;;  %v799_v34 = vpack.c.bf16 %v16423_v28, %v16409_v22  ;;  %v11917_v35 = vld [vmem:[%s16373_s9 + $0x2ba] sm:$0xff]  ;;  %v16449_v36 = vld [vmem:[%s16373_s9 + $0x402] sm:$0xff]  ;;  %v800_v38 = vpack.c.bf16 %v16441_v33, %v16437_v31  ;;  %s254_s28 = scalar_lea.vmem %s20643_s3, %s11771_s25 }
  0x1b   : > { %20731 = vst [vmem:[#allocation4_spill] sm:$0xff] %v16420_v26  ;;  %14827 = vmatpush3.bf16.msra.mxu1 %v1546_v21  ;;  %14670 = vmatprep.mubr.msk.bf16.mxu0 %vm347_vm1, %v16420_v26  ;;  %v16452_v37 = vld [vmem:[%s16373_s9 + $0x40a] sm:$0xff]  ;;  %v11918_v39 = vld [vmem:[%s16373_s9 + $0x2c2] sm:$0xff]  ;;  %v16465_v42 = vpack.c.bf16 %v16437_v31, %v16423_v28  ;;  %v16468_v43 = vld [vmem:[%s16373_s9 + $0x412] sm:$0xff]  ;;  %v780_v45 = vpack.c.bf16 %v11917_v35, %v11916_v32 }
  0x1c   : > { %14724 = vmatprep.mubr.msk.bf16.mxu1 %vm347_vm1, %v779_v27  ;;  %v11919_v40 = vld [vmem:[%s16373_s9 + $0x2ca] sm:$0xff]  ;;  %v801_v41 = vpack.c.bf16 %v16452_v37, %v16449_v36  ;;  %16180 = vmatprep.subr.msk.bf16.mxu0 %vm426_vm0, %v16428_v29  ;;  %v16471_v44 = vld [vmem:[%s16373_s9 + $0x41a] sm:$0xff]  ;;  %v16477_v46 = vpack.c.bf16 %v16449_v36, %v16441_v33  ;;  %v11920_v49 = vld [vmem:[%s16373_s9 + $0x2d2] sm:$0xff]  ;;  %v16494_v54 = vpack.c.bf16 %v16468_v43, %v16452_v37 }
  0x1d   : > { %20732 = vst [vmem:[#allocation5_spill] sm:$0xff] %v16465_v42  ;;  %16181 = vmatprep.subr.msk.bf16.mxu1 %vm426_vm0, %v16433_v30  ;;  %v802_v47 = vpack.c.bf16 %v16471_v44, %v16468_v43  ;;  %v781_v48 = vpack.c.bf16 %v11919_v40, %v11918_v39  ;;  %v11921_v50 = vld [vmem:[%s16373_s9 + $0x2da] sm:$0xff]  ;;  %v11788_v51 = vld [vmem:[%s16373_s9 + $0x422] sm:$0xff]  ;;  %v11923_v53 = vld [vmem:[%s16373_s9 + $0x2ea] sm:$0xff] }
  0x1e   : > { %20733 = vst [vmem:[#allocation6_spill] sm:$0xff] %v16477_v46  ;;  %v11922_v52 = vld [vmem:[%s16373_s9 + $0x2e2] sm:$0xff]  ;;  %20734 = vst [vmem:[#allocation7_spill] sm:$0xff] %v16494_v54  ;;  %v782_v55 = vpack.c.bf16 %v11921_v50, %v11920_v49  ;;  %v16497_v56 = vpack.c.bf16 %v11788_v51, %v16471_v44  ;;  %v11789_v58 = vld [vmem:[%s16373_s9 + $0x42a] sm:$0xff]  ;;  %v1938_v44 = vsel %vm426_vm0, %v16428_v29, 0 }
  0x1f   : > { %v783_v57 = vpack.c.bf16 %v11923_v53, %v11922_v52  ;;  %v11790_v59 = vld [vmem:[%s16373_s9 + $0x432] sm:$0xff]  ;;  %v11925_v61 = vld [vmem:[%s16373_s9 + $0x2fa] sm:$0xff]  ;;  %v11792_v63 = vld [vmem:[%s16373_s9 + $0x442] sm:$0xff] }
  0x20   : > { %20735 = vst [vmem:[#allocation8_spill] sm:$0xff] %v16497_v56  ;;  %v11924_v60 = vld [vmem:[%s16373_s9 + $0x2f2] sm:$0xff]  ;;  %v11791_v62 = vld [vmem:[%s16373_s9 + $0x43a] sm:$0xff]  ;;  %v11926_v0 = vld [vmem:[%s16373_s9 + $0x302] sm:$0xff]  ;;  %v16513_v2 = vpack.c.bf16 %v11790_v59, %v11789_v58 }
  0x21   : > { %14671 = vmatmul.mubr.msk.bf16.gmra.mxu0 %vm347_vm1, %v16465_v42  ;;  %v11927_v1 = vld [vmem:[%s16373_s9 + $0x30a] sm:$0xff]  ;;  %v784_v3 = vpack.c.bf16 %v11925_v61, %v11924_v60  ;;  %v16515_v4 = vpack.c.bf16 %v11792_v63, %v11791_v62  ;;  %v11794_v10 = vld [vmem:[%s16373_s9 + $0x452] sm:$0xff]  ;;  %v11929_v15 = vld [vmem:[%s16373_s9 + $0x31a] sm:$0xff] }
  0x22   : > { %14725 = vmatmul.mubr.msk.bf16.gmra.mxu1 %vm347_vm1, %v780_v45  ;;  %14674 = vmatprep.mubr.msk.bf16.mxu0 %vm347_vm1, %v16477_v46  ;;  %20736 = vst [vmem:[#allocation9_spill] sm:$0xff] %v16513_v2  ;;  %v785_v5 = vpack.c.bf16 %v11927_v1, %v11926_v0  ;;  %v11793_v8 = vld [vmem:[%s16373_s9 + $0x44a] sm:$0xff]  ;;  %v11928_v13 = vld [vmem:[%s16373_s9 + $0x312] sm:$0xff]  ;;  %v11795_v16 = vld [vmem:[%s16373_s9 + $0x45a] sm:$0xff] }
  0x23   : > { %14728 = vmatprep.mubr.msk.bf16.mxu1 %vm347_vm1, %v781_v48  ;;  %20737 = vst [vmem:[#allocation10_spill] sm:$0xff] %v16515_v4  ;;  %v11796_v17 = vld [vmem:[%s16373_s9 + $0x462] sm:$0xff]  ;;  %v11931_v21 = vld [vmem:[%s16373_s9 + $0x32a] sm:$0xff]  ;;  %v16531_v23 = vpack.c.bf16 %v11794_v10, %v11793_v8  ;;  %v786_v24 = vpack.c.bf16 %v11929_v15, %v11928_v13  ;;  %v11798_v39 = vld [vmem:[%s16373_s9 + $0x472] sm:$0xff] }
  0x24   : > { %v11930_v20 = vld [vmem:[%s16373_s9 + $0x322] sm:$0xff]  ;;  %v16533_v27 = vpack.c.bf16 %v11796_v17, %v11795_v16  ;;  %v11797_v35 = vld [vmem:[%s16373_s9 + $0x46a] sm:$0xff]  ;;  %v11932_v40 = vld [vmem:[%s16373_s9 + $0x332] sm:$0xff] }
  0x25   : > { %20738 = vst [vmem:[#allocation11_spill] sm:$0xff] %v16531_v23  ;;  %v787_v32 = vpack.c.bf16 %v11931_v21, %v11930_v20  ;;  %v11933_v45 = vld [vmem:[%s16373_s9 + $0x33a] sm:$0xff]  ;;  %v11800_v49 = vld [vmem:[%s16373_s9 + $0x482] sm:$0xff]  ;;  %v11935_v51 = vld [vmem:[%s16373_s9 + $0x34a] sm:$0xff]  ;;  %v16549_v52 = vpack.c.bf16 %v11798_v39, %v11797_v35 }
  0x26   : > { %20739 = vst [vmem:[#allocation12_spill] sm:$0xff] %v16533_v27  ;;  %v11799_v48 = vld [vmem:[%s16373_s9 + $0x47a] sm:$0xff]  ;;  %v11934_v50 = vld [vmem:[%s16373_s9 + $0x342] sm:$0xff]  ;;  %v788_v53 = vpack.c.bf16 %v11933_v45, %v11932_v40  ;;  %v11801_v58 = vld [vmem:[%s16373_s9 + $0x48a] sm:$0xff] }
  0x27   : > { %20740 = vst [vmem:[#allocation13_spill] sm:$0xff] %v16549_v52  ;;  %v11802_v59 = vld [vmem:[%s16373_s9 + $0x492] sm:$0xff]  ;;  %v11937_v61 = vld [vmem:[%s16373_s9 + $0x35a] sm:$0xff]  ;;  %v11804_v63 = vld [vmem:[%s16373_s9 + $0x4a2] sm:$0xff] }
  0x28   : > { %v11936_v60 = vld [vmem:[%s16373_s9 + $0x352] sm:$0xff]  ;;  %v11803_v62 = vld [vmem:[%s16373_s9 + $0x49a] sm:$0xff]  ;;  %v11938_v0 = vld [vmem:[%s16373_s9 + $0x362] sm:$0xff] }
  0x29   : > { %14675 = vmatmul.mubr.msk.bf16.gmra.mxu0 %vm347_vm1, %v16494_v54  ;;  %v11939_v1 = vld [vmem:[%s16373_s9 + $0x36a] sm:$0xff]  ;;  %v16569_v8 = vpack.c.bf16 %v11804_v63, %v11803_v62  ;;  %v11806_v15 = vld [vmem:[%s16373_s9 + $0x4b2] sm:$0xff]  ;;  %v11941_v17 = vld [vmem:[%s16373_s9 + $0x37a] sm:$0xff] }
  0x2a   : > { %14729 = vmatmul.mubr.msk.bf16.gmra.mxu1 %vm347_vm1, %v782_v55  ;;  %14678 = vmatprep.mubr.msk.bf16.mxu0 %vm347_vm1, %v16497_v56  ;;  %v16551_v55 = vpack.c.bf16 %v11800_v49, %v11799_v48  ;;  %v791_v10 = vpack.c.bf16 %v11939_v1, %v11938_v0  ;;  %v11805_v13 = vld [vmem:[%s16373_s9 + $0x4aa] sm:$0xff]  ;;  %v11940_v16 = vld [vmem:[%s16373_s9 + $0x372] sm:$0xff]  ;;  %v11807_v20 = vld [vmem:[%s16373_s9 + $0x4ba] sm:$0xff] }
  0x2b   : > { %14732 = vmatprep.mubr.msk.bf16.mxu1 %vm347_vm1, %v783_v57  ;;  %v789_v57 = vpack.c.bf16 %v11935_v51, %v11934_v50  ;;  %20743 = vst [vmem:[#allocation16_spill] sm:$0xff] %v16569_v8  ;;  %v11808_v21 = vld [vmem:[%s16373_s9 + $0x4c2] sm:$0xff]  ;;  %v16585_v35 = vpack.c.bf16 %v11806_v15, %v11805_v13  ;;  %v792_v39 = vpack.c.bf16 %v11941_v17, %v11940_v16  ;;  %v11809_v48 = vld [vmem:[%s16373_s9 + $0x4ca] sm:$0xff]  ;;  %v11810_v49 = vld [vmem:[%s16373_s9 + $0x4d2] sm:$0xff] }
  0x2c   : > { %20741 = vst [vmem:[#allocation14_spill] sm:$0xff] %v16551_v55  ;;  %v16587_v40 = vpack.c.bf16 %v11808_v21, %v11807_v20  ;;  %v11944_v50 = vld [vmem:[%s16373_s9 + $0x392] sm:$0xff]  ;;  %v11945_v51 = vld [vmem:[%s16373_s9 + $0x39a] sm:$0xff]  ;;  %v11813_v0 = vld [vmem:[%s16373_s9 + $0x4ea] sm:$0xff] }
  0x2d   : > { %20744 = vst [vmem:[#allocation17_spill] sm:$0xff] %v16585_v35  ;;  %v11814_v1 = vld [vmem:[%s16373_s9 + $0x4f2] sm:$0xff]  ;;  %v11816_v13 = vld [vmem:[%s16373_s9 + $0x502] sm:$0xff]  ;;  %v11817_v20 = vld [vmem:[%s16373_s9 + $0x50a] sm:$0xff] }
  0x2e   : > { %20745 = vst [vmem:[#allocation18_spill] sm:$0xff] %v16587_v40  ;;  %v16618_v15 = vpack.c.bf16 %v11814_v1, %v11813_v0  ;;  %v11818_v21 = vld [vmem:[%s16373_s9 + $0x512] sm:$0xff]  ;;  %v11821_v7 = vld [vmem:[%s16373_s9 + $0x52a] sm:$0xff] }
  0x2f   : > { %v11822_v11 = vld [vmem:[%s16373_s9 + $0x532] sm:$0xff]  ;;  %v11825_v18 = vld [vmem:[%s16373_s9 + $0x54a] sm:$0xff] }
  0x30   : > { %20748 = vst [vmem:[#allocation21_spill] sm:$0xff] %v16618_v15  ;;  %v11826_v22 = vld [vmem:[%s16373_s9 + $0x552] sm:$0xff]  ;;  %v11856_v28 = vld [vmem:[%s16373_s9 + $0x284] sm:$0xff]  ;;  %v16705_v1 = vld [vmem:[%s20641_s1 + $0xc] sm:$0x3] }
  0x31   : > { %14679 = vmatmul.mubr.msk.bf16.gmra.mxu0 %vm347_vm1, %v16513_v2  ;;  %v12017_v31 = vld [vmem:[%s16373_s9 + $0x288] sm:$0xff]  ;;  %v12018_v33 = vld [vmem:[%s16373_s9 + $0x290] sm:$0xff] }
  0x32   : > { %14733 = vmatmul.mubr.msk.bf16.gmra.mxu1 %vm347_vm1, %v784_v3  ;;  %14682 = vmatprep.mubr.msk.bf16.mxu0 %vm347_vm1, %v16515_v4  ;;  %v16567_v3 = vpack.c.bf16 %v11802_v59, %v11801_v58  ;;  %v11946_v58 = vld [vmem:[%s16373_s9 + $0x3a2] sm:$0xff]  ;;  %v11947_v59 = vld [vmem:[%s16373_s9 + $0x3aa] sm:$0xff]  ;;  %v11858_v37 = vld [vmem:[%s16373_s9 + $0x294] sm:$0xff] }
  0x33   : > { %14736 = vmatprep.mubr.msk.bf16.mxu1 %vm347_vm1, %v785_v5  ;;  %v790_v5 = vpack.c.bf16 %v11937_v61, %v11936_v60  ;;  %v16603_v60 = vpack.c.bf16 %v11810_v49, %v11809_v48  ;;  %v794_v61 = vpack.c.bf16 %v11945_v51, %v11944_v50  ;;  %v795_v63 = vpack.c.bf16 %v11947_v59, %v11946_v58  ;;  %v11857_v36 = vld [vmem:[%s16373_s9 + $0x28c] sm:$0xff]  ;;  %v12020_v50 = vld [vmem:[%s16373_s9 + $0x2a0] sm:$0xff]  ;;  %v11862_v29 = vld [vmem:[%s16373_s9 + $0x2b4] sm:$0xff] }
  0x34   : > { %20742 = vst [vmem:[#allocation15_spill] sm:$0xff] %v16567_v3  ;;  %v16656_v48 = vpack.c.bf16 %v11822_v11, %v11821_v7  ;;  %v1439_v49 = vpack.c.bf16 %v12018_v33, %v12017_v31  ;;  %v11859_v51 = vld [vmem:[%s16373_s9 + $0x29c] sm:$0xff]  ;;  %v12021_v58 = vld [vmem:[%s16373_s9 + $0x2a8] sm:$0xff]  ;;  %v12022_v59 = vld [vmem:[%s16373_s9 + $0x2b0] sm:$0xff] }
  0x35   : > { %20746 = vst [vmem:[#allocation19_spill] sm:$0xff] %v16603_v60  ;;  %v11861_v0 = vld [vmem:[%s16373_s9 + $0x2ac] sm:$0xff] }
  0x36   : > { %20752 = vst [vmem:[#allocation25_spill] sm:$0xff] %v16656_v48  ;;  %v12029_v31 = vld [vmem:[%s16373_s9 + $0x2e8] sm:$0xff]  ;;  %v12030_v33 = vld [vmem:[%s16373_s9 + $0x2f0] sm:$0xff] }
  0x39   : > { %14683 = vmatmul.mubr.msk.bf16.gmra.mxu0 %vm347_vm1, %v16531_v23 }
  0x3a   : > { %14737 = vmatmul.mubr.msk.bf16.gmra.mxu1 %vm347_vm1, %v786_v24  ;;  %14686 = vmatprep.mubr.msk.bf16.mxu0 %vm347_vm1, %v16533_v27  ;;  %v11942_v24 = vld [vmem:[%s16373_s9 + $0x382] sm:$0xff] }
  0x3b   : > { %14740 = vmatprep.mubr.msk.bf16.mxu1 %vm347_vm1, %v787_v32  ;;  %v11943_v32 = vld [vmem:[%s16373_s9 + $0x38a] sm:$0xff] }
  0x3c   : > { %v793_v45 = vpack.c.bf16 %v11943_v32, %v11942_v24  ;;  %v11820_v24 = vld [vmem:[%s16373_s9 + $0x522] sm:$0xff]  ;;  %v16636_v32 = vpack.c.bf16 %v11818_v21, %v11817_v20  ;;  %v12026_v21 = vld [vmem:[%s16373_s9 + $0x2d0] sm:$0xff] }
  0x3d   : > { %v12025_v20 = vld [vmem:[%s16373_s9 + $0x2c8] sm:$0xff] }
  0x3e   : > { %20750 = vst [vmem:[#allocation23_spill] sm:$0xff] %v16636_v32  ;;  %v1443_v11 = vpack.c.bf16 %v12026_v21, %v12025_v20  ;;  %v12037_v20 = vld [vmem:[%s16373_s9 + $0x328] sm:$0xff]  ;;  %v12038_v21 = vld [vmem:[%s16373_s9 + $0x330] sm:$0xff] }
  0x41   : > { %14687 = vmatmul.mubr.msk.bf16.gmra.mxu0 %vm347_vm1, %v16549_v52 }
  0x42   : > { %14741 = vmatmul.mubr.msk.bf16.gmra.mxu1 %vm347_vm1, %v788_v53  ;;  %14690 = vmatprep.mubr.msk.bf16.mxu0 %vm347_vm1, %v16551_v55  ;;  %v11811_v53 = vld [vmem:[%s16373_s9 + $0x4da] sm:$0xff] }
  0x43   : > { %14744 = vmatprep.mubr.msk.bf16.mxu1 %vm347_vm1, %v789_v57  ;;  %v11812_v57 = vld [vmem:[%s16373_s9 + $0x4e2] sm:$0xff] }
  0x44   : > { %v16605_v62 = vpack.c.bf16 %v11812_v57, %v11811_v53  ;;  %v11860_v53 = vld [vmem:[%s16373_s9 + $0x2a4] sm:$0xff]  ;;  %v696_v57 = vpack.c.bf16 %v11858_v37, %v11857_v36  ;;  %v1445_v37 = vpack.c.bf16 %v12030_v33, %v12029_v31  ;;  %v12042_v33 = vld [vmem:[%s16373_s9 + $0x350] sm:$0xff] }
  0x45   : > { %v12041_v31 = vld [vmem:[%s16373_s9 + $0x348] sm:$0xff] }
  0x46   : > { %20747 = vst [vmem:[#allocation20_spill] sm:$0xff] %v16605_v62 }
  0x49   : > { %14691 = vmatmul.mubr.msk.bf16.gmra.mxu0 %vm347_vm1, %v16567_v3 }
  0x4a   : > { %14745 = vmatmul.mubr.msk.bf16.gmra.mxu1 %vm347_vm1, %v790_v5  ;;  %14694 = vmatprep.mubr.msk.bf16.mxu0 %vm347_vm1, %v16569_v8  ;;  %v11948_v5 = vld [vmem:[%s16373_s9 + $0x3b2] sm:$0xff] }
  0x4b   : > { %14748 = vmatprep.mubr.msk.bf16.mxu1 %vm347_vm1, %v791_v10  ;;  %v11815_v10 = vld [vmem:[%s16373_s9 + $0x4fa] sm:$0xff]  ;;  %v796_v16 = vpack.c.bf16 %v16376_v6, %v11948_v5 }
  0x4c   : > { %v16621_v17 = vpack.c.bf16 %v11816_v13, %v11815_v10  ;;  %v11819_v6 = vld [vmem:[%s16373_s9 + $0x51a] sm:$0xff] }
  0x4d   : > { %v12023_v5 = vld [vmem:[%s16373_s9 + $0x2b8] sm:$0xff]  ;;  %v12024_v10 = vld [vmem:[%s16373_s9 + $0x2c0] sm:$0xff] }
  0x4e   : > { %20749 = vst [vmem:[#allocation22_spill] sm:$0xff] %v16621_v17  ;;  %v11863_v13 = vld [vmem:[%s16373_s9 + $0x2bc] sm:$0xff] }
  0x51   : > { %14695 = vmatmul.mubr.msk.bf16.gmra.mxu0 %vm347_vm1, %v16585_v35 }
  0x52   : > { %14749 = vmatmul.mubr.msk.bf16.gmra.mxu1 %vm347_vm1, %v792_v39  ;;  %14698 = vmatprep.mubr.msk.bf16.mxu0 %vm347_vm1, %v16587_v40  ;;  %v16638_v39 = vpack.c.bf16 %v11820_v24, %v11819_v6  ;;  %v698_v6 = vpack.c.bf16 %v11862_v29, %v11861_v0  ;;  %v1442_v24 = vpack.c.bf16 %v12024_v10, %v12023_v5  ;;  %v11873_v0 = vld [vmem:[%s16373_s9 + $0x30c] sm:$0xff]  ;;  %v11874_v29 = vld [vmem:[%s16373_s9 + $0x314] sm:$0xff]  ;;  %v12036_v10 = vld [vmem:[%s16373_s9 + $0x320] sm:$0xff] }
  0x53   : > { %14752 = vmatprep.mubr.msk.bf16.mxu1 %vm347_vm1, %v793_v45  ;;  %v11824_v45 = vld [vmem:[%s16373_s9 + $0x542] sm:$0xff]  ;;  %v12035_v5 = vld [vmem:[%s16373_s9 + $0x318] sm:$0xff] }
  0x54   : > { %20751 = vst [vmem:[#allocation24_spill] sm:$0xff] %v16638_v39 }
  0x59   : > { %14699 = vmatmul.mubr.msk.bf16.gmra.mxu0 %vm347_vm1, %v16603_v60 }
  0x5a   : > { %14753 = vmatmul.mubr.msk.bf16.gmra.mxu1 %vm347_vm1, %v794_v61  ;;  %14702 = vmatprep.mubr.msk.bf16.mxu0 %vm347_vm1, %v16605_v62  ;;  %v2172_v61 = vsel %vm426_vm0, %v16433_v30, 0  ;;  %v16713_v30 = vld [vmem:[%s20641_s1 + $0xe] sm:$0x3] }
  0x5b   : > { %14756 = vmatprep.mubr.msk.bf16.mxu1 %vm347_vm1, %v795_v63  ;;  %v1441_v63 = vpack.c.bf16 %v12022_v59, %v12021_v58  ;;  %v11872_v58 = vld [vmem:[%s16373_s9 + $0x304] sm:$0xff] }
  0x5c   : > { %v12033_v59 = vld [vmem:[%s16373_s9 + $0x308] sm:$0xff] }
  0x61   : > { %14703 = vmatmul.mubr.msk.bf16.gmra.mxu0 %vm347_vm1, %v16618_v15 }
  0x62   : > { %14757 = vmatmul.mubr.msk.bf16.gmra.mxu1 %vm347_vm1, %v796_v16  ;;  %14706 = vmatprep.mubr.msk.bf16.mxu0 %vm347_vm1, %v16621_v17  ;;  %v11864_v16 = vld [vmem:[%s16373_s9 + $0x2c4] sm:$0xff] }
  0x63   : > { %14760 = vmatprep.mubr.msk.bf16.mxu1 %vm347_vm1, %v797_v19  ;;  %v11823_v19 = vld [vmem:[%s16373_s9 + $0x53a] sm:$0xff]  ;;  %v699_v7 = vpack.c.bf16 %v11864_v16, %v11863_v13  ;;  %v11876_v16 = vld [vmem:[%s16373_s9 + $0x324] sm:$0xff] }
  0x64   : > { %v16658_v12 = vpack.c.bf16 %v11824_v45, %v11823_v19  ;;  %v11865_v19 = vld [vmem:[%s16373_s9 + $0x2cc] sm:$0xff]  ;;  %v11866_v45 = vld [vmem:[%s16373_s9 + $0x2d4] sm:$0xff]  ;;  %v11875_v13 = vld [vmem:[%s16373_s9 + $0x31c] sm:$0xff] }
  0x66   : > { %20753 = vst [vmem:[#allocation26_spill] sm:$0xff] %v16658_v12 }
  0x69   : > { %14707 = vmatmul.mubr.msk.bf16.gmra.mxu0 %vm347_vm1, %v16636_v32 }
  0x6a   : > { %14761 = vmatmul.mubr.msk.bf16.gmra.mxu1 %vm347_vm1, %v798_v25  ;;  %14710 = vmatprep.mubr.msk.bf16.mxu0 %vm347_vm1, %v16638_v39  ;;  %v11855_v25 = vld [vmem:[%s16373_s9 + $0x27c] sm:$0xff] }
  0x6b   : > { %14764 = vmatprep.mubr.msk.bf16.mxu1 %vm347_vm1, %v799_v34  ;;  %v16678_v34 = vpack.c.bf16 %v11826_v22, %v11825_v18  ;;  %v12027_v18 = vld [vmem:[%s16373_s9 + $0x2d8] sm:$0xff]  ;;  %v12028_v22 = vld [vmem:[%s16373_s9 + $0x2e0] sm:$0xff] }
  0x6d   : > { %20754 = vst [vmem:[#allocation27_spill] sm:$0xff] %v16678_v34 }
  0x71   : > { %14711 = vmatmul.mubr.msk.bf16.gmra.mxu0 %vm347_vm1, %v16656_v48 }
  0x72   : > { %14765 = vmatmul.mubr.msk.bf16.gmra.mxu1 %vm347_vm1, %v800_v38  ;;  %14714 = vmatprep.mubr.msk.bf16.mxu0 %vm347_vm1, %v16658_v12  ;;  %v695_v38 = vpack.c.bf16 %v11856_v28, %v11855_v25  ;;  %v11867_v25 = vld [vmem:[%s16373_s9 + $0x2dc] sm:$0xff]  ;;  %v11868_v28 = vld [vmem:[%s16373_s9 + $0x2e4] sm:$0xff] }
  0x73   : > { %14768 = vmatprep.mubr.msk.bf16.mxu1 %vm347_vm1, %v801_v41  ;;  %v12019_v41 = vld [vmem:[%s16373_s9 + $0x298] sm:$0xff]  ;;  %v701_v36 = vpack.c.bf16 %v11868_v28, %v11867_v25  ;;  %v11880_v28 = vld [vmem:[%s16373_s9 + $0x344] sm:$0xff] }
  0x74   : > { %v1440_v43 = vpack.c.bf16 %v12020_v50, %v12019_v41  ;;  %v11869_v41 = vld [vmem:[%s16373_s9 + $0x2ec] sm:$0xff]  ;;  %v11870_v50 = vld [vmem:[%s16373_s9 + $0x2f4] sm:$0xff]  ;;  %v11879_v25 = vld [vmem:[%s16373_s9 + $0x33c] sm:$0xff] }
  0x79   : > { %14715 = vmatmul.mubr.msk.bf16.gmra.mxu0 %vm347_vm1, %v16678_v34 }
  0x7a   : > { %14769 = vmatmul.mubr.msk.bf16.gmra.mxu1 %vm347_vm1, %v802_v47  ;;  %14774 = vmatprep.mubr.msk.bf16.mxu0 %vm347_vm1, %v695_v38  ;;  %v697_v47 = vpack.c.bf16 %v11860_v53, %v11859_v51  ;;  %v700_v38 = vpack.c.bf16 %v11866_v45, %v11865_v19  ;;  %v12031_v51 = vld [vmem:[%s16373_s9 + $0x2f8] sm:$0xff]  ;;  %v12032_v53 = vld [vmem:[%s16373_s9 + $0x300] sm:$0xff]  ;;  %v11877_v19 = vld [vmem:[%s16373_s9 + $0x32c] sm:$0xff] }
  0x7b   : > { %14828 = vmatprep.mubr.msk.bf16.mxu1 %vm347_vm1, %v1439_v49  ;;  %v1444_v49 = vpack.c.bf16 %v12028_v22, %v12027_v18  ;;  %v11878_v45 = vld [vmem:[%s16373_s9 + $0x334] sm:$0xff]  ;;  %v12040_v22 = vld [vmem:[%s16373_s9 + $0x340] sm:$0xff] }
  0x7c   : > { %v12039_v18 = vld [vmem:[%s16373_s9 + $0x338] sm:$0xff] }
  0x81   : > { %14775 = vmatmul.mubr.msk.bf16.vlgmr.msra.gmra.mxu0 %vm347_vm1, %v696_v57  ;;  %v11871_v57 = vld [vmem:[%s16373_s9 + $0x2fc] sm:$0xff] }
  0x82   : > { %14829 = vmatmul.mubr.msk.bf16.vlgmr.msra.gmra.mxu1 %vm347_vm1, %v1440_v43  ;;  %14881 = vmatpush3.bf16.msra.mxu0 %v1938_v44  ;;  %v12034_v43 = vld [vmem:[%s16373_s9 + $0x310] sm:$0xff]  ;;  %v702_v44 = vpack.c.bf16 %v11870_v50, %v11869_v41 }
  0x83   : > { %14935 = vmatpush3.bf16.msra.mxu1 %v2172_v61  ;;  %14778 = vmatprep.mubr.msk.bf16.mxu0 %vm347_vm1, %v697_v47  ;;  %v1446_v47 = vpack.c.bf16 %v12032_v53, %v12031_v51  ;;  %v703_v61 = vpack.c.bf16 %v11872_v58, %v11871_v57  ;;  %v11881_v41 = vld [vmem:[%s16373_s9 + $0x34c] sm:$0xff]  ;;  %v11882_v50 = vld [vmem:[%s16373_s9 + $0x354] sm:$0xff]  ;;  %v12044_v53 = vld [vmem:[%s16373_s9 + $0x360] sm:$0xff] }
  0x84   : > { %14832 = vmatprep.mubr.msk.bf16.mxu1 %vm347_vm1, %v1441_v63  ;;  %16182 = vmatprep.subr.msk.bf16.mxu0 %vm426_vm0, %v16705_v1  ;;  %v1447_v63 = vpack.c.bf16 %v12034_v43, %v12033_v59  ;;  %v12043_v51 = vld [vmem:[%s16373_s9 + $0x358] sm:$0xff]  ;;  %v11884_v58 = vld [vmem:[%s16373_s9 + $0x364] sm:$0xff]  ;;  %v12046_v43 = vld [vmem:[%s16373_s9 + $0x370] sm:$0xff] }
  0x85   : > { %16183 = vmatprep.subr.msk.bf16.mxu1 %vm426_vm0, %v16713_v30  ;;  %v11883_v57 = vld [vmem:[%s16373_s9 + $0x35c] sm:$0xff]  ;;  %v12045_v59 = vld [vmem:[%s16373_s9 + $0x368] sm:$0xff] }
  0x89   : > { %14779 = vmatmul.mubr.msk.bf16.gmra.mxu0 %vm347_vm1, %v698_v6  ;;  %v704_v6 = vpack.c.bf16 %v11874_v29, %v11873_v0  ;;  %v11885_v0 = vld [vmem:[%s16373_s9 + $0x36c] sm:$0xff]  ;;  %v11886_v29 = vld [vmem:[%s16373_s9 + $0x374] sm:$0xff] }
  0x8a   : > { %14833 = vmatmul.mubr.msk.bf16.gmra.mxu1 %vm347_vm1, %v1442_v24  ;;  %14782 = vmatprep.mubr.msk.bf16.mxu0 %vm347_vm1, %v699_v7  ;;  %v1448_v24 = vpack.c.bf16 %v12036_v10, %v12035_v5  ;;  %v705_v7 = vpack.c.bf16 %v11876_v16, %v11875_v13  ;;  %v12047_v5 = vld [vmem:[%s16373_s9 + $0x378] sm:$0xff]  ;;  %v12048_v10 = vld [vmem:[%s16373_s9 + $0x380] sm:$0xff] }
  0x8b   : > { %14836 = vmatprep.mubr.msk.bf16.mxu1 %vm347_vm1, %v1443_v11  ;;  %v1449_v11 = vpack.c.bf16 %v12038_v21, %v12037_v20  ;;  %v11887_v13 = vld [vmem:[%s16373_s9 + $0x37c] sm:$0xff]  ;;  %v11888_v16 = vld [vmem:[%s16373_s9 + $0x384] sm:$0xff]  ;;  %v12050_v21 = vld [vmem:[%s16373_s9 + $0x390] sm:$0xff] }
  0x8c   : > { %v12049_v20 = vld [vmem:[%s16373_s9 + $0x388] sm:$0xff] }
  0x91   : > { %14783 = vmatmul.mubr.msk.bf16.gmra.mxu0 %vm347_vm1, %v700_v38  ;;  %v706_v38 = vpack.c.bf16 %v11878_v45, %v11877_v19  ;;  %v11889_v19 = vld [vmem:[%s16373_s9 + $0x38c] sm:$0xff]  ;;  %v11890_v45 = vld [vmem:[%s16373_s9 + $0x394] sm:$0xff] }
  0x92   : > { %14837 = vmatmul.mubr.msk.bf16.gmra.mxu1 %vm347_vm1, %v1444_v49  ;;  %14786 = vmatprep.mubr.msk.bf16.mxu0 %vm347_vm1, %v701_v36  ;;  %v1450_v49 = vpack.c.bf16 %v12040_v22, %v12039_v18  ;;  %v707_v36 = vpack.c.bf16 %v11880_v28, %v11879_v25  ;;  %v12051_v18 = vld [vmem:[%s16373_s9 + $0x398] sm:$0xff]  ;;  %v12052_v22 = vld [vmem:[%s16373_s9 + $0x3a0] sm:$0xff] }
  0x93   : > { %14840 = vmatprep.mubr.msk.bf16.mxu1 %vm347_vm1, %v1445_v37  ;;  %v1451_v37 = vpack.c.bf16 %v12042_v33, %v12041_v31  ;;  %v11891_v25 = vld [vmem:[%s16373_s9 + $0x39c] sm:$0xff]  ;;  %v11892_v28 = vld [vmem:[%s16373_s9 + $0x3a4] sm:$0xff]  ;;  %v12054_v33 = vld [vmem:[%s16373_s9 + $0x3b0] sm:$0xff] }
  0x94   : > { %v12053_v31 = vld [vmem:[%s16373_s9 + $0x3a8] sm:$0xff] }
  0x99   : > { %14787 = vmatmul.mubr.msk.bf16.gmra.mxu0 %vm347_vm1, %v702_v44  ;;  %v708_v44 = vpack.c.bf16 %v11882_v50, %v11881_v41  ;;  %v11893_v41 = vld [vmem:[%s16373_s9 + $0x3ac] sm:$0xff]  ;;  %v16815_v50 = vld [vmem:[%s16373_s9 + $0x3b4] sm:$0xff] }
  0x9a   : > { %14841 = vmatmul.mubr.msk.bf16.gmra.mxu1 %vm347_vm1, %v1446_v47  ;;  %14790 = vmatprep.mubr.msk.bf16.mxu0 %vm347_vm1, %v703_v61  ;;  %v1452_v47 = vpack.c.bf16 %v12044_v53, %v12043_v51  ;;  %v709_v61 = vpack.c.bf16 %v11884_v58, %v11883_v57  ;;  %v12055_v51 = vld [vmem:[%s16373_s9 + $0x3b8] sm:$0xff]  ;;  %v16820_v53 = vld [vmem:[%s16373_s9 + $0x3c0] sm:$0xff] }
  0x9b   : > { %14844 = vmatprep.mubr.msk.bf16.mxu1 %vm347_vm1, %v1447_v63  ;;  %v1453_v63 = vpack.c.bf16 %v12046_v43, %v12045_v59  ;;  %v16823_v57 = vld [vmem:[%s16373_s9 + $0x3bc] sm:$0xff]  ;;  %v16826_v58 = vld [vmem:[%s16373_s9 + $0x3c4] sm:$0xff]  ;;  %v16832_v43 = vld [vmem:[%s16373_s9 + $0x3d0] sm:$0xff] }
  0x9c   : > { %v16829_v59 = vld [vmem:[%s16373_s9 + $0x3c8] sm:$0xff] }
  0xa1   : > { %14791 = vmatmul.mubr.msk.bf16.gmra.mxu0 %vm347_vm1, %v704_v6  ;;  %v710_v6 = vpack.c.bf16 %v11886_v29, %v11885_v0  ;;  %v16844_v0 = vld [vmem:[%s16373_s9 + $0x3cc] sm:$0xff]  ;;  %v16847_v29 = vld [vmem:[%s16373_s9 + $0x3d4] sm:$0xff] }
  0xa2   : > { %14845 = vmatmul.mubr.msk.bf16.gmra.mxu1 %vm347_vm1, %v1448_v24  ;;  %14794 = vmatprep.mubr.msk.bf16.mxu0 %vm347_vm1, %v705_v7  ;;  %v1454_v24 = vpack.c.bf16 %v12048_v10, %v12047_v5  ;;  %v711_v7 = vpack.c.bf16 %v11888_v16, %v11887_v13  ;;  %v16850_v5 = vld [vmem:[%s16373_s9 + $0x3d8] sm:$0xff]  ;;  %v16854_v10 = vld [vmem:[%s16373_s9 + $0x3e0] sm:$0xff] }
  0xa3   : > { %14848 = vmatprep.mubr.msk.bf16.mxu1 %vm347_vm1, %v1449_v11  ;;  %v1455_v11 = vpack.c.bf16 %v12050_v21, %v12049_v20  ;;  %v16857_v13 = vld [vmem:[%s16373_s9 + $0x3dc] sm:$0xff]  ;;  %v16860_v16 = vld [vmem:[%s16373_s9 + $0x3e4] sm:$0xff]  ;;  %v16866_v21 = vld [vmem:[%s16373_s9 + $0x3f0] sm:$0xff] }
  0xa4   : > { %v16863_v20 = vld [vmem:[%s16373_s9 + $0x3e8] sm:$0xff] }
  0xa9   : > { %14795 = vmatmul.mubr.msk.bf16.gmra.mxu0 %vm347_vm1, %v706_v38  ;;  %v712_v38 = vpack.c.bf16 %v11890_v45, %v11889_v19  ;;  %v16880_v19 = vld [vmem:[%s16373_s9 + $0x3ec] sm:$0xff]  ;;  %v16883_v45 = vld [vmem:[%s16373_s9 + $0x3f4] sm:$0xff] }
  0xaa   : > { %14849 = vmatmul.mubr.msk.bf16.gmra.mxu1 %vm347_vm1, %v1450_v49  ;;  %14798 = vmatprep.mubr.msk.bf16.mxu0 %vm347_vm1, %v707_v36  ;;  %v1456_v49 = vpack.c.bf16 %v12052_v22, %v12051_v18  ;;  %v713_v36 = vpack.c.bf16 %v11892_v28, %v11891_v25  ;;  %v16886_v18 = vld [vmem:[%s16373_s9 + $0x3f8] sm:$0xff]  ;;  %v16890_v22 = vld [vmem:[%s16373_s9 + $0x400] sm:$0xff] }
  0xab   : > { %14852 = vmatprep.mubr.msk.bf16.mxu1 %vm347_vm1, %v1451_v37  ;;  %v1457_v37 = vpack.c.bf16 %v12054_v33, %v12053_v31  ;;  %v16893_v25 = vld [vmem:[%s16373_s9 + $0x3fc] sm:$0xff]  ;;  %v16896_v28 = vld [vmem:[%s16373_s9 + $0x404] sm:$0xff]  ;;  %v16902_v33 = vld [vmem:[%s16373_s9 + $0x410] sm:$0xff] }
  0xac   : > { %v16899_v31 = vld [vmem:[%s16373_s9 + $0x408] sm:$0xff] }
  0xb1   : > { %14799 = vmatmul.mubr.msk.bf16.gmra.mxu0 %vm347_vm1, %v708_v44  ;;  %v714_v44 = vpack.c.bf16 %v16815_v50, %v11893_v41 }
  0xb2   : > { %14853 = vmatmul.mubr.msk.bf16.gmra.mxu1 %vm347_vm1, %v1452_v47  ;;  %14802 = vmatprep.mubr.msk.bf16.mxu0 %vm347_vm1, %v709_v61  ;;  %v1458_v47 = vpack.c.bf16 %v16820_v53, %v12055_v51  ;;  %v715_v61 = vpack.c.bf16 %v16826_v58, %v16823_v57 }
  0xb3   : > { %14856 = vmatprep.mubr.msk.bf16.mxu1 %vm347_vm1, %v1453_v63  ;;  %v1459_v63 = vpack.c.bf16 %v16832_v43, %v16829_v59 }
  0xb9   : > { %14803 = vmatmul.mubr.msk.bf16.gmra.mxu0 %vm347_vm1, %v710_v6  ;;  %v716_v6 = vpack.c.bf16 %v16847_v29, %v16844_v0 }
  0xba   : > { %14857 = vmatmul.mubr.msk.bf16.gmra.mxu1 %vm347_vm1, %v1454_v24  ;;  %14806 = vmatprep.mubr.msk.bf16.mxu0 %vm347_vm1, %v711_v7  ;;  %v1460_v24 = vpack.c.bf16 %v16854_v10, %v16850_v5  ;;  %v717_v7 = vpack.c.bf16 %v16860_v16, %v16857_v13 }
  0xbb   : > { %14860 = vmatprep.mubr.msk.bf16.mxu1 %vm347_vm1, %v1455_v11  ;;  %v1461_v11 = vpack.c.bf16 %v16866_v21, %v16863_v20 }
  0xc1   : > { %14807 = vmatmul.mubr.msk.bf16.gmra.mxu0 %vm347_vm1, %v712_v38  ;;  %v718_v38 = vpack.c.bf16 %v16883_v45, %v16880_v19 }
  0xc2   : > { %14861 = vmatmul.mubr.msk.bf16.gmra.mxu1 %vm347_vm1, %v1456_v49  ;;  %14810 = vmatprep.mubr.msk.bf16.mxu0 %vm347_vm1, %v713_v36  ;;  %v1462_v49 = vpack.c.bf16 %v16890_v22, %v16886_v18  ;;  %v719_v36 = vpack.c.bf16 %v16896_v28, %v16893_v25 }
  0xc3   : > { %14864 = vmatprep.mubr.msk.bf16.mxu1 %vm347_vm1, %v1457_v37  ;;  %v1463_v37 = vpack.c.bf16 %v16902_v33, %v16899_v31 }
  0xc9   : > { %14811 = vmatmul.mubr.msk.bf16.gmra.mxu0 %vm347_vm1, %v714_v44  ;;  %v16916_v44 = vld [vmem:[%s16373_s9 + $0x40c] sm:$0xff] }
  0xca   : > { %14865 = vmatmul.mubr.msk.bf16.gmra.mxu1 %vm347_vm1, %v1458_v47  ;;  %14814 = vmatprep.mubr.msk.bf16.mxu0 %vm347_vm1, %v715_v61  ;;  %v16919_v47 = vld [vmem:[%s16373_s9 + $0x414] sm:$0xff] }
  0xcb   : > { %14868 = vmatprep.mubr.msk.bf16.mxu1 %vm347_vm1, %v1459_v63  ;;  %v16925_v63 = vld [vmem:[%s16373_s9 + $0x418] sm:$0xff] }
  0xd1   : > { %14815 = vmatmul.mubr.msk.bf16.gmra.mxu0 %vm347_vm1, %v716_v6  ;;  %v16928_v6 = vld [vmem:[%s16373_s9 + $0x420] sm:$0xff] }
  0xd2   : > { %14869 = vmatmul.mubr.msk.bf16.gmra.mxu1 %vm347_vm1, %v1460_v24  ;;  %14818 = vmatprep.mubr.msk.bf16.mxu0 %vm347_vm1, %v717_v7 }
  0xd3   : > { %14872 = vmatprep.mubr.msk.bf16.mxu1 %vm347_vm1, %v1461_v11  ;;  %v720_v11 = vpack.c.bf16 %v16919_v47, %v16916_v44 }
  0xd9   : > { %v14668_v41 = vpop.f32.mrf.mxu0  ;;  %14819 = vmatmul.mubr.msk.bf16.gmra.mxu0 %vm347_vm1, %v718_v38 }
  0xda   : > { %v14722_v51 = vpop.f32.mrf.mxu1  ;;  %14873 = vmatmul.mubr.msk.bf16.gmra.mxu1 %vm347_vm1, %v1462_v49  ;;  %14822 = vmatprep.mubr.msk.bf16.mxu0 %vm347_vm1, %v719_v36  ;;  %v1464_v49 = vpack.c.bf16 %v16928_v6, %v16925_v63  ;;  %v1831_v36 = vpack.c.bf16 %v16823_v57, %v16815_v50  ;;  %v1832_v57 = vpack.c.bf16 %v16844_v0, %v16826_v58  ;;  %v16967_v58 = vld [vmem:[%s20641_s1 + $0x10] sm:$0x3] }
  0xdb   : > { %v16921_v61 = vpop.f32.mrf.mxu0  ;;  %14876 = vmatprep.mubr.msk.bf16.mxu1 %vm347_vm1, %v1463_v37 }
  0xdc   : > { %20755 = vst [vmem:[#allocation28_spill] sm:$0xff] %v16921_v61  ;;  %v16930_v24 = vpop.f32.mrf.mxu1 }
  0xdd   : > { %v14669_v7 = vpop.f32.mrf.mxu0 }
  0xde   : > { %v14723_v38 = vpop.f32.mrf.mxu1 }
  0xdf   : > { %v16938_v41 = vpop.f32.mrf.mxu0 }
  0xe0   : > { %20756 = vst [vmem:[#allocation29_spill] sm:$0xff] %v16938_v41  ;;  %v16940_v37 = vpop.f32.mrf.mxu1 }
  0xe1   : > { %v16942_v51 = vpop.f32.mrf.mxu0  ;;  %14823 = vmatmul.mubr.msk.bf16.gmra.mxu0 %vm347_vm1, %v720_v11  ;;  %v2564_v11 = vsel %vm426_vm0, %v16705_v1, 0  ;;  %v16974_v1 = vld [vmem:[%s20641_s1 + $0x12] sm:$0x3] }
  0xe2   : > { %20757 = vst [vmem:[#allocation30_spill] sm:$0xff] %v16942_v51  ;;  %v16945_v61 = vpop.f32.mrf.mxu1  ;;  %14877 = vmatmul.mubr.msk.bf16.gmra.mxu1 %vm347_vm1, %v1464_v49  ;;  %14882 = vmatprep.mubr.msk.bf16.mxu0 %vm347_vm1, %v1831_v36  ;;  %v1833_v49 = vpack.c.bf16 %v16857_v13, %v16847_v29  ;;  %v1834_v13 = vpack.c.bf16 %v16880_v19, %v16860_v16  ;;  %v12111_v19 = vld [vmem:[%s16373_s9 + $0x41c] sm:$0xff] }
  0xe3   : > { %v478_v7 = vpop.f32.mrf.mxu0  ;;  %14936 = vmatprep.mubr.msk.bf16.mxu1 %vm347_vm1, %v16384_v9 }
  0xe4   : > { %v934_v38 = vpop.f32.mrf.mxu1  ;;  %v2958_v7 = vsel %vm426_vm0, %v16713_v30, 0 }
  0xe5   : > { %v16951_v50 = vpop.f32.mrf.mxu0  ;;  %v1835_v38 = vpack.c.bf16 %v16893_v25, %v16883_v45 }
  0xe6   : > { %20758 = vst [vmem:[#allocation31_spill] sm:$0xff] %v16951_v50  ;;  %v16955_v41 = vpop.f32.mrf.mxu1 }
  0xe7   : > { %v480_v51 = vpop.f32.mrf.mxu0 }
  0xe8   : > { %v936_v36 = vpop.f32.mrf.mxu1 }
  0xe9   : > { %v14676_v9 = vpop.f32.mrf.mxu0  ;;  %14883 = vmatmul.mubr.msk.bf16.vlgmr.msra.gmra.mxu0 %vm347_vm1, %v1832_v57 }
  0xea   : > { %v14730_v0 = vpop.f32.mrf.mxu1  ;;  %14937 = vmatmul.mubr.msk.bf16.vlgmr.msra.gmra.mxu1 %vm347_vm1, %v16395_v14  ;;  %14989 = vmatpush3.bf16.msra.mxu0 %v2564_v11  ;;  %v17948_v14 = vld [vmem:[%s16373_s9 + $0x23e] sm:$0xff] }
  0xeb   : > { %v16976_v29 = vpop.f32.mrf.mxu0  ;;  %15043 = vmatpush3.bf16.msra.mxu1 %v2958_v7  ;;  %14886 = vmatprep.mubr.msk.bf16.mxu0 %vm347_vm1, %v1833_v49  ;;  %v1836_v7 = vpack.c.bf16 %v16916_v44, %v16896_v28  ;;  %v12114_v28 = vld [vmem:[%s16373_s9 + $0x434] sm:$0xff]  ;;  %v12115_v44 = vld [vmem:[%s16373_s9 + $0x43c] sm:$0xff] }
  0xec   : > { %20759 = vst [vmem:[#allocation32_spill] sm:$0xff] %v16976_v29  ;;  %v16979_v9 = vpop.f32.mrf.mxu1  ;;  %14940 = vmatprep.mubr.msk.bf16.mxu1 %vm347_vm1, %v16420_v26  ;;  %16184 = vmatprep.subr.msk.bf16.mxu0 %vm426_vm0, %v16967_v58 }
  0xed   : > { %v14677_v30 = vpop.f32.mrf.mxu0  ;;  %16185 = vmatprep.subr.msk.bf16.mxu1 %vm426_vm0, %v16974_v1 }
  0xee   : > { %v14731_v51 = vpop.f32.mrf.mxu1  ;;  %v1837_v30 = vpack.c.bf16 %v12111_v19, %v16919_v47 }
  0xef   : > { %v495_v57 = vpop.f32.mrf.mxu0 }
  0xf0   : > { %v951_v11 = vpop.f32.mrf.mxu1 }
  0xf1   : > { %v16991_v49 = vpop.f32.mrf.mxu0  ;;  %14887 = vmatmul.mubr.msk.bf16.gmra.mxu0 %vm347_vm1, %v1834_v13  ;;  %v12112_v11 = vld [vmem:[%s16373_s9 + $0x424] sm:$0xff] }
  0xf2   : > { %20760 = vst [vmem:[#allocation33_spill] sm:$0xff] %v16991_v49  ;;  %v16994_v36 = vpop.f32.mrf.mxu1  ;;  %14941 = vmatmul.mubr.msk.bf16.gmra.mxu1 %vm347_vm1, %v16465_v42  ;;  %14890 = vmatprep.mubr.msk.bf16.mxu0 %vm347_vm1, %v1835_v38 }
  0xf3   : > { %v505_v16 = vpop.f32.mrf.mxu0  ;;  %14944 = vmatprep.mubr.msk.bf16.mxu1 %vm347_vm1, %v16477_v46 }
  0xf4   : > { %v961_v45 = vpop.f32.mrf.mxu1  ;;  %v12113_v16 = vld [vmem:[%s16373_s9 + $0x42c] sm:$0xff] }
  0xf5   : > { %v14681_v25 = vpop.f32.mrf.mxu0 }
  0xf6   : > { %v14735_v0 = vpop.f32.mrf.mxu1  ;;  %v1838_v25 = vpack.c.bf16 %v12113_v16, %v12112_v11  ;;  %v12118_v11 = vld [vmem:[%s16373_s9 + $0x454] sm:$0xff]  ;;  %v12119_v16 = vld [vmem:[%s16373_s9 + $0x45c] sm:$0xff] }
  0xf7   : > { %v17005_v13 = vpop.f32.mrf.mxu0  ;;  %v1839_v0 = vpack.c.bf16 %v12115_v44, %v12114_v28 }
  0xf8   : > { %20761 = vst [vmem:[#allocation34_spill] sm:$0xff] %v17005_v13  ;;  %v17007_v51 = vpop.f32.mrf.mxu1  ;;  %v12117_v13 = vld [vmem:[%s16373_s9 + $0x44c] sm:$0xff] }
  0xf9   : > { %v14684_v38 = vpop.f32.mrf.mxu0  ;;  %14891 = vmatmul.mubr.msk.bf16.gmra.mxu0 %vm347_vm1, %v1836_v7 }
  0xfa   : > { %v14738_v57 = vpop.f32.mrf.mxu1  ;;  %14945 = vmatmul.mubr.msk.bf16.gmra.mxu1 %vm347_vm1, %v16494_v54  ;;  %14894 = vmatprep.mubr.msk.bf16.mxu0 %vm347_vm1, %v1837_v30 }
  0xfb   : > { %v519_v45 = vpop.f32.mrf.mxu0  ;;  %14948 = vmatprep.mubr.msk.bf16.mxu1 %vm347_vm1, %v16497_v56 }
  0xfc   : > { %v975_v47 = vpop.f32.mrf.mxu1 }
  0xfd   : > { %v17019_v19 = vpop.f32.mrf.mxu0  ;;  %v12116_v47 = vld [vmem:[%s16373_s9 + $0x444] sm:$0xff] }
  0xfe   : > { %20762 = vst [vmem:[#allocation35_spill] sm:$0xff] %v17019_v19  ;;  %v17021_v7 = vpop.f32.mrf.mxu1  ;;  %v12121_v19 = vld [vmem:[%s16373_s9 + $0x46c] sm:$0xff] }
  0xff   : > { %v521_v30 = vpop.f32.mrf.mxu0 }
 0x100   : > { %v977_v38 = vpop.f32.mrf.mxu1 }
 0x101   : > { %v14688_v57 = vpop.f32.mrf.mxu0  ;;  %14895 = vmatmul.mubr.msk.bf16.gmra.mxu0 %vm347_vm1, %v1838_v25  ;;  %v1840_v25 = vpack.c.bf16 %v12117_v13, %v12116_v47  ;;  %v1841_v38 = vpack.c.bf16 %v12119_v16, %v12118_v11  ;;  %v12122_v47 = vld [vmem:[%s16373_s9 + $0x474] sm:$0xff]  ;;  %v12123_v11 = vld [vmem:[%s16373_s9 + $0x47c] sm:$0xff] }
 0x102   : > { %v14742_v45 = vpop.f32.mrf.mxu1  ;;  %14949 = vmatmul.mubr.msk.bf16.gmra.mxu1 %vm347_vm1, %v16513_v2  ;;  %14898 = vmatprep.mubr.msk.bf16.mxu0 %vm347_vm1, %v1839_v0  ;;  %v1843_v50 = vpack.c.bf16 %v12123_v11, %v12122_v47 }
 0x103   : > { %v17029_v49 = vpop.f32.mrf.mxu0  ;;  %14952 = vmatprep.mubr.msk.bf16.mxu1 %vm347_vm1, %v16515_v4 }
 0x104   : > { %20763 = vst [vmem:[#allocation36_spill] sm:$0xff] %v17029_v49  ;;  %v17035_v28 = vpop.f32.mrf.mxu1 }
 0x105   : > { %v14689_v44 = vpop.f32.mrf.mxu0 }
 0x106   : > { %v14743_v30 = vpop.f32.mrf.mxu1  ;;  %v12120_v44 = vld [vmem:[%s16373_s9 + $0x464] sm:$0xff] }
 0x107   : > { %v17037_v0 = vpop.f32.mrf.mxu0  ;;  %v1842_v30 = vpack.c.bf16 %v12121_v19, %v12120_v44  ;;  %v12126_v19 = vld [vmem:[%s16373_s9 + $0x494] sm:$0xff]  ;;  %v12127_v44 = vld [vmem:[%s16373_s9 + $0x49c] sm:$0xff] }
 0x108   : > { %20764 = vst [vmem:[#allocation37_spill] sm:$0xff] %v17037_v0  ;;  %v17039_v57 = vpop.f32.mrf.mxu1 }
 0x109   : > { %v17041_v45 = vpop.f32.mrf.mxu0  ;;  %14899 = vmatmul.mubr.msk.bf16.gmra.mxu0 %vm347_vm1, %v1840_v25 }
 0x10a   : > { %20765 = vst [vmem:[#allocation38_spill] sm:$0xff] %v17041_v45  ;;  %v17044_v49 = vpop.f32.mrf.mxu1  ;;  %14953 = vmatmul.mubr.msk.bf16.gmra.mxu1 %vm347_vm1, %v16531_v23  ;;  %14902 = vmatprep.mubr.msk.bf16.mxu0 %vm347_vm1, %v1841_v38 }
 0x10b   : > { %v546_v13 = vpop.f32.mrf.mxu0  ;;  %14956 = vmatprep.mubr.msk.bf16.mxu1 %vm347_vm1, %v16533_v27  ;;  %v12125_v27 = vld [vmem:[%s16373_s9 + $0x48c] sm:$0xff] }
 0x10c   : > { %v1002_v16 = vpop.f32.mrf.mxu1 }
 0x10d   : > { %v17055_v25 = vpop.f32.mrf.mxu0  ;;  %v12124_v16 = vld [vmem:[%s16373_s9 + $0x484] sm:$0xff] }
 0x10e   : > { %20766 = vst [vmem:[#allocation39_spill] sm:$0xff] %v17055_v25  ;;  %v17057_v29 = vpop.f32.mrf.mxu1  ;;  %v1844_v47 = vpack.c.bf16 %v12125_v27, %v12124_v16  ;;  %v12129_v25 = vld [vmem:[%s16373_s9 + $0x4ac] sm:$0xff]  ;;  %v12130_v27 = vld [vmem:[%s16373_s9 + $0x4b4] sm:$0xff]  ;;  %v12131_v16 = vld [vmem:[%s16373_s9 + $0x4bc] sm:$0xff] }
 0x10f   : > { %v548_v38 = vpop.f32.mrf.mxu0 }
 0x110   : > { %v1004_v45 = vpop.f32.mrf.mxu1 }
 0x111   : > { %v14696_v0 = vpop.f32.mrf.mxu0  ;;  %14903 = vmatmul.mubr.msk.bf16.gmra.mxu0 %vm347_vm1, %v1842_v30  ;;  %v1845_v30 = vpack.c.bf16 %v12127_v44, %v12126_v19 }
 0x112   : > { %v14750_v13 = vpop.f32.mrf.mxu1  ;;  %14957 = vmatmul.mubr.msk.bf16.gmra.mxu1 %vm347_vm1, %v16549_v52  ;;  %14906 = vmatprep.mubr.msk.bf16.mxu0 %vm347_vm1, %v1843_v50 }
 0x113   : > { %v560_v23 = vpop.f32.mrf.mxu0  ;;  %14960 = vmatprep.mubr.msk.bf16.mxu1 %vm347_vm1, %v16551_v55 }
 0x114   : > { %v1016_v45 = vpop.f32.mrf.mxu1 }
 0x115   : > { %v14697_v0 = vpop.f32.mrf.mxu0  ;;  %v12128_v45 = vld [vmem:[%s16373_s9 + $0x4a4] sm:$0xff] }
 0x116   : > { %v14751_v11 = vpop.f32.mrf.mxu1 }
 0x117   : > { %v562_v38 = vpop.f32.mrf.mxu0 }
 0x118   : > { %v1018_v13 = vpop.f32.mrf.mxu1  ;;  %v1847_v38 = vpack.c.bf16 %v12131_v16, %v12130_v27 }
 0x119   : > { %v17069_v50 = vpop.f32.mrf.mxu0  ;;  %14907 = vmatmul.mubr.msk.bf16.gmra.mxu0 %vm347_vm1, %v1844_v47  ;;  %v1846_v47 = vpack.c.bf16 %v12129_v25, %v12128_v45  ;;  %v12134_v25 = vld [vmem:[%s16373_s9 + $0x4d4] sm:$0xff]  ;;  %v12135_v45 = vld [vmem:[%s16373_s9 + $0x4dc] sm:$0xff] }
 0x11a   : > { %20767 = vst [vmem:[#allocation40_spill] sm:$0xff] %v17069_v50  ;;  %v17072_v23 = vpop.f32.mrf.mxu1  ;;  %14961 = vmatmul.mubr.msk.bf16.gmra.mxu1 %vm347_vm1, %v16567_v3  ;;  %14910 = vmatprep.mubr.msk.bf16.mxu0 %vm347_vm1, %v1845_v30  ;;  %v12133_v3 = vld [vmem:[%s16373_s9 + $0x4cc] sm:$0xff] }
 0x11b   : > { %v17079_v0 = vpop.f32.mrf.mxu0  ;;  %14964 = vmatprep.mubr.msk.bf16.mxu1 %vm347_vm1, %v16569_v8  ;;  %v12132_v8 = vld [vmem:[%s16373_s9 + $0x4c4] sm:$0xff] }
 0x11c   : > { %20768 = vst [vmem:[#allocation41_spill] sm:$0xff] %v17079_v0  ;;  %v17085_v19 = vpop.f32.mrf.mxu1 }
 0x11d   : > { %v14701_v44 = vpop.f32.mrf.mxu0 }
 0x11e   : > { %v14755_v11 = vpop.f32.mrf.mxu1 }
 0x11f   : > { %v17087_v30 = vpop.f32.mrf.mxu0 }
 0x120   : > { %20769 = vst [vmem:[#allocation42_spill] sm:$0xff] %v17087_v30  ;;  %v17089_v13 = vpop.f32.mrf.mxu1 }
 0x121   : > { %v14704_v0 = vpop.f32.mrf.mxu0  ;;  %14911 = vmatmul.mubr.msk.bf16.gmra.mxu0 %vm347_vm1, %v1846_v47  ;;  %v1849_v47 = vpack.c.bf16 %v12135_v45, %v12134_v25 }
 0x122   : > { %v14758_v50 = vpop.f32.mrf.mxu1  ;;  %14965 = vmatmul.mubr.msk.bf16.gmra.mxu1 %vm347_vm1, %v16585_v35  ;;  %14914 = vmatprep.mubr.msk.bf16.mxu0 %vm347_vm1, %v1847_v38  ;;  %v17170_v35 = vld [vmem:[%s16373_s9 + $0x52c] sm:$0xff] }
 0x123   : > { %v587_v44 = vpop.f32.mrf.mxu0  ;;  %14968 = vmatprep.mubr.msk.bf16.mxu1 %vm347_vm1, %v16587_v40  ;;  %v1848_v50 = vpack.c.bf16 %v12133_v3, %v12132_v8  ;;  %v17111_v40 = vld [vmem:[%s16373_s9 + $0x4ec] sm:$0xff]  ;;  %v17118_v3 = vld [vmem:[%s16373_s9 + $0x4f4] sm:$0xff]  ;;  %v17121_v8 = vld [vmem:[%s16373_s9 + $0x4fc] sm:$0xff] }
 0x124   : > { %v1043_v27 = vpop.f32.mrf.mxu1  ;;  %v2851_v54 = vpack.c.bf16 %v17118_v3, %v17111_v40 }
 0x125   : > { %v17101_v0 = vpop.f32.mrf.mxu0  ;;  %v12136_v27 = vld [vmem:[%s16373_s9 + $0x4e4] sm:$0xff] }
 0x126   : > { %20770 = vst [vmem:[#allocation43_spill] sm:$0xff] %v17101_v0  ;;  %v17103_v16 = vpop.f32.mrf.mxu1  ;;  %v1850_v45 = vpack.c.bf16 %v17111_v40, %v12136_v27  ;;  %v17140_v27 = vld [vmem:[%s16373_s9 + $0x50c] sm:$0xff] }
 0x127   : > { %v589_v11 = vpop.f32.mrf.mxu0 }
 0x128   : > { %v1045_v38 = vpop.f32.mrf.mxu1 }
 0x129   : > { %v14708_v30 = vpop.f32.mrf.mxu0  ;;  %14915 = vmatmul.mubr.msk.bf16.gmra.mxu0 %vm347_vm1, %v1848_v50 }
 0x12a   : > { %v14762_v44 = vpop.f32.mrf.mxu1  ;;  %14969 = vmatmul.mubr.msk.bf16.gmra.mxu1 %vm347_vm1, %v16603_v60  ;;  %14918 = vmatprep.mubr.msk.bf16.mxu0 %vm347_vm1, %v1849_v47  ;;  %v1851_v47 = vpack.c.bf16 %v17121_v8, %v17118_v3  ;;  %v3350_v3 = vsel %vm426_vm0, %v16967_v58, 0 }
 0x12b   : > { %v17113_v0 = vpop.f32.mrf.mxu0  ;;  %14972 = vmatprep.mubr.msk.bf16.mxu1 %vm347_vm1, %v16605_v62 }
 0x12c   : > { %20771 = vst [vmem:[#allocation44_spill] sm:$0xff] %v17113_v0  ;;  %v17123_v30 = vpop.f32.mrf.mxu1 }
 0x12d   : > { %v14709_v25 = vpop.f32.mrf.mxu0 }
 0x12e   : > { %v14763_v50 = vpop.f32.mrf.mxu1  ;;  %v17137_v25 = vld [vmem:[%s16373_s9 + $0x504] sm:$0xff] }
 0x12f   : > { %v603_v11 = vpop.f32.mrf.mxu0 }
 0x130   : > { %v1059_v38 = vpop.f32.mrf.mxu1  ;;  %v17145_v11 = vld [vmem:[%s16373_s9 + $0x514] sm:$0xff] }
 0x131   : > { %v17128_v44 = vpop.f32.mrf.mxu0  ;;  %14919 = vmatmul.mubr.msk.bf16.gmra.mxu0 %vm347_vm1, %v1850_v45  ;;  %v17148_v45 = vld [vmem:[%s16373_s9 + $0x51c] sm:$0xff] }
 0x132   : > { %20772 = vst [vmem:[#allocation45_spill] sm:$0xff] %v17128_v44  ;;  %v17131_v0 = vpop.f32.mrf.mxu1  ;;  %14973 = vmatmul.mubr.msk.bf16.gmra.mxu1 %vm347_vm1, %v16618_v15  ;;  %14922 = vmatprep.mubr.msk.bf16.mxu0 %vm347_vm1, %v1851_v47  ;;  %v1852_v47 = vpack.c.bf16 %v17140_v27, %v17137_v25 }
 0x133   : > { %v613_v50 = vpop.f32.mrf.mxu0  ;;  %14976 = vmatprep.mubr.msk.bf16.mxu1 %vm347_vm1, %v16621_v17 }
 0x134   : > { %v1069_v38 = vpop.f32.mrf.mxu1  ;;  %v1853_v50 = vpack.c.bf16 %v17148_v45, %v17145_v11 }
 0x135   : > { %v17150_v44 = vpop.f32.mrf.mxu0 }
 0x136   : > { %20773 = vst [vmem:[#allocation46_spill] sm:$0xff] %v17150_v44  ;;  %v17154_v15 = vpop.f32.mrf.mxu1  ;;  %v17167_v44 = vld [vmem:[%s16373_s9 + $0x524] sm:$0xff] }
 0x137   : > { %v17158_v62 = vpop.f32.mrf.mxu0 }
 0x138   : > { %20774 = vst [vmem:[#allocation47_spill] sm:$0xff] %v17158_v62  ;;  %v17160_v17 = vpop.f32.mrf.mxu1  ;;  %v17175_v62 = vld [vmem:[%s16373_s9 + $0x534] sm:$0xff] }
 0x139   : > { %v14716_v60 = vpop.f32.mrf.mxu0  ;;  %14923 = vmatmul.mubr.msk.bf16.gmra.mxu0 %vm347_vm1, %v1852_v47 }
 0x13a   : > { %v14770_v38 = vpop.f32.mrf.mxu1  ;;  %14977 = vmatmul.mubr.msk.bf16.gmra.mxu1 %vm347_vm1, %v16636_v32  ;;  %14926 = vmatprep.mubr.msk.bf16.mxu0 %vm347_vm1, %v1853_v50  ;;  %v17178_v60 = vld [vmem:[%s16373_s9 + $0x53c] sm:$0xff]  ;;  %v1854_v32 = vpack.c.bf16 %v17170_v35, %v17167_v44 }
 0x13b   : > { %v628_v55 = vpop.f32.mrf.mxu0  ;;  %14980 = vmatprep.mubr.msk.bf16.mxu1 %vm347_vm1, %v16638_v39  ;;  %v1855_v52 = vpack.c.bf16 %v17178_v60, %v17175_v62 }
 0x13c   : > { %v1084_v47 = vpop.f32.mrf.mxu1 }
 0x13d   : > { %v14717_v38 = vpop.f32.mrf.mxu0  ;;  %v17189_v47 = vld [vmem:[%s16373_s9 + $0x544] sm:$0xff] }
 0x13e   : > { %v14771_v50 = vpop.f32.mrf.mxu1  ;;  %v17192_v38 = vld [vmem:[%s16373_s9 + $0x54c] sm:$0xff] }
 0x13f   : > { %v630_v4 = vpop.f32.mrf.mxu0 }
 0x140   : > { %v1086_v55 = vpop.f32.mrf.mxu1 }
 0x141   : > { %v14776_v2 = vpop.f32.mrf.mxu0  ;;  %14927 = vmatmul.mubr.msk.bf16.gmra.mxu0 %vm347_vm1, %v1854_v32  ;;  %v1856_v32 = vpack.c.bf16 %v17192_v38, %v17189_v47 }
 0x142   : > { %v14830_v39 = vpop.f32.mrf.mxu1  ;;  %14981 = vmatmul.mubr.msk.bf16.gmra.mxu1 %vm347_vm1, %v16656_v48  ;;  %14930 = vmatprep.mubr.msk.bf16.mxu0 %vm347_vm1, %v1855_v52  ;;  %v2457_v52 = vpack.c.bf16 %v16829_v59, %v16820_v53 }
 0x143   : > { %v1210_v56 = vpop.f32.mrf.mxu0  ;;  %14984 = vmatprep.mubr.msk.bf16.mxu1 %vm347_vm1, %v16658_v12 }
 0x144   : > { %v1211_v4 = vadd.f32 %v1210_v56, %v16930_v24  ;;  %v1582_v50 = vpop.f32.mrf.mxu1 }
 0x145   : > { %v14777_v2 = vpop.f32.mrf.mxu0 }
 0x146   : > { %v17199_v39 = vadd.f32 %v1582_v50, %v1211_v4  ;;  %v14831_v55 = vpop.f32.mrf.mxu1 }
 0x147   : > { %v1213_v48 = vpop.f32.mrf.mxu0 }
 0x148   : > { %v1214_v46 = vadd.f32 %v1213_v48, %v16940_v37  ;;  %v1585_v12 = vpop.f32.mrf.mxu1  ;;  %v2458_v37 = vpack.c.bf16 %v16850_v5, %v16832_v43  ;;  %v2853_v43 = vpack.c.bf16 %v17145_v11, %v17140_v27  ;;  %v2460_v27 = vpack.c.bf16 %v16886_v18, %v16866_v21 }
 0x149   : > { %v14780_v42 = vpop.f32.mrf.mxu0  ;;  %14931 = vmatmul.mubr.msk.bf16.gmra.mxu0 %vm347_vm1, %v1856_v32  ;;  %v3742_v32 = vsel %vm426_vm0, %v16974_v1, 0 }
 0x14a   : > { %v17207_v56 = vadd.f32 %v1585_v12, %v1214_v46  ;;  %v1231_v24 = vadd.f32 %v14780_v42, %v16945_v61  ;;  %v14834_v4 = vpop.f32.mrf.mxu1  ;;  %14985 = vmatmul.mubr.msk.bf16.gmra.mxu1 %vm347_vm1, %v16678_v34  ;;  %14990 = vmatprep.mubr.msk.bf16.mxu0 %vm347_vm1, %v2457_v52  ;;  %v2852_v42 = vpack.c.bf16 %v17137_v25, %v17121_v8 }
 0x14b   : > { %v1224_v53 = vpop.f32.mrf.mxu0  ;;  %15044 = vmatprep.mubr.msk.bf16.mxu1 %vm347_vm1, %v2851_v54  ;;  %v2459_v54 = vpack.c.bf16 %v16863_v20, %v16854_v10  ;;  %v17241_v10 = vld [vmem:[%s20641_s1 + $0x14] sm:$0x3]  ;;  %v2461_v52 = vpack.c.bf16 %v16899_v31, %v16890_v22 }
 0x14c   : > { %v17214_v40 = vadd.f32 %v14834_v4, %v1231_v24  ;;  %v1596_v48 = vpop.f32.mrf.mxu1  ;;  %v2855_v4 = vpack.c.bf16 %v17175_v62, %v17170_v35  ;;  %v2462_v62 = vpack.c.bf16 %v16925_v63, %v16902_v33 }
 0x14d   : > { %v14781_v59 = vpop.f32.mrf.mxu0 }
 0x14e   : > { %v1234_v46 = vadd.f32 %v14781_v59, %v16955_v41  ;;  %v14835_v12 = vpop.f32.mrf.mxu1  ;;  %v17235_v41 = vld [vmem:[%s20641_s1 + $0x16] sm:$0x3] }
 0x14f   : > { %v1226_v61 = vpop.f32.mrf.mxu0  ;;  %v12300_v59 = vld [vmem:[%s16373_s9 + $0x554] sm:$0xff] }
 0x150   : > { %v17225_v50 = vadd.f32 %v14835_v12, %v1234_v46  ;;  %v1598_v2 = vpop.f32.mrf.mxu1 }
 0x151   : > { %v14784_v5 = vpop.f32.mrf.mxu0  ;;  %14991 = vmatmul.mubr.msk.bf16.vlgmr.msra.gmra.mxu0 %vm347_vm1, %v2458_v37  ;;  %v2856_v37 = vpack.c.bf16 %v17189_v47, %v17178_v60  ;;  %v12221_v60 = vld [vmem:[%s16373_s9 + $0x438] sm:$0xff]  ;;  %v12222_v2 = vld [vmem:[%s16373_s9 + $0x440] sm:$0xff] }
 0x152   : > { %v14838_v58 = vpop.f32.mrf.mxu1  ;;  %15045 = vmatmul.mubr.msk.bf16.vlgmr.msra.gmra.mxu1 %vm347_vm1, %v2852_v42  ;;  %15097 = vmatpush3.bf16.msra.mxu0 %v3350_v3  ;;  %v2857_v42 = vpack.c.bf16 %v12300_v59, %v17192_v38  ;;  %v12301_v47 = vld [vmem:[%s16373_s9 + $0x55c] sm:$0xff]  ;;  %v12303_v5 = vld [vmem:[%s16373_s9 + $0x56c] sm:$0xff] }
 0x153   : > { %v1238_v20 = vpop.f32.mrf.mxu0  ;;  %15151 = vmatpush3.bf16.msra.mxu1 %v3742_v32  ;;  %14994 = vmatprep.mubr.msk.bf16.mxu0 %vm347_vm1, %v2459_v54  ;;  %v12223_v32 = vld [vmem:[%s16373_s9 + $0x448] sm:$0xff]  ;;  %v12304_v58 = vld [vmem:[%s16373_s9 + $0x574] sm:$0xff] }
 0x154   : > { %v1239_v1 = vadd.f32 %v1238_v20, %v16979_v9  ;;  %v1610_v8 = vpop.f32.mrf.mxu1  ;;  %15048 = vmatprep.mubr.msk.bf16.mxu1 %vm347_vm1, %v2853_v43  ;;  %16186 = vmatprep.subr.msk.bf16.mxu0 %vm426_vm0, %v17235_v41  ;;  %v2854_v9 = vpack.c.bf16 %v17167_v44, %v17148_v45  ;;  %v12219_v45 = vld [vmem:[%s16373_s9 + $0x428] sm:$0xff] }
 0x155   : > { %v14785_v25 = vpop.f32.mrf.mxu0  ;;  %16187 = vmatprep.subr.msk.bf16.mxu1 %vm426_vm0, %v17241_v10  ;;  %v2463_v46 = vpack.c.bf16 %v12219_v45, %v16928_v6  ;;  %v12220_v6 = vld [vmem:[%s16373_s9 + $0x430] sm:$0xff]  ;;  %v12306_v45 = vld [vmem:[%s16373_s9 + $0x584] sm:$0xff] }
 0x156   : > { %v17252_v11 = vadd.f32 %v1610_v8, %v1239_v1  ;;  %v14839_v55 = vpop.f32.mrf.mxu1  ;;  %v2464_v1 = vpack.c.bf16 %v12221_v60, %v12220_v6  ;;  %v12227_v59 = vld [vmem:[%s16373_s9 + $0x468] sm:$0xff] }
 0x157   : > { %v1241_v24 = vpop.f32.mrf.mxu0  ;;  %v2465_v55 = vpack.c.bf16 %v12223_v32, %v12222_v2  ;;  %v12228_v32 = vld [vmem:[%s16373_s9 + $0x470] sm:$0xff] }
 0x158   : > { %v1613_v53 = vpop.f32.mrf.mxu1 }
 0x159   : > { %v14788_v21 = vpop.f32.mrf.mxu0  ;;  %14995 = vmatmul.mubr.msk.bf16.gmra.mxu0 %vm347_vm1, %v2460_v27 }
 0x15a   : > { %v1259_v18 = vadd.f32 %v14788_v21, %v16994_v36  ;;  %v14842_v48 = vpop.f32.mrf.mxu1  ;;  %15049 = vmatmul.mubr.msk.bf16.gmra.mxu1 %vm347_vm1, %v2854_v9  ;;  %14998 = vmatprep.mubr.msk.bf16.mxu0 %vm347_vm1, %v2461_v52  ;;  %v2859_v52 = vpack.c.bf16 %v12304_v58, %v12303_v5  ;;  %v12309_v5 = vld [vmem:[%s16373_s9 + $0x59c] sm:$0xff]  ;;  %v12310_v58 = vld [vmem:[%s16373_s9 + $0x5a4] sm:$0xff] }
 0x15b   : > { %v1251_v44 = vpop.f32.mrf.mxu0  ;;  %15052 = vmatprep.mubr.msk.bf16.mxu1 %vm347_vm1, %v2855_v4 }
 0x15c   : > { %v17266_v22 = vadd.f32 %v14842_v48, %v1259_v18  ;;  %v1623_v31 = vpop.f32.mrf.mxu1  ;;  %v12225_v18 = vld [vmem:[%s16373_s9 + $0x458] sm:$0xff] }
 0x15d   : > { %v14789_v35 = vpop.f32.mrf.mxu0  ;;  %v12305_v48 = vld [vmem:[%s16373_s9 + $0x57c] sm:$0xff] }
 0x15e   : > { %v14843_v36 = vpop.f32.mrf.mxu1  ;;  %v12226_v31 = vld [vmem:[%s16373_s9 + $0x460] sm:$0xff] }
 0x15f   : > { %v1253_v12 = vpop.f32.mrf.mxu0  ;;  %v12307_v36 = vld [vmem:[%s16373_s9 + $0x58c] sm:$0xff] }
 0x160   : > { %v1254_v61 = vadd.f32 %v1253_v12, %v17007_v51  ;;  %v1625_v3 = vpop.f32.mrf.mxu1  ;;  %v12302_v51 = vld [vmem:[%s16373_s9 + $0x564] sm:$0xff] }
 0x161   : > { %v14792_v54 = vpop.f32.mrf.mxu0  ;;  %14999 = vmatmul.mubr.msk.bf16.gmra.mxu0 %vm347_vm1, %v2462_v62  ;;  %v2858_v27 = vpack.c.bf16 %v12302_v51, %v12301_v47 }
 0x162   : > { %v17277_v33 = vadd.f32 %v1625_v3, %v1254_v61  ;;  %v14846_v63 = vpop.f32.mrf.mxu1  ;;  %15053 = vmatmul.mubr.msk.bf16.gmra.mxu1 %vm347_vm1, %v2856_v37  ;;  %15002 = vmatprep.mubr.msk.bf16.mxu0 %vm347_vm1, %v2463_v46  ;;  %v12308_v37 = vld [vmem:[%s16373_s9 + $0x594] sm:$0xff]  ;;  %v2860_v3 = vpack.c.bf16 %v12306_v45, %v12305_v48  ;;  %v2467_v54 = vpack.c.bf16 %v12227_v59, %v12226_v31 }
 0x163   : > { %v1265_v38 = vpop.f32.mrf.mxu0  ;;  %15056 = vmatprep.mubr.msk.bf16.mxu1 %vm347_vm1, %v2857_v42  ;;  %v2861_v6 = vpack.c.bf16 %v12308_v37, %v12307_v36  ;;  %v12233_v59 = vld [vmem:[%s16373_s9 + $0x498] sm:$0xff]  ;;  %v12314_v36 = vld [vmem:[%s16373_s9 + $0x5c4] sm:$0xff] }
 0x164   : > { %v1637_v43 = vpop.f32.mrf.mxu1  ;;  %v12234_v37 = vld [vmem:[%s16373_s9 + $0x4a0] sm:$0xff] }
 0x165   : > { %v14793_v20 = vpop.f32.mrf.mxu0  ;;  %v12229_v43 = vld [vmem:[%s16373_s9 + $0x478] sm:$0xff] }
 0x166   : > { %v1274_v8 = vadd.f32 %v14793_v20, %v17021_v7  ;;  %v14847_v25 = vpop.f32.mrf.mxu1  ;;  %v12224_v7 = vld [vmem:[%s16373_s9 + $0x450] sm:$0xff]  ;;  %v12230_v20 = vld [vmem:[%s16373_s9 + $0x480] sm:$0xff] }
 0x167   : > { %v1267_v9 = vpop.f32.mrf.mxu0  ;;  %v2466_v12 = vpack.c.bf16 %v12225_v18, %v12224_v7 }
 0x168   : > { %v17291_v24 = vadd.f32 %v14847_v25, %v1274_v8  ;;  %v1639_v4 = vpop.f32.mrf.mxu1  ;;  %v2468_v9 = vpack.c.bf16 %v12229_v43, %v12228_v32 }
 0x169   : > { %v14796_v53 = vpop.f32.mrf.mxu0  ;;  %15003 = vmatmul.mubr.msk.bf16.gmra.mxu0 %vm347_vm1, %v2464_v1  ;;  %v12231_v1 = vld [vmem:[%s16373_s9 + $0x488] sm:$0xff] }
 0x16a   : > { %v14850_v21 = vpop.f32.mrf.mxu1  ;;  %15057 = vmatmul.mubr.msk.bf16.gmra.mxu1 %vm347_vm1, %v2858_v27  ;;  %15006 = vmatprep.mubr.msk.bf16.mxu0 %vm347_vm1, %v2465_v55  ;;  %v12311_v27 = vld [vmem:[%s16373_s9 + $0x5ac] sm:$0xff]  ;;  %v12312_v55 = vld [vmem:[%s16373_s9 + $0x5b4] sm:$0xff]  ;;  %v2862_v53 = vpack.c.bf16 %v12310_v58, %v12309_v5 }
 0x16b   : > { %v1278_v44 = vpop.f32.mrf.mxu0  ;;  %15060 = vmatprep.mubr.msk.bf16.mxu1 %vm347_vm1, %v2859_v52  ;;  %v2469_v21 = vpack.c.bf16 %v12231_v1, %v12230_v20  ;;  %v2863_v18 = vpack.c.bf16 %v12312_v55, %v12311_v27  ;;  %v12237_v58 = vld [vmem:[%s16373_s9 + $0x4b8] sm:$0xff]  ;;  %v12238_v27 = vld [vmem:[%s16373_s9 + $0x4c0] sm:$0xff]  ;;  %v12239_v55 = vld [vmem:[%s16373_s9 + $0x4c8] sm:$0xff] }
 0x16c   : > { %v1279_v35 = vadd.f32 %v1278_v44, %v17035_v28  ;;  %v1650_v62 = vpop.f32.mrf.mxu1  ;;  %v12317_v20 = vld [vmem:[%s16373_s9 + $0x5dc] sm:$0xff] }
 0x16d   : > { %v14797_v46 = vpop.f32.mrf.mxu0 }
 0x16e   : > { %v17306_v42 = vadd.f32 %v1650_v62, %v1279_v35  ;;  %v14851_v61 = vpop.f32.mrf.mxu1  ;;  %v12313_v35 = vld [vmem:[%s16373_s9 + $0x5bc] sm:$0xff]  ;;  %v12235_v46 = vld [vmem:[%s16373_s9 + $0x4a8] sm:$0xff] }
 0x16f   : > { %v1281_v63 = vpop.f32.mrf.mxu0  ;;  %v12315_v61 = vld [vmem:[%s16373_s9 + $0x5cc] sm:$0xff] }
 0x170   : > { %v1282_v60 = vadd.f32 %v1281_v63, %v17039_v57  ;;  %v1653_v28 = vpop.f32.mrf.mxu1 }
 0x171   : > { %v14800_v47 = vpop.f32.mrf.mxu0  ;;  %15007 = vmatmul.mubr.msk.bf16.gmra.mxu0 %vm347_vm1, %v2466_v12 }
 0x172   : > { %v17310_v38 = vadd.f32 %v1653_v28, %v1282_v60  ;;  %v1299_v51 = vadd.f32 %v14800_v47, %v17044_v49  ;;  %v14854_v2 = vpop.f32.mrf.mxu1  ;;  %15061 = vmatmul.mubr.msk.bf16.gmra.mxu1 %vm347_vm1, %v2860_v3  ;;  %15010 = vmatprep.mubr.msk.bf16.mxu0 %vm347_vm1, %v2467_v54  ;;  %v12316_v3 = vld [vmem:[%s16373_s9 + $0x5d4] sm:$0xff]  ;;  %v2864_v60 = vpack.c.bf16 %v12314_v36, %v12313_v35 }
 0x173   : > { %v1292_v57 = vpop.f32.mrf.mxu0  ;;  %15064 = vmatprep.mubr.msk.bf16.mxu1 %vm347_vm1, %v2861_v6  ;;  %v2471_v28 = vpack.c.bf16 %v12235_v46, %v12234_v37  ;;  %v12240_v37 = vld [vmem:[%s16373_s9 + $0x4d0] sm:$0xff]  ;;  %v12241_v46 = vld [vmem:[%s16373_s9 + $0x4d8] sm:$0xff] }
 0x174   : > { %v17322_v8 = vadd.f32 %v14854_v2, %v1299_v51  ;;  %v1664_v25 = vpop.f32.mrf.mxu1  ;;  %v2865_v51 = vpack.c.bf16 %v12316_v3, %v12315_v61  ;;  %v12236_v57 = vld [vmem:[%s16373_s9 + $0x4b0] sm:$0xff]  ;;  %v12242_v3 = vld [vmem:[%s16373_s9 + $0x4e0] sm:$0xff] }
 0x175   : > { %v14801_v49 = vpop.f32.mrf.mxu0  ;;  %v12318_v25 = vld [vmem:[%s16373_s9 + $0x5e4] sm:$0xff] }
 0x176   : > { %v1302_v52 = vadd.f32 %v14801_v49, %v17057_v29  ;;  %v14855_v4 = vpop.f32.mrf.mxu1  ;;  %v12232_v29 = vld [vmem:[%s16373_s9 + $0x490] sm:$0xff] }
 0x177   : > { %v1294_v7 = vpop.f32.mrf.mxu0  ;;  %v2470_v63 = vpack.c.bf16 %v12233_v59, %v12232_v29 }
 0x178   : > { %v17327_v48 = vadd.f32 %v14855_v4, %v1302_v52  ;;  %v1666_v44 = vpop.f32.mrf.mxu1  ;;  %v12319_v52 = vld [vmem:[%s16373_s9 + $0x5ec] sm:$0xff]  ;;  %v12320_v4 = vld [vmem:[%s16373_s9 + $0x5f4] sm:$0xff] }
 0x179   : > { %v14804_v45 = vpop.f32.mrf.mxu0  ;;  %15011 = vmatmul.mubr.msk.bf16.gmra.mxu0 %vm347_vm1, %v2468_v9  ;;  %v2866_v44 = vpack.c.bf16 %v12318_v25, %v12317_v20  ;;  %v2867_v29 = vpack.c.bf16 %v12320_v4, %v12319_v52  ;;  %v17388_v52 = vld [vmem:[%s16373_s9 + $0x500] sm:$0xff]  ;;  %v17391_v4 = vld [vmem:[%s16373_s9 + $0x508] sm:$0xff] }
 0x17a   : > { %v14858_v31 = vpop.f32.mrf.mxu1  ;;  %15065 = vmatmul.mubr.msk.bf16.gmra.mxu1 %vm347_vm1, %v2862_v53  ;;  %15014 = vmatprep.mubr.msk.bf16.mxu0 %vm347_vm1, %v2469_v21  ;;  %v2472_v21 = vpack.c.bf16 %v12237_v58, %v12236_v57  ;;  %v2473_v45 = vpack.c.bf16 %v12239_v55, %v12238_v27  ;;  %v17382_v27 = vld [vmem:[%s16373_s9 + $0x4f8] sm:$0xff] }
 0x17b   : > { %v1306_v62 = vpop.f32.mrf.mxu0  ;;  %15068 = vmatprep.mubr.msk.bf16.mxu1 %vm347_vm1, %v2863_v18  ;;  %v12325_v55 = vld [vmem:[%s16373_s9 + $0x61c] sm:$0xff] }
 0x17c   : > { %v1678_v12 = vpop.f32.mrf.mxu1 }
 0x17d   : > { %v14805_v54 = vpop.f32.mrf.mxu0  ;;  %v12321_v12 = vld [vmem:[%s16373_s9 + $0x5fc] sm:$0xff] }
 0x17e   : > { %v14859_v6 = vpop.f32.mrf.mxu1  ;;  %v12243_v54 = vld [vmem:[%s16373_s9 + $0x4e8] sm:$0xff] }
 0x17f   : > { %v1308_v47 = vpop.f32.mrf.mxu0  ;;  %v12323_v6 = vld [vmem:[%s16373_s9 + $0x60c] sm:$0xff] }
 0x180   : > { %v1680_v2 = vpop.f32.mrf.mxu1  ;;  %v2474_v47 = vpack.c.bf16 %v12241_v46, %v12240_v37 }
 0x181   : > { %v14808_v32 = vpop.f32.mrf.mxu0  ;;  %15015 = vmatmul.mubr.msk.bf16.gmra.mxu0 %vm347_vm1, %v2470_v63 }
 0x182   : > { %v1327_v43 = vadd.f32 %v14808_v32, %v17072_v23  ;;  %v14862_v5 = vpop.f32.mrf.mxu1  ;;  %15069 = vmatmul.mubr.msk.bf16.gmra.mxu1 %vm347_vm1, %v2864_v60  ;;  %15018 = vmatprep.mubr.msk.bf16.mxu0 %vm347_vm1, %v2471_v28  ;;  %v12324_v60 = vld [vmem:[%s16373_s9 + $0x614] sm:$0xff] }
 0x183   : > { %v1318_v1 = vpop.f32.mrf.mxu0  ;;  %15072 = vmatprep.mubr.msk.bf16.mxu1 %vm347_vm1, %v2865_v51  ;;  %v2869_v57 = vpack.c.bf16 %v12324_v60, %v12323_v6  ;;  %v12330_v6 = vld [vmem:[%s16373_s9 + $0x644] sm:$0xff] }
 0x184   : > { %v17352_v49 = vadd.f32 %v14862_v5, %v1327_v43  ;;  %v1319_v9 = vadd.f32 %v1318_v1, %v17085_v19  ;;  %v1690_v23 = vpop.f32.mrf.mxu1  ;;  %v2475_v43 = vpack.c.bf16 %v12243_v54, %v12242_v3  ;;  %v17409_v3 = vld [vmem:[%s16373_s9 + $0x518] sm:$0xff]  ;;  %v17415_v60 = vld [vmem:[%s16373_s9 + $0x520] sm:$0xff] }
 0x185   : > { %v14809_v53 = vpop.f32.mrf.mxu0  ;;  %v12329_v54 = vld [vmem:[%s16373_s9 + $0x63c] sm:$0xff] }
 0x186   : > { %v17357_v7 = vadd.f32 %v1690_v23, %v1319_v9  ;;  %v14863_v18 = vpop.f32.mrf.mxu1  ;;  %v12326_v23 = vld [vmem:[%s16373_s9 + $0x624] sm:$0xff] }
 0x187   : > { %v1321_v31 = vpop.f32.mrf.mxu0  ;;  %v12327_v18 = vld [vmem:[%s16373_s9 + $0x62c] sm:$0xff] }
 0x188   : > { %v1322_v19 = vadd.f32 %v1321_v31, %v17089_v13  ;;  %v1693_v59 = vpop.f32.mrf.mxu1  ;;  %v12322_v13 = vld [vmem:[%s16373_s9 + $0x604] sm:$0xff] }
 0x189   : > { %v14812_v35 = vpop.f32.mrf.mxu0  ;;  %15019 = vmatmul.mubr.msk.bf16.gmra.mxu0 %vm347_vm1, %v2472_v21  ;;  %v2868_v32 = vpack.c.bf16 %v12322_v13, %v12321_v12  ;;  %v17406_v13 = vld [vmem:[%s16373_s9 + $0x510] sm:$0xff] }
 0x18a   : > { %v17361_v62 = vadd.f32 %v1693_v59, %v1322_v19  ;;  %v14866_v36 = vpop.f32.mrf.mxu1  ;;  %15073 = vmatmul.mubr.msk.bf16.gmra.mxu1 %vm347_vm1, %v2866_v44  ;;  %15022 = vmatprep.mubr.msk.bf16.mxu0 %vm347_vm1, %v2473_v45  ;;  %v12328_v44 = vld [vmem:[%s16373_s9 + $0x634] sm:$0xff]  ;;  %v2870_v59 = vpack.c.bf16 %v12326_v23, %v12325_v55  ;;  %v2477_v35 = vpack.c.bf16 %v17391_v4, %v17388_v52 }
 0x18b   : > { %v1333_v61 = vpop.f32.mrf.mxu0  ;;  %15076 = vmatprep.mubr.msk.bf16.mxu1 %vm347_vm1, %v2867_v29 }
 0x18c   : > { %v1705_v63 = vpop.f32.mrf.mxu1 }
 0x18d   : > { %v14813_v28 = vpop.f32.mrf.mxu0 }
 0x18e   : > { %v1342_v51 = vadd.f32 %v14813_v28, %v17103_v16  ;;  %v14867_v2 = vpop.f32.mrf.mxu1  ;;  %v12244_v16 = vld [vmem:[%s16373_s9 + $0x4f0] sm:$0xff]  ;;  %v17418_v28 = vld [vmem:[%s16373_s9 + $0x528] sm:$0xff] }
 0x18f   : > { %v1335_v5 = vpop.f32.mrf.mxu0  ;;  %v2476_v31 = vpack.c.bf16 %v17382_v27, %v12244_v16 }
 0x190   : > { %v17375_v58 = vadd.f32 %v14867_v2, %v1342_v51  ;;  %v1707_v20 = vpop.f32.mrf.mxu1  ;;  %v12331_v51 = vld [vmem:[%s16373_s9 + $0x64c] sm:$0xff]  ;;  %v12332_v2 = vld [vmem:[%s16373_s9 + $0x654] sm:$0xff] }
 0x191   : > { %v14816_v1 = vpop.f32.mrf.mxu0  ;;  %15023 = vmatmul.mubr.msk.bf16.gmra.mxu0 %vm347_vm1, %v2474_v47  ;;  %v2872_v20 = vpack.c.bf16 %v12330_v6, %v12329_v54  ;;  %v2873_v16 = vpack.c.bf16 %v12332_v2, %v12331_v51 }
 0x192   : > { %v14870_v25 = vpop.f32.mrf.mxu1  ;;  %15077 = vmatmul.mubr.msk.bf16.gmra.mxu1 %vm347_vm1, %v2868_v32  ;;  %15026 = vmatprep.mubr.msk.bf16.mxu0 %vm347_vm1, %v2475_v43  ;;  %v2478_v43 = vpack.c.bf16 %v17409_v3, %v17406_v13  ;;  %v2479_v1 = vpack.c.bf16 %v17418_v28, %v17415_v60 }
 0x193   : > { %v1346_v9 = vpop.f32.mrf.mxu0  ;;  %15080 = vmatprep.mubr.msk.bf16.mxu1 %vm347_vm1, %v2869_v57 }
 0x194   : > { %v1347_v53 = vadd.f32 %v1346_v9, %v17123_v30  ;;  %v1718_v21 = vpop.f32.mrf.mxu1  ;;  %v2871_v30 = vpack.c.bf16 %v12328_v44, %v12327_v18  ;;  %v17438_v18 = vld [vmem:[%s16373_s9 + $0x530] sm:$0xff]  ;;  %v17441_v44 = vld [vmem:[%s16373_s9 + $0x538] sm:$0xff] }
 0x195   : > { %v14817_v45 = vpop.f32.mrf.mxu0 }
 0x196   : > { %v17397_v29 = vadd.f32 %v1718_v21, %v1347_v53  ;;  %v14871_v19 = vpop.f32.mrf.mxu1  ;;  %v12333_v45 = vld [vmem:[%s16373_s9 + $0x65c] sm:$0xff] }
 0x197   : > { %v1349_v36 = vpop.f32.mrf.mxu0  ;;  %v17447_v19 = vld [vmem:[%s16373_s9 + $0x540] sm:$0xff] }
 0x198   : > { %v1721_v37 = vpop.f32.mrf.mxu1  ;;  %v12335_v36 = vld [vmem:[%s16373_s9 + $0x66c] sm:$0xff] }
 0x199   : > { %v14820_v46 = vpop.f32.mrf.mxu0  ;;  %15027 = vmatmul.mubr.msk.bf16.gmra.mxu0 %vm347_vm1, %v2476_v31 }
 0x19a   : > { %v1367_v12 = vadd.f32 %v14820_v46, %v17131_v0  ;;  %v14874_v61 = vpop.f32.mrf.mxu1  ;;  %15081 = vmatmul.mubr.msk.bf16.gmra.mxu1 %vm347_vm1, %v2870_v59  ;;  %15030 = vmatprep.mubr.msk.bf16.mxu0 %vm347_vm1, %v2477_v35  ;;  %v17450_v59 = vld [vmem:[%s16373_s9 + $0x548] sm:$0xff]  ;;  %v2480_v46 = vpack.c.bf16 %v17441_v44, %v17438_v18 }
 0x19b   : > { %v1359_v63 = vpop.f32.mrf.mxu0  ;;  %15084 = vmatprep.mubr.msk.bf16.mxu1 %vm347_vm1, %v2871_v30  ;;  %v12336_v30 = vld [vmem:[%s16373_s9 + $0x674] sm:$0xff]  ;;  %v2481_v54 = vpack.c.bf16 %v17450_v59, %v17447_v19 }
 0x19c   : > { %v17420_v47 = vadd.f32 %v14874_v61, %v1367_v12  ;;  %v1731_v0 = vpop.f32.mrf.mxu1  ;;  %v2875_v6 = vpack.c.bf16 %v12336_v30, %v12335_v36  ;;  %v3635_v36 = vpack.c.bf16 %v17388_v52, %v17382_v27 }
 0x19d   : > { %v14821_v32 = vpop.f32.mrf.mxu0 }
 0x19e   : > { %v1370_v5 = vadd.f32 %v14821_v32, %v17154_v15  ;;  %v14875_v57 = vpop.f32.mrf.mxu1  ;;  %v17462_v32 = vld [vmem:[%s16373_s9 + $0x550] sm:$0xff] }
 0x19f   : > { %v1361_v25 = vpop.f32.mrf.mxu0 }
 0x1a0   : > { %v17429_v55 = vadd.f32 %v14875_v57, %v1370_v5  ;;  %v1362_v9 = vadd.f32 %v1361_v25, %v17160_v17  ;;  %v1733_v23 = vpop.f32.mrf.mxu1  ;;  %v12334_v17 = vld [vmem:[%s16373_s9 + $0x664] sm:$0xff]  ;;  %v12337_v5 = vld [vmem:[%s16373_s9 + $0x67c] sm:$0xff] }
 0x1a1   : > { %v14824_v53 = vpop.f32.mrf.mxu0  ;;  %15031 = vmatmul.mubr.msk.bf16.gmra.mxu0 %vm347_vm1, %v2478_v43  ;;  %v2874_v61 = vpack.c.bf16 %v12334_v17, %v12333_v45  ;;  %v17465_v43 = vld [vmem:[%s16373_s9 + $0x558] sm:$0xff] }
 0x1a2   : > { %v17433_v15 = vadd.f32 %v1733_v23, %v1362_v9  ;;  %v14878_v21 = vpop.f32.mrf.mxu1  ;;  %15085 = vmatmul.mubr.msk.bf16.gmra.mxu1 %vm347_vm1, %v2872_v20  ;;  %15034 = vmatprep.mubr.msk.bf16.mxu0 %vm347_vm1, %v2479_v1  ;;  %v12338_v20 = vld [vmem:[%s16373_s9 + $0x684] sm:$0xff]  ;;  %v12368_v1 = vld [vmem:[%s16373_s9 + $0x4f2] sm:$0xff]  ;;  %v12369_v25 = vld [vmem:[%s16373_s9 + $0x4fa] sm:$0xff]  ;;  %v2482_v53 = vpack.c.bf16 %v17465_v43, %v17462_v32 }
 0x1a3   : > { %v1374_v31 = vpop.f32.mrf.mxu0  ;;  %15088 = vmatprep.mubr.msk.bf16.mxu1 %vm347_vm1, %v2873_v16  ;;  %v3243_v17 = vpack.c.bf16 %v12369_v25, %v12368_v1  ;;  %v4218_v1 = vsel %vm426_vm0, %v17235_v41, 0 }
 0x1a4   : > { %v1746_v35 = vpop.f32.mrf.mxu1  ;;  %v2876_v31 = vpack.c.bf16 %v12338_v20, %v12337_v5 }
 0x1a5   : > { %v14825_v37 = vpop.f32.mrf.mxu0 }
 0x1a6   : > { %v14879_v12 = vpop.f32.mrf.mxu1 }
 0x1a7   : > { %v1376_v63 = vpop.f32.mrf.mxu0 }
 0x1a8   : > { %v1748_v0 = vpop.f32.mrf.mxu1  ;;  %v12371_v63 = vld [vmem:[%s16373_s9 + $0x50a] sm:$0xff] }
 0x1a9   : > { %v14884_v51 = vpop.f32.mrf.mxu0  ;;  %15035 = vmatmul.mubr.msk.bf16.gmra.mxu0 %vm347_vm1, %v2480_v46  ;;  %v12373_v0 = vld [vmem:[%s16373_s9 + $0x51a] sm:$0xff] }
 0x1aa   : > { %v14938_v2 = vpop.f32.mrf.mxu1  ;;  %15089 = vmatmul.mubr.msk.bf16.gmra.mxu1 %vm347_vm1, %v2874_v61  ;;  %15038 = vmatprep.mubr.msk.bf16.mxu0 %vm347_vm1, %v2481_v54  ;;  %v12370_v54 = vld [vmem:[%s16373_s9 + $0x502] sm:$0xff] }
 0x1ab   : > { %v1974_v57 = vpop.f32.mrf.mxu0  ;;  %15092 = vmatprep.mubr.msk.bf16.mxu1 %vm347_vm1, %v2875_v6  ;;  %v12372_v6 = vld [vmem:[%s16373_s9 + $0x512] sm:$0xff]  ;;  %v3244_v2 = vpack.c.bf16 %v12371_v63, %v12370_v54  ;;  %v3639_v54 = vpack.c.bf16 %v17447_v19, %v17441_v44 }
 0x1ac   : > { %v2149_v16 = vadd.f32 %v1974_v57, %v17199_v39  ;;  %v2208_v9 = vpop.f32.mrf.mxu1  ;;  %v3636_v57 = vpack.c.bf16 %v17406_v13, %v17391_v4  ;;  %v3245_v25 = vpack.c.bf16 %v12373_v0, %v12372_v6  ;;  %v17508_v4 = vld [vmem:[%s20641_s1 + $0x18] sm:$0x3]  ;;  %v12374_v13 = vld [vmem:[%s16373_s9 + $0x522] sm:$0xff] }
 0x1ad   : > { %v14885_v23 = vpop.f32.mrf.mxu0  ;;  %v12378_v0 = vld [vmem:[%s16373_s9 + $0x542] sm:$0xff] }
 0x1ae   : > { %v17475_v21 = vadd.f32 %v2208_v9, %v2149_v16  ;;  %v14939_v45 = vpop.f32.mrf.mxu1  ;;  %v4508_v23 = vsel %vm426_vm0, %v17241_v10, 0  ;;  %v17516_v10 = vld [vmem:[%s20641_s1 + $0x1a] sm:$0x3] }
 0x1af   : > { %v1977_v35 = vpop.f32.mrf.mxu0  ;;  %v12375_v45 = vld [vmem:[%s16373_s9 + $0x52a] sm:$0xff] }
 0x1b0   : > { %v2150_v30 = vadd.f32 %v1977_v35, %v17207_v56  ;;  %v2211_v39 = vpop.f32.mrf.mxu1 }
 0x1b1   : > { %v14888_v37 = vpop.f32.mrf.mxu0  ;;  %15039 = vmatmul.mubr.msk.bf16.gmra.mxu0 %vm347_vm1, %v2482_v53 }
 0x1b2   : > { %v17481_v46 = vadd.f32 %v2211_v39, %v2150_v30  ;;  %v2151_v12 = vadd.f32 %v14888_v37, %v17214_v40  ;;  %v14942_v61 = vpop.f32.mrf.mxu1  ;;  %15093 = vmatmul.mubr.msk.bf16.gmra.mxu1 %vm347_vm1, %v2876_v31  ;;  %15098 = vmatprep.mubr.msk.bf16.mxu0 %vm347_vm1, %v3243_v17  ;;  %v12377_v31 = vld [vmem:[%s16373_s9 + $0x53a] sm:$0xff]  ;;  %v3246_v30 = vpack.c.bf16 %v12375_v45, %v12374_v13  ;;  %v12463_v45 = vld [vmem:[%s16373_s9 + $0x568] sm:$0xff] }
 0x1b3   : > { %v1988_v27 = vpop.f32.mrf.mxu0  ;;  %15152 = vmatprep.mubr.msk.bf16.mxu1 %vm347_vm1, %v3635_v36 }
 0x1b4   : > { %v17489_v56 = vadd.f32 %v14942_v61, %v2151_v12  ;;  %v2222_v52 = vpop.f32.mrf.mxu1 }
 0x1b5   : > { %v14889_v51 = vpop.f32.mrf.mxu0 }
 0x1b6   : > { %v2152_v5 = vadd.f32 %v14889_v51, %v17225_v50  ;;  %v14943_v40 = vpop.f32.mrf.mxu1  ;;  %v3637_v50 = vpack.c.bf16 %v17415_v60, %v17409_v3  ;;  %v12376_v60 = vld [vmem:[%s16373_s9 + $0x532] sm:$0xff] }
 0x1b7   : > { %v1990_v20 = vpop.f32.mrf.mxu0  ;;  %v3247_v12 = vpack.c.bf16 %v12377_v31, %v12376_v60  ;;  %v12380_v51 = vld [vmem:[%s16373_s9 + $0x552] sm:$0xff]  ;;  %v12385_v60 = vld [vmem:[%s16373_s9 + $0x57a] sm:$0xff] }
 0x1b8   : > { %v17498_v16 = vadd.f32 %v14943_v40, %v2152_v5  ;;  %v2224_v9 = vpop.f32.mrf.mxu1  ;;  %v12462_v5 = vld [vmem:[%s16373_s9 + $0x560] sm:$0xff]  ;;  %v3640_v20 = vpack.c.bf16 %v17462_v32, %v17450_v59  ;;  %v12383_v32 = vld [vmem:[%s16373_s9 + $0x56a] sm:$0xff] }
 0x1b9   : > { %v14892_v53 = vpop.f32.mrf.mxu0  ;;  %15099 = vmatmul.mubr.msk.bf16.vlgmr.msra.gmra.mxu0 %vm347_vm1, %v3244_v2  ;;  %v12381_v2 = vld [vmem:[%s16373_s9 + $0x55a] sm:$0xff]  ;;  %v3641_v9 = vpack.c.bf16 %v12462_v5, %v17465_v43  ;;  %v12382_v59 = vld [vmem:[%s16373_s9 + $0x562] sm:$0xff] }
 0x1ba   : > { %v14946_v41 = vpop.f32.mrf.mxu1  ;;  %15153 = vmatmul.mubr.msk.bf16.vlgmr.msra.gmra.mxu1 %vm347_vm1, %v3636_v57  ;;  %15205 = vmatpush3.bf16.msra.mxu0 %v4218_v1  ;;  %v3249_v1 = vpack.c.bf16 %v12381_v2, %v12380_v51  ;;  %v12468_v2 = vld [vmem:[%s16373_s9 + $0x590] sm:$0xff]  ;;  %v12389_v5 = vld [vmem:[%s16373_s9 + $0x59a] sm:$0xff] }
 0x1bb   : > { %v2002_v3 = vpop.f32.mrf.mxu0  ;;  %15259 = vmatpush3.bf16.msra.mxu1 %v4508_v23  ;;  %15102 = vmatprep.mubr.msk.bf16.mxu0 %vm347_vm1, %v3245_v25 }
 0x1bc   : > { %v2153_v17 = vadd.f32 %v2002_v3, %v17252_v11  ;;  %v2236_v35 = vpop.f32.mrf.mxu1  ;;  %15156 = vmatprep.mubr.msk.bf16.mxu1 %vm347_vm1, %v3637_v50  ;;  %16188 = vmatprep.subr.msk.bf16.mxu0 %vm426_vm0, %v17508_v4  ;;  %v3638_v11 = vpack.c.bf16 %v17438_v18, %v17418_v28  ;;  %v12379_v28 = vld [vmem:[%s16373_s9 + $0x54a] sm:$0xff]  ;;  %v12384_v3 = vld [vmem:[%s16373_s9 + $0x572] sm:$0xff] }
 0x1bd   : > { %v14893_v36 = vpop.f32.mrf.mxu0  ;;  %16189 = vmatprep.subr.msk.bf16.mxu1 %vm426_vm0, %v17516_v10 }
 0x1be   : > { %v17527_v39 = vadd.f32 %v2236_v35, %v2153_v17  ;;  %v14947_v37 = vpop.f32.mrf.mxu1  ;;  %v12465_v17 = vld [vmem:[%s16373_s9 + $0x578] sm:$0xff]  ;;  %v12466_v35 = vld [vmem:[%s16373_s9 + $0x580] sm:$0xff] }
 0x1bf   : > { %v2005_v61 = vpop.f32.mrf.mxu0 }
 0x1c0   : > { %v2239_v63 = vpop.f32.mrf.mxu1  ;;  %v3251_v61 = vpack.c.bf16 %v12385_v60, %v12384_v3  ;;  %v12390_v60 = vld [vmem:[%s16373_s9 + $0x5a2] sm:$0xff] }
 0x1c1   : > { %v14896_v27 = vpop.f32.mrf.mxu0  ;;  %15103 = vmatmul.mubr.msk.bf16.gmra.mxu0 %vm347_vm1, %v3246_v30  ;;  %v3250_v30 = vpack.c.bf16 %v12383_v32, %v12382_v59  ;;  %v3643_v63 = vpack.c.bf16 %v12466_v35, %v12465_v17  ;;  %v12471_v17 = vld [vmem:[%s16373_s9 + $0x5a8] sm:$0xff]  ;;  %v12472_v35 = vld [vmem:[%s16373_s9 + $0x5b0] sm:$0xff] }
 0x1c2   : > { %v2155_v52 = vadd.f32 %v14896_v27, %v17266_v22  ;;  %v14950_v6 = vpop.f32.mrf.mxu1  ;;  %15157 = vmatmul.mubr.msk.bf16.gmra.mxu1 %vm347_vm1, %v3638_v11  ;;  %15106 = vmatprep.mubr.msk.bf16.mxu0 %vm347_vm1, %v3247_v12  ;;  %v3248_v22 = vpack.c.bf16 %v12379_v28, %v12378_v0  ;;  %v12387_v28 = vld [vmem:[%s16373_s9 + $0x58a] sm:$0xff] }
 0x1c3   : > { %v2015_v18 = vpop.f32.mrf.mxu0  ;;  %15160 = vmatprep.mubr.msk.bf16.mxu1 %vm347_vm1, %v3639_v54 }
 0x1c4   : > { %v17542_v44 = vadd.f32 %v14950_v6, %v2155_v52  ;;  %v2249_v19 = vpop.f32.mrf.mxu1  ;;  %v12467_v18 = vld [vmem:[%s16373_s9 + $0x588] sm:$0xff] }
 0x1c5   : > { %v14897_v40 = vpop.f32.mrf.mxu0  ;;  %v12388_v19 = vld [vmem:[%s16373_s9 + $0x592] sm:$0xff] }
 0x1c6   : > { %v14951_v57 = vpop.f32.mrf.mxu1 }
 0x1c7   : > { %v2017_v25 = vpop.f32.mrf.mxu0  ;;  %v12469_v57 = vld [vmem:[%s16373_s9 + $0x598] sm:$0xff] }
 0x1c8   : > { %v2154_v23 = vadd.f32 %v2017_v25, %v17277_v33  ;;  %v2251_v50 = vpop.f32.mrf.mxu1  ;;  %v12464_v33 = vld [vmem:[%s16373_s9 + $0x570] sm:$0xff] }
 0x1c9   : > { %v14900_v53 = vpop.f32.mrf.mxu0  ;;  %15107 = vmatmul.mubr.msk.bf16.gmra.mxu0 %vm347_vm1, %v3248_v22  ;;  %v3642_v12 = vpack.c.bf16 %v12464_v33, %v12463_v45 }
 0x1ca   : > { %v17550_v41 = vadd.f32 %v2251_v50, %v2154_v23  ;;  %v14954_v13 = vpop.f32.mrf.mxu1  ;;  %15161 = vmatmul.mubr.msk.bf16.gmra.mxu1 %vm347_vm1, %v3640_v20  ;;  %15110 = vmatprep.mubr.msk.bf16.mxu0 %vm347_vm1, %v3249_v1  ;;  %v12470_v20 = vld [vmem:[%s16373_s9 + $0x5a0] sm:$0xff]  ;;  %v3644_v50 = vpack.c.bf16 %v12468_v2, %v12467_v18  ;;  %v3253_v53 = vpack.c.bf16 %v12389_v5, %v12388_v19  ;;  %v12395_v5 = vld [vmem:[%s16373_s9 + $0x5ca] sm:$0xff] }
 0x1cb   : > { %v2029_v43 = vpop.f32.mrf.mxu0  ;;  %15164 = vmatprep.mubr.msk.bf16.mxu1 %vm347_vm1, %v3641_v9  ;;  %v3645_v59 = vpack.c.bf16 %v12470_v20, %v12469_v57  ;;  %v12476_v57 = vld [vmem:[%s16373_s9 + $0x5d0] sm:$0xff] }
 0x1cc   : > { %v2263_v31 = vpop.f32.mrf.mxu1  ;;  %v12396_v20 = vld [vmem:[%s16373_s9 + $0x5d2] sm:$0xff] }
 0x1cd   : > { %v14901_v36 = vpop.f32.mrf.mxu0  ;;  %v12391_v31 = vld [vmem:[%s16373_s9 + $0x5aa] sm:$0xff] }
 0x1ce   : > { %v2156_v37 = vadd.f32 %v14901_v36, %v17291_v24  ;;  %v14955_v11 = vpop.f32.mrf.mxu1  ;;  %v12386_v24 = vld [vmem:[%s16373_s9 + $0x582] sm:$0xff]  ;;  %v12392_v36 = vld [vmem:[%s16373_s9 + $0x5b2] sm:$0xff] }
 0x1cf   : > { %v2031_v54 = vpop.f32.mrf.mxu0  ;;  %v3252_v25 = vpack.c.bf16 %v12387_v28, %v12386_v24 }
 0x1d0   : > { %v17564_v27 = vadd.f32 %v14955_v11, %v2156_v37  ;;  %v2265_v52 = vpop.f32.mrf.mxu1  ;;  %v3254_v54 = vpack.c.bf16 %v12391_v31, %v12390_v60 }
 0x1d1   : > { %v14904_v6 = vpop.f32.mrf.mxu0  ;;  %15111 = vmatmul.mubr.msk.bf16.gmra.mxu0 %vm347_vm1, %v3250_v30  ;;  %v12393_v30 = vld [vmem:[%s16373_s9 + $0x5ba] sm:$0xff] }
 0x1d2   : > { %v14958_v0 = vpop.f32.mrf.mxu1  ;;  %15165 = vmatmul.mubr.msk.bf16.gmra.mxu1 %vm347_vm1, %v3642_v12  ;;  %15114 = vmatprep.mubr.msk.bf16.mxu0 %vm347_vm1, %v3251_v61  ;;  %v12473_v12 = vld [vmem:[%s16373_s9 + $0x5b8] sm:$0xff]  ;;  %v12474_v61 = vld [vmem:[%s16373_s9 + $0x5c0] sm:$0xff]  ;;  %v3646_v6 = vpack.c.bf16 %v12472_v35, %v12471_v17  ;;  %v12399_v35 = vld [vmem:[%s16373_s9 + $0x5ea] sm:$0xff] }
 0x1d3   : > { %v2042_v51 = vpop.f32.mrf.mxu0  ;;  %15168 = vmatprep.mubr.msk.bf16.mxu1 %vm347_vm1, %v3643_v63  ;;  %v3255_v0 = vpack.c.bf16 %v12393_v30, %v12392_v36  ;;  %v3647_v28 = vpack.c.bf16 %v12474_v61, %v12473_v12  ;;  %v12479_v36 = vld [vmem:[%s16373_s9 + $0x5e8] sm:$0xff]  ;;  %v12400_v12 = vld [vmem:[%s16373_s9 + $0x5f2] sm:$0xff]  ;;  %v12401_v61 = vld [vmem:[%s16373_s9 + $0x5fa] sm:$0xff] }
 0x1d4   : > { %v2157_v40 = vadd.f32 %v2042_v51, %v17306_v42  ;;  %v2276_v22 = vpop.f32.mrf.mxu1 }
 0x1d5   : > { %v14905_v1 = vpop.f32.mrf.mxu0 }
 0x1d6   : > { %v17579_v9 = vadd.f32 %v2276_v22, %v2157_v40  ;;  %v14959_v23 = vpop.f32.mrf.mxu1  ;;  %v12475_v40 = vld [vmem:[%s16373_s9 + $0x5c8] sm:$0xff]  ;;  %v12397_v1 = vld [vmem:[%s16373_s9 + $0x5da] sm:$0xff] }
 0x1d7   : > { %v2045_v13 = vpop.f32.mrf.mxu0  ;;  %v12477_v23 = vld [vmem:[%s16373_s9 + $0x5d8] sm:$0xff] }
 0x1d8   : > { %v2158_v32 = vadd.f32 %v2045_v13, %v17310_v38  ;;  %v2279_v42 = vpop.f32.mrf.mxu1 }
 0x1d9   : > { %v14908_v45 = vpop.f32.mrf.mxu0  ;;  %15115 = vmatmul.mubr.msk.bf16.gmra.mxu0 %vm347_vm1, %v3252_v25 }
 0x1da   : > { %v17583_v43 = vadd.f32 %v2279_v42, %v2158_v32  ;;  %v2159_v33 = vadd.f32 %v14908_v45, %v17322_v8  ;;  %v14962_v3 = vpop.f32.mrf.mxu1  ;;  %15169 = vmatmul.mubr.msk.bf16.gmra.mxu1 %vm347_vm1, %v3644_v50  ;;  %15118 = vmatprep.mubr.msk.bf16.mxu0 %vm347_vm1, %v3253_v53  ;;  %v12478_v50 = vld [vmem:[%s16373_s9 + $0x5e0] sm:$0xff]  ;;  %v3648_v32 = vpack.c.bf16 %v12476_v57, %v12475_v40 }
 0x1db   : > { %v2056_v38 = vpop.f32.mrf.mxu0  ;;  %15172 = vmatprep.mubr.msk.bf16.mxu1 %vm347_vm1, %v3645_v59  ;;  %v3257_v42 = vpack.c.bf16 %v12397_v1, %v12396_v20  ;;  %v12402_v20 = vld [vmem:[%s16373_s9 + $0x602] sm:$0xff]  ;;  %v12403_v1 = vld [vmem:[%s16373_s9 + $0x60a] sm:$0xff] }
 0x1dc   : > { %v17595_v37 = vadd.f32 %v14962_v3, %v2159_v33  ;;  %v2290_v11 = vpop.f32.mrf.mxu1  ;;  %v3649_v33 = vpack.c.bf16 %v12478_v50, %v12477_v23  ;;  %v12398_v38 = vld [vmem:[%s16373_s9 + $0x5e2] sm:$0xff]  ;;  %v12404_v50 = vld [vmem:[%s16373_s9 + $0x612] sm:$0xff] }
 0x1dd   : > { %v14909_v8 = vpop.f32.mrf.mxu0  ;;  %v12480_v11 = vld [vmem:[%s16373_s9 + $0x5f0] sm:$0xff] }
 0x1de   : > { %v2160_v63 = vadd.f32 %v14909_v8, %v17327_v48  ;;  %v14963_v52 = vpop.f32.mrf.mxu1  ;;  %v12394_v48 = vld [vmem:[%s16373_s9 + $0x5c2] sm:$0xff] }
 0x1df   : > { %v2058_v24 = vpop.f32.mrf.mxu0  ;;  %v3256_v13 = vpack.c.bf16 %v12395_v5, %v12394_v48 }
 0x1e0   : > { %v17600_v18 = vadd.f32 %v14963_v52, %v2160_v63  ;;  %v2292_v51 = vpop.f32.mrf.mxu1  ;;  %v12481_v63 = vld [vmem:[%s16373_s9 + $0x5f8] sm:$0xff]  ;;  %v12482_v52 = vld [vmem:[%s16373_s9 + $0x600] sm:$0xff] }
 0x1e1   : > { %v14912_v2 = vpop.f32.mrf.mxu0  ;;  %15119 = vmatmul.mubr.msk.bf16.gmra.mxu0 %vm347_vm1, %v3254_v54  ;;  %v3650_v51 = vpack.c.bf16 %v12480_v11, %v12479_v36  ;;  %v3651_v48 = vpack.c.bf16 %v12482_v52, %v12481_v63  ;;  %v12408_v63 = vld [vmem:[%s16373_s9 + $0x632] sm:$0xff]  ;;  %v12409_v52 = vld [vmem:[%s16373_s9 + $0x63a] sm:$0xff] }
 0x1e2   : > { %v14966_v19 = vpop.f32.mrf.mxu1  ;;  %15173 = vmatmul.mubr.msk.bf16.gmra.mxu1 %vm347_vm1, %v3646_v6  ;;  %15122 = vmatprep.mubr.msk.bf16.mxu0 %vm347_vm1, %v3255_v0  ;;  %v3258_v0 = vpack.c.bf16 %v12399_v35, %v12398_v38  ;;  %v3259_v2 = vpack.c.bf16 %v12401_v61, %v12400_v12  ;;  %v12407_v12 = vld [vmem:[%s16373_s9 + $0x62a] sm:$0xff] }
 0x1e3   : > { %v2070_v22 = vpop.f32.mrf.mxu0  ;;  %15176 = vmatprep.mubr.msk.bf16.mxu1 %vm347_vm1, %v3647_v28  ;;  %v12487_v61 = vld [vmem:[%s16373_s9 + $0x628] sm:$0xff] }
 0x1e4   : > { %v2304_v25 = vpop.f32.mrf.mxu1 }
 0x1e5   : > { %v14913_v53 = vpop.f32.mrf.mxu0  ;;  %v12483_v25 = vld [vmem:[%s16373_s9 + $0x608] sm:$0xff] }
 0x1e6   : > { %v14967_v59 = vpop.f32.mrf.mxu1  ;;  %v12405_v53 = vld [vmem:[%s16373_s9 + $0x61a] sm:$0xff] }
 0x1e7   : > { %v2072_v45 = vpop.f32.mrf.mxu0  ;;  %v12485_v59 = vld [vmem:[%s16373_s9 + $0x618] sm:$0xff] }
 0x1e8   : > { %v2306_v3 = vpop.f32.mrf.mxu1  ;;  %v3260_v45 = vpack.c.bf16 %v12403_v1, %v12402_v20 }
 0x1e9   : > { %v14916_v60 = vpop.f32.mrf.mxu0  ;;  %15123 = vmatmul.mubr.msk.bf16.gmra.mxu0 %vm347_vm1, %v3256_v13 }
 0x1ea   : > { %v2163_v31 = vadd.f32 %v14916_v60, %v17352_v49  ;;  %v14970_v17 = vpop.f32.mrf.mxu1  ;;  %15177 = vmatmul.mubr.msk.bf16.gmra.mxu1 %vm347_vm1, %v3648_v32  ;;  %15126 = vmatprep.mubr.msk.bf16.mxu0 %vm347_vm1, %v3257_v42  ;;  %v12486_v32 = vld [vmem:[%s16373_s9 + $0x620] sm:$0xff] }
 0x1eb   : > { %v2082_v30 = vpop.f32.mrf.mxu0  ;;  %15180 = vmatprep.mubr.msk.bf16.mxu1 %vm347_vm1, %v3649_v33  ;;  %v3653_v38 = vpack.c.bf16 %v12486_v32, %v12485_v59  ;;  %v12492_v59 = vld [vmem:[%s16373_s9 + $0x650] sm:$0xff] }
 0x1ec   : > { %v17625_v8 = vadd.f32 %v14970_v17, %v2163_v31  ;;  %v2161_v54 = vadd.f32 %v2082_v30, %v17357_v7  ;;  %v2316_v49 = vpop.f32.mrf.mxu1  ;;  %v3261_v31 = vpack.c.bf16 %v12405_v53, %v12404_v50  ;;  %v12411_v50 = vld [vmem:[%s16373_s9 + $0x64a] sm:$0xff]  ;;  %v12412_v32 = vld [vmem:[%s16373_s9 + $0x652] sm:$0xff] }
 0x1ed   : > { %v14917_v6 = vpop.f32.mrf.mxu0  ;;  %v12491_v53 = vld [vmem:[%s16373_s9 + $0x648] sm:$0xff] }
 0x1ee   : > { %v17630_v24 = vadd.f32 %v2316_v49, %v2161_v54  ;;  %v14971_v28 = vpop.f32.mrf.mxu1  ;;  %v12488_v49 = vld [vmem:[%s16373_s9 + $0x630] sm:$0xff] }
 0x1ef   : > { %v2085_v19 = vpop.f32.mrf.mxu0  ;;  %v12489_v28 = vld [vmem:[%s16373_s9 + $0x638] sm:$0xff] }
 0x1f0   : > { %v2162_v7 = vadd.f32 %v2085_v19, %v17361_v62  ;;  %v2319_v5 = vpop.f32.mrf.mxu1  ;;  %v12484_v62 = vld [vmem:[%s16373_s9 + $0x610] sm:$0xff] }
 0x1f1   : > { %v14920_v40 = vpop.f32.mrf.mxu0  ;;  %15127 = vmatmul.mubr.msk.bf16.gmra.mxu0 %vm347_vm1, %v3258_v0  ;;  %v3652_v60 = vpack.c.bf16 %v12484_v62, %v12483_v25  ;;  %v12410_v62 = vld [vmem:[%s16373_s9 + $0x642] sm:$0xff] }
 0x1f2   : > { %v17634_v22 = vadd.f32 %v2319_v5, %v2162_v7  ;;  %v14974_v57 = vpop.f32.mrf.mxu1  ;;  %15181 = vmatmul.mubr.msk.bf16.gmra.mxu1 %vm347_vm1, %v3650_v51  ;;  %15130 = vmatprep.mubr.msk.bf16.mxu0 %vm347_vm1, %v3259_v2  ;;  %v12490_v51 = vld [vmem:[%s16373_s9 + $0x640] sm:$0xff]  ;;  %v3654_v5 = vpack.c.bf16 %v12488_v49, %v12487_v61  ;;  %v3263_v40 = vpack.c.bf16 %v12409_v52, %v12408_v63 }
 0x1f3   : > { %v2097_v23 = vpop.f32.mrf.mxu0  ;;  %15184 = vmatprep.mubr.msk.bf16.mxu1 %vm347_vm1, %v3651_v48  ;;  %v3655_v20 = vpack.c.bf16 %v12490_v51, %v12489_v28  ;;  %v12414_v52 = vld [vmem:[%s16373_s9 + $0x662] sm:$0xff]  ;;  %v12416_v51 = vld [vmem:[%s16373_s9 + $0x672] sm:$0xff] }
 0x1f4   : > { %v2331_v13 = vpop.f32.mrf.mxu1 }
 0x1f5   : > { %v14921_v42 = vpop.f32.mrf.mxu0 }
 0x1f6   : > { %v2164_v33 = vadd.f32 %v14921_v42, %v17375_v58  ;;  %v14975_v3 = vpop.f32.mrf.mxu1  ;;  %v12406_v58 = vld [vmem:[%s16373_s9 + $0x622] sm:$0xff]  ;;  %v12413_v42 = vld [vmem:[%s16373_s9 + $0x65a] sm:$0xff] }
 0x1f7   : > { %v2099_v17 = vpop.f32.mrf.mxu0  ;;  %v3262_v19 = vpack.c.bf16 %v12407_v12, %v12406_v58 }
 0x1f8   : > { %v17648_v35 = vadd.f32 %v14975_v3, %v2164_v33  ;;  %v2333_v36 = vpop.f32.mrf.mxu1  ;;  %v12493_v3 = vld [vmem:[%s16373_s9 + $0x658] sm:$0xff] }
 0x1f9   : > { %v14924_v30 = vpop.f32.mrf.mxu0  ;;  %15131 = vmatmul.mubr.msk.bf16.gmra.mxu0 %vm347_vm1, %v3260_v45  ;;  %v3656_v36 = vpack.c.bf16 %v12492_v59, %v12491_v53  ;;  %v12419_v59 = vld [vmem:[%s16373_s9 + $0x68a] sm:$0xff] }
 0x1fa   : > { %v14978_v11 = vpop.f32.mrf.mxu1  ;;  %15185 = vmatmul.mubr.msk.bf16.gmra.mxu1 %vm347_vm1, %v3652_v60  ;;  %15134 = vmatprep.mubr.msk.bf16.mxu0 %vm347_vm1, %v3261_v31  ;;  %v12494_v60 = vld [vmem:[%s16373_s9 + $0x660] sm:$0xff]  ;;  %v3264_v31 = vpack.c.bf16 %v12411_v50, %v12410_v62  ;;  %v3265_v30 = vpack.c.bf16 %v12413_v42, %v12412_v32  ;;  %v12499_v32 = vld [vmem:[%s16373_s9 + $0x688] sm:$0xff] }
 0x1fb   : > { %v2110_v54 = vpop.f32.mrf.mxu0  ;;  %15188 = vmatprep.mubr.msk.bf16.mxu1 %vm347_vm1, %v3653_v38  ;;  %v3657_v58 = vpack.c.bf16 %v12494_v60, %v12493_v3  ;;  %v12585_v3 = vld [vmem:[%s16373_s9 + $0x14a] sm:$0xff]  ;;  %v12586_v60 = vld [vmem:[%s16373_s9 + $0x152] sm:$0xff] }
 0x1fc   : > { %v2165_v6 = vadd.f32 %v2110_v54, %v17397_v29  ;;  %v2344_v0 = vpop.f32.mrf.mxu1 }
 0x1fd   : > { %v14925_v2 = vpop.f32.mrf.mxu0 }
 0x1fe   : > { %v17663_v48 = vadd.f32 %v2344_v0, %v2165_v6  ;;  %v14979_v7 = vpop.f32.mrf.mxu1  ;;  %v12415_v6 = vld [vmem:[%s16373_s9 + $0x66a] sm:$0xff]  ;;  %v12417_v2 = vld [vmem:[%s16373_s9 + $0x67a] sm:$0xff] }
 0x1ff   : > { %v2113_v57 = vpop.f32.mrf.mxu0  ;;  %v12495_v0 = vld [vmem:[%s16373_s9 + $0x668] sm:$0xff]  ;;  %v12497_v7 = vld [vmem:[%s16373_s9 + $0x678] sm:$0xff] }
 0x200   : > { %v2347_v1 = vpop.f32.mrf.mxu1  ;;  %v3266_v57 = vpack.c.bf16 %v12415_v6, %v12414_v52 }
 0x201   : > { %v14928_v29 = vpop.f32.mrf.mxu0  ;;  %15135 = vmatmul.mubr.msk.bf16.gmra.mxu0 %vm347_vm1, %v3262_v19 }
 0x202   : > { %v2167_v25 = vadd.f32 %v14928_v29, %v17420_v47  ;;  %v14982_v23 = vpop.f32.mrf.mxu1  ;;  %15189 = vmatmul.mubr.msk.bf16.gmra.mxu1 %vm347_vm1, %v3654_v5  ;;  %15138 = vmatprep.mubr.msk.bf16.mxu0 %vm347_vm1, %v3263_v40  ;;  %v12498_v5 = vld [vmem:[%s16373_s9 + $0x680] sm:$0xff]  ;;  %v3267_v29 = vpack.c.bf16 %v12417_v2, %v12416_v51 }
 0x203   : > { %v2123_v13 = vpop.f32.mrf.mxu0  ;;  %15192 = vmatprep.mubr.msk.bf16.mxu1 %vm347_vm1, %v3655_v20  ;;  %v12587_v51 = vld [vmem:[%s16373_s9 + $0x15a] sm:$0xff]  ;;  %v12588_v2 = vld [vmem:[%s16373_s9 + $0x162] sm:$0xff] }
 0x204   : > { %v17676_v45 = vadd.f32 %v14982_v23, %v2167_v25  ;;  %v2357_v33 = vpop.f32.mrf.mxu1  ;;  %v3659_v23 = vpack.c.bf16 %v12498_v5, %v12497_v7  ;;  %v12418_v13 = vld [vmem:[%s16373_s9 + $0x682] sm:$0xff]  ;;  %v17725_v7 = vld [vmem:[%s16373_s9 + $0x156] sm:$0xff] }
 0x205   : > { %v14929_v47 = vpop.f32.mrf.mxu0  ;;  %v12500_v33 = vld [vmem:[%s16373_s9 + $0x690] sm:$0xff] }
 0x206   : > { %v2168_v17 = vadd.f32 %v14929_v47, %v17429_v55  ;;  %v14983_v38 = vpop.f32.mrf.mxu1 }
 0x207   : > { %v2125_v11 = vpop.f32.mrf.mxu0 }
 0x208   : > { %v17681_v12 = vadd.f32 %v14983_v38, %v2168_v17  ;;  %v2166_v61 = vadd.f32 %v2125_v11, %v17433_v15  ;;  %v2359_v54 = vpop.f32.mrf.mxu1  ;;  %v12496_v15 = vld [vmem:[%s16373_s9 + $0x670] sm:$0xff]  ;;  %v12530_v17 = vld [vmem:[%s16373_s9 + $0x13e] sm:$0xff]  ;;  %v12531_v38 = vld [vmem:[%s16373_s9 + $0x146] sm:$0xff] }
 0x209   : > { %v14932_v49 = vpop.f32.mrf.mxu0  ;;  %15139 = vmatmul.mubr.msk.bf16.gmra.mxu0 %vm347_vm1, %v3264_v31  ;;  %v3658_v1 = vpack.c.bf16 %v12496_v15, %v12495_v0 }
 0x20a   : > { %v17685_v55 = vadd.f32 %v2359_v54, %v2166_v61  ;;  %v14986_v63 = vpop.f32.mrf.mxu1  ;;  %15193 = vmatmul.mubr.msk.bf16.gmra.mxu1 %vm347_vm1, %v3656_v36  ;;  %15142 = vmatprep.mubr.msk.bf16.mxu0 %vm347_vm1, %v3265_v30  ;;  %v3268_v30 = vpack.c.bf16 %v12419_v59, %v12418_v13  ;;  %v3660_v61 = vpack.c.bf16 %v12500_v33, %v12499_v32  ;;  %v4880_v13 = vsel %vm426_vm0, %v17508_v4, 0  ;;  %v17752_v4 = vld [vmem:[%s20641_s1 + $0x1c] sm:$0x3] }
 0x20b   : > { %v2138_v28 = vpop.f32.mrf.mxu0  ;;  %15196 = vmatprep.mubr.msk.bf16.mxu1 %vm347_vm1, %v3657_v58  ;;  %v4111_v54 = vpack.c.bf16 %v12586_v60, %v12585_v3  ;;  %v4029_v63 = vpack.c.bf16 %v12531_v38, %v12530_v17  ;;  %v5272_v33 = vsel %vm426_vm0, %v17516_v10, 0  ;;  %v12591_v60 = vld [vmem:[%s16373_s9 + $0x17a] sm:$0xff]  ;;  %v12592_v10 = vld [vmem:[%s16373_s9 + $0x182] sm:$0xff] }
 0x20c   : > { %v2372_v19 = vpop.f32.mrf.mxu1  ;;  %v17762_v17 = vld [vmem:[%s20641_s1 + $0x1e] sm:$0x3] }
 0x20d   : > { %v14933_v40 = vpop.f32.mrf.mxu0  ;;  %v12532_v19 = vld [vmem:[%s16373_s9 + $0x14e] sm:$0xff] }
 0x20e   : > { %v14987_v20 = vpop.f32.mrf.mxu1 }
 0x20f   : > { %v2140_v25 = vpop.f32.mrf.mxu0 }
 0x210   : > { %v2374_v62 = vpop.f32.mrf.mxu1  ;;  %v17735_v25 = vld [vmem:[%s16373_s9 + $0x166] sm:$0xff] }
 0x211   : > { %v14992_v50 = vpop.f32.mrf.mxu0  ;;  %15143 = vmatmul.mubr.msk.bf16.gmra.mxu0 %vm347_vm1, %v3266_v57  ;;  %v12589_v57 = vld [vmem:[%s16373_s9 + $0x16a] sm:$0xff] }
 0x212   : > { %v15046_v53 = vpop.f32.mrf.mxu1  ;;  %15197 = vmatmul.mubr.msk.bf16.gmra.mxu1 %vm347_vm1, %v3658_v1  ;;  %15146 = vmatprep.mubr.msk.bf16.mxu0 %vm347_vm1, %v3267_v29  ;;  %v4112_v1 = vpack.c.bf16 %v12588_v2, %v12587_v51  ;;  %v17732_v29 = vld [vmem:[%s16373_s9 + $0x15e] sm:$0xff]  ;;  %v4030_v50 = vpack.c.bf16 %v17725_v7, %v12532_v19 }
 0x213   : > { %v2600_v42 = vpop.f32.mrf.mxu0  ;;  %15200 = vmatprep.mubr.msk.bf16.mxu1 %vm347_vm1, %v3659_v23 }
 0x214   : > { %v2775_v47 = vadd.f32 %v2600_v42, %v17475_v21  ;;  %v2994_v31 = vpop.f32.mrf.mxu1 }
 0x215   : > { %v14993_v36 = vpop.f32.mrf.mxu0 }
 0x216   : > { %v17711_v11 = vadd.f32 %v2994_v31, %v2775_v47  ;;  %v15047_v58 = vpop.f32.mrf.mxu1  ;;  %v17757_v31 = vld [vmem:[%s16373_s9 + $0x16e] sm:$0xff]  ;;  %v17766_v36 = vld [vmem:[%s16373_s9 + $0x176] sm:$0xff] }
 0x217   : > { %v2603_v49 = vpop.f32.mrf.mxu0  ;;  %v12594_v58 = vld [vmem:[%s16373_s9 + $0x192] sm:$0xff] }
 0x218   : > { %v2776_v52 = vadd.f32 %v2603_v49, %v17481_v46  ;;  %v2997_v6 = vpop.f32.mrf.mxu1  ;;  %v17773_v49 = vld [vmem:[%s16373_s9 + $0x17e] sm:$0xff] }
 0x219   : > { %v14996_v21 = vpop.f32.mrf.mxu0  ;;  %15147 = vmatmul.mubr.msk.bf16.gmra.mxu0 %vm347_vm1, %v3268_v30  ;;  %v12593_v30 = vld [vmem:[%s16373_s9 + $0x18a] sm:$0xff] }
 0x21a   : > { %v17715_v0 = vadd.f32 %v2997_v6, %v2776_v52  ;;  %v2777_v28 = vadd.f32 %v14996_v21, %v17489_v56  ;;  %v15050_v15 = vpop.f32.mrf.mxu1  ;;  %15201 = vmatmul.mubr.msk.bf16.gmra.mxu1 %vm347_vm1, %v3660_v61  ;;  %15206 = vmatprep.mubr.msk.bf16.mxu0 %vm347_vm1, %v4111_v54  ;;  %v12590_v56 = vld [vmem:[%s16373_s9 + $0x172] sm:$0xff]  ;;  %v4114_v6 = vpack.c.bf16 %v12592_v10, %v12591_v60 }
 0x21b   : > { %v2614_v46 = vpop.f32.mrf.mxu0  ;;  %15260 = vmatprep.mubr.msk.bf16.mxu1 %vm347_vm1, %v4029_v63  ;;  %v4113_v59 = vpack.c.bf16 %v12590_v56, %v12589_v57  ;;  %v17776_v63 = vld [vmem:[%s16373_s9 + $0x186] sm:$0xff]  ;;  %v12595_v56 = vld [vmem:[%s16373_s9 + $0x19a] sm:$0xff] }
 0x21c   : > { %v17727_v5 = vadd.f32 %v15050_v15, %v2777_v28  ;;  %v3008_v40 = vpop.f32.mrf.mxu1  ;;  %v4032_v28 = vpack.c.bf16 %v17766_v36, %v17757_v31  ;;  %v4115_v15 = vpack.c.bf16 %v12594_v58, %v12593_v30  ;;  %v4033_v2 = vpack.c.bf16 %v17776_v63, %v17773_v49 }
 0x21d   : > { %v14997_v20 = vpop.f32.mrf.mxu0 }
 0x21e   : > { %v2778_v23 = vadd.f32 %v14997_v20, %v17498_v16  ;;  %v15051_v62 = vpop.f32.mrf.mxu1  ;;  %v4031_v16 = vpack.c.bf16 %v17735_v25, %v17732_v29  ;;  %v12596_v20 = vld [vmem:[%s16373_s9 + $0x1a2] sm:$0xff] }
 0x21f   : > { %v2616_v53 = vpop.f32.mrf.mxu0 }
 0x220   : > { %v17741_v32 = vadd.f32 %v15051_v62, %v2778_v23  ;;  %v3010_v42 = vpop.f32.mrf.mxu1  ;;  %v17799_v62 = vld [vmem:[%s16373_s9 + $0x196] sm:$0xff] }
 0x221   : > { %v15000_v3 = vpop.f32.mrf.mxu0  ;;  %15207 = vmatmul.mubr.msk.bf16.vlgmr.msra.gmra.mxu0 %vm347_vm1, %v4112_v1  ;;  %v17795_v1 = vld [vmem:[%s16373_s9 + $0x18e] sm:$0xff]  ;;  %v17809_v42 = vld [vmem:[%s16373_s9 + $0x1a6] sm:$0xff] }
 0x222   : > { %v15054_v47 = vpop.f32.mrf.mxu1  ;;  %15261 = vmatmul.mubr.msk.bf16.vlgmr.msra.gmra.mxu1 %vm347_vm1, %v4030_v50  ;;  %15313 = vmatpush3.bf16.msra.mxu0 %v4880_v13  ;;  %v12597_v50 = vld [vmem:[%s16373_s9 + $0x1aa] sm:$0xff]  ;;  %v12598_v53 = vld [vmem:[%s16373_s9 + $0x1b2] sm:$0xff]  ;;  %v4034_v60 = vpack.c.bf16 %v17799_v62, %v17795_v1 }
 0x223   : > { %v2628_v38 = vpop.f32.mrf.mxu0  ;;  %15367 = vmatpush3.bf16.msra.mxu1 %v5272_v33  ;;  %15210 = vmatprep.mubr.msk.bf16.mxu0 %vm347_vm1, %v4113_v59  ;;  %v4117_v47 = vpack.c.bf16 %v12598_v53, %v12597_v50 }
 0x224   : > { %v2779_v61 = vadd.f32 %v2628_v38, %v17527_v39  ;;  %v3022_v54 = vpop.f32.mrf.mxu1  ;;  %15264 = vmatprep.mubr.msk.bf16.mxu1 %vm347_vm1, %v4031_v16  ;;  %16190 = vmatprep.subr.msk.bf16.mxu0 %vm426_vm0, %v17752_v4  ;;  %v4116_v16 = vpack.c.bf16 %v12596_v20, %v12595_v56 }
 0x225   : > { %v15001_v52 = vpop.f32.mrf.mxu0  ;;  %16191 = vmatprep.subr.msk.bf16.mxu1 %vm426_vm0, %v17762_v17 }
 0x226   : > { %v17782_v21 = vadd.f32 %v3022_v54, %v2779_v61  ;;  %v15055_v39 = vpop.f32.mrf.mxu1 }
 0x227   : > { %v2631_v51 = vpop.f32.mrf.mxu0  ;;  %v12600_v39 = vld [vmem:[%s16373_s9 + $0x1c2] sm:$0xff] }
 0x228   : > { %v3025_v46 = vpop.f32.mrf.mxu1  ;;  %v12601_v51 = vld [vmem:[%s16373_s9 + $0x1ca] sm:$0xff] }
 0x229   : > { %v15004_v19 = vpop.f32.mrf.mxu0  ;;  %15211 = vmatmul.mubr.msk.bf16.gmra.mxu0 %vm347_vm1, %v4114_v6  ;;  %v12599_v6 = vld [vmem:[%s16373_s9 + $0x1ba] sm:$0xff] }
 0x22a   : > { %v2781_v40 = vadd.f32 %v15004_v19, %v17542_v44  ;;  %v15058_v57 = vpop.f32.mrf.mxu1  ;;  %15265 = vmatmul.mubr.msk.bf16.gmra.mxu1 %vm347_vm1, %v4032_v28  ;;  %15214 = vmatprep.mubr.msk.bf16.mxu0 %vm347_vm1, %v4115_v15  ;;  %v17806_v44 = vld [vmem:[%s16373_s9 + $0x19e] sm:$0xff]  ;;  %v17824_v28 = vld [vmem:[%s16373_s9 + $0x1ae] sm:$0xff]  ;;  %v4118_v56 = vpack.c.bf16 %v12600_v39, %v12599_v6 }
 0x22b   : > { %v2641_v23 = vpop.f32.mrf.mxu0  ;;  %15268 = vmatprep.mubr.msk.bf16.mxu1 %vm347_vm1, %v4033_v2  ;;  %v4035_v38 = vpack.c.bf16 %v17809_v42, %v17806_v44  ;;  %v12602_v2 = vld [vmem:[%s16373_s9 + $0x1d2] sm:$0xff]  ;;  %v17833_v19 = vld [vmem:[%s16373_s9 + $0x1be] sm:$0xff] }
 0x22c   : > { %v17803_v13 = vadd.f32 %v15058_v57, %v2781_v40  ;;  %v3035_v59 = vpop.f32.mrf.mxu1  ;;  %v17836_v40 = vld [vmem:[%s16373_s9 + $0x1c6] sm:$0xff]  ;;  %v4119_v53 = vpack.c.bf16 %v12602_v2, %v12601_v51 }
 0x22d   : > { %v15005_v33 = vpop.f32.mrf.mxu0  ;;  %v17864_v51 = vld [vmem:[%s16373_s9 + $0x1e6] sm:$0xff] }
 0x22e   : > { %v15059_v3 = vpop.f32.mrf.mxu1  ;;  %v4037_v33 = vpack.c.bf16 %v17836_v40, %v17833_v19 }
 0x22f   : > { %v2643_v10 = vpop.f32.mrf.mxu0 }
 0x230   : > { %v2780_v30 = vadd.f32 %v2643_v10, %v17550_v41  ;;  %v3037_v58 = vpop.f32.mrf.mxu1  ;;  %v17828_v41 = vld [vmem:[%s16373_s9 + $0x1b6] sm:$0xff]  ;;  %v12604_v10 = vld [vmem:[%s16373_s9 + $0x1e2] sm:$0xff] }
 0x231   : > { %v15008_v61 = vpop.f32.mrf.mxu0  ;;  %15215 = vmatmul.mubr.msk.bf16.gmra.mxu0 %vm347_vm1, %v4116_v16  ;;  %v4036_v50 = vpack.c.bf16 %v17828_v41, %v17824_v28 }
 0x232   : > { %v17817_v54 = vadd.f32 %v3037_v58, %v2780_v30  ;;  %v15062_v52 = vpop.f32.mrf.mxu1  ;;  %15269 = vmatmul.mubr.msk.bf16.gmra.mxu1 %vm347_vm1, %v4034_v60  ;;  %15218 = vmatprep.mubr.msk.bf16.mxu0 %vm347_vm1, %v4117_v47  ;;  %v12603_v47 = vld [vmem:[%s16373_s9 + $0x1da] sm:$0xff]  ;;  %v12605_v61 = vld [vmem:[%s16373_s9 + $0x1ea] sm:$0xff] }
 0x233   : > { %v2655_v15 = vpop.f32.mrf.mxu0  ;;  %15272 = vmatprep.mubr.msk.bf16.mxu1 %vm347_vm1, %v4035_v38  ;;  %v17851_v38 = vld [vmem:[%s16373_s9 + $0x1ce] sm:$0xff]  ;;  %v17855_v58 = vld [vmem:[%s16373_s9 + $0x1d6] sm:$0xff] }
 0x234   : > { %v3049_v46 = vpop.f32.mrf.mxu1  ;;  %v12606_v52 = vld [vmem:[%s16373_s9 + $0x1f2] sm:$0xff]  ;;  %v17861_v15 = vld [vmem:[%s16373_s9 + $0x1de] sm:$0xff] }
 0x235   : > { %v15009_v57 = vpop.f32.mrf.mxu0  ;;  %v4120_v46 = vpack.c.bf16 %v12604_v10, %v12603_v47  ;;  %v12607_v47 = vld [vmem:[%s16373_s9 + $0x1fa] sm:$0xff]  ;;  %v12608_v10 = vld [vmem:[%s16373_s9 + $0x202] sm:$0xff] }
 0x236   : > { %v2782_v20 = vadd.f32 %v15009_v57, %v17564_v27  ;;  %v15063_v23 = vpop.f32.mrf.mxu1 }
 0x237   : > { %v2657_v59 = vpop.f32.mrf.mxu0 }
 0x238   : > { %v17843_v16 = vadd.f32 %v15063_v23, %v2782_v20  ;;  %v3051_v3 = vpop.f32.mrf.mxu1  ;;  %v4038_v20 = vpack.c.bf16 %v17855_v58, %v17851_v38  ;;  %v4121_v23 = vpack.c.bf16 %v12606_v52, %v12605_v61  ;;  %v17886_v61 = vld [vmem:[%s16373_s9 + $0x1f6] sm:$0xff]  ;;  %v12609_v52 = vld [vmem:[%s16373_s9 + $0x20a] sm:$0xff] }
 0x239   : > { %v15012_v60 = vpop.f32.mrf.mxu0  ;;  %15219 = vmatmul.mubr.msk.bf16.gmra.mxu0 %vm347_vm1, %v4118_v56 }
 0x23a   : > { %v15066_v27 = vpop.f32.mrf.mxu1  ;;  %15273 = vmatmul.mubr.msk.bf16.gmra.mxu1 %vm347_vm1, %v4036_v50  ;;  %15222 = vmatprep.mubr.msk.bf16.mxu0 %vm347_vm1, %v4119_v53 }
 0x23b   : > { %v2668_v30 = vpop.f32.mrf.mxu0  ;;  %15276 = vmatprep.mubr.msk.bf16.mxu1 %vm347_vm1, %v4037_v33 }
 0x23c   : > { %v2783_v6 = vadd.f32 %v2668_v30, %v17579_v9  ;;  %v3062_v39 = vpop.f32.mrf.mxu1  ;;  %v4039_v9 = vpack.c.bf16 %v17864_v51, %v17861_v15  ;;  %v17882_v30 = vld [vmem:[%s16373_s9 + $0x1ee] sm:$0xff] }
 0x23d   : > { %v15013_v2 = vpop.f32.mrf.mxu0 }
 0x23e   : > { %v17866_v57 = vadd.f32 %v3062_v39, %v2783_v6  ;;  %v15067_v56 = vpop.f32.mrf.mxu1  ;;  %v12610_v6 = vld [vmem:[%s16373_s9 + $0x212] sm:$0xff] }
 0x23f   : > { %v2671_v50 = vpop.f32.mrf.mxu0 }
 0x240   : > { %v2784_v53 = vadd.f32 %v2671_v50, %v17583_v43  ;;  %v3065_v59 = vpop.f32.mrf.mxu1 }
 0x241   : > { %v15016_v33 = vpop.f32.mrf.mxu0  ;;  %15223 = vmatmul.mubr.msk.bf16.gmra.mxu0 %vm347_vm1, %v4120_v46  ;;  %v17896_v46 = vld [vmem:[%s16373_s9 + $0x206] sm:$0xff] }
 0x242   : > { %v17874_v3 = vadd.f32 %v3065_v59, %v2784_v53  ;;  %v2785_v60 = vadd.f32 %v15016_v33, %v17595_v37  ;;  %v15070_v27 = vpop.f32.mrf.mxu1  ;;  %15277 = vmatmul.mubr.msk.bf16.gmra.mxu1 %vm347_vm1, %v4038_v20  ;;  %15226 = vmatprep.mubr.msk.bf16.mxu0 %vm347_vm1, %v4121_v23  ;;  %v17893_v37 = vld [vmem:[%s16373_s9 + $0x1fe] sm:$0xff]  ;;  %v4122_v20 = vpack.c.bf16 %v12608_v10, %v12607_v47 }
 0x243   : > { %v2682_v43 = vpop.f32.mrf.mxu0  ;;  %15280 = vmatprep.mubr.msk.bf16.mxu1 %vm347_vm1, %v4039_v9  ;;  %v4040_v9 = vpack.c.bf16 %v17886_v61, %v17882_v30  ;;  %v4123_v53 = vpack.c.bf16 %v12610_v6, %v12609_v52  ;;  %v4041_v33 = vpack.c.bf16 %v17896_v46, %v17893_v37  ;;  %v12611_v10 = vld [vmem:[%s16373_s9 + $0x21a] sm:$0xff]  ;;  %v17911_v52 = vld [vmem:[%s16373_s9 + $0x20e] sm:$0xff] }
 0x244   : > { %v17890_v39 = vadd.f32 %v15070_v27, %v2785_v60  ;;  %v3076_v2 = vpop.f32.mrf.mxu1  ;;  %v12612_v43 = vld [vmem:[%s16373_s9 + $0x222] sm:$0xff] }
 0x245   : > { %v15017_v56 = vpop.f32.mrf.mxu0  ;;  %v17915_v2 = vld [vmem:[%s16373_s9 + $0x216] sm:$0xff] }
 0x246   : > { %v2786_v23 = vadd.f32 %v15017_v56, %v17600_v18  ;;  %v15071_v50 = vpop.f32.mrf.mxu1  ;;  %20775 = vst [vmem:[#allocation48_spill] sm:$0xff] %v17915_v2  ;;  %v12613_v56 = vld [vmem:[%s16373_s9 + $0x22a] sm:$0xff] }
 0x247   : > { %v2684_v59 = vpop.f32.mrf.mxu0 }
 0x248   : > { %v17903_v60 = vadd.f32 %v15071_v50, %v2786_v23  ;;  %v3078_v27 = vpop.f32.mrf.mxu1  ;;  %v12614_v23 = vld [vmem:[%s16373_s9 + $0x232] sm:$0xff]  ;;  %v17920_v59 = vld [vmem:[%s16373_s9 + $0x21e] sm:$0xff] }
 0x249   : > { %v15020_v47 = vpop.f32.mrf.mxu0  ;;  %15227 = vmatmul.mubr.msk.bf16.gmra.mxu0 %vm347_vm1, %v4122_v20  ;;  %20776 = vst [vmem:[#allocation49_spill] sm:$0xff] %v17920_v59  ;;  %v17923_v20 = vld [vmem:[%s16373_s9 + $0x226] sm:$0xff] }
 0x24a   : > { %v15074_v18 = vpop.f32.mrf.mxu1  ;;  %15281 = vmatmul.mubr.msk.bf16.gmra.mxu1 %vm347_vm1, %v4040_v9  ;;  %15230 = vmatprep.mubr.msk.bf16.mxu0 %vm347_vm1, %v4123_v53  ;;  %20777 = vst [vmem:[#allocation50_spill] sm:$0xff] %v17923_v20  ;;  %v4124_v53 = vpack.c.bf16 %v12612_v43, %v12611_v10  ;;  %v4042_v47 = vpack.c.bf16 %v17915_v2, %v17911_v52  ;;  %v12615_v43 = vld [vmem:[%s16373_s9 + $0x23a] sm:$0xff] }
 0x24b   : > { %v2696_v6 = vpop.f32.mrf.mxu0  ;;  %15284 = vmatprep.mubr.msk.bf16.mxu1 %vm347_vm1, %v4041_v33  ;;  %v4125_v33 = vpack.c.bf16 %v12614_v23, %v12613_v56  ;;  %v12616_v56 = vld [vmem:[%s16373_s9 + $0x242] sm:$0xff]  ;;  %v17936_v23 = vld [vmem:[%s16373_s9 + $0x22e] sm:$0xff] }
 0x24c   : > { %v3090_v50 = vpop.f32.mrf.mxu1  ;;  %v4043_v6 = vpack.c.bf16 %v17923_v20, %v17920_v59  ;;  %v4126_v20 = vpack.c.bf16 %v12616_v56, %v12615_v43 }
 0x24d   : > { %v15021_v9 = vpop.f32.mrf.mxu0 }
 0x24e   : > { %v15075_v27 = vpop.f32.mrf.mxu1 }
 0x24f   : > { %v2698_v18 = vpop.f32.mrf.mxu0 }
 0x250   : > { %v3092_v50 = vpop.f32.mrf.mxu1  ;;  %v17940_v18 = vld [vmem:[%s16373_s9 + $0x236] sm:$0xff] }
 0x251   : > { %v15024_v34 = vpop.f32.mrf.mxu0  ;;  %15231 = vmatmul.mubr.msk.bf16.gmra.mxu0 %vm347_vm1, %v4124_v53  ;;  %v12617_v50 = vld [vmem:[%s16373_s9 + $0x24a] sm:$0xff]  ;;  %v12618_v53 = vld [vmem:[%s16373_s9 + $0x252] sm:$0xff]  ;;  %v4044_v2 = vpack.c.bf16 %v17940_v18, %v17936_v23 }
 0x252   : > { %v2789_v9 = vadd.f32 %v15024_v34, %v17625_v8  ;;  %v15078_v10 = vpop.f32.mrf.mxu1  ;;  %15285 = vmatmul.mubr.msk.bf16.gmra.mxu1 %vm347_vm1, %v4042_v47  ;;  %15234 = vmatprep.mubr.msk.bf16.mxu0 %vm347_vm1, %v4125_v33  ;;  %v17951_v47 = vld [vmem:[%s16373_s9 + $0x246] sm:$0xff] }
 0x253   : > { %v2708_v27 = vpop.f32.mrf.mxu0  ;;  %15288 = vmatprep.mubr.msk.bf16.mxu1 %vm347_vm1, %v4043_v6  ;;  %20779 = vst [vmem:[#allocation52_spill] sm:$0xff] %v17951_v47 }
 0x254   : > { %v17944_v26 = vadd.f32 %v15078_v10, %v2789_v9  ;;  %v2787_v34 = vadd.f32 %v2708_v27, %v17630_v24  ;;  %v3102_v8 = vpop.f32.mrf.mxu1  ;;  %v4127_v9 = vpack.c.bf16 %v12618_v53, %v12617_v50  ;;  %v4045_v24 = vpack.c.bf16 %v17951_v47, %v17948_v14  ;;  %v12619_v50 = vld [vmem:[%s16373_s9 + $0x25a] sm:$0xff]  ;;  %v12620_v53 = vld [vmem:[%s16373_s9 + $0x262] sm:$0xff] }
 0x255   : > { %v15025_v33 = vpop.f32.mrf.mxu0 }
 0x256   : > { %20778 = vst [vmem:[#allocation51_spill] sm:$0xff] %v17944_v26  ;;  %v17953_v59 = vadd.f32 %v3102_v8, %v2787_v34  ;;  %v15079_v6 = vpop.f32.mrf.mxu1  ;;  %v17968_v8 = vld [vmem:[%s16373_s9 + $0x24e] sm:$0xff] }
 0x257   : > { %v2711_v10 = vpop.f32.mrf.mxu0  ;;  %20782 = vst [vmem:[#allocation55_spill] sm:$0xff] %v17968_v8 }
 0x258   : > { %20780 = vst [vmem:[#allocation53_spill] sm:$0xff] %v17953_v59  ;;  %v2788_v27 = vadd.f32 %v2711_v10, %v17634_v22  ;;  %v3105_v33 = vpop.f32.mrf.mxu1  ;;  %v17972_v22 = vld [vmem:[%s16373_s9 + $0x256] sm:$0xff]  ;;  %v12621_v10 = vld [vmem:[%s16373_s9 + $0x26a] sm:$0xff] }
 0x259   : > { %v15028_v43 = vpop.f32.mrf.mxu0  ;;  %15235 = vmatmul.mubr.msk.bf16.gmra.mxu0 %vm347_vm1, %v4126_v20  ;;  %20783 = vst [vmem:[#allocation56_spill] sm:$0xff] %v17972_v22  ;;  %v17977_v20 = vld [vmem:[%s16373_s9 + $0x25e] sm:$0xff] }
 0x25a   : > { %v17961_v56 = vadd.f32 %v3105_v33, %v2788_v27  ;;  %v15082_v34 = vpop.f32.mrf.mxu1  ;;  %15289 = vmatmul.mubr.msk.bf16.gmra.mxu1 %vm347_vm1, %v4044_v2  ;;  %15238 = vmatprep.mubr.msk.bf16.mxu0 %vm347_vm1, %v4127_v9  ;;  %v12622_v43 = vld [vmem:[%s16373_s9 + $0x272] sm:$0xff]  ;;  %20784 = vst [vmem:[#allocation57_spill] sm:$0xff] %v17977_v20  ;;  %v17980_v27 = vld [vmem:[%s16373_s9 + $0x266] sm:$0xff]  ;;  %v4128_v9 = vpack.c.bf16 %v12620_v53, %v12619_v50  ;;  %v12623_v53 = vld [vmem:[%s16373_s9 + $0x27a] sm:$0xff] }
 0x25b   : > { %v2723_v6 = vpop.f32.mrf.mxu0  ;;  %15292 = vmatprep.mubr.msk.bf16.mxu1 %vm347_vm1, %v4045_v24  ;;  %20785 = vst [vmem:[#allocation58_spill] sm:$0xff] %v17980_v27  ;;  %v4046_v24 = vpack.c.bf16 %v17972_v22, %v17968_v8 }
 0x25c   : > { %20781 = vst [vmem:[#allocation54_spill] sm:$0xff] %v17961_v56  ;;  %v3117_v47 = vpop.f32.mrf.mxu1  ;;  %v4129_v6 = vpack.c.bf16 %v12622_v43, %v12621_v10  ;;  %v12624_v10 = vld [vmem:[%s16373_s9 + $0x282] sm:$0xff] }
 0x25d   : > { %v15029_v2 = vpop.f32.mrf.mxu0  ;;  %v4047_v47 = vpack.c.bf16 %v17980_v27, %v17977_v20 }
 0x25e   : > { %v2790_v33 = vadd.f32 %v15029_v2, %v17648_v35  ;;  %v15083_v34 = vpop.f32.mrf.mxu1  ;;  %v17999_v2 = vld [vmem:[%s16373_s9 + $0x276] sm:$0xff] }
 0x25f   : > { %v2725_v56 = vpop.f32.mrf.mxu0 }
 0x260   : > { %v17987_v59 = vadd.f32 %v15083_v34, %v2790_v33  ;;  %v3119_v26 = vpop.f32.mrf.mxu1  ;;  %v17995_v56 = vld [vmem:[%s16373_s9 + $0x26e] sm:$0xff] }
 0x261   : > { %v15032_v50 = vpop.f32.mrf.mxu0  ;;  %15239 = vmatmul.mubr.msk.bf16.gmra.mxu0 %vm347_vm1, %v4128_v9  ;;  %v12625_v26 = vld [vmem:[%s16373_s9 + $0x28a] sm:$0xff]  ;;  %v12626_v33 = vld [vmem:[%s16373_s9 + $0x292] sm:$0xff]  ;;  %v18005_v9 = vld [vmem:[%s16373_s9 + $0x27e] sm:$0xff] }
 0x262   : > { %20786 = vst [vmem:[#allocation59_spill] sm:$0xff] %v17987_v59  ;;  %v15086_v35 = vpop.f32.mrf.mxu1  ;;  %15293 = vmatmul.mubr.msk.bf16.gmra.mxu1 %vm347_vm1, %v4046_v24  ;;  %15242 = vmatprep.mubr.msk.bf16.mxu0 %vm347_vm1, %v4129_v6  ;;  %20787 = vst [vmem:[#allocation60_spill] sm:$0xff] %v18005_v9  ;;  %v4130_v6 = vpack.c.bf16 %v12624_v10, %v12623_v53  ;;  %v4131_v20 = vpack.c.bf16 %v12626_v33, %v12625_v26  ;;  %v12627_v10 = vld [vmem:[%s16373_s9 + $0x29a] sm:$0xff]  ;;  %v12628_v26 = vld [vmem:[%s16373_s9 + $0x2a2] sm:$0xff] }
 0x263   : > { %v2736_v43 = vpop.f32.mrf.mxu0  ;;  %15296 = vmatprep.mubr.msk.bf16.mxu1 %vm347_vm1, %v4047_v47  ;;  %v18008_v35 = vld [vmem:[%s16373_s9 + $0x286] sm:$0xff]  ;;  %v4048_v47 = vpack.c.bf16 %v17999_v2, %v17995_v56  ;;  %v18023_v33 = vld [vmem:[%s16373_s9 + $0x28e] sm:$0xff] }
 0x264   : > { %v2791_v34 = vadd.f32 %v2736_v43, %v17663_v48  ;;  %v3130_v50 = vpop.f32.mrf.mxu1  ;;  %20788 = vst [vmem:[#allocation61_spill] sm:$0xff] %v18008_v35  ;;  %v4049_v43 = vpack.c.bf16 %v18008_v35, %v18005_v9 }
 0x265   : > { %v15033_v24 = vpop.f32.mrf.mxu0 }
 0x266   : > { %v18010_v59 = vadd.f32 %v3130_v50, %v2791_v34  ;;  %v15087_v27 = vpop.f32.mrf.mxu1  ;;  %v12629_v50 = vld [vmem:[%s16373_s9 + $0x2aa] sm:$0xff]  ;;  %v12630_v24 = vld [vmem:[%s16373_s9 + $0x2b2] sm:$0xff] }
 0x267   : > { %v2739_v48 = vpop.f32.mrf.mxu0 }
 0x268   : > { %20789 = vst [vmem:[#allocation62_spill] sm:$0xff] %v18010_v59  ;;  %v3133_v22 = vpop.f32.mrf.mxu1  ;;  %v4133_v59 = vpack.c.bf16 %v12630_v24, %v12629_v50  ;;  %v12631_v24 = vld [vmem:[%s16373_s9 + $0x2ba] sm:$0xff] }
 0x269   : > { %v15036_v8 = vpop.f32.mrf.mxu0  ;;  %15243 = vmatmul.mubr.msk.bf16.gmra.mxu0 %vm347_vm1, %v4130_v6  ;;  %v18027_v22 = vld [vmem:[%s16373_s9 + $0x296] sm:$0xff] }
 0x26a   : > { %v2793_v53 = vadd.f32 %v15036_v8, %v17676_v45  ;;  %v15090_v27 = vpop.f32.mrf.mxu1  ;;  %15297 = vmatmul.mubr.msk.bf16.gmra.mxu1 %vm347_vm1, %v4048_v47  ;;  %15246 = vmatprep.mubr.msk.bf16.mxu0 %vm347_vm1, %v4131_v20  ;;  %v18034_v45 = vld [vmem:[%s16373_s9 + $0x29e] sm:$0xff]  ;;  %v18037_v8 = vld [vmem:[%s16373_s9 + $0x2a6] sm:$0xff]  ;;  %v4132_v20 = vpack.c.bf16 %v12628_v26, %v12627_v10 }
 0x26b   : > { %v2749_v34 = vpop.f32.mrf.mxu0  ;;  %15300 = vmatprep.mubr.msk.bf16.mxu1 %vm347_vm1, %v4049_v43  ;;  %20791 = vst [vmem:[#allocation64_spill] sm:$0xff] %v18037_v8  ;;  %v4050_v43 = vpack.c.bf16 %v18027_v22, %v18023_v33 }
 0x26c   : > { %v18031_v6 = vadd.f32 %v15090_v27, %v2793_v53  ;;  %v3143_v48 = vpop.f32.mrf.mxu1  ;;  %v4051_v53 = vpack.c.bf16 %v18037_v8, %v18034_v45 }
 0x26d   : > { %v15037_v47 = vpop.f32.mrf.mxu0 }
 0x26e   : > { %20790 = vst [vmem:[#allocation63_spill] sm:$0xff] %v18031_v6  ;;  %v2794_v35 = vadd.f32 %v15037_v47, %v17681_v12  ;;  %v15091_v34 = vpop.f32.mrf.mxu1  ;;  %v12632_v47 = vld [vmem:[%s16373_s9 + $0x2c2] sm:$0xff] }
 0x26f   : > { %v2751_v9 = vpop.f32.mrf.mxu0 }
 0x270   : > { %v18044_v27 = vadd.f32 %v15091_v34, %v2794_v35  ;;  %v2792_v10 = vadd.f32 %v2751_v9, %v17685_v55  ;;  %v3145_v26 = vpop.f32.mrf.mxu1  ;;  %v18055_v35 = vld [vmem:[%s16373_s9 + $0x2ae] sm:$0xff]  ;;  %v18059_v55 = vld [vmem:[%s16373_s9 + $0x2b6] sm:$0xff] }
 0x271   : > { %v15040_v12 = vpop.f32.mrf.mxu0  ;;  %15247 = vmatmul.mubr.msk.bf16.gmra.mxu0 %vm347_vm1, %v4132_v20  ;;  %20794 = vst [vmem:[#allocation67_spill] sm:$0xff] %v18055_v35  ;;  %20795 = vst [vmem:[#allocation68_spill] sm:$0xff] %v18059_v55  ;;  %v12633_v9 = vld [vmem:[%s16373_s9 + $0x2ca] sm:$0xff]  ;;  %v18064_v20 = vld [vmem:[%s16373_s9 + $0x2be] sm:$0xff] }
 0x272   : > { %20792 = vst [vmem:[#allocation65_spill] sm:$0xff] %v18044_v27  ;;  %v18048_v48 = vadd.f32 %v3145_v26, %v2792_v10  ;;  %v15094_v50 = vpop.f32.mrf.mxu1  ;;  %15301 = vmatmul.mubr.msk.bf16.gmra.mxu1 %vm347_vm1, %v4050_v43  ;;  %15250 = vmatprep.mubr.msk.bf16.mxu0 %vm347_vm1, %v4133_v59  ;;  %v12634_v12 = vld [vmem:[%s16373_s9 + $0x2d2] sm:$0xff]  ;;  %20796 = vst [vmem:[#allocation69_spill] sm:$0xff] %v18064_v20  ;;  %v18067_v10 = vld [vmem:[%s16373_s9 + $0x2c6] sm:$0xff]  ;;  %v4134_v59 = vpack.c.bf16 %v12632_v47, %v12631_v24 }
 0x273   : > { %v2764_v34 = vpop.f32.mrf.mxu0  ;;  %15304 = vmatprep.mubr.msk.bf16.mxu1 %vm347_vm1, %v4051_v53  ;;  %20797 = vst [vmem:[#allocation70_spill] sm:$0xff] %v18067_v10  ;;  %v4052_v50 = vpack.c.bf16 %v18059_v55, %v18055_v35  ;;  %v4135_v53 = vpack.c.bf16 %v12634_v12, %v12633_v9  ;;  %v12635_v24 = vld [vmem:[%s16373_s9 + $0x2da] sm:$0xff]  ;;  %v12636_v47 = vld [vmem:[%s16373_s9 + $0x2e2] sm:$0xff]  ;;  %v18080_v9 = vld [vmem:[%s16373_s9 + $0x2ce] sm:$0xff] }
 0x274   : > { %20793 = vst [vmem:[#allocation66_spill] sm:$0xff] %v18048_v48  ;;  %v3158_v27 = vpop.f32.mrf.mxu1  ;;  %v18083_v12 = vld [vmem:[%s16373_s9 + $0x2d6] sm:$0xff] }
 0x275   : > { %v15041_v43 = vpop.f32.mrf.mxu0  ;;  %v4053_v27 = vpack.c.bf16 %v18067_v10, %v18064_v20  ;;  %v4773_v20 = vpack.c.bf16 %v17732_v29, %v17725_v7  ;;  %v18101_v29 = vld [vmem:[%s16373_s9 + $0x3c6] sm:$0xff] }
 0x276   : > { %v15095_v26 = vpop.f32.mrf.mxu1 }
 0x277   : > { %v2766_v34 = vpop.f32.mrf.mxu0 }
 0x278   : > { %v3160_v48 = vpop.f32.mrf.mxu1  ;;  %v12774_v34 = vld [vmem:[%s16373_s9 + $0x3b6] sm:$0xff] }
 0x279   : > { %v15100_v8 = vpop.f32.mrf.mxu0  ;;  %15251 = vmatmul.mubr.msk.bf16.gmra.mxu0 %vm347_vm1, %v4134_v59 }
 0x27a   : > { %v15154_v6 = vpop.f32.mrf.mxu1  ;;  %15305 = vmatmul.mubr.msk.bf16.gmra.mxu1 %vm347_vm1, %v4052_v50  ;;  %15254 = vmatprep.mubr.msk.bf16.mxu0 %vm347_vm1, %v4135_v53  ;;  %v12773_v8 = vld [vmem:[%s16373_s9 + $0x3ae] sm:$0xff]  ;;  %v4054_v53 = vpack.c.bf16 %v18083_v12, %v18080_v9 }
 0x27b   : > { %v3386_v43 = vpop.f32.mrf.mxu0  ;;  %15308 = vmatprep.mubr.msk.bf16.mxu1 %vm347_vm1, %v4053_v27  ;;  %v4136_v6 = vpack.c.bf16 %v12636_v47, %v12635_v24  ;;  %v5165_v55 = vpack.c.bf16 %v12774_v34, %v12773_v8  ;;  %v18110_v34 = vld [vmem:[%s16373_s9 + $0x3d6] sm:$0xff] }
 0x27c   : > { %v3561_v26 = vadd.f32 %v3386_v43, %v17711_v11  ;;  %v3778_v48 = vpop.f32.mrf.mxu1 }
 0x27d   : > { %v15101_v59 = vpop.f32.mrf.mxu0 }
 0x27e   : > { %v3953_v10 = vadd.f32 %v3778_v48, %v3561_v26  ;;  %v15155_v50 = vpop.f32.mrf.mxu1 }
 0x27f   : > { %v3389_v27 = vpop.f32.mrf.mxu0  ;;  %v5506_v50 = vsel %vm426_vm0, %v17752_v4, 0  ;;  %v18128_v4 = vld [vmem:[%s20641_s1 + $0x20] sm:$0x3] }
 0x280   : > { %v3562_v35 = vadd.f32 %v3389_v27, %v17715_v0  ;;  %v3781_v11 = vpop.f32.mrf.mxu1  ;;  %10657 = vrot.lane.b32.xlu0 %v3953_v10, %s16288_s23  ;;  %v12775_v0 = vld [vmem:[%s16373_s9 + $0x3be] sm:$0xff] }
 0x281   : > { %v15104_v43 = vpop.f32.mrf.mxu0  ;;  %15255 = vmatmul.mubr.msk.bf16.gmra.mxu0 %vm347_vm1, %v4136_v6 }
 0x282   : > { %v3954_v24 = vadd.f32 %v3781_v11, %v3562_v35  ;;  %v3563_v47 = vadd.f32 %v15104_v43, %v17727_v5  ;;  %v15158_v26 = vpop.f32.mrf.mxu1  ;;  %15309 = vmatmul.mubr.msk.bf16.gmra.mxu1 %vm347_vm1, %v4054_v53  ;;  %15314 = vmatprep.mubr.msk.bf16.mxu0 %vm347_vm1, %v4773_v20  ;;  %v4774_v35 = vpack.c.bf16 %v17757_v31, %v17735_v25  ;;  %v18107_v5 = vld [vmem:[%s16373_s9 + $0x3ce] sm:$0xff]  ;;  %v5898_v25 = vsel %vm426_vm0, %v17762_v17, 0  ;;  %v18133_v17 = vld [vmem:[%s20641_s1 + $0x22] sm:$0x3] }
 0x283   : > { %v3400_v7 = vpop.f32.mrf.mxu0  ;;  %15368 = vmatprep.mubr.msk.bf16.mxu1 %vm347_vm1, %v5165_v55  ;;  %v5166_v55 = vpack.c.bf16 %v18101_v29, %v12775_v0  ;;  %v4775_v31 = vpack.c.bf16 %v17773_v49, %v17766_v36  ;;  %v18137_v49 = vld [vmem:[%s16373_s9 + $0x3de] sm:$0xff]  ;;  %v18149_v0 = vld [vmem:[%s16373_s9 + $0x3f6] sm:$0xff] }
 0x284   : > { %v3955_v10 = vadd.f32 %v15158_v26, %v3563_v47  ;;  %v3792_v48 = vpop.f32.mrf.mxu1  ;;  %10659 = vrot.lane.b32.xlu0 %v3954_v24, %s16288_s23  ;;  %v18140_v24 = vld [vmem:[%s16373_s9 + $0x3e6] sm:$0xff]  ;;  %v18146_v7 = vld [vmem:[%s16373_s9 + $0x3ee] sm:$0xff] }
 0x285   : > { %v15105_v8 = vpop.f32.mrf.mxu0  ;;  %v4776_v48 = vpack.c.bf16 %v17795_v1, %v17776_v63  ;;  %v5169_v63 = vpack.c.bf16 %v18149_v0, %v18146_v7 }
 0x286   : > { %v3564_v20 = vadd.f32 %v15105_v8, %v17741_v32  ;;  %v15159_v59 = vpop.f32.mrf.mxu1  ;;  %10661 = vrot.lane.b32.xlu1 %v3955_v10, %s16288_s23  ;;  %v5167_v32 = vpack.c.bf16 %v18110_v34, %v18107_v5 }
 0x287   : > { %v3402_v6 = vpop.f32.mrf.mxu0 }
 0x288   : > { %v3956_v53 = vadd.f32 %v15159_v59, %v3564_v20  ;;  %v3794_v27 = vpop.f32.mrf.mxu1  ;;  %v4777_v20 = vpack.c.bf16 %v17806_v44, %v17799_v62  ;;  %v18170_v44 = vld [vmem:[%s16373_s9 + $0x3fe] sm:$0xff] }
 0x289   : > { %v15108_v11 = vpop.f32.mrf.mxu0  ;;  %15315 = vmatmul.mubr.msk.bf16.vlgmr.msra.gmra.mxu0 %vm347_vm1, %v4774_v35  ;;  %v5168_v35 = vpack.c.bf16 %v18140_v24, %v18137_v49 }
 0x28a   : > { %v15162_v43 = vpop.f32.mrf.mxu1  ;;  %15369 = vmatmul.mubr.msk.bf16.vlgmr.msra.gmra.mxu1 %vm347_vm1, %v5166_v55  ;;  %15421 = vmatpush3.bf16.msra.mxu0 %v5506_v50 }
 0x28b   : > { %10663 = vrot.lane.b32.xlu1 %v3956_v53, %s16288_s23  ;;  %v3414_v36 = vpop.f32.mrf.mxu0  ;;  %15475 = vmatpush3.bf16.msra.mxu1 %v5898_v25  ;;  %v18173_v53 = vld [vmem:[%s16373_s9 + $0x406] sm:$0xff] }
 0x28c   : > { %v3565_v47 = vadd.f32 %v3414_v36, %v17782_v21  ;;  %v3806_v26 = vpop.f32.mrf.mxu1  ;;  %15318 = vmatprep.mubr.msk.bf16.mxu0 %vm347_vm1, %v4775_v31  ;;  %15372 = vmatprep.mubr.msk.bf16.mxu1 %vm347_vm1, %v5167_v32  ;;  %v18176_v31 = vld [vmem:[%s16373_s9 + $0x40e] sm:$0xff]  ;;  %v18179_v32 = vld [vmem:[%s16373_s9 + $0x416] sm:$0xff]  ;;  %v5170_v36 = vpack.c.bf16 %v18173_v53, %v18170_v44 }
 0x28d   : > { %v15109_v10 = vpop.f32.mrf.mxu0  ;;  %16192 = vmatprep.subr.msk.bf16.mxu0 %vm426_vm0, %v18128_v4  ;;  %16193 = vmatprep.subr.msk.bf16.mxu1 %vm426_vm0, %v18133_v17 }
 0x28e   : > { %v3957_v21 = vadd.f32 %v3806_v26, %v3565_v47  ;;  %v15163_v8 = vpop.f32.mrf.mxu1  ;;  %v4779_v47 = vpack.c.bf16 %v17833_v19, %v17828_v41  ;;  %v5171_v10 = vpack.c.bf16 %v18179_v32, %v18176_v31  ;;  %v18196_v41 = vld [vmem:[%s16373_s9 + $0x41e] sm:$0xff]  ;;  %v18199_v19 = vld [vmem:[%s16373_s9 + $0x426] sm:$0xff] }
 0x28f   : > { %v3417_v59 = vpop.f32.mrf.mxu0 }
 0x290   : > { %v3809_v1 = vpop.f32.mrf.mxu1  ;;  %10665 = vrot.lane.b32.xlu0 %v3957_v21, %s16288_s23  ;;  %v18206_v59 = vld [vmem:[%s16373_s9 + $0x436] sm:$0xff] }
 0x291   : > { %v15112_v55 = vpop.f32.mrf.mxu0  ;;  %15319 = vmatmul.mubr.msk.bf16.gmra.mxu0 %vm347_vm1, %v4776_v48  ;;  %v4780_v1 = vpack.c.bf16 %v17851_v38, %v17836_v40 }
 0x292   : > { %v3567_v6 = vadd.f32 %v15112_v55, %v17803_v13  ;;  %v15166_v50 = vpop.f32.mrf.mxu1  ;;  %15373 = vmatmul.mubr.msk.bf16.gmra.mxu1 %vm347_vm1, %v5168_v35  ;;  %15322 = vmatprep.mubr.msk.bf16.mxu0 %vm347_vm1, %v4777_v20  ;;  %v4778_v13 = vpack.c.bf16 %v17824_v28, %v17809_v42 }
 0x293   : > { %v3427_v62 = vpop.f32.mrf.mxu0  ;;  %15376 = vmatprep.mubr.msk.bf16.mxu1 %vm347_vm1, %v5169_v63 }
 0x294   : > { %v3959_v27 = vadd.f32 %v15166_v50, %v3567_v6  ;;  %v3819_v25 = vpop.f32.mrf.mxu1  ;;  %v5172_v50 = vpack.c.bf16 %v18199_v19, %v18196_v41 }
 0x295   : > { %v15113_v11 = vpop.f32.mrf.mxu0 }
 0x296   : > { %v15167_v43 = vpop.f32.mrf.mxu1  ;;  %10669 = vrot.lane.b32.xlu0 %v3959_v27, %s16288_s23  ;;  %v4781_v27 = vpack.c.bf16 %v17861_v15, %v17855_v58  ;;  %v18223_v58 = vld [vmem:[%s16373_s9 + $0x43e] sm:$0xff]  ;;  %v18226_v15 = vld [vmem:[%s16373_s9 + $0x446] sm:$0xff] }
 0x297   : > { %v3429_v26 = vpop.f32.mrf.mxu0 }
 0x298   : > { %v3566_v48 = vadd.f32 %v3429_v26, %v17817_v54  ;;  %v3821_v42 = vpop.f32.mrf.mxu1  ;;  %v18203_v54 = vld [vmem:[%s16373_s9 + $0x42e] sm:$0xff]  ;;  %v18233_v26 = vld [vmem:[%s16373_s9 + $0x456] sm:$0xff] }
 0x299   : > { %v15116_v28 = vpop.f32.mrf.mxu0  ;;  %15323 = vmatmul.mubr.msk.bf16.gmra.mxu0 %vm347_vm1, %v4778_v13  ;;  %v5173_v25 = vpack.c.bf16 %v18206_v59, %v18203_v54 }
 0x29a   : > { %v3958_v21 = vadd.f32 %v3821_v42, %v3566_v48  ;;  %v15170_v8 = vpop.f32.mrf.mxu1  ;;  %15377 = vmatmul.mubr.msk.bf16.gmra.mxu1 %vm347_vm1, %v5170_v36  ;;  %15326 = vmatprep.mubr.msk.bf16.mxu0 %vm347_vm1, %v4779_v47  ;;  %v18230_v47 = vld [vmem:[%s16373_s9 + $0x44e] sm:$0xff]  ;;  %v4782_v48 = vpack.c.bf16 %v17882_v30, %v17864_v51 }
 0x29b   : > { %v3441_v35 = vpop.f32.mrf.mxu0  ;;  %15380 = vmatprep.mubr.msk.bf16.mxu1 %vm347_vm1, %v5171_v10  ;;  %v4783_v8 = vpack.c.bf16 %v17893_v37, %v17886_v61  ;;  %v18254_v37 = vld [vmem:[%s16373_s9 + $0x466] sm:$0xff] }
 0x29c   : > { %v3833_v20 = vpop.f32.mrf.mxu1  ;;  %10667 = vrot.lane.b32.xlu1 %v3958_v21, %s16288_s23  ;;  %v5174_v21 = vpack.c.bf16 %v18226_v15, %v18223_v58  ;;  %v5175_v35 = vpack.c.bf16 %v18233_v26, %v18230_v47 }
 0x29d   : > { %v15117_v63 = vpop.f32.mrf.mxu0 }
 0x29e   : > { %v3568_v55 = vadd.f32 %v15117_v63, %v17843_v16  ;;  %v15171_v6 = vpop.f32.mrf.mxu1 }
 0x29f   : > { %v3443_v62 = vpop.f32.mrf.mxu0 }
 0x2a0   : > { %v3960_v11 = vadd.f32 %v15171_v6, %v3568_v55  ;;  %v3835_v13 = vpop.f32.mrf.mxu1  ;;  %v18258_v62 = vld [vmem:[%s16373_s9 + $0x46e] sm:$0xff] }
 0x2a1   : > { %v15120_v40 = vpop.f32.mrf.mxu0  ;;  %15327 = vmatmul.mubr.msk.bf16.gmra.mxu0 %vm347_vm1, %v4780_v1 }
 0x2a2   : > { %v15174_v16 = vpop.f32.mrf.mxu1  ;;  %15381 = vmatmul.mubr.msk.bf16.gmra.mxu1 %vm347_vm1, %v5172_v50  ;;  %10671 = vrot.lane.b32.xlu1 %v3960_v11, %s16288_s23 }
 0x2a3   : > { %v3454_v38 = vpop.f32.mrf.mxu0  ;;  %15330 = vmatprep.mubr.msk.bf16.mxu0 %vm347_vm1, %v4781_v27  ;;  %15384 = vmatprep.mubr.msk.bf16.mxu1 %vm347_vm1, %v5173_v25  ;;  %v18261_v27 = vld [vmem:[%s16373_s9 + $0x476] sm:$0xff]  ;;  %v4784_v25 = vpack.c.bf16 %v17911_v52, %v17896_v46 }
 0x2a4   : > { %v3569_v43 = vadd.f32 %v3454_v38, %v17866_v57  ;;  %v3846_v36 = vpop.f32.mrf.mxu1  ;;  %v20798_v38 = vld [vmem:[#allocation48_spill] sm:$0xff] }
 0x2a5   : > { %v15121_v10 = vpop.f32.mrf.mxu0 }
 0x2a6   : > { %v3961_v42 = vadd.f32 %v3846_v36, %v3569_v43  ;;  %v15175_v28 = vpop.f32.mrf.mxu1  ;;  %v20799_v43 = vld [vmem:[#allocation49_spill] sm:$0xff]  ;;  %v5177_v10 = vpack.c.bf16 %v18261_v27, %v18258_v62 }
 0x2a7   : > { %v3457_v57 = vpop.f32.mrf.mxu0  ;;  %v4785_v36 = vpack.c.bf16 %v20799_v43, %v20798_v38  ;;  %v18279_v28 = vld [vmem:[%s16373_s9 + $0x47e] sm:$0xff] }
 0x2a8   : > { %v3570_v20 = vadd.f32 %v3457_v57, %v17874_v3  ;;  %v3849_v63 = vpop.f32.mrf.mxu1  ;;  %10673 = vrot.lane.b32.xlu0 %v3961_v42, %s16288_s23  ;;  %v18251_v3 = vld [vmem:[%s16373_s9 + $0x45e] sm:$0xff]  ;;  %v18285_v57 = vld [vmem:[%s16373_s9 + $0x48e] sm:$0xff] }
 0x2a9   : > { %v15124_v51 = vpop.f32.mrf.mxu0  ;;  %15331 = vmatmul.mubr.msk.bf16.gmra.mxu0 %vm347_vm1, %v4782_v48  ;;  %v5176_v40 = vpack.c.bf16 %v18254_v37, %v18251_v3 }
 0x2aa   : > { %v3962_v30 = vadd.f32 %v3849_v63, %v3570_v20  ;;  %v3571_v1 = vadd.f32 %v15124_v51, %v17890_v39  ;;  %v15178_v55 = vpop.f32.mrf.mxu1  ;;  %15385 = vmatmul.mubr.msk.bf16.gmra.mxu1 %vm347_vm1, %v5174_v21  ;;  %15334 = vmatprep.mubr.msk.bf16.mxu0 %vm347_vm1, %v4783_v8  ;;  %v18282_v21 = vld [vmem:[%s16373_s9 + $0x486] sm:$0xff] }
 0x2ab   : > { %v3468_v61 = vpop.f32.mrf.mxu0  ;;  %15388 = vmatprep.mubr.msk.bf16.mxu1 %vm347_vm1, %v5175_v35  ;;  %v18288_v35 = vld [vmem:[%s16373_s9 + $0x496] sm:$0xff]  ;;  %v20800_v63 = vld [vmem:[#allocation50_spill] sm:$0xff] }
 0x2ac   : > { %v3963_v6 = vadd.f32 %v15178_v55, %v3571_v1  ;;  %v3860_v50 = vpop.f32.mrf.mxu1  ;;  %10675 = vrot.lane.b32.xlu1 %v3962_v30, %s16288_s23  ;;  %v4786_v51 = vpack.c.bf16 %v17936_v23, %v20800_v63  ;;  %v5178_v1 = vpack.c.bf16 %v18282_v21, %v18279_v28  ;;  %v4787_v55 = vpack.c.bf16 %v17948_v14, %v17940_v18  ;;  %v18304_v14 = vld [vmem:[%s16373_s9 + $0x49e] sm:$0xff]  ;;  %v18307_v18 = vld [vmem:[%s16373_s9 + $0x4a6] sm:$0xff]  ;;  %v20805_v63 = vld [vmem:[#allocation56_spill] sm:$0xff] }
 0x2ad   : > { %v15125_v39 = vpop.f32.mrf.mxu0 }
 0x2ae   : > { %v3572_v11 = vadd.f32 %v15125_v39, %v17903_v60  ;;  %v15179_v13 = vpop.f32.mrf.mxu1  ;;  %10677 = vrot.lane.b32.xlu0 %v3963_v6, %s16288_s23  ;;  %v5179_v6 = vpack.c.bf16 %v18288_v35, %v18285_v57 }
 0x2af   : > { %v3470_v16 = vpop.f32.mrf.mxu0 }
 0x2b0   : > { %v3964_v46 = vadd.f32 %v15179_v13, %v3572_v11  ;;  %v3862_v52 = vpop.f32.mrf.mxu1  ;;  %v20802_v16 = vld [vmem:[#allocation53_spill] sm:$0xff] }
 0x2b1   : > { %v15128_v60 = vpop.f32.mrf.mxu0  ;;  %15335 = vmatmul.mubr.msk.bf16.gmra.mxu0 %vm347_vm1, %v4784_v25  ;;  %v20801_v25 = vld [vmem:[#allocation51_spill] sm:$0xff]  ;;  %v20803_v52 = vld [vmem:[#allocation52_spill] sm:$0xff] }
 0x2b2   : > { %v15182_v48 = vpop.f32.mrf.mxu1  ;;  %15389 = vmatmul.mubr.msk.bf16.gmra.mxu1 %vm347_vm1, %v5176_v40  ;;  %10679 = vrot.lane.b32.xlu1 %v3964_v46, %s16288_s23  ;;  %v20804_v60 = vld [vmem:[#allocation55_spill] sm:$0xff] }
 0x2b3   : > { %v3482_v42 = vpop.f32.mrf.mxu0  ;;  %15338 = vmatprep.mubr.msk.bf16.mxu0 %vm347_vm1, %v4785_v36  ;;  %15392 = vmatprep.mubr.msk.bf16.mxu1 %vm347_vm1, %v5177_v10  ;;  %v18311_v36 = vld [vmem:[%s16373_s9 + $0x4ae] sm:$0xff]  ;;  %v18314_v10 = vld [vmem:[%s16373_s9 + $0x4b6] sm:$0xff]  ;;  %v4788_v48 = vpack.c.bf16 %v20804_v60, %v20803_v52  ;;  %v20808_v52 = vld [vmem:[#allocation58_spill] sm:$0xff] }
 0x2b4   : > { %v3874_v8 = vpop.f32.mrf.mxu1  ;;  %v4790_v60 = vpack.c.bf16 %v17995_v56, %v20808_v52 }
 0x2b5   : > { %v15129_v20 = vpop.f32.mrf.mxu0  ;;  %v5180_v8 = vpack.c.bf16 %v18307_v18, %v18304_v14 }
 0x2b6   : > { %v15183_v30 = vpop.f32.mrf.mxu1 }
 0x2b7   : > { %v3484_v61 = vpop.f32.mrf.mxu0 }
 0x2b8   : > { %v3876_v50 = vpop.f32.mrf.mxu1  ;;  %v20807_v61 = vld [vmem:[#allocation54_spill] sm:$0xff] }
 0x2b9   : > { %v15132_v39 = vpop.f32.mrf.mxu0  ;;  %15339 = vmatmul.mubr.msk.bf16.gmra.mxu0 %vm347_vm1, %v4786_v51  ;;  %v20806_v51 = vld [vmem:[#allocation57_spill] sm:$0xff] }
 0x2ba   : > { %v3575_v23 = vadd.f32 %v15132_v39, %v20801_v25  ;;  %v15186_v11 = vpop.f32.mrf.mxu1  ;;  %15393 = vmatmul.mubr.msk.bf16.gmra.mxu1 %vm347_vm1, %v5178_v1  ;;  %15342 = vmatprep.mubr.msk.bf16.mxu0 %vm347_vm1, %v4787_v55  ;;  %v4789_v30 = vpack.c.bf16 %v20806_v51, %v20805_v63  ;;  %v5181_v1 = vpack.c.bf16 %v18314_v10, %v18311_v36  ;;  %v20810_v51 = vld [vmem:[#allocation60_spill] sm:$0xff] }
 0x2bb   : > { %v3494_v13 = vpop.f32.mrf.mxu0  ;;  %15396 = vmatprep.mubr.msk.bf16.mxu1 %vm347_vm1, %v5179_v6 }
 0x2bc   : > { %v3967_v40 = vadd.f32 %v15186_v11, %v3575_v23  ;;  %v3573_v38 = vadd.f32 %v3494_v13, %v20802_v16  ;;  %v3886_v43 = vpop.f32.mrf.mxu1  ;;  %v18332_v13 = vld [vmem:[%s16373_s9 + $0x4be] sm:$0xff] }
 0x2bd   : > { %v15133_v46 = vpop.f32.mrf.mxu0 }
 0x2be   : > { %v15187_v42 = vpop.f32.mrf.mxu1  ;;  %10685 = vrot.lane.b32.xlu0 %v3967_v40, %s16288_s23  ;;  %v3965_v55 = vadd.f32 %v3886_v43, %v3573_v38  ;;  %v18335_v40 = vld [vmem:[%s16373_s9 + $0x4c6] sm:$0xff]  ;;  %v18339_v38 = vld [vmem:[%s16373_s9 + $0x4ce] sm:$0xff]  ;;  %v18342_v43 = vld [vmem:[%s16373_s9 + $0x4d6] sm:$0xff] }
 0x2bf   : > { %v3497_v20 = vpop.f32.mrf.mxu0 }
 0x2c0   : > { %v3574_v6 = vadd.f32 %v3497_v20, %v20807_v61  ;;  %v3889_v50 = vpop.f32.mrf.mxu1  ;;  %v5182_v20 = vpack.c.bf16 %v18335_v40, %v18332_v13 }
 0x2c1   : > { %v15136_v39 = vpop.f32.mrf.mxu0  ;;  %15343 = vmatmul.mubr.msk.bf16.gmra.mxu0 %vm347_vm1, %v4788_v48  ;;  %v20809_v48 = vld [vmem:[#allocation59_spill] sm:$0xff] }
 0x2c2   : > { %v3966_v25 = vadd.f32 %v3889_v50, %v3574_v6  ;;  %v15190_v23 = vpop.f32.mrf.mxu1  ;;  %15397 = vmatmul.mubr.msk.bf16.gmra.mxu1 %vm347_vm1, %v5180_v8  ;;  %10681 = vrot.lane.b32.xlu0 %v3965_v55, %s16288_s23  ;;  %v18362_v39 = vld [vmem:[%s16373_s9 + $0x4e6] sm:$0xff] }
 0x2c3   : > { %v3509_v11 = vpop.f32.mrf.mxu0  ;;  %15346 = vmatprep.mubr.msk.bf16.mxu0 %vm347_vm1, %v4789_v30  ;;  %15400 = vmatprep.mubr.msk.bf16.mxu1 %vm347_vm1, %v5181_v1  ;;  %v4791_v30 = vpack.c.bf16 %v20810_v51, %v17999_v2  ;;  %v5183_v1 = vpack.c.bf16 %v18342_v43, %v18339_v38  ;;  %v18359_v2 = vld [vmem:[%s16373_s9 + $0x4de] sm:$0xff] }
 0x2c4   : > { %v3901_v16 = vpop.f32.mrf.mxu1  ;;  %10683 = vrot.lane.b32.xlu1 %v3966_v25, %s16288_s23  ;;  %v20811_v25 = vld [vmem:[#allocation62_spill] sm:$0xff] }
 0x2c5   : > { %v15137_v46 = vpop.f32.mrf.mxu0  ;;  %v18366_v16 = vld [vmem:[%s16373_s9 + $0x4ee] sm:$0xff] }
 0x2c6   : > { %v3576_v42 = vadd.f32 %v15137_v46, %v20809_v48  ;;  %v15191_v8 = vpop.f32.mrf.mxu1  ;;  %v18369_v46 = vld [vmem:[%s16373_s9 + $0x4f6] sm:$0xff] }
 0x2c7   : > { %v3511_v63 = vpop.f32.mrf.mxu0 }
 0x2c8   : > { %v3968_v55 = vadd.f32 %v15191_v8, %v3576_v42  ;;  %v3903_v61 = vpop.f32.mrf.mxu1  ;;  %v4793_v63 = vpack.c.bf16 %v18034_v45, %v18027_v22  ;;  %v18386_v45 = vld [vmem:[%s16373_s9 + $0x4fe] sm:$0xff] }
 0x2c9   : > { %v15140_v56 = vpop.f32.mrf.mxu0  ;;  %15347 = vmatmul.mubr.msk.bf16.gmra.mxu0 %vm347_vm1, %v4790_v60  ;;  %v20812_v60 = vld [vmem:[#allocation61_spill] sm:$0xff] }
 0x2ca   : > { %v15194_v6 = vpop.f32.mrf.mxu1  ;;  %15401 = vmatmul.mubr.msk.bf16.gmra.mxu1 %vm347_vm1, %v5182_v20  ;;  %10687 = vrot.lane.b32.xlu0 %v3968_v55, %s16288_s23  ;;  %v4792_v48 = vpack.c.bf16 %v18023_v33, %v20812_v60  ;;  %v5184_v20 = vpack.c.bf16 %v18362_v39, %v18359_v2  ;;  %v20813_v55 = vld [vmem:[#allocation63_spill] sm:$0xff]  ;;  %v20814_v60 = vld [vmem:[#allocation64_spill] sm:$0xff] }
 0x2cb   : > { %v3522_v50 = vpop.f32.mrf.mxu0  ;;  %15350 = vmatprep.mubr.msk.bf16.mxu0 %vm347_vm1, %v4791_v30  ;;  %15404 = vmatprep.mubr.msk.bf16.mxu1 %vm347_vm1, %v5183_v1  ;;  %v5185_v30 = vpack.c.bf16 %v18369_v46, %v18366_v16  ;;  %v18389_v6 = vld [vmem:[%s16373_s9 + $0x506] sm:$0xff] }
 0x2cc   : > { %v3577_v23 = vadd.f32 %v3522_v50, %v20811_v25  ;;  %v3914_v11 = vpop.f32.mrf.mxu1 }
 0x2cd   : > { %v15141_v52 = vpop.f32.mrf.mxu0 }
 0x2ce   : > { %v3969_v42 = vadd.f32 %v3914_v11, %v3577_v23  ;;  %v15195_v8 = vpop.f32.mrf.mxu1  ;;  %v18392_v23 = vld [vmem:[%s16373_s9 + $0x50e] sm:$0xff]  ;;  %v18395_v11 = vld [vmem:[%s16373_s9 + $0x516] sm:$0xff] }
 0x2cf   : > { %v3525_v51 = vpop.f32.mrf.mxu0  ;;  %v20816_v8 = vld [vmem:[#allocation65_spill] sm:$0xff] }
 0x2d0   : > { %v3917_v1 = vpop.f32.mrf.mxu1  ;;  %10689 = vrot.lane.b32.xlu1 %v3969_v42, %s16288_s23  ;;  %v5186_v51 = vpack.c.bf16 %v18389_v6, %v18386_v45 }
 0x2d1   : > { %v15144_v33 = vpop.f32.mrf.mxu0  ;;  %15351 = vmatmul.mubr.msk.bf16.gmra.mxu0 %vm347_vm1, %v4792_v48  ;;  %v20815_v48 = vld [vmem:[#allocation67_spill] sm:$0xff]  ;;  %v20817_v1 = vld [vmem:[#allocation68_spill] sm:$0xff] }
 0x2d2   : > { %v3579_v61 = vadd.f32 %v15144_v33, %v20813_v55  ;;  %v15198_v56 = vpop.f32.mrf.mxu1  ;;  %15405 = vmatmul.mubr.msk.bf16.gmra.mxu1 %vm347_vm1, %v5184_v20  ;;  %15354 = vmatprep.mubr.msk.bf16.mxu0 %vm347_vm1, %v4793_v63  ;;  %v4794_v42 = vpack.c.bf16 %v20815_v48, %v20814_v60  ;;  %v20818_v33 = vld [vmem:[#allocation69_spill] sm:$0xff] }
 0x2d3   : > { %v3535_v22 = vpop.f32.mrf.mxu0  ;;  %15408 = vmatprep.mubr.msk.bf16.mxu1 %vm347_vm1, %v5185_v30  ;;  %v4795_v55 = vpack.c.bf16 %v20818_v33, %v20817_v1  ;;  %v18421_v33 = vld [vmem:[%s16373_s9 + $0x52e] sm:$0xff] }
 0x2d4   : > { %v3971_v50 = vadd.f32 %v15198_v56, %v3579_v61  ;;  %v3927_v25 = vpop.f32.mrf.mxu1  ;;  %v5187_v61 = vpack.c.bf16 %v18395_v11, %v18392_v23  ;;  %v20819_v22 = vld [vmem:[#allocation66_spill] sm:$0xff]  ;;  %20820 = vst [vmem:[#allocation48_spill] sm:$0xff] %v18421_v33 }
 0x2d5   : > { %v15145_v52 = vpop.f32.mrf.mxu0 }
 0x2d6   : > { %v3580_v20 = vadd.f32 %v15145_v52, %v20816_v8  ;;  %v15199_v63 = vpop.f32.mrf.mxu1  ;;  %10693 = vrot.lane.b32.xlu0 %v3971_v50, %s16288_s23  ;;  %v18414_v8 = vld [vmem:[%s16373_s9 + $0x51e] sm:$0xff] }
 0x2d7   : > { %v3537_v30 = vpop.f32.mrf.mxu0 }
 0x2d8   : > { %v3972_v56 = vadd.f32 %v15199_v63, %v3580_v20  ;;  %v3578_v25 = vadd.f32 %v3537_v30, %v20819_v22  ;;  %v3929_v52 = vpop.f32.mrf.mxu1  ;;  %v18417_v20 = vld [vmem:[%s16373_s9 + $0x526] sm:$0xff]  ;;  %v12741_v63 = vld [vmem:[%s16373_s9 + $0x2de] sm:$0xff] }
 0x2d9   : > { %v15148_v50 = vpop.f32.mrf.mxu0  ;;  %15355 = vmatmul.mubr.msk.bf16.gmra.mxu0 %vm347_vm1, %v4794_v42  ;;  %v18424_v42 = vld [vmem:[%s16373_s9 + $0x536] sm:$0xff] }
 0x2da   : > { %v15202_v60 = vpop.f32.mrf.mxu1  ;;  %15409 = vmatmul.mubr.msk.bf16.gmra.mxu1 %vm347_vm1, %v5186_v51  ;;  %10695 = vrot.lane.b32.xlu1 %v3972_v56, %s16288_s23  ;;  %v3970_v30 = vadd.f32 %v3929_v52, %v3578_v25  ;;  %20821 = vst [vmem:[#allocation49_spill] sm:$0xff] %v18424_v42  ;;  %v20822_v56 = vld [vmem:[#allocation70_spill] sm:$0xff]  ;;  %v4797_v25 = vpack.c.bf16 %v12741_v63, %v18083_v12 }
 0x2db   : > { %v3550_v48 = vpop.f32.mrf.mxu0  ;;  %15358 = vmatprep.mubr.msk.bf16.mxu0 %vm347_vm1, %v4795_v55  ;;  %15412 = vmatprep.mubr.msk.bf16.mxu1 %vm347_vm1, %v5187_v61  ;;  %v4796_v22 = vpack.c.bf16 %v18080_v9, %v20822_v56  ;;  %v5188_v61 = vpack.c.bf16 %v18417_v20, %v18414_v8  ;;  %v5189_v50 = vpack.c.bf16 %v18424_v42, %v18421_v33  ;;  %v12742_v9 = vld [vmem:[%s16373_s9 + $0x2e6] sm:$0xff]  ;;  %v18441_v56 = vld [vmem:[%s16373_s9 + $0x53e] sm:$0xff] }
 0x2dc   : > { %v3942_v1 = vpop.f32.mrf.mxu1  ;;  %v18444_v12 = vld [vmem:[%s16373_s9 + $0x546] sm:$0xff] }
 0x2dd   : > { %v15149_v51 = vpop.f32.mrf.mxu0 }
 0x2de   : > { %v15203_v55 = vpop.f32.mrf.mxu1  ;;  %10691 = vrot.lane.b32.xlu1 %v3970_v30, %s16288_s23  ;;  %v12743_v30 = vld [vmem:[%s16373_s9 + $0x2ee] sm:$0xff]  ;;  %s11769_s23 = sshll.u32 %s243_s12, 2 }
 0x2df   : > { %v3552_v52 = vpop.f32.mrf.mxu0  ;;  %s20433_s24 = scalar_lea.vmem %s20642_s2, %s11769_s23 }
 0x2e0   : > { %v3944_v60 = vpop.f32.mrf.mxu1 }
 0x2e1   : > { %v15208_v48 = vpop.f32.mrf.mxu0  ;;  %15359 = vmatmul.mubr.msk.bf16.gmra.mxu0 %vm347_vm1, %v4796_v22  ;;  %v4798_v60 = vpack.c.bf16 %v12743_v30, %v12742_v9 }
 0x2e2   : > { %v15262_v1 = vpop.f32.mrf.mxu1  ;;  %15413 = vmatmul.mubr.msk.bf16.gmra.mxu1 %vm347_vm1, %v5188_v61  ;;  %15362 = vmatprep.mubr.msk.bf16.mxu0 %vm347_vm1, %v4797_v25  ;;  %v5190_v61 = vpack.c.bf16 %v18444_v12, %v18441_v56  ;;  %v5791_v25 = vpack.c.bf16 %v18107_v5, %v18101_v29  ;;  %v5792_v5 = vpack.c.bf16 %v18137_v49, %v18110_v34  ;;  %v18476_v34 = vld [vmem:[%s20641_s1 + $0x24] sm:$0x3] }
 0x2e3   : > { %v4254_v51 = vpop.f32.mrf.mxu0  ;;  %15416 = vmatprep.mubr.msk.bf16.mxu1 %vm347_vm1, %v5189_v50 }
 0x2e4   : > { %v4544_v63 = vpop.f32.mrf.mxu1 }
 0x2e5   : > { %v18446_v55 = vadd.f32 %v4544_v63, %v4254_v51  ;;  %v15209_v52 = vpop.f32.mrf.mxu0  ;;  %v20823_v51 = vld [vmem:[#allocation2_spill] sm:$0xff] }
 0x2e6   : > { %v15263_v22 = vpop.f32.mrf.mxu1 }
 0x2e7   : > { %v4257_v48 = vpop.f32.mrf.mxu0 }
 0x2e8   : > { %v4547_v1 = vpop.f32.mrf.mxu1 }
 0x2e9   : > { %v18452_v42 = vadd.f32 %v4547_v1, %v4257_v48  ;;  %v15212_v50 = vpop.f32.mrf.mxu0  ;;  %15363 = vmatmul.mubr.msk.bf16.gmra.mxu0 %vm347_vm1, %v4798_v60  ;;  %v5793_v48 = vpack.c.bf16 %v18146_v7, %v18140_v24  ;;  %v6684_v1 = vsel %vm426_vm0, %v18133_v17, 0  ;;  %v20825_v7 = vld [vmem:[#allocation4_spill] sm:$0xff] }
 0x2ea   : > { %v15266_v33 = vpop.f32.mrf.mxu1  ;;  %15417 = vmatmul.mubr.msk.bf16.gmra.mxu1 %vm347_vm1, %v5190_v61  ;;  %15422 = vmatprep.mubr.msk.bf16.mxu0 %vm347_vm1, %v20823_v51  ;;  %v6292_v61 = vsel %vm426_vm0, %v18128_v4, 0  ;;  %v18482_v4 = vld [vmem:[%s20641_s1 + $0x28] sm:$0x3] }
 0x2eb   : > { %v18458_v9 = vadd.f32 %v15266_v33, %v15212_v50  ;;  %v4268_v30 = vpop.f32.mrf.mxu0  ;;  %15476 = vmatprep.mubr.msk.bf16.mxu1 %vm347_vm1, %v5791_v25  ;;  %v20824_v50 = vld [vmem:[#allocation3_spill] sm:$0xff] }
 0x2ec   : > { %v4558_v63 = vpop.f32.mrf.mxu1 }
 0x2ed   : > { %v15213_v52 = vpop.f32.mrf.mxu0 }
 0x2ee   : > { %v15267_v29 = vpop.f32.mrf.mxu1 }
 0x2ef   : > { %v18463_v22 = vadd.f32 %v15267_v29, %v15213_v52  ;;  %v4270_v60 = vpop.f32.mrf.mxu0  ;;  %v5794_v29 = vpack.c.bf16 %v18170_v44, %v18149_v0 }
 0x2f0   : > { %v4560_v33 = vpop.f32.mrf.mxu1  ;;  %v5795_v60 = vpack.c.bf16 %v18176_v31, %v18173_v53  ;;  %v5796_v53 = vpack.c.bf16 %v18196_v41, %v18179_v32 }
 0x2f1   : > { %v15216_v25 = vpop.f32.mrf.mxu0  ;;  %15423 = vmatmul.mubr.msk.bf16.vlgmr.msra.gmra.mxu0 %vm347_vm1, %v20824_v50  ;;  %v20826_v33 = vld [vmem:[#allocation5_spill] sm:$0xff] }
 0x2f2   : > { %v15270_v49 = vpop.f32.mrf.mxu1  ;;  %15477 = vmatmul.mubr.msk.bf16.vlgmr.msra.gmra.mxu1 %vm347_vm1, %v5792_v5  ;;  %15529 = vmatpush3.bf16.msra.mxu0 %v6292_v61  ;;  %v20827_v25 = vld [vmem:[#allocation6_spill] sm:$0xff] }
 0x2f3   : > { %v4282_v24 = vpop.f32.mrf.mxu0  ;;  %15583 = vmatpush3.bf16.msra.mxu1 %v6684_v1  ;;  %15480 = vmatprep.mubr.msk.bf16.mxu1 %vm347_vm1, %v5793_v48 }
 0x2f4   : > { %v4572_v17 = vpop.f32.mrf.mxu1  ;;  %15426 = vmatprep.mubr.msk.bf16.mxu0 %vm347_vm1, %v20825_v7  ;;  %16194 = vmatprep.subr.msk.bf16.mxu0 %vm426_vm0, %v18476_v34 }
 0x2f5   : > { %v18489_v30 = vadd.f32 %v4572_v17, %v4282_v24  ;;  %v15217_v63 = vpop.f32.mrf.mxu0  ;;  %16195 = vmatprep.subr.msk.bf16.mxu1 %vm426_vm0, %v18482_v4 }
 0x2f6   : > { %v15271_v52 = vpop.f32.mrf.mxu1  ;;  %v5797_v63 = vpack.c.bf16 %v18203_v54, %v18199_v19  ;;  %v5798_v19 = vpack.c.bf16 %v18223_v58, %v18206_v59 }
 0x2f7   : > { %v4285_v5 = vpop.f32.mrf.mxu0 }
 0x2f8   : > { %v4575_v61 = vpop.f32.mrf.mxu1 }
 0x2f9   : > { %v15220_v48 = vpop.f32.mrf.mxu0  ;;  %15427 = vmatmul.mubr.msk.bf16.gmra.mxu0 %vm347_vm1, %v20826_v33  ;;  %v20828_v61 = vld [vmem:[#allocation7_spill] sm:$0xff] }
 0x2fa   : > { %v15274_v1 = vpop.f32.mrf.mxu1  ;;  %15481 = vmatmul.mubr.msk.bf16.gmra.mxu1 %vm347_vm1, %v5794_v29  ;;  %15430 = vmatprep.mubr.msk.bf16.mxu0 %vm347_vm1, %v20827_v25 }
 0x2fb   : > { %v18502_v49 = vadd.f32 %v15274_v1, %v15220_v48  ;;  %v4295_v24 = vpop.f32.mrf.mxu0  ;;  %15484 = vmatprep.mubr.msk.bf16.mxu1 %vm347_vm1, %v5795_v60  ;;  %v20829_v60 = vld [vmem:[#allocation8_spill] sm:$0xff] }
 0x2fc   : > { %v4585_v0 = vpop.f32.mrf.mxu1 }
 0x2fd   : > { %v15221_v44 = vpop.f32.mrf.mxu0 }
 0x2fe   : > { %v15275_v17 = vpop.f32.mrf.mxu1  ;;  %v5799_v44 = vpack.c.bf16 %v18230_v47, %v18226_v15  ;;  %v5800_v15 = vpack.c.bf16 %v18251_v3, %v18233_v26 }
 0x2ff   : > { %v4297_v31 = vpop.f32.mrf.mxu0 }
 0x300   : > { %v4587_v52 = vpop.f32.mrf.mxu1 }
 0x301   : > { %v18509_v29 = vadd.f32 %v4587_v52, %v4297_v31  ;;  %v15224_v5 = vpop.f32.mrf.mxu0  ;;  %15431 = vmatmul.mubr.msk.bf16.gmra.mxu0 %vm347_vm1, %v20828_v61  ;;  %v20830_v31 = vld [vmem:[#allocation9_spill] sm:$0xff] }
 0x302   : > { %v15278_v48 = vpop.f32.mrf.mxu1  ;;  %15485 = vmatmul.mubr.msk.bf16.gmra.mxu1 %vm347_vm1, %v5796_v53  ;;  %15434 = vmatprep.mubr.msk.bf16.mxu0 %vm347_vm1, %v20829_v60 }
 0x303   : > { %v4309_v1 = vpop.f32.mrf.mxu0  ;;  %15488 = vmatprep.mubr.msk.bf16.mxu1 %vm347_vm1, %v5797_v63  ;;  %v20831_v63 = vld [vmem:[#allocation10_spill] sm:$0xff] }
 0x304   : > { %v4599_v32 = vpop.f32.mrf.mxu1 }
 0x305   : > { %v15225_v41 = vpop.f32.mrf.mxu0  ;;  %v5801_v32 = vpack.c.bf16 %v18258_v62, %v18254_v37 }
 0x306   : > { %v15279_v24 = vpop.f32.mrf.mxu1 }
 0x307   : > { %v18519_v54 = vadd.f32 %v15279_v24, %v15225_v41  ;;  %v4311_v0 = vpop.f32.mrf.mxu0 }
 0x308   : > { %v4601_v17 = vpop.f32.mrf.mxu1  ;;  %v20832_v0 = vld [vmem:[#allocation11_spill] sm:$0xff] }
 0x309   : > { %v15228_v53 = vpop.f32.mrf.mxu0  ;;  %15435 = vmatmul.mubr.msk.bf16.gmra.mxu0 %vm347_vm1, %v20830_v31  ;;  %v20833_v17 = vld [vmem:[#allocation12_spill] sm:$0xff] }
 0x30a   : > { %v15282_v52 = vpop.f32.mrf.mxu1  ;;  %15489 = vmatmul.mubr.msk.bf16.gmra.mxu1 %vm347_vm1, %v5798_v19  ;;  %15438 = vmatprep.mubr.msk.bf16.mxu0 %vm347_vm1, %v20831_v63 }
 0x30b   : > { %v4322_v5 = vpop.f32.mrf.mxu0  ;;  %15492 = vmatprep.mubr.msk.bf16.mxu1 %vm347_vm1, %v5799_v44  ;;  %v5802_v52 = vpack.c.bf16 %v18279_v28, %v18261_v27 }
 0x30c   : > { %v4612_v59 = vpop.f32.mrf.mxu1 }
 0x30d   : > { %v18529_v58 = vadd.f32 %v4612_v59, %v4322_v5  ;;  %v15229_v48 = vpop.f32.mrf.mxu0 }
 0x30e   : > { %v15283_v1 = vpop.f32.mrf.mxu1  ;;  %v5803_v48 = vpack.c.bf16 %v18285_v57, %v18282_v21  ;;  %v5804_v21 = vpack.c.bf16 %v18304_v14, %v18288_v35 }
 0x30f   : > { %v4325_v47 = vpop.f32.mrf.mxu0 }
 0x310   : > { %v4615_v41 = vpop.f32.mrf.mxu1 }
 0x311   : > { %v18535_v24 = vadd.f32 %v4615_v41, %v4325_v47  ;;  %v15232_v19 = vpop.f32.mrf.mxu0  ;;  %15439 = vmatmul.mubr.msk.bf16.gmra.mxu0 %vm347_vm1, %v20832_v0  ;;  %v20834_v47 = vld [vmem:[#allocation13_spill] sm:$0xff] }
 0x312   : > { %v15286_v44 = vpop.f32.mrf.mxu1  ;;  %15493 = vmatmul.mubr.msk.bf16.gmra.mxu1 %vm347_vm1, %v5800_v15  ;;  %15442 = vmatprep.mubr.msk.bf16.mxu0 %vm347_vm1, %v20833_v17 }
 0x313   : > { %v18542_v53 = vadd.f32 %v15286_v44, %v15232_v19  ;;  %v4336_v26 = vpop.f32.mrf.mxu0  ;;  %15496 = vmatprep.mubr.msk.bf16.mxu1 %vm347_vm1, %v5801_v32  ;;  %v20835_v32 = vld [vmem:[#allocation14_spill] sm:$0xff] }
 0x314   : > { %v4626_v3 = vpop.f32.mrf.mxu1  ;;  %v5805_v26 = vpack.c.bf16 %v18311_v36, %v18307_v18 }
 0x315   : > { %v15233_v37 = vpop.f32.mrf.mxu0 }
 0x316   : > { %v15287_v62 = vpop.f32.mrf.mxu1 }
 0x317   : > { %v18547_v5 = vadd.f32 %v15287_v62, %v15233_v37  ;;  %v4338_v59 = vpop.f32.mrf.mxu0  ;;  %v20836_v62 = vld [vmem:[#allocation15_spill] sm:$0xff] }
 0x318   : > { %v4628_v1 = vpop.f32.mrf.mxu1  ;;  %v20837_v59 = vld [vmem:[#allocation16_spill] sm:$0xff] }
 0x319   : > { %v15236_v15 = vpop.f32.mrf.mxu0  ;;  %15443 = vmatmul.mubr.msk.bf16.gmra.mxu0 %vm347_vm1, %v20834_v47 }
 0x31a   : > { %v15290_v41 = vpop.f32.mrf.mxu1  ;;  %15497 = vmatmul.mubr.msk.bf16.gmra.mxu1 %vm347_vm1, %v5802_v52  ;;  %15446 = vmatprep.mubr.msk.bf16.mxu0 %vm347_vm1, %v20835_v32  ;;  %v5806_v15 = vpack.c.bf16 %v18332_v13, %v18314_v10 }
 0x31b   : > { %v4350_v19 = vpop.f32.mrf.mxu0  ;;  %15500 = vmatprep.mubr.msk.bf16.mxu1 %vm347_vm1, %v5803_v48 }
 0x31c   : > { %v4640_v27 = vpop.f32.mrf.mxu1  ;;  %v5807_v19 = vpack.c.bf16 %v18339_v38, %v18335_v40  ;;  %v5808_v40 = vpack.c.bf16 %v18359_v2, %v18342_v43 }
 0x31d   : > { %v15237_v28 = vpop.f32.mrf.mxu0 }
 0x31e   : > { %v15291_v44 = vpop.f32.mrf.mxu1 }
 0x31f   : > { %v4352_v57 = vpop.f32.mrf.mxu0 }
 0x320   : > { %v4642_v3 = vpop.f32.mrf.mxu1 }
 0x321   : > { %v15240_v37 = vpop.f32.mrf.mxu0  ;;  %15447 = vmatmul.mubr.msk.bf16.gmra.mxu0 %vm347_vm1, %v20836_v62 }
 0x322   : > { %v15294_v52 = vpop.f32.mrf.mxu1  ;;  %15501 = vmatmul.mubr.msk.bf16.gmra.mxu1 %vm347_vm1, %v5804_v21  ;;  %15450 = vmatprep.mubr.msk.bf16.mxu0 %vm347_vm1, %v20837_v59  ;;  %v20838_v21 = vld [vmem:[#allocation17_spill] sm:$0xff] }
 0x323   : > { %v18566_v48 = vadd.f32 %v15294_v52, %v15240_v37  ;;  %v4362_v1 = vpop.f32.mrf.mxu0  ;;  %15504 = vmatprep.mubr.msk.bf16.mxu1 %vm347_vm1, %v5805_v26  ;;  %v20839_v26 = vld [vmem:[#allocation18_spill] sm:$0xff] }
 0x324   : > { %v4652_v35 = vpop.f32.mrf.mxu1 }
 0x325   : > { %v18569_v14 = vadd.f32 %v4652_v35, %v4362_v1  ;;  %v15241_v18 = vpop.f32.mrf.mxu0  ;;  %v5809_v1 = vpack.c.bf16 %v18366_v16, %v18362_v39  ;;  %v5810_v39 = vpack.c.bf16 %v18386_v45, %v18369_v46 }
 0x326   : > { %v15295_v36 = vpop.f32.mrf.mxu1 }
 0x327   : > { %v4365_v41 = vpop.f32.mrf.mxu0  ;;  %v20840_v36 = vld [vmem:[#allocation19_spill] sm:$0xff] }
 0x328   : > { %v4655_v27 = vpop.f32.mrf.mxu1 }
 0x329   : > { %v18575_v28 = vadd.f32 %v4655_v27, %v4365_v41  ;;  %v15244_v44 = vpop.f32.mrf.mxu0  ;;  %15451 = vmatmul.mubr.msk.bf16.gmra.mxu0 %vm347_vm1, %v20838_v21  ;;  %v20841_v41 = vld [vmem:[#allocation20_spill] sm:$0xff] }
 0x32a   : > { %v15298_v57 = vpop.f32.mrf.mxu1  ;;  %15505 = vmatmul.mubr.msk.bf16.gmra.mxu1 %vm347_vm1, %v5806_v15  ;;  %15454 = vmatprep.mubr.msk.bf16.mxu0 %vm347_vm1, %v20839_v26 }
 0x32b   : > { %v4377_v3 = vpop.f32.mrf.mxu0  ;;  %15508 = vmatprep.mubr.msk.bf16.mxu1 %vm347_vm1, %v5807_v19  ;;  %v5811_v57 = vpack.c.bf16 %v18392_v23, %v18389_v6  ;;  %v5812_v23 = vpack.c.bf16 %v18414_v8, %v18395_v11 }
 0x32c   : > { %v4667_v10 = vpop.f32.mrf.mxu1 }
 0x32d   : > { %v15245_v13 = vpop.f32.mrf.mxu0 }
 0x32e   : > { %v15299_v37 = vpop.f32.mrf.mxu1 }
 0x32f   : > { %v18585_v38 = vadd.f32 %v15299_v37, %v15245_v13  ;;  %v4379_v52 = vpop.f32.mrf.mxu0  ;;  %v20842_v13 = vld [vmem:[#allocation21_spill] sm:$0xff] }
 0x330   : > { %v4669_v35 = vpop.f32.mrf.mxu1 }
 0x331   : > { %v15248_v18 = vpop.f32.mrf.mxu0  ;;  %15455 = vmatmul.mubr.msk.bf16.gmra.mxu0 %vm347_vm1, %v20840_v36 }
 0x332   : > { %v15302_v15 = vpop.f32.mrf.mxu1  ;;  %15509 = vmatmul.mubr.msk.bf16.gmra.mxu1 %vm347_vm1, %v5808_v40  ;;  %15458 = vmatprep.mubr.msk.bf16.mxu0 %vm347_vm1, %v20841_v41  ;;  %v20843_v40 = vld [vmem:[#allocation22_spill] sm:$0xff] }
 0x333   : > { %v4390_v19 = vpop.f32.mrf.mxu0  ;;  %15512 = vmatprep.mubr.msk.bf16.mxu1 %vm347_vm1, %v5809_v1  ;;  %v20844_v15 = vld [vmem:[#allocation48_spill] sm:$0xff] }
 0x334   : > { %v4680_v43 = vpop.f32.mrf.mxu1 }
 0x335   : > { %v18595_v2 = vadd.f32 %v4680_v43, %v4390_v19  ;;  %v15249_v27 = vpop.f32.mrf.mxu0  ;;  %v5813_v19 = vpack.c.bf16 %v20844_v15, %v18417_v20  ;;  %v12930_v20 = vld [vmem:[%s16373_s9 + $0x54e] sm:$0xff] }
 0x336   : > { %v15303_v44 = vpop.f32.mrf.mxu1 }
 0x337   : > { %v4393_v16 = vpop.f32.mrf.mxu0 }
 0x338   : > { %v4683_v3 = vpop.f32.mrf.mxu1 }
 0x339   : > { %v15252_v10 = vpop.f32.mrf.mxu0  ;;  %15459 = vmatmul.mubr.msk.bf16.gmra.mxu0 %vm347_vm1, %v20842_v13 }
 0x33a   : > { %v15306_v37 = vpop.f32.mrf.mxu1  ;;  %15513 = vmatmul.mubr.msk.bf16.gmra.mxu1 %vm347_vm1, %v5810_v39  ;;  %15462 = vmatprep.mubr.msk.bf16.mxu0 %vm347_vm1, %v20843_v40  ;;  %v20845_v39 = vld [vmem:[#allocation23_spill] sm:$0xff] }
 0x33b   : > { %v18606_v52 = vadd.f32 %v15306_v37, %v15252_v10  ;;  %v4403_v1 = vpop.f32.mrf.mxu0  ;;  %15516 = vmatprep.mubr.msk.bf16.mxu1 %vm347_vm1, %v5811_v57  ;;  %v20846_v57 = vld [vmem:[#allocation24_spill] sm:$0xff]  ;;  %v20847_v37 = vld [vmem:[#allocation49_spill] sm:$0xff] }
 0x33c   : > { %v4693_v46 = vpop.f32.mrf.mxu1  ;;  %v5814_v1 = vpack.c.bf16 %v18441_v56, %v20847_v37  ;;  %v12932_v56 = vld [vmem:[%s16373_s9 + $0x55e] sm:$0xff] }
 0x33d   : > { %v15253_v45 = vpop.f32.mrf.mxu0 }
 0x33e   : > { %v15307_v6 = vpop.f32.mrf.mxu1 }
 0x33f   : > { %v18611_v35 = vadd.f32 %v15307_v6, %v15253_v45  ;;  %v4405_v18 = vpop.f32.mrf.mxu0  ;;  %v5815_v45 = vpack.c.bf16 %v12930_v20, %v18444_v12  ;;  %v13043_v20 = vld [vmem:[%s16373_s9 + $0x62a] sm:$0xff] }
 0x340   : > { %v4695_v43 = vpop.f32.mrf.mxu1 }
 0x341   : > { %v18615_v27 = vadd.f32 %v4695_v43, %v4405_v18  ;;  %v15256_v44 = vpop.f32.mrf.mxu0  ;;  %15463 = vmatmul.mubr.msk.bf16.gmra.mxu0 %vm347_vm1, %v20845_v39  ;;  %v20848_v18 = vld [vmem:[#allocation25_spill] sm:$0xff] }
 0x342   : > { %v15310_v16 = vpop.f32.mrf.mxu1  ;;  %15517 = vmatmul.mubr.msk.bf16.gmra.mxu1 %vm347_vm1, %v5812_v23  ;;  %15466 = vmatprep.mubr.msk.bf16.mxu0 %vm347_vm1, %v20846_v57  ;;  %v12931_v43 = vld [vmem:[%s16373_s9 + $0x556] sm:$0xff] }
 0x343   : > { %v4418_v11 = vpop.f32.mrf.mxu0  ;;  %15520 = vmatprep.mubr.msk.bf16.mxu1 %vm347_vm1, %v5813_v19  ;;  %v20849_v19 = vld [vmem:[#allocation26_spill] sm:$0xff] }
 0x344   : > { %v4708_v8 = vpop.f32.mrf.mxu1  ;;  %v12962_v16 = vld [vmem:[%s16373_s9 + $0x61e] sm:$0xff]  ;;  %v12963_v11 = vld [vmem:[%s16373_s9 + $0x626] sm:$0xff] }
 0x345   : > { %v15257_v3 = vpop.f32.mrf.mxu0 }
 0x346   : > { %v15311_v10 = vpop.f32.mrf.mxu1  ;;  %v13044_v3 = vld [vmem:[%s16373_s9 + $0x632] sm:$0xff] }
 0x347   : > { %v4420_v46 = vpop.f32.mrf.mxu0 }
 0x348   : > { %v4710_v6 = vpop.f32.mrf.mxu1  ;;  %v5816_v46 = vpack.c.bf16 %v12932_v56, %v12931_v43  ;;  %v12964_v56 = vld [vmem:[%s16373_s9 + $0x62e] sm:$0xff] }
 0x349   : > { %v15316_v23 = vpop.f32.mrf.mxu0  ;;  %15467 = vmatmul.mubr.msk.bf16.gmra.mxu0 %vm347_vm1, %v20848_v18  ;;  %v6185_v6 = vpack.c.bf16 %v12963_v11, %v12962_v16  ;;  %v13045_v11 = vld [vmem:[%s16373_s9 + $0x63a] sm:$0xff] }
 0x34a   : > { %v15370_v15 = vpop.f32.mrf.mxu1  ;;  %15521 = vmatmul.mubr.msk.bf16.gmra.mxu1 %vm347_vm1, %v5814_v1  ;;  %15470 = vmatprep.mubr.msk.bf16.mxu0 %vm347_vm1, %v20849_v19 }
 0x34b   : > { %v4916_v44 = vpop.f32.mrf.mxu0  ;;  %15524 = vmatprep.mubr.msk.bf16.mxu1 %vm347_vm1, %v5815_v45  ;;  %v6577_v45 = vpack.c.bf16 %v13044_v3, %v13043_v20  ;;  %v18660_v3 = vld [vmem:[%s16373_s9 + $0x63e] sm:$0xff] }
 0x34c   : > { %v5091_v12 = vadd.f32 %v4916_v44, %v18446_v55  ;;  %v5308_v8 = vpop.f32.mrf.mxu1  ;;  %v20850_v44 = vld [vmem:[#allocation27_spill] sm:$0xff] }
 0x34d   : > { %v15317_v10 = vpop.f32.mrf.mxu0 }
 0x34e   : > { %v18640_v37 = vadd.f32 %v5308_v8, %v5091_v12  ;;  %v15371_v1 = vpop.f32.mrf.mxu1  ;;  %v13046_v8 = vld [vmem:[%s16373_s9 + $0x642] sm:$0xff] }
 0x34f   : > { %v4919_v23 = vpop.f32.mrf.mxu0 }
 0x350   : > { %v5092_v15 = vadd.f32 %v4919_v23, %v18452_v42  ;;  %v5311_v19 = vpop.f32.mrf.mxu1  ;;  %v18652_v42 = vld [vmem:[%s16373_s9 + $0x636] sm:$0xff] }
 0x351   : > { %v15320_v55 = vpop.f32.mrf.mxu0  ;;  %15471 = vmatmul.mubr.msk.bf16.gmra.mxu0 %vm347_vm1, %v20850_v44  ;;  %v13048_v23 = vld [vmem:[%s16373_s9 + $0x652] sm:$0xff] }
 0x352   : > { %v18645_v10 = vadd.f32 %v5311_v19, %v5092_v15  ;;  %v5093_v12 = vadd.f32 %v15320_v55, %v18458_v9  ;;  %v15374_v43 = vpop.f32.mrf.mxu1  ;;  %15525 = vmatmul.mubr.msk.bf16.gmra.mxu1 %vm347_vm1, %v5816_v46  ;;  %15530 = vmatprep.mubr.msk.bf16.mxu0 %vm347_vm1, %v6185_v6  ;;  %v18663_v9 = vld [vmem:[%s16373_s9 + $0x646] sm:$0xff]  ;;  %v6186_v46 = vpack.c.bf16 %v18652_v42, %v12964_v56  ;;  %v7550_v56 = vsel %vm426_vm0, %v18482_v4, 0  ;;  %v18688_v4 = vld [vmem:[%s16373_s9 + $0x656] sm:$0xff] }
 0x353   : > { %v4930_v16 = vpop.f32.mrf.mxu0  ;;  %15584 = vmatprep.mubr.msk.bf16.mxu1 %vm347_vm1, %v6577_v45  ;;  %v13047_v6 = vld [vmem:[%s16373_s9 + $0x64a] sm:$0xff]  ;;  %v6578_v45 = vpack.c.bf16 %v13046_v8, %v13045_v11 }
 0x354   : > { %v18657_v20 = vadd.f32 %v15374_v43, %v5093_v12  ;;  %v5322_v19 = vpop.f32.mrf.mxu1  ;;  %v7076_v12 = vsel %vm426_vm0, %v18476_v34, 0  ;;  %v6187_v43 = vpack.c.bf16 %v18663_v9, %v18660_v3  ;;  %v18679_v11 = vld [vmem:[%s16373_s9 + $0x64e] sm:$0xff]  ;;  %v18684_v34 = vld [vmem:[%s20641_s1 + $0x26] sm:$0x3] }
 0x355   : > { %v15321_v1 = vpop.f32.mrf.mxu0 }
 0x356   : > { %v5094_v15 = vadd.f32 %v15321_v1, %v18463_v22  ;;  %v15375_v55 = vpop.f32.mrf.mxu1  ;;  %v6579_v22 = vpack.c.bf16 %v13048_v23, %v13047_v6  ;;  %v13050_v23 = vld [vmem:[%s16373_s9 + $0x662] sm:$0xff] }
 0x357   : > { %v4932_v16 = vpop.f32.mrf.mxu0 }
 0x358   : > { %v18673_v19 = vadd.f32 %v15375_v55, %v5094_v15  ;;  %v5324_v44 = vpop.f32.mrf.mxu1  ;;  %v18699_v15 = vld [vmem:[%s16373_s9 + $0x65e] sm:$0xff]  ;;  %v18702_v55 = vld [vmem:[%s16373_s9 + $0x666] sm:$0xff] }
 0x359   : > { %v15324_v1 = vpop.f32.mrf.mxu0  ;;  %15531 = vmatmul.mubr.msk.bf16.vlgmr.msra.gmra.mxu0 %vm347_vm1, %v6186_v46  ;;  %v13049_v44 = vld [vmem:[%s16373_s9 + $0x65a] sm:$0xff]  ;;  %v18694_v46 = vld [vmem:[%s20641_s1 + $0x2a] sm:$0x3] }
 0x35a   : > { %v15378_v8 = vpop.f32.mrf.mxu1  ;;  %15585 = vmatmul.mubr.msk.bf16.vlgmr.msra.gmra.mxu1 %vm347_vm1, %v6578_v45  ;;  %15637 = vmatpush3.bf16.msra.mxu0 %v7076_v12  ;;  %v13051_v12 = vld [vmem:[%s16373_s9 + $0x66a] sm:$0xff]  ;;  %v13052_v1 = vld [vmem:[%s16373_s9 + $0x672] sm:$0xff] }
 0x35b   : > { %v4944_v6 = vpop.f32.mrf.mxu0  ;;  %15691 = vmatpush3.bf16.msra.mxu1 %v7550_v56  ;;  %15534 = vmatprep.mubr.msk.bf16.mxu0 %vm347_vm1, %v6187_v43  ;;  %v6188_v43 = vpack.c.bf16 %v18688_v4, %v18679_v11 }
 0x35c   : > { %v5095_v45 = vadd.f32 %v4944_v6, %v18489_v30  ;;  %v5336_v16 = vpop.f32.mrf.mxu1  ;;  %15588 = vmatprep.mubr.msk.bf16.mxu1 %vm347_vm1, %v6579_v22  ;;  %16196 = vmatprep.subr.msk.bf16.mxu0 %vm426_vm0, %v18684_v34  ;;  %v6580_v6 = vpack.c.bf16 %v13050_v23, %v13049_v44  ;;  %v6189_v22 = vpack.c.bf16 %v18702_v55, %v18699_v15  ;;  %v18723_v44 = vld [vmem:[%s16373_s9 + $0x66e] sm:$0xff]  ;;  %v18726_v23 = vld [vmem:[%s16373_s9 + $0x676] sm:$0xff] }
 0x35d   : > { %v15325_v8 = vpop.f32.mrf.mxu0  ;;  %16197 = vmatprep.subr.msk.bf16.mxu1 %vm426_vm0, %v18694_v46 }
 0x35e   : > { %v18714_v56 = vadd.f32 %v5336_v16, %v5095_v45  ;;  %v15379_v30 = vpop.f32.mrf.mxu1  ;;  %v6581_v8 = vpack.c.bf16 %v13052_v1, %v13051_v12  ;;  %v18732_v12 = vld [vmem:[%s16373_s9 + $0x67e] sm:$0xff]  ;;  %v18735_v1 = vld [vmem:[%s16373_s9 + $0x686] sm:$0xff] }
 0x35f   : > { %v4947_v18 = vpop.f32.mrf.mxu0  ;;  %v13056_v30 = vld [vmem:[%s16373_s9 + $0x692] sm:$0xff] }
 0x360   : > { %v5339_v57 = vpop.f32.mrf.mxu1  ;;  %v13053_v18 = vld [vmem:[%s16373_s9 + $0x67a] sm:$0xff] }
 0x361   : > { %v15328_v39 = vpop.f32.mrf.mxu0  ;;  %15535 = vmatmul.mubr.msk.bf16.gmra.mxu0 %vm347_vm1, %v6188_v43  ;;  %v13054_v57 = vld [vmem:[%s16373_s9 + $0x682] sm:$0xff] }
 0x362   : > { %v5097_v40 = vadd.f32 %v15328_v39, %v18502_v49  ;;  %v15382_v45 = vpop.f32.mrf.mxu1  ;;  %15589 = vmatmul.mubr.msk.bf16.gmra.mxu1 %vm347_vm1, %v6580_v6  ;;  %15538 = vmatprep.mubr.msk.bf16.mxu0 %vm347_vm1, %v6189_v22  ;;  %v13055_v39 = vld [vmem:[%s16373_s9 + $0x68a] sm:$0xff]  ;;  %v6190_v22 = vpack.c.bf16 %v18726_v23, %v18723_v44  ;;  %v6582_v13 = vpack.c.bf16 %v13054_v57, %v13053_v18  ;;  %v18755_v57 = vld [vmem:[%s16373_s9 + $0x696] sm:$0xff] }
 0x363   : > { %v4957_v16 = vpop.f32.mrf.mxu0  ;;  %15592 = vmatprep.mubr.msk.bf16.mxu1 %vm347_vm1, %v6581_v8  ;;  %v6191_v8 = vpack.c.bf16 %v18735_v1, %v18732_v12  ;;  %v18752_v18 = vld [vmem:[%s16373_s9 + $0x68e] sm:$0xff] }
 0x364   : > { %v18737_v43 = vadd.f32 %v15382_v45, %v5097_v40  ;;  %v5349_v49 = vpop.f32.mrf.mxu1  ;;  %v6583_v40 = vpack.c.bf16 %v13056_v30, %v13055_v39  ;;  %v13057_v39 = vld [vmem:[%s16373_s9 + $0x69a] sm:$0xff] }
 0x365   : > { %v15329_v6 = vpop.f32.mrf.mxu0 }
 0x366   : > { %v15383_v16 = vpop.f32.mrf.mxu1 }
 0x367   : > { %v4959_v41 = vpop.f32.mrf.mxu0 }
 0x368   : > { %v5096_v45 = vadd.f32 %v4959_v41, %v18509_v29  ;;  %v5351_v49 = vpop.f32.mrf.mxu1  ;;  %v13058_v29 = vld [vmem:[%s16373_s9 + $0x6a2] sm:$0xff] }
 0x369   : > { %v15332_v6 = vpop.f32.mrf.mxu0  ;;  %15539 = vmatmul.mubr.msk.bf16.gmra.mxu0 %vm347_vm1, %v6190_v22  ;;  %v18761_v41 = vld [vmem:[%s16373_s9 + $0x69e] sm:$0xff]  ;;  %v6584_v26 = vpack.c.bf16 %v13058_v29, %v13057_v39  ;;  %v18782_v39 = vld [vmem:[%s16373_s9 + $0x6b6] sm:$0xff] }
 0x36a   : > { %v18747_v36 = vadd.f32 %v5351_v49, %v5096_v45  ;;  %v15386_v16 = vpop.f32.mrf.mxu1  ;;  %15593 = vmatmul.mubr.msk.bf16.gmra.mxu1 %vm347_vm1, %v6582_v13  ;;  %15542 = vmatprep.mubr.msk.bf16.mxu0 %vm347_vm1, %v6191_v8  ;;  %v18764_v6 = vld [vmem:[%s16373_s9 + $0x6a6] sm:$0xff]  ;;  %v13060_v49 = vld [vmem:[%s16373_s9 + $0x6b2] sm:$0xff]  ;;  %v6192_v8 = vpack.c.bf16 %v18755_v57, %v18752_v18 }
 0x36b   : > { %v4971_v30 = vpop.f32.mrf.mxu0  ;;  %15596 = vmatprep.mubr.msk.bf16.mxu1 %vm347_vm1, %v6583_v40  ;;  %v13059_v45 = vld [vmem:[%s16373_s9 + $0x6aa] sm:$0xff]  ;;  %v6193_v40 = vpack.c.bf16 %v18764_v6, %v18761_v41 }
 0x36c   : > { %v5363_v22 = vpop.f32.mrf.mxu1 }
 0x36d   : > { %v15333_v13 = vpop.f32.mrf.mxu0  ;;  %v6585_v22 = vpack.c.bf16 %v13060_v49, %v13059_v45  ;;  %v13062_v45 = vld [vmem:[%s16373_s9 + $0x6c2] sm:$0xff] }
 0x36e   : > { %v5098_v16 = vadd.f32 %v15333_v13, %v18519_v54  ;;  %v15387_v30 = vpop.f32.mrf.mxu1  ;;  %v18779_v54 = vld [vmem:[%s16373_s9 + $0x6ae] sm:$0xff] }
 0x36f   : > { %v4973_v21 = vpop.f32.mrf.mxu0  ;;  %v13063_v13 = vld [vmem:[%s16373_s9 + $0x6ca] sm:$0xff] }
 0x370   : > { %v18773_v59 = vadd.f32 %v15387_v30, %v5098_v16  ;;  %v5365_v62 = vpop.f32.mrf.mxu1  ;;  %v13061_v21 = vld [vmem:[%s16373_s9 + $0x6ba] sm:$0xff]  ;;  %v6194_v16 = vpack.c.bf16 %v18782_v39, %v18779_v54 }
 0x371   : > { %v15336_v32 = vpop.f32.mrf.mxu0  ;;  %15543 = vmatmul.mubr.msk.bf16.gmra.mxu0 %vm347_vm1, %v6192_v8  ;;  %v18788_v62 = vld [vmem:[%s16373_s9 + $0x6be] sm:$0xff] }
 0x372   : > { %v15390_v47 = vpop.f32.mrf.mxu1  ;;  %15597 = vmatmul.mubr.msk.bf16.gmra.mxu1 %vm347_vm1, %v6584_v26  ;;  %15546 = vmatprep.mubr.msk.bf16.mxu0 %vm347_vm1, %v6193_v40  ;;  %v18791_v32 = vld [vmem:[%s16373_s9 + $0x6c6] sm:$0xff]  ;;  %v13064_v26 = vld [vmem:[%s16373_s9 + $0x6d2] sm:$0xff] }
 0x373   : > { %v4984_v29 = vpop.f32.mrf.mxu0  ;;  %15600 = vmatprep.mubr.msk.bf16.mxu1 %vm347_vm1, %v6585_v22  ;;  %v6586_v22 = vpack.c.bf16 %v13062_v45, %v13061_v21  ;;  %v6195_v17 = vpack.c.bf16 %v18791_v32, %v18788_v62 }
 0x374   : > { %v5099_v49 = vadd.f32 %v4984_v29, %v18529_v58  ;;  %v5376_v47 = vpop.f32.mrf.mxu1  ;;  %v6587_v58 = vpack.c.bf16 %v13064_v26, %v13063_v13  ;;  %v18813_v13 = vld [vmem:[%s16373_s9 + $0x6d6] sm:$0xff]  ;;  %v13066_v26 = vld [vmem:[%s16373_s9 + $0x6e2] sm:$0xff] }
 0x375   : > { %v15337_v8 = vpop.f32.mrf.mxu0 }
 0x376   : > { %v18798_v30 = vadd.f32 %v5376_v47, %v5099_v49  ;;  %v15391_v40 = vpop.f32.mrf.mxu1  ;;  %v18810_v47 = vld [vmem:[%s16373_s9 + $0x6ce] sm:$0xff] }
 0x377   : > { %v4987_v0 = vpop.f32.mrf.mxu0  ;;  %v18822_v40 = vld [vmem:[%s16373_s9 + $0x6e6] sm:$0xff] }
 0x378   : > { %v5100_v29 = vadd.f32 %v4987_v0, %v18535_v24  ;;  %v5379_v8 = vpop.f32.mrf.mxu1  ;;  %v13065_v24 = vld [vmem:[%s16373_s9 + $0x6da] sm:$0xff] }
 0x379   : > { %v15340_v63 = vpop.f32.mrf.mxu0  ;;  %15547 = vmatmul.mubr.msk.bf16.gmra.mxu0 %vm347_vm1, %v6194_v16  ;;  %v18819_v16 = vld [vmem:[%s16373_s9 + $0x6de] sm:$0xff]  ;;  %v6588_v31 = vpack.c.bf16 %v13066_v26, %v13065_v24  ;;  %v18842_v24 = vld [vmem:[%s16373_s9 + $0x6f6] sm:$0xff] }
 0x37a   : > { %v18804_v49 = vadd.f32 %v5379_v8, %v5100_v29  ;;  %v5101_v21 = vadd.f32 %v15340_v63, %v18542_v53  ;;  %v15394_v45 = vpop.f32.mrf.mxu1  ;;  %15601 = vmatmul.mubr.msk.bf16.gmra.mxu1 %vm347_vm1, %v6586_v22  ;;  %15550 = vmatprep.mubr.msk.bf16.mxu0 %vm347_vm1, %v6195_v17  ;;  %v13067_v53 = vld [vmem:[%s16373_s9 + $0x6ea] sm:$0xff]  ;;  %v13068_v22 = vld [vmem:[%s16373_s9 + $0x6f2] sm:$0xff]  ;;  %v6196_v8 = vpack.c.bf16 %v18813_v13, %v18810_v47  ;;  %v13069_v26 = vld [vmem:[%s16373_s9 + $0x6fa] sm:$0xff] }
 0x37b   : > { %v4998_v0 = vpop.f32.mrf.mxu0  ;;  %15604 = vmatprep.mubr.msk.bf16.mxu1 %vm347_vm1, %v6587_v58  ;;  %v6197_v60 = vpack.c.bf16 %v18822_v40, %v18819_v16  ;;  %20851 = vst [vmem:[#allocation50_spill] sm:$0xff] %v18842_v24 }
 0x37c   : > { %v18824_v29 = vadd.f32 %v15394_v45, %v5101_v21  ;;  %v5390_v63 = vpop.f32.mrf.mxu1  ;;  %v6589_v45 = vpack.c.bf16 %v13068_v22, %v13067_v53  ;;  %v13070_v53 = vld [vmem:[%s16373_s9 + $0x702] sm:$0xff] }
 0x37d   : > { %v15341_v17 = vpop.f32.mrf.mxu0  ;;  %v18848_v22 = vld [vmem:[%s16373_s9 + $0x6fe] sm:$0xff] }
 0x37e   : > { %v5102_v0 = vadd.f32 %v15341_v17, %v18547_v5  ;;  %v15395_v58 = vpop.f32.mrf.mxu1  ;;  %v18839_v5 = vld [vmem:[%s16373_s9 + $0x6ee] sm:$0xff]  ;;  %20852 = vst [vmem:[#allocation51_spill] sm:$0xff] %v18848_v22 }
 0x37f   : > { %v5000_v21 = vpop.f32.mrf.mxu0 }
 0x380   : > { %v18833_v63 = vadd.f32 %v15395_v58, %v5102_v0  ;;  %v5392_v61 = vpop.f32.mrf.mxu1  ;;  %v6590_v58 = vpack.c.bf16 %v13070_v53, %v13069_v26  ;;  %v18864_v26 = vld [vmem:[%s16373_s9 + $0x70e] sm:$0xff]  ;;  %v18867_v53 = vld [vmem:[%s16373_s9 + $0x716] sm:$0xff] }
 0x381   : > { %v15344_v25 = vpop.f32.mrf.mxu0  ;;  %15551 = vmatmul.mubr.msk.bf16.gmra.mxu0 %vm347_vm1, %v6196_v8  ;;  %v18851_v61 = vld [vmem:[%s16373_s9 + $0x706] sm:$0xff] }
 0x382   : > { %v15398_v33 = vpop.f32.mrf.mxu1  ;;  %15605 = vmatmul.mubr.msk.bf16.gmra.mxu1 %vm347_vm1, %v6588_v31  ;;  %15554 = vmatprep.mubr.msk.bf16.mxu0 %vm347_vm1, %v6197_v60  ;;  %20853 = vst [vmem:[#allocation53_spill] sm:$0xff] %v18851_v61  ;;  %v13071_v8 = vld [vmem:[%s16373_s9 + $0x70a] sm:$0xff]  ;;  %v6198_v60 = vpack.c.bf16 %v18842_v24, %v18839_v5  ;;  %v6199_v21 = vpack.c.bf16 %v18851_v61, %v18848_v22 }
 0x383   : > { %v5012_v17 = vpop.f32.mrf.mxu0  ;;  %15608 = vmatprep.mubr.msk.bf16.mxu1 %vm347_vm1, %v6589_v45  ;;  %v13072_v33 = vld [vmem:[%s16373_s9 + $0x712] sm:$0xff]  ;;  %v6200_v61 = vpack.c.bf16 %v18867_v53, %v18864_v26 }
 0x384   : > { %v5404_v25 = vpop.f32.mrf.mxu1  ;;  %v6591_v17 = vpack.c.bf16 %v13072_v33, %v13071_v8  ;;  %v13074_v8 = vld [vmem:[%s16373_s9 + $0x722] sm:$0xff] }
 0x385   : > { %v15345_v31 = vpop.f32.mrf.mxu0  ;;  %v18873_v33 = vld [vmem:[%s16373_s9 + $0x71e] sm:$0xff] }
 0x386   : > { %v15399_v0 = vpop.f32.mrf.mxu1  ;;  %20854 = vst [vmem:[#allocation52_spill] sm:$0xff] %v18873_v33 }
 0x387   : > { %v5014_v45 = vpop.f32.mrf.mxu0  ;;  %v13073_v0 = vld [vmem:[%s16373_s9 + $0x71a] sm:$0xff] }
 0x388   : > { %v5406_v25 = vpop.f32.mrf.mxu1  ;;  %v6592_v24 = vpack.c.bf16 %v13074_v8, %v13073_v0  ;;  %v18896_v0 = vld [vmem:[%s16373_s9 + $0x72e] sm:$0xff]  ;;  %v18899_v8 = vld [vmem:[%s16373_s9 + $0x736] sm:$0xff] }
 0x389   : > { %v15348_v7 = vpop.f32.mrf.mxu0  ;;  %15555 = vmatmul.mubr.msk.bf16.gmra.mxu0 %vm347_vm1, %v6198_v60  ;;  %v18876_v60 = vld [vmem:[%s16373_s9 + $0x726] sm:$0xff]  ;;  %20859 = vst [vmem:[#allocation58_spill] sm:$0xff] %v18899_v8 }
 0x38a   : > { %v5105_v31 = vadd.f32 %v15348_v7, %v18566_v48  ;;  %v15402_v50 = vpop.f32.mrf.mxu1  ;;  %15609 = vmatmul.mubr.msk.bf16.gmra.mxu1 %vm347_vm1, %v6590_v58  ;;  %15558 = vmatprep.mubr.msk.bf16.mxu0 %vm347_vm1, %v6199_v21  ;;  %20855 = vst [vmem:[#allocation55_spill] sm:$0xff] %v18876_v60  ;;  %v13075_v25 = vld [vmem:[%s16373_s9 + $0x72a] sm:$0xff]  ;;  %v13076_v21 = vld [vmem:[%s16373_s9 + $0x732] sm:$0xff] }
 0x38b   : > { %v5024_v45 = vpop.f32.mrf.mxu0  ;;  %15612 = vmatprep.mubr.msk.bf16.mxu1 %vm347_vm1, %v6591_v17 }
 0x38c   : > { %v18878_v7 = vadd.f32 %v15402_v50, %v5105_v31  ;;  %v5103_v48 = vadd.f32 %v5024_v45, %v18569_v14  ;;  %v5416_v58 = vpop.f32.mrf.mxu1  ;;  %v6201_v50 = vpack.c.bf16 %v18876_v60, %v18873_v33  ;;  %v6593_v14 = vpack.c.bf16 %v13076_v21, %v13075_v25  ;;  %v13077_v25 = vld [vmem:[%s16373_s9 + $0x73a] sm:$0xff] }
 0x38d   : > { %v15349_v51 = vpop.f32.mrf.mxu0 }
 0x38e   : > { %20856 = vst [vmem:[#allocation56_spill] sm:$0xff] %v18878_v7  ;;  %v18885_v22 = vadd.f32 %v5416_v58, %v5103_v48  ;;  %v15403_v17 = vpop.f32.mrf.mxu1 }
 0x38f   : > { %v5027_v31 = vpop.f32.mrf.mxu0  ;;  %v18908_v17 = vld [vmem:[%s16373_s9 + $0x746] sm:$0xff] }
 0x390   : > { %20857 = vst [vmem:[#allocation57_spill] sm:$0xff] %v18885_v22  ;;  %v5104_v51 = vadd.f32 %v5027_v31, %v18575_v28  ;;  %v5419_v45 = vpop.f32.mrf.mxu1  ;;  %v13078_v28 = vld [vmem:[%s16373_s9 + $0x742] sm:$0xff]  ;;  %20861 = vst [vmem:[#allocation60_spill] sm:$0xff] %v18908_v17  ;;  %v13079_v31 = vld [vmem:[%s16373_s9 + $0x74a] sm:$0xff] }
 0x391   : > { %v15352_v7 = vpop.f32.mrf.mxu0  ;;  %15559 = vmatmul.mubr.msk.bf16.gmra.mxu0 %vm347_vm1, %v6200_v61 }
 0x392   : > { %v18891_v48 = vadd.f32 %v5419_v45, %v5104_v51  ;;  %v15406_v58 = vpop.f32.mrf.mxu1  ;;  %15613 = vmatmul.mubr.msk.bf16.gmra.mxu1 %vm347_vm1, %v6592_v24  ;;  %15562 = vmatprep.mubr.msk.bf16.mxu0 %vm347_vm1, %v6201_v50  ;;  %v18905_v7 = vld [vmem:[%s16373_s9 + $0x73e] sm:$0xff]  ;;  %v13080_v51 = vld [vmem:[%s16373_s9 + $0x752] sm:$0xff]  ;;  %v6202_v50 = vpack.c.bf16 %v18899_v8, %v18896_v0 }
 0x393   : > { %v5039_v21 = vpop.f32.mrf.mxu0  ;;  %15616 = vmatprep.mubr.msk.bf16.mxu1 %vm347_vm1, %v6593_v14  ;;  %20860 = vst [vmem:[#allocation59_spill] sm:$0xff] %v18905_v7  ;;  %v6203_v14 = vpack.c.bf16 %v18908_v17, %v18905_v7 }
 0x394   : > { %20858 = vst [vmem:[#allocation54_spill] sm:$0xff] %v18891_v48  ;;  %v5431_v61 = vpop.f32.mrf.mxu1  ;;  %v6594_v21 = vpack.c.bf16 %v13078_v28, %v13077_v25  ;;  %v18926_v25 = vld [vmem:[%s16373_s9 + $0x756] sm:$0xff] }
 0x395   : > { %v15353_v24 = vpop.f32.mrf.mxu0  ;;  %v6595_v61 = vpack.c.bf16 %v13080_v51, %v13079_v31  ;;  %v13082_v31 = vld [vmem:[%s16373_s9 + $0x762] sm:$0xff] }
 0x396   : > { %v5106_v45 = vadd.f32 %v15353_v24, %v18585_v38  ;;  %v15407_v58 = vpop.f32.mrf.mxu1  ;;  %v18923_v38 = vld [vmem:[%s16373_s9 + $0x74e] sm:$0xff] }
 0x397   : > { %v5041_v48 = vpop.f32.mrf.mxu0  ;;  %v13083_v24 = vld [vmem:[%s16373_s9 + $0x76a] sm:$0xff] }
 0x398   : > { %v18917_v60 = vadd.f32 %v15407_v58, %v5106_v45  ;;  %v5433_v22 = vpop.f32.mrf.mxu1  ;;  %v13081_v48 = vld [vmem:[%s16373_s9 + $0x75a] sm:$0xff]  ;;  %v6204_v58 = vpack.c.bf16 %v18926_v25, %v18923_v38 }
 0x399   : > { %v15356_v33 = vpop.f32.mrf.mxu0  ;;  %15563 = vmatmul.mubr.msk.bf16.gmra.mxu0 %vm347_vm1, %v6202_v50  ;;  %v18932_v22 = vld [vmem:[%s16373_s9 + $0x75e] sm:$0xff]  ;;  %v13084_v50 = vld [vmem:[%s16373_s9 + $0x772] sm:$0xff] }
 0x39a   : > { %20862 = vst [vmem:[#allocation62_spill] sm:$0xff] %v18917_v60  ;;  %v15410_v8 = vpop.f32.mrf.mxu1  ;;  %15617 = vmatmul.mubr.msk.bf16.gmra.mxu1 %vm347_vm1, %v6594_v21  ;;  %15566 = vmatprep.mubr.msk.bf16.mxu0 %vm347_vm1, %v6203_v14  ;;  %20863 = vst [vmem:[#allocation61_spill] sm:$0xff] %v18932_v22  ;;  %v18935_v33 = vld [vmem:[%s16373_s9 + $0x766] sm:$0xff] }
 0x39b   : > { %v5052_v28 = vpop.f32.mrf.mxu0  ;;  %15620 = vmatprep.mubr.msk.bf16.mxu1 %vm347_vm1, %v6595_v61  ;;  %20864 = vst [vmem:[#allocation63_spill] sm:$0xff] %v18935_v33  ;;  %v6596_v61 = vpack.c.bf16 %v13082_v31, %v13081_v48  ;;  %v6205_v60 = vpack.c.bf16 %v18935_v33, %v18932_v22  ;;  %v18951_v48 = vld [vmem:[%s16373_s9 + $0x76e] sm:$0xff]  ;;  %v18954_v31 = vld [vmem:[%s16373_s9 + $0x776] sm:$0xff] }
 0x39c   : > { %v5107_v51 = vadd.f32 %v5052_v28, %v18595_v2  ;;  %v5444_v8 = vpop.f32.mrf.mxu1  ;;  %v6597_v28 = vpack.c.bf16 %v13084_v50, %v13083_v24  ;;  %20866 = vst [vmem:[#allocation67_spill] sm:$0xff] %v18954_v31  ;;  %v18960_v24 = vld [vmem:[%s16373_s9 + $0x77e] sm:$0xff]  ;;  %v18963_v50 = vld [vmem:[%s16373_s9 + $0x786] sm:$0xff] }
 0x39d   : > { %v15357_v45 = vpop.f32.mrf.mxu0 }
 0x39e   : > { %v18942_v21 = vadd.f32 %v5444_v8, %v5107_v51  ;;  %v15411_v14 = vpop.f32.mrf.mxu1  ;;  %v13085_v8 = vld [vmem:[%s16373_s9 + $0x77a] sm:$0xff] }
 0x39f   : > { %v5055_v2 = vpop.f32.mrf.mxu0 }
 0x3a0   : > { %20865 = vst [vmem:[#allocation64_spill] sm:$0xff] %v18942_v21  ;;  %v5447_v17 = vpop.f32.mrf.mxu1  ;;  %v6207_v21 = vpack.c.bf16 %v18963_v50, %v18960_v24 }
 0x3a1   : > { %v15360_v7 = vpop.f32.mrf.mxu0  ;;  %15567 = vmatmul.mubr.msk.bf16.gmra.mxu0 %vm347_vm1, %v6204_v58  ;;  %v13086_v17 = vld [vmem:[%s16373_s9 + $0x782] sm:$0xff] }
 0x3a2   : > { %v5109_v45 = vadd.f32 %v15360_v7, %v18606_v52  ;;  %v15414_v51 = vpop.f32.mrf.mxu1  ;;  %15621 = vmatmul.mubr.msk.bf16.gmra.mxu1 %vm347_vm1, %v6596_v61  ;;  %15570 = vmatprep.mubr.msk.bf16.mxu0 %vm347_vm1, %v6205_v60  ;;  %v13087_v7 = vld [vmem:[%s16373_s9 + $0x78a] sm:$0xff]  ;;  %v13088_v61 = vld [vmem:[%s16373_s9 + $0x792] sm:$0xff]  ;;  %v6206_v60 = vpack.c.bf16 %v18954_v31, %v18951_v48 }
 0x3a3   : > { %v5065_v14 = vpop.f32.mrf.mxu0  ;;  %15624 = vmatprep.mubr.msk.bf16.mxu1 %vm347_vm1, %v6597_v28  ;;  %v6598_v28 = vpack.c.bf16 %v13086_v17, %v13085_v8  ;;  %v18983_v17 = vld [vmem:[%s16373_s9 + $0x78e] sm:$0xff] }
 0x3a4   : > { %v18965_v58 = vadd.f32 %v15414_v51, %v5109_v45  ;;  %v5457_v52 = vpop.f32.mrf.mxu1  ;;  %v6599_v45 = vpack.c.bf16 %v13088_v61, %v13087_v7  ;;  %20870 = vst [vmem:[#allocation66_spill] sm:$0xff] %v18983_v17  ;;  %v13089_v7 = vld [vmem:[%s16373_s9 + $0x79a] sm:$0xff] }
 0x3a5   : > { %v15361_v2 = vpop.f32.mrf.mxu0 }
 0x3a6   : > { %20867 = vst [vmem:[#allocation65_spill] sm:$0xff] %v18965_v58  ;;  %v5110_v33 = vadd.f32 %v15361_v2, %v18611_v35  ;;  %v15415_v14 = vpop.f32.mrf.mxu1  ;;  %v13091_v2 = vld [vmem:[%s16373_s9 + $0x7aa] sm:$0xff] }
 0x3a7   : > { %v5067_v22 = vpop.f32.mrf.mxu0 }
 0x3a8   : > { %v18974_v51 = vadd.f32 %v15415_v14, %v5110_v33  ;;  %v5108_v52 = vadd.f32 %v5067_v22, %v18615_v27  ;;  %v5459_v58 = vpop.f32.mrf.mxu1  ;;  %v18986_v33 = vld [vmem:[%s16373_s9 + $0x796] sm:$0xff]  ;;  %v13090_v27 = vld [vmem:[%s16373_s9 + $0x7a2] sm:$0xff] }
 0x3a9   : > { %v15364_v31 = vpop.f32.mrf.mxu0  ;;  %15571 = vmatmul.mubr.msk.bf16.gmra.mxu0 %vm347_vm1, %v6206_v60  ;;  %20871 = vst [vmem:[#allocation70_spill] sm:$0xff] %v18986_v33  ;;  %v18992_v22 = vld [vmem:[%s16373_s9 + $0x79e] sm:$0xff]  ;;  %v13092_v60 = vld [vmem:[%s16373_s9 + $0x7b2] sm:$0xff] }
 0x3aa   : > { %20868 = vst [vmem:[#allocation68_spill] sm:$0xff] %v18974_v51  ;;  %v18978_v35 = vadd.f32 %v5459_v58, %v5108_v52  ;;  %v15418_v8 = vpop.f32.mrf.mxu1  ;;  %15625 = vmatmul.mubr.msk.bf16.gmra.mxu1 %vm347_vm1, %v6598_v28  ;;  %15574 = vmatprep.mubr.msk.bf16.mxu0 %vm347_vm1, %v6207_v21  ;;  %20872 = vst [vmem:[#allocation48_spill] sm:$0xff] %v18992_v22  ;;  %v18995_v31 = vld [vmem:[%s16373_s9 + $0x7a6] sm:$0xff]  ;;  %v6208_v21 = vpack.c.bf16 %v18986_v33, %v18983_v17 }
 0x3ab   : > { %v5080_v61 = vpop.f32.mrf.mxu0  ;;  %15628 = vmatprep.mubr.msk.bf16.mxu1 %vm347_vm1, %v6599_v45  ;;  %20873 = vst [vmem:[#allocation49_spill] sm:$0xff] %v18995_v31  ;;  %v6600_v52 = vpack.c.bf16 %v13090_v27, %v13089_v7  ;;  %v6209_v45 = vpack.c.bf16 %v18995_v31, %v18992_v22  ;;  %v13093_v27 = vld [vmem:[%s16373_s9 + $0x7ba] sm:$0xff] }
 0x3ac   : > { %20869 = vst [vmem:[#allocation69_spill] sm:$0xff] %v18978_v35  ;;  %v5472_v58 = vpop.f32.mrf.mxu1  ;;  %v6601_v61 = vpack.c.bf16 %v13092_v60, %v13091_v2 }
 0x3ad   : > { %v15365_v14 = vpop.f32.mrf.mxu0 }
 0x3ae   : > { %v15419_v28 = vpop.f32.mrf.mxu1  ;;  %v19007_v14 = vld [vmem:[%s16373_s9 + $0x7ae] sm:$0xff] }
 0x3af   : > { %v5082_v8 = vpop.f32.mrf.mxu0  ;;  %v19010_v28 = vld [vmem:[%s16373_s9 + $0x7b6] sm:$0xff] }
 0x3b0   : > { %v5474_v58 = vpop.f32.mrf.mxu1  ;;  %v13094_v8 = vld [vmem:[%s16373_s9 + $0x7c2] sm:$0xff] }
 0x3b1   : > { %v15424_v35 = vpop.f32.mrf.mxu0  ;;  %15575 = vmatmul.mubr.msk.bf16.gmra.mxu0 %vm347_vm1, %v6208_v21  ;;  %v13205_v58 = vld [vmem:[%s16373_s9 + $0x1a] sm:$0xff]  ;;  %v6602_v31 = vpack.c.bf16 %v13094_v8, %v13093_v27 }
 0x3b2   : > { %v15478_v51 = vpop.f32.mrf.mxu1  ;;  %15629 = vmatmul.mubr.msk.bf16.gmra.mxu1 %vm347_vm1, %v6600_v52  ;;  %15578 = vmatprep.mubr.msk.bf16.mxu0 %vm347_vm1, %v6209_v45  ;;  %v13204_v35 = vld [vmem:[%s16373_s9 + $0x12] sm:$0xff] }
 0x3b3   : > { %v5542_v7 = vpop.f32.mrf.mxu0  ;;  %15632 = vmatprep.mubr.msk.bf16.mxu1 %vm347_vm1, %v6601_v61  ;;  %v6210_v51 = vpack.c.bf16 %v19010_v28, %v19007_v14  ;;  %v6969_v61 = vpack.c.bf16 %v18660_v3, %v18652_v42  ;;  %v7443_v33 = vpack.c.bf16 %v13205_v58, %v13204_v35  ;;  %v13206_v3 = vld [vmem:[%s16373_s9 + $0x22] sm:$0xff]  ;;  %v6970_v35 = vpack.c.bf16 %v18679_v11, %v18663_v9  ;;  %v13208_v58 = vld [vmem:[%s16373_s9 + $0x32] sm:$0xff] }
 0x3b4   : > { %v5717_v2 = vadd.f32 %v5542_v7, %v18640_v37  ;;  %v5934_v60 = vpop.f32.mrf.mxu1  ;;  %v8212_v9 = vsel %vm426_vm0, %v18694_v46, 0 }
 0x3b5   : > { %v15425_v21 = vpop.f32.mrf.mxu0 }
 0x3b6   : > { %v19020_v52 = vadd.f32 %v5934_v60, %v5717_v2  ;;  %v15479_v45 = vpop.f32.mrf.mxu1 }
 0x3b7   : > { %v5545_v22 = vpop.f32.mrf.mxu0 }
 0x3b8   : > { %v5718_v37 = vadd.f32 %v5545_v22, %v18645_v10  ;;  %v5937_v7 = vpop.f32.mrf.mxu1  ;;  %v13207_v10 = vld [vmem:[%s16373_s9 + $0x2a] sm:$0xff] }
 0x3b9   : > { %v15428_v17 = vpop.f32.mrf.mxu0  ;;  %15579 = vmatmul.mubr.msk.bf16.gmra.mxu0 %vm347_vm1, %v6210_v51  ;;  %v13209_v51 = vld [vmem:[%s16373_s9 + $0x3a] sm:$0xff] }
 0x3ba   : > { %v19026_v21 = vadd.f32 %v5937_v7, %v5718_v37  ;;  %v5719_v2 = vadd.f32 %v15428_v17, %v18657_v20  ;;  %v15482_v60 = vpop.f32.mrf.mxu1  ;;  %15633 = vmatmul.mubr.msk.bf16.gmra.mxu1 %vm347_vm1, %v6602_v31  ;;  %15638 = vmatprep.mubr.msk.bf16.mxu0 %vm347_vm1, %v6969_v61  ;;  %v7444_v31 = vpack.c.bf16 %v13207_v10, %v13206_v3  ;;  %v7840_v61 = vsel %vm426_vm0, %v18684_v34, 0  ;;  %v19053_v34 = vld [vmem:[%s20641_s1 + $0x2c] sm:$0x3]  ;;  %v13212_v10 = vld [vmem:[%s16373_s9 + $0x52] sm:$0xff] }
 0x3bb   : > { %v5556_v42 = vpop.f32.mrf.mxu0  ;;  %15692 = vmatprep.mubr.msk.bf16.mxu1 %vm347_vm1, %v7443_v33  ;;  %v6971_v33 = vpack.c.bf16 %v18699_v15, %v18688_v4  ;;  %v7445_v11 = vpack.c.bf16 %v13209_v51, %v13208_v58  ;;  %v19059_v4 = vld [vmem:[%s20641_s1 + $0x2e] sm:$0x3]  ;;  %v13210_v15 = vld [vmem:[%s16373_s9 + $0x42] sm:$0xff] }
 0x3bc   : > { %v19034_v22 = vadd.f32 %v15482_v60, %v5719_v2  ;;  %v5948_v27 = vpop.f32.mrf.mxu1  ;;  %v13211_v60 = vld [vmem:[%s16373_s9 + $0x4a] sm:$0xff] }
 0x3bd   : > { %v15429_v8 = vpop.f32.mrf.mxu0  ;;  %v13213_v27 = vld [vmem:[%s16373_s9 + $0x5a] sm:$0xff]  ;;  %v7446_v51 = vpack.c.bf16 %v13211_v60, %v13210_v15  ;;  %v6975_v60 = vpack.c.bf16 %v18761_v41, %v18755_v57  ;;  %v13218_v57 = vld [vmem:[%s16373_s9 + $0x82] sm:$0xff]  ;;  %v13219_v41 = vld [vmem:[%s16373_s9 + $0x8a] sm:$0xff] }
 0x3be   : > { %v5720_v20 = vadd.f32 %v15429_v8, %v18673_v19  ;;  %v15483_v17 = vpop.f32.mrf.mxu1 }
 0x3bf   : > { %v5558_v45 = vpop.f32.mrf.mxu0 }
 0x3c0   : > { %v19045_v37 = vadd.f32 %v15483_v17, %v5720_v20  ;;  %v5950_v7 = vpop.f32.mrf.mxu1  ;;  %v6973_v20 = vpack.c.bf16 %v18732_v12, %v18726_v23  ;;  %v13215_v23 = vld [vmem:[%s16373_s9 + $0x6a] sm:$0xff] }
 0x3c1   : > { %v15432_v19 = vpop.f32.mrf.mxu0  ;;  %15639 = vmatmul.mubr.msk.bf16.vlgmr.msra.gmra.mxu0 %vm347_vm1, %v6970_v35  ;;  %v6972_v35 = vpack.c.bf16 %v18723_v44, %v18702_v55  ;;  %v13214_v7 = vld [vmem:[%s16373_s9 + $0x62] sm:$0xff] }
 0x3c2   : > { %v15486_v2 = vpop.f32.mrf.mxu1  ;;  %15693 = vmatmul.mubr.msk.bf16.vlgmr.msra.gmra.mxu1 %vm347_vm1, %v7444_v31  ;;  %15745 = vmatpush3.bf16.msra.mxu0 %v7840_v61  ;;  %v7447_v31 = vpack.c.bf16 %v13213_v27, %v13212_v10  ;;  %v13217_v19 = vld [vmem:[%s16373_s9 + $0x7a] sm:$0xff]  ;;  %v7448_v15 = vpack.c.bf16 %v13215_v23, %v13214_v7 }
 0x3c3   : > { %v5570_v46 = vpop.f32.mrf.mxu0  ;;  %15799 = vmatpush3.bf16.msra.mxu1 %v8212_v9  ;;  %15642 = vmatprep.mubr.msk.bf16.mxu0 %vm347_vm1, %v6971_v33 }
 0x3c4   : > { %v5721_v42 = vadd.f32 %v5570_v46, %v18714_v56  ;;  %v5962_v3 = vpop.f32.mrf.mxu1  ;;  %15696 = vmatprep.mubr.msk.bf16.mxu1 %vm347_vm1, %v7445_v11  ;;  %16198 = vmatprep.subr.msk.bf16.mxu0 %vm426_vm0, %v19053_v34  ;;  %v13216_v11 = vld [vmem:[%s16373_s9 + $0x72] sm:$0xff]  ;;  %v6974_v46 = vpack.c.bf16 %v18752_v18, %v18735_v1 }
 0x3c5   : > { %v15433_v8 = vpop.f32.mrf.mxu0  ;;  %16199 = vmatprep.subr.msk.bf16.mxu1 %vm426_vm0, %v19059_v4 }
 0x3c6   : > { %v19074_v58 = vadd.f32 %v5962_v3, %v5721_v42  ;;  %v15487_v56 = vpop.f32.mrf.mxu1  ;;  %v7449_v3 = vpack.c.bf16 %v13217_v19, %v13216_v11  ;;  %v13224_v19 = vld [vmem:[%s16373_s9 + $0xb2] sm:$0xff] }
 0x3c7   : > { %v5573_v17 = vpop.f32.mrf.mxu0 }
 0x3c8   : > { %v5965_v45 = vpop.f32.mrf.mxu1  ;;  %v6976_v17 = vpack.c.bf16 %v18779_v54, %v18764_v6  ;;  %v13222_v54 = vld [vmem:[%s16373_s9 + $0xa2] sm:$0xff] }
 0x3c9   : > { %v15436_v61 = vpop.f32.mrf.mxu0  ;;  %15643 = vmatmul.mubr.msk.bf16.gmra.mxu0 %vm347_vm1, %v6972_v35 }
 0x3ca   : > { %v5723_v55 = vadd.f32 %v15436_v61, %v18737_v43  ;;  %v15490_v44 = vpop.f32.mrf.mxu1  ;;  %15697 = vmatmul.mubr.msk.bf16.gmra.mxu1 %vm347_vm1, %v7446_v51  ;;  %15646 = vmatprep.mubr.msk.bf16.mxu0 %vm347_vm1, %v6973_v20  ;;  %v13220_v51 = vld [vmem:[%s16373_s9 + $0x92] sm:$0xff]  ;;  %v13221_v20 = vld [vmem:[%s16373_s9 + $0x9a] sm:$0xff]  ;;  %v7450_v61 = vpack.c.bf16 %v13219_v41, %v13218_v57  ;;  %v13227_v57 = vld [vmem:[%s16373_s9 + $0xca] sm:$0xff] }
 0x3cb   : > { %v5583_v33 = vpop.f32.mrf.mxu0  ;;  %15700 = vmatprep.mubr.msk.bf16.mxu1 %vm347_vm1, %v7447_v31 }
 0x3cc   : > { %v19085_v12 = vadd.f32 %v15490_v44, %v5723_v55  ;;  %v5975_v9 = vpop.f32.mrf.mxu1  ;;  %v6977_v55 = vpack.c.bf16 %v18788_v62, %v18782_v39  ;;  %v7451_v33 = vpack.c.bf16 %v13221_v20, %v13220_v51  ;;  %v13223_v39 = vld [vmem:[%s16373_s9 + $0xaa] sm:$0xff]  ;;  %v13229_v51 = vld [vmem:[%s16373_s9 + $0xda] sm:$0xff] }
 0x3cd   : > { %v15437_v2 = vpop.f32.mrf.mxu0 }
 0x3ce   : > { %v15491_v43 = vpop.f32.mrf.mxu1  ;;  %v13225_v2 = vld [vmem:[%s16373_s9 + $0xba] sm:$0xff] }
 0x3cf   : > { %v5585_v42 = vpop.f32.mrf.mxu0  ;;  %v6978_v43 = vpack.c.bf16 %v18810_v47, %v18791_v32 }
 0x3d0   : > { %v5722_v10 = vadd.f32 %v5585_v42, %v18747_v36  ;;  %v5977_v27 = vpop.f32.mrf.mxu1  ;;  %v7452_v42 = vpack.c.bf16 %v13223_v39, %v13222_v54  ;;  %v13232_v39 = vld [vmem:[%s16373_s9 + $0xf2] sm:$0xff] }
 0x3d1   : > { %v15440_v8 = vpop.f32.mrf.mxu0  ;;  %15647 = vmatmul.mubr.msk.bf16.gmra.mxu0 %vm347_vm1, %v6974_v46 }
 0x3d2   : > { %v19095_v35 = vadd.f32 %v5977_v27, %v5722_v10  ;;  %v15494_v1 = vpop.f32.mrf.mxu1  ;;  %15701 = vmatmul.mubr.msk.bf16.gmra.mxu1 %vm347_vm1, %v7448_v15  ;;  %15650 = vmatprep.mubr.msk.bf16.mxu0 %vm347_vm1, %v6975_v60  ;;  %v7453_v27 = vpack.c.bf16 %v13225_v2, %v13224_v19  ;;  %v20876_v19 = vld [vmem:[#allocation53_spill] sm:$0xff] }
 0x3d3   : > { %v5597_v18 = vpop.f32.mrf.mxu0  ;;  %15704 = vmatprep.mubr.msk.bf16.mxu1 %vm347_vm1, %v7449_v3  ;;  %v6979_v3 = vpack.c.bf16 %v18819_v16, %v18813_v13  ;;  %v13226_v16 = vld [vmem:[%s16373_s9 + $0xc2] sm:$0xff]  ;;  %v6982_v2 = vpack.c.bf16 %v18864_v26, %v20876_v19  ;;  %v13240_v19 = vld [vmem:[%s16373_s9 + $0x132] sm:$0xff] }
 0x3d4   : > { %v5989_v56 = vpop.f32.mrf.mxu1 }
 0x3d5   : > { %v15441_v36 = vpop.f32.mrf.mxu0  ;;  %v13228_v56 = vld [vmem:[%s16373_s9 + $0xd2] sm:$0xff] }
 0x3d6   : > { %v5724_v31 = vadd.f32 %v15441_v36, %v18773_v59  ;;  %v15495_v45 = vpop.f32.mrf.mxu1  ;;  %v6980_v36 = vpack.c.bf16 %v18839_v5, %v18822_v40  ;;  %v13230_v5 = vld [vmem:[%s16373_s9 + $0xe2] sm:$0xff] }
 0x3d7   : > { %v5599_v44 = vpop.f32.mrf.mxu0 }
 0x3d8   : > { %v19109_v7 = vadd.f32 %v15495_v45, %v5724_v31  ;;  %v5991_v23 = vpop.f32.mrf.mxu1  ;;  %v7454_v31 = vpack.c.bf16 %v13227_v57, %v13226_v16  ;;  %v20874_v45 = vld [vmem:[#allocation50_spill] sm:$0xff]  ;;  %v20879_v16 = vld [vmem:[#allocation57_spill] sm:$0xff] }
 0x3d9   : > { %v15444_v9 = vpop.f32.mrf.mxu0  ;;  %15651 = vmatmul.mubr.msk.bf16.gmra.mxu0 %vm347_vm1, %v6976_v17 }
 0x3da   : > { %v15498_v6 = vpop.f32.mrf.mxu1  ;;  %15705 = vmatmul.mubr.msk.bf16.gmra.mxu1 %vm347_vm1, %v7450_v61  ;;  %15654 = vmatprep.mubr.msk.bf16.mxu0 %vm347_vm1, %v6977_v55  ;;  %v20875_v61 = vld [vmem:[#allocation51_spill] sm:$0xff] }
 0x3db   : > { %v5610_v59 = vpop.f32.mrf.mxu0  ;;  %15708 = vmatprep.mubr.msk.bf16.mxu1 %vm347_vm1, %v7451_v33  ;;  %v6981_v55 = vpack.c.bf16 %v20875_v61, %v20874_v45  ;;  %v7455_v33 = vpack.c.bf16 %v13229_v51, %v13228_v56  ;;  %v13236_v56 = vld [vmem:[%s16373_s9 + $0x112] sm:$0xff]  ;;  %v13237_v51 = vld [vmem:[%s16373_s9 + $0x11a] sm:$0xff] }
 0x3dc   : > { %v5725_v62 = vadd.f32 %v5610_v59, %v18798_v30  ;;  %v6002_v11 = vpop.f32.mrf.mxu1  ;;  %v13231_v59 = vld [vmem:[%s16373_s9 + $0xea] sm:$0xff]  ;;  %v20881_v61 = vld [vmem:[#allocation58_spill] sm:$0xff] }
 0x3dd   : > { %v15445_v46 = vpop.f32.mrf.mxu0 }
 0x3de   : > { %v19122_v15 = vadd.f32 %v6002_v11, %v5725_v62  ;;  %v15499_v60 = vpop.f32.mrf.mxu1  ;;  %v13233_v62 = vld [vmem:[%s16373_s9 + $0xfa] sm:$0xff] }
 0x3df   : > { %v5613_v10 = vpop.f32.mrf.mxu0  ;;  %v20877_v60 = vld [vmem:[#allocation52_spill] sm:$0xff] }
 0x3e0   : > { %v5726_v30 = vadd.f32 %v5613_v10, %v18804_v49  ;;  %v6005_v8 = vpop.f32.mrf.mxu1  ;;  %v7457_v10 = vpack.c.bf16 %v13233_v62, %v13232_v39  ;;  %v13238_v39 = vld [vmem:[%s16373_s9 + $0x122] sm:$0xff]  ;;  %v13239_v62 = vld [vmem:[%s16373_s9 + $0x12a] sm:$0xff] }
 0x3e1   : > { %v15448_v1 = vpop.f32.mrf.mxu0  ;;  %15655 = vmatmul.mubr.msk.bf16.gmra.mxu0 %vm347_vm1, %v6978_v43  ;;  %v7456_v43 = vpack.c.bf16 %v13231_v59, %v13230_v5 }
 0x3e2   : > { %v19128_v32 = vadd.f32 %v6005_v8, %v5726_v30  ;;  %v5727_v47 = vadd.f32 %v15448_v1, %v18824_v29  ;;  %v15502_v18 = vpop.f32.mrf.mxu1  ;;  %15709 = vmatmul.mubr.msk.bf16.gmra.mxu1 %vm347_vm1, %v7452_v42  ;;  %15658 = vmatprep.mubr.msk.bf16.mxu0 %vm347_vm1, %v6979_v3  ;;  %v6983_v42 = vpack.c.bf16 %v20877_v60, %v18867_v53  ;;  %v20878_v8 = vld [vmem:[#allocation56_spill] sm:$0xff] }
 0x3e3   : > { %v5624_v13 = vpop.f32.mrf.mxu0  ;;  %15712 = vmatprep.mubr.msk.bf16.mxu1 %vm347_vm1, %v7453_v27  ;;  %v13235_v53 = vld [vmem:[%s16373_s9 + $0x10a] sm:$0xff] }
 0x3e4   : > { %v19136_v49 = vadd.f32 %v15502_v18, %v5727_v47  ;;  %v6016_v41 = vpop.f32.mrf.mxu1  ;;  %v13234_v18 = vld [vmem:[%s16373_s9 + $0x102] sm:$0xff] }
 0x3e5   : > { %v15449_v20 = vpop.f32.mrf.mxu0  ;;  %v7458_v45 = vpack.c.bf16 %v13235_v53, %v13234_v18 }
 0x3e6   : > { %v5728_v29 = vadd.f32 %v15449_v20, %v18833_v63  ;;  %v15503_v17 = vpop.f32.mrf.mxu1 }
 0x3e7   : > { %v5626_v44 = vpop.f32.mrf.mxu0 }
 0x3e8   : > { %v19145_v23 = vadd.f32 %v15503_v17, %v5728_v29  ;;  %v6018_v9 = vpop.f32.mrf.mxu1 }
 0x3e9   : > { %v15452_v6 = vpop.f32.mrf.mxu0  ;;  %15659 = vmatmul.mubr.msk.bf16.gmra.mxu0 %vm347_vm1, %v6980_v36  ;;  %v20880_v36 = vld [vmem:[#allocation55_spill] sm:$0xff]  ;;  %v7459_v9 = vpack.c.bf16 %v13237_v51, %v13236_v56 }
 0x3ea   : > { %v15506_v40 = vpop.f32.mrf.mxu1  ;;  %15713 = vmatmul.mubr.msk.bf16.gmra.mxu1 %vm347_vm1, %v7454_v31  ;;  %15662 = vmatprep.mubr.msk.bf16.mxu0 %vm347_vm1, %v6981_v55  ;;  %v6984_v29 = vpack.c.bf16 %v18896_v0, %v20880_v36  ;;  %v20882_v55 = vld [vmem:[#allocation59_spill] sm:$0xff]  ;;  %v20883_v6 = vld [vmem:[#allocation54_spill] sm:$0xff] }
 0x3eb   : > { %v5638_v63 = vpop.f32.mrf.mxu0  ;;  %15716 = vmatprep.mubr.msk.bf16.mxu1 %vm347_vm1, %v7455_v33  ;;  %v6985_v44 = vpack.c.bf16 %v20882_v55, %v20881_v61  ;;  %v13245_v36 = vld [vmem:[%s16373_s9 + $0x15a] sm:$0xff] }
 0x3ec   : > { %v6030_v54 = vpop.f32.mrf.mxu1 }
 0x3ed   : > { %v15453_v11 = vpop.f32.mrf.mxu0 }
 0x3ee   : > { %v15507_v46 = vpop.f32.mrf.mxu1 }
 0x3ef   : > { %v5640_v3 = vpop.f32.mrf.mxu0 }
 0x3f0   : > { %v6032_v27 = vpop.f32.mrf.mxu1 }
 0x3f1   : > { %v15456_v30 = vpop.f32.mrf.mxu0  ;;  %15663 = vmatmul.mubr.msk.bf16.gmra.mxu0 %vm347_vm1, %v6982_v2  ;;  %v13241_v2 = vld [vmem:[%s16373_s9 + $0x13a] sm:$0xff]  ;;  %v7460_v27 = vpack.c.bf16 %v13239_v62, %v13238_v39  ;;  %v13246_v62 = vld [vmem:[%s16373_s9 + $0x162] sm:$0xff] }
 0x3f2   : > { %v5731_v1 = vadd.f32 %v15456_v30, %v20878_v8  ;;  %v15510_v47 = vpop.f32.mrf.mxu1  ;;  %15717 = vmatmul.mubr.msk.bf16.gmra.mxu1 %vm347_vm1, %v7456_v43  ;;  %15666 = vmatprep.mubr.msk.bf16.mxu0 %vm347_vm1, %v6983_v42  ;;  %v20884_v43 = vld [vmem:[#allocation60_spill] sm:$0xff]  ;;  %v20885_v42 = vld [vmem:[#allocation62_spill] sm:$0xff]  ;;  %v20886_v30 = vld [vmem:[#allocation61_spill] sm:$0xff] }
 0x3f3   : > { %v5650_v26 = vpop.f32.mrf.mxu0  ;;  %15720 = vmatprep.mubr.msk.bf16.mxu1 %vm347_vm1, %v7457_v10  ;;  %v6986_v60 = vpack.c.bf16 %v18923_v38, %v20884_v43  ;;  %v6987_v8 = vpack.c.bf16 %v20886_v30, %v18926_v25  ;;  %v13243_v25 = vld [vmem:[%s16373_s9 + $0x14a] sm:$0xff] }
 0x3f4   : > { %v19166_v13 = vadd.f32 %v15510_v47, %v5731_v1  ;;  %v5729_v57 = vadd.f32 %v5650_v26, %v20879_v16  ;;  %v6042_v41 = vpop.f32.mrf.mxu1  ;;  %v7461_v47 = vpack.c.bf16 %v13241_v2, %v13240_v19  ;;  %v13248_v2 = vld [vmem:[%s16373_s9 + $0x172] sm:$0xff] }
 0x3f5   : > { %v15457_v20 = vpop.f32.mrf.mxu0 }
 0x3f6   : > { %v19173_v17 = vadd.f32 %v6042_v41, %v5729_v57  ;;  %v15511_v31 = vpop.f32.mrf.mxu1  ;;  %v13242_v57 = vld [vmem:[%s16373_s9 + $0x142] sm:$0xff]  ;;  %v20887_v41 = vld [vmem:[#allocation64_spill] sm:$0xff] }
 0x3f7   : > { %v5653_v33 = vpop.f32.mrf.mxu0  ;;  %v13244_v20 = vld [vmem:[%s16373_s9 + $0x152] sm:$0xff]  ;;  %v20888_v31 = vld [vmem:[#allocation63_spill] sm:$0xff] }
 0x3f8   : > { %v5730_v40 = vadd.f32 %v5653_v33, %v20883_v6  ;;  %v6045_v63 = vpop.f32.mrf.mxu1  ;;  %v20889_v33 = vld [vmem:[#allocation67_spill] sm:$0xff] }
 0x3f9   : > { %v15460_v5 = vpop.f32.mrf.mxu0  ;;  %15667 = vmatmul.mubr.msk.bf16.gmra.mxu0 %vm347_vm1, %v6984_v29 }
 0x3fa   : > { %v19179_v0 = vadd.f32 %v6045_v63, %v5730_v40  ;;  %v15514_v59 = vpop.f32.mrf.mxu1  ;;  %15721 = vmatmul.mubr.msk.bf16.gmra.mxu1 %vm347_vm1, %v7458_v45  ;;  %15670 = vmatprep.mubr.msk.bf16.mxu0 %vm347_vm1, %v6985_v44  ;;  %v6988_v45 = vpack.c.bf16 %v18951_v48, %v20888_v31  ;;  %v7462_v44 = vpack.c.bf16 %v13243_v25, %v13242_v57 }
 0x3fb   : > { %v5665_v54 = vpop.f32.mrf.mxu0  ;;  %15724 = vmatprep.mubr.msk.bf16.mxu1 %vm347_vm1, %v7459_v9  ;;  %v6989_v9 = vpack.c.bf16 %v18960_v24, %v20889_v33  ;;  %v7463_v40 = vpack.c.bf16 %v13245_v36, %v13244_v20  ;;  %v20890_v59 = vld [vmem:[#allocation65_spill] sm:$0xff]  ;;  %v13247_v24 = vld [vmem:[%s16373_s9 + $0x16a] sm:$0xff]  ;;  %v13250_v20 = vld [vmem:[%s16373_s9 + $0x182] sm:$0xff] }
 0x3fc   : > { %v6057_v11 = vpop.f32.mrf.mxu1  ;;  %v7464_v30 = vpack.c.bf16 %v13247_v24, %v13246_v62  ;;  %v13251_v36 = vld [vmem:[%s16373_s9 + $0x18a] sm:$0xff]  ;;  %v20896_v33 = vld [vmem:[#allocation49_spill] sm:$0xff]  ;;  %v13254_v24 = vld [vmem:[%s16373_s9 + $0x1a2] sm:$0xff] }
 0x3fd   : > { %v15461_v46 = vpop.f32.mrf.mxu0  ;;  %v13175_v62 = vld [vmem:[%s16373_s9 + $0x7ce] sm:$0xff] }
 0x3fe   : > { %v5732_v3 = vadd.f32 %v15461_v46, %v20885_v42  ;;  %v15515_v10 = vpop.f32.mrf.mxu1  ;;  %v13249_v46 = vld [vmem:[%s16373_s9 + $0x17a] sm:$0xff] }
 0x3ff   : > { %v5667_v1 = vpop.f32.mrf.mxu0 }
 0x400   : > { %v19193_v26 = vadd.f32 %v15515_v10, %v5732_v3  ;;  %v6059_v18 = vpop.f32.mrf.mxu1  ;;  %v20892_v3 = vld [vmem:[#allocation68_spill] sm:$0xff] }
 0x401   : > { %v15464_v53 = vpop.f32.mrf.mxu0  ;;  %15671 = vmatmul.mubr.msk.bf16.gmra.mxu0 %vm347_vm1, %v6986_v60  ;;  %v20891_v60 = vld [vmem:[#allocation66_spill] sm:$0xff]  ;;  %v20894_v1 = vld [vmem:[#allocation48_spill] sm:$0xff] }
 0x402   : > { %v15518_v38 = vpop.f32.mrf.mxu1  ;;  %15725 = vmatmul.mubr.msk.bf16.gmra.mxu1 %vm347_vm1, %v7460_v27  ;;  %15674 = vmatprep.mubr.msk.bf16.mxu0 %vm347_vm1, %v6987_v8  ;;  %v6990_v42 = vpack.c.bf16 %v20891_v60, %v18963_v50  ;;  %v20893_v8 = vld [vmem:[#allocation70_spill] sm:$0xff]  ;;  %v7465_v53 = vpack.c.bf16 %v13249_v46, %v13248_v2  ;;  %v7310_v46 = vld [vmem:[%s16373_s9 + $0x8] sm:$0xff] }
 0x403   : > { %v5678_v16 = vpop.f32.mrf.mxu0  ;;  %15728 = vmatprep.mubr.msk.bf16.mxu1 %vm347_vm1, %v7461_v47  ;;  %v6991_v47 = vpack.c.bf16 %v20894_v1, %v20893_v8  ;;  %v7309_v2 = vld [vmem:[%s16373_s9] sm:$0xff] }
 0x404   : > { %v5733_v56 = vadd.f32 %v5678_v16, %v20887_v41  ;;  %v6070_v51 = vpop.f32.mrf.mxu1  ;;  %v20895_v16 = vld [vmem:[#allocation69_spill] sm:$0xff] }
 0x405   : > { %v15465_v29 = vpop.f32.mrf.mxu0 }
 0x406   : > { %v19206_v61 = vadd.f32 %v6070_v51, %v5733_v56  ;;  %v15519_v55 = vpop.f32.mrf.mxu1  ;;  %v13173_v29 = vld [vmem:[%s16373_s9 + $0x7be] sm:$0xff] }
 0x407   : > { %v5681_v6 = vpop.f32.mrf.mxu0  ;;  %v13253_v55 = vld [vmem:[%s16373_s9 + $0x19a] sm:$0xff] }
 0x408   : > { %v6073_v63 = vpop.f32.mrf.mxu1 }
 0x409   : > { %v15468_v5 = vpop.f32.mrf.mxu0  ;;  %15675 = vmatmul.mubr.msk.bf16.gmra.mxu0 %vm347_vm1, %v6988_v45  ;;  %v13252_v45 = vld [vmem:[%s16373_s9 + $0x192] sm:$0xff]  ;;  %v6993_v63 = vpack.c.bf16 %v13173_v29, %v19010_v28  ;;  %v13255_v28 = vld [vmem:[%s16373_s9 + $0x1aa] sm:$0xff]  ;;  %v13312_v29 = vld [vmem:[%s16373_s9 + $0x3c] sm:$0xff] }
 0x40a   : > { %v5735_v54 = vadd.f32 %v15468_v5, %v20890_v59  ;;  %v15522_v48 = vpop.f32.mrf.mxu1  ;;  %15729 = vmatmul.mubr.msk.bf16.gmra.mxu1 %vm347_vm1, %v7462_v44  ;;  %15678 = vmatprep.mubr.msk.bf16.mxu0 %vm347_vm1, %v6989_v9  ;;  %v6992_v9 = vpack.c.bf16 %v19007_v14, %v20896_v33  ;;  %v7467_v59 = vpack.c.bf16 %v13253_v55, %v13252_v45  ;;  %v13174_v14 = vld [vmem:[%s16373_s9 + $0x7c6] sm:$0xff] }
 0x40b   : > { %v5691_v39 = vpop.f32.mrf.mxu0  ;;  %15732 = vmatprep.mubr.msk.bf16.mxu1 %vm347_vm1, %v7463_v40  ;;  %v7466_v40 = vpack.c.bf16 %v13251_v36, %v13250_v20  ;;  %v7468_v1 = vpack.c.bf16 %v13255_v28, %v13254_v24  ;;  %v7312_v20 = vld [vmem:[%s16373_s9 + $0x18] sm:$0xff]  ;;  %v7313_v55 = vld [vmem:[%s16373_s9 + $0x20] sm:$0xff]  ;;  %v19288_v28 = vld [vmem:[%s20641_s1 + $0x30] sm:$0x3] }
 0x40c   : > { %v19217_v11 = vadd.f32 %v15522_v48, %v5735_v54  ;;  %v6083_v19 = vpop.f32.mrf.mxu1  ;;  %v13311_v36 = vld [vmem:[%s16373_s9 + $0x34] sm:$0xff] }
 0x40d   : > { %v15469_v43 = vpop.f32.mrf.mxu0 }
 0x40e   : > { %v5736_v10 = vadd.f32 %v15469_v43, %v20892_v3  ;;  %v15523_v27 = vpop.f32.mrf.mxu1  ;;  %v13310_v3 = vld [vmem:[%s16373_s9 + $0x2c] sm:$0xff] }
 0x40f   : > { %v5693_v18 = vpop.f32.mrf.mxu0 }
 0x410   : > { %v19226_v38 = vadd.f32 %v15523_v27, %v5736_v10  ;;  %v5734_v57 = vadd.f32 %v5693_v18, %v20895_v16  ;;  %v6085_v25 = vpop.f32.mrf.mxu1  ;;  %v6994_v27 = vpack.c.bf16 %v13175_v62, %v13174_v14  ;;  %v8837_v62 = vsel %vm426_vm0, %v19059_v4, 0  ;;  %v13315_v4 = vld [vmem:[%s16373_s9 + $0x54] sm:$0xff] }
 0x411   : > { %v15472_v50 = vpop.f32.mrf.mxu0  ;;  %15679 = vmatmul.mubr.msk.bf16.gmra.mxu0 %vm347_vm1, %v6990_v42  ;;  %v13309_v42 = vld [vmem:[%s16373_s9 + $0x24] sm:$0xff] }
 0x412   : > { %v19230_v41 = vadd.f32 %v6085_v25, %v5734_v57  ;;  %v15526_v56 = vpop.f32.mrf.mxu1  ;;  %15733 = vmatmul.mubr.msk.bf16.gmra.mxu1 %vm347_vm1, %v7464_v30  ;;  %15682 = vmatprep.mubr.msk.bf16.mxu0 %vm347_vm1, %v6991_v47  ;;  %v7361_v47 = vpack.c.bf16 %v7310_v46, %v7309_v2  ;;  %v7316_v2 = vld [vmem:[%s16373_s9 + $0x38] sm:$0xff]  ;;  %v19296_v46 = vld [vmem:[%s20641_s1 + $0x32] sm:$0x3] }
 0x413   : > { %v5706_v51 = vpop.f32.mrf.mxu0  ;;  %15736 = vmatprep.mubr.msk.bf16.mxu1 %vm347_vm1, %v7465_v53  ;;  %v8105_v53 = vpack.c.bf16 %v13310_v3, %v13309_v42  ;;  %v7317_v42 = vld [vmem:[%s16373_s9 + $0x40] sm:$0xff]  ;;  %v7318_v3 = vld [vmem:[%s16373_s9 + $0x48] sm:$0xff] }
 0x414   : > { %v6098_v31 = vpop.f32.mrf.mxu1  ;;  %v7311_v51 = vld [vmem:[%s16373_s9 + $0x10] sm:$0xff] }
 0x415   : > { %v15473_v44 = vpop.f32.mrf.mxu0  ;;  %v7362_v33 = vpack.c.bf16 %v7312_v20, %v7311_v51 }
 0x416   : > { %v15527_v6 = vpop.f32.mrf.mxu1  ;;  %v7314_v44 = vld [vmem:[%s16373_s9 + $0x28] sm:$0xff] }
 0x417   : > { %v5708_v5 = vpop.f32.mrf.mxu0  ;;  %v13314_v6 = vld [vmem:[%s16373_s9 + $0x4c] sm:$0xff] }
 0x418   : > { %v6100_v54 = vpop.f32.mrf.mxu1  ;;  %v8106_v5 = vpack.c.bf16 %v13312_v29, %v13311_v36  ;;  %v7319_v36 = vld [vmem:[%s16373_s9 + $0x50] sm:$0xff]  ;;  %v7320_v29 = vld [vmem:[%s16373_s9 + $0x58] sm:$0xff] }
 0x419   : > { %v15532_v48 = vpop.f32.mrf.mxu0  ;;  %15683 = vmatmul.mubr.msk.bf16.gmra.mxu0 %vm347_vm1, %v6992_v9  ;;  %v13313_v9 = vld [vmem:[%s16373_s9 + $0x44] sm:$0xff]  ;;  %v8603_v54 = vsel %vm426_vm0, %v19053_v34, 0 }
 0x41a   : > { %v15586_v39 = vpop.f32.mrf.mxu1  ;;  %15737 = vmatmul.mubr.msk.bf16.gmra.mxu1 %vm347_vm1, %v7466_v40  ;;  %15686 = vmatprep.mubr.msk.bf16.mxu0 %vm347_vm1, %v6993_v63  ;;  %v7363_v48 = vpack.c.bf16 %v7314_v44, %v7313_v55  ;;  %v8107_v24 = vpack.c.bf16 %v13314_v6, %v13313_v9  ;;  %v13320_v44 = vld [vmem:[%s16373_s9 + $0x7c] sm:$0xff] }
 0x41b   : > { %v6328_v19 = vpop.f32.mrf.mxu0  ;;  %15740 = vmatprep.mubr.msk.bf16.mxu1 %vm347_vm1, %v7467_v59 }
 0x41c   : > { %v6503_v43 = vadd.f32 %v6328_v19, %v19020_v52  ;;  %v6720_v60 = vpop.f32.mrf.mxu1  ;;  %v7315_v19 = vld [vmem:[%s16373_s9 + $0x30] sm:$0xff] }
 0x41d   : > { %v15533_v10 = vpop.f32.mrf.mxu0 }
 0x41e   : > { %v19256_v30 = vadd.f32 %v6720_v60, %v6503_v43  ;;  %v15587_v8 = vpop.f32.mrf.mxu1  ;;  %v13316_v60 = vld [vmem:[%s16373_s9 + $0x5c] sm:$0xff] }
 0x41f   : > { %v6331_v18 = vpop.f32.mrf.mxu0  ;;  %v13317_v8 = vld [vmem:[%s16373_s9 + $0x64] sm:$0xff] }
 0x420   : > { %v6504_v16 = vadd.f32 %v6331_v18, %v19026_v21  ;;  %v6723_v57 = vpop.f32.mrf.mxu1  ;;  %v7364_v18 = vpack.c.bf16 %v7316_v2, %v7315_v19 }
 0x421   : > { %v15536_v52 = vpop.f32.mrf.mxu0  ;;  %15687 = vmatmul.mubr.msk.bf16.gmra.mxu0 %vm347_vm1, %v6994_v27 }
 0x422   : > { %v19260_v25 = vadd.f32 %v6723_v57, %v6504_v16  ;;  %v6505_v50 = vadd.f32 %v15536_v52, %v19034_v22  ;;  %v15590_v56 = vpop.f32.mrf.mxu1  ;;  %15741 = vmatmul.mubr.msk.bf16.gmra.mxu1 %vm347_vm1, %v7468_v1  ;;  %15746 = vmatprep.mubr.msk.bf16.mxu0 %vm347_vm1, %v7361_v47  ;;  %v13318_v1 = vld [vmem:[%s16373_s9 + $0x6c] sm:$0xff]  ;;  %v7365_v57 = vpack.c.bf16 %v7318_v3, %v7317_v42  ;;  %v7325_v3 = vld [vmem:[%s16373_s9 + $0x80] sm:$0xff] }
 0x423   : > { %v6342_v21 = vpop.f32.mrf.mxu0  ;;  %15800 = vmatprep.mubr.msk.bf16.mxu1 %vm347_vm1, %v8105_v53 }
 0x424   : > { %v19270_v31 = vadd.f32 %v15590_v56, %v6505_v50  ;;  %v6734_v45 = vpop.f32.mrf.mxu1  ;;  %v8109_v50 = vpack.c.bf16 %v13318_v1, %v13317_v8  ;;  %v13325_v8 = vld [vmem:[%s16373_s9 + $0xa4] sm:$0xff]  ;;  %v13326_v1 = vld [vmem:[%s16373_s9 + $0xac] sm:$0xff] }
 0x425   : > { %v15537_v22 = vpop.f32.mrf.mxu0  ;;  %v13319_v45 = vld [vmem:[%s16373_s9 + $0x74] sm:$0xff] }
 0x426   : > { %v6506_v40 = vadd.f32 %v15537_v22, %v19045_v37  ;;  %v15591_v63 = vpop.f32.mrf.mxu1  ;;  %v7321_v22 = vld [vmem:[%s16373_s9 + $0x60] sm:$0xff] }
 0x427   : > { %v6344_v59 = vpop.f32.mrf.mxu0 }
 0x428   : > { %v19279_v39 = vadd.f32 %v15591_v63, %v6506_v40  ;;  %v6736_v14 = vpop.f32.mrf.mxu1  ;;  %v13321_v40 = vld [vmem:[%s16373_s9 + $0x84] sm:$0xff]  ;;  %v13322_v63 = vld [vmem:[%s16373_s9 + $0x8c] sm:$0xff] }
 0x429   : > { %v15540_v37 = vpop.f32.mrf.mxu0  ;;  %15747 = vmatmul.mubr.msk.bf16.vlgmr.msra.gmra.mxu0 %vm347_vm1, %v7362_v33  ;;  %v7322_v33 = vld [vmem:[%s16373_s9 + $0x68] sm:$0xff] }
 0x42a   : > { %v15594_v34 = vpop.f32.mrf.mxu1  ;;  %15801 = vmatmul.mubr.msk.bf16.vlgmr.msra.gmra.mxu1 %vm347_vm1, %v8106_v5  ;;  %15853 = vmatpush3.bf16.msra.mxu0 %v8603_v54  ;;  %v7366_v5 = vpack.c.bf16 %v7320_v29, %v7319_v36  ;;  %v8110_v54 = vpack.c.bf16 %v13320_v44, %v13319_v45  ;;  %v7328_v29 = vld [vmem:[%s16373_s9 + $0x98] sm:$0xff] }
 0x42b   : > { %v6356_v43 = vpop.f32.mrf.mxu0  ;;  %15907 = vmatpush3.bf16.msra.mxu1 %v8837_v62  ;;  %15750 = vmatprep.mubr.msk.bf16.mxu0 %vm347_vm1, %v7363_v48  ;;  %v7367_v48 = vpack.c.bf16 %v7322_v33, %v7321_v22  ;;  %v8111_v62 = vpack.c.bf16 %v13322_v63, %v13321_v40  ;;  %v13327_v45 = vld [vmem:[%s16373_s9 + $0xb4] sm:$0xff]  ;;  %v13328_v44 = vld [vmem:[%s16373_s9 + $0xbc] sm:$0xff]  ;;  %v7330_v33 = vld [vmem:[%s16373_s9 + $0xa8] sm:$0xff] }
 0x42c   : > { %v6507_v10 = vadd.f32 %v6356_v43, %v19074_v58  ;;  %v6748_v27 = vpop.f32.mrf.mxu1  ;;  %15804 = vmatprep.mubr.msk.bf16.mxu1 %vm347_vm1, %v8107_v24  ;;  %16200 = vmatprep.subr.msk.bf16.mxu0 %vm426_vm0, %v19288_v28  ;;  %v8108_v58 = vpack.c.bf16 %v13316_v60, %v13315_v4  ;;  %v7323_v4 = vld [vmem:[%s16373_s9 + $0x70] sm:$0xff]  ;;  %v7324_v43 = vld [vmem:[%s16373_s9 + $0x78] sm:$0xff]  ;;  %v7329_v22 = vld [vmem:[%s16373_s9 + $0xa0] sm:$0xff] }
 0x42d   : > { %v15541_v47 = vpop.f32.mrf.mxu0  ;;  %16201 = vmatprep.subr.msk.bf16.mxu1 %vm426_vm0, %v19296_v46  ;;  %v13323_v60 = vld [vmem:[%s16373_s9 + $0x94] sm:$0xff]  ;;  %v13329_v63 = vld [vmem:[%s16373_s9 + $0xc4] sm:$0xff] }
 0x42e   : > { %v19310_v53 = vadd.f32 %v6748_v27, %v6507_v10  ;;  %v15595_v16 = vpop.f32.mrf.mxu1  ;;  %v7326_v10 = vld [vmem:[%s16373_s9 + $0x88] sm:$0xff] }
 0x42f   : > { %v6359_v52 = vpop.f32.mrf.mxu0 }
 0x430   : > { %v6751_v56 = vpop.f32.mrf.mxu1  ;;  %v7369_v52 = vpack.c.bf16 %v7326_v10, %v7325_v3  ;;  %v13331_v3 = vld [vmem:[%s16373_s9 + $0xd4] sm:$0xff]  ;;  %v13332_v10 = vld [vmem:[%s16373_s9 + $0xdc] sm:$0xff] }
 0x431   : > { %v15544_v51 = vpop.f32.mrf.mxu0  ;;  %15751 = vmatmul.mubr.msk.bf16.gmra.mxu0 %vm347_vm1, %v7364_v18  ;;  %v7368_v18 = vpack.c.bf16 %v7324_v43, %v7323_v4  ;;  %v8113_v56 = vpack.c.bf16 %v13326_v1, %v13325_v8  ;;  %v7334_v8 = vld [vmem:[%s16373_s9 + $0xc8] sm:$0xff] }
 0x432   : > { %v6509_v20 = vadd.f32 %v15544_v51, %v19085_v12  ;;  %v15598_v21 = vpop.f32.mrf.mxu1  ;;  %15805 = vmatmul.mubr.msk.bf16.gmra.mxu1 %vm347_vm1, %v8108_v58  ;;  %15754 = vmatprep.mubr.msk.bf16.mxu0 %vm347_vm1, %v7365_v57 }
 0x433   : > { %v6369_v55 = vpop.f32.mrf.mxu0  ;;  %15808 = vmatprep.mubr.msk.bf16.mxu1 %vm347_vm1, %v8109_v50 }
 0x434   : > { %v19323_v9 = vadd.f32 %v15598_v21, %v6509_v20  ;;  %v6761_v6 = vpop.f32.mrf.mxu1 }
 0x435   : > { %v15545_v12 = vpop.f32.mrf.mxu0 }
 0x436   : > { %v15599_v59 = vpop.f32.mrf.mxu1  ;;  %v13330_v12 = vld [vmem:[%s16373_s9 + $0xcc] sm:$0xff] }
 0x437   : > { %v6371_v14 = vpop.f32.mrf.mxu0 }
 0x438   : > { %v6508_v24 = vadd.f32 %v6371_v14, %v19095_v35  ;;  %v6763_v37 = vpop.f32.mrf.mxu1  ;;  %v13324_v35 = vld [vmem:[%s16373_s9 + $0x9c] sm:$0xff]  ;;  %v8114_v14 = vpack.c.bf16 %v13328_v44, %v13327_v45  ;;  %v13335_v44 = vld [vmem:[%s16373_s9 + $0xf4] sm:$0xff] }
 0x439   : > { %v15548_v19 = vpop.f32.mrf.mxu0  ;;  %15755 = vmatmul.mubr.msk.bf16.gmra.mxu0 %vm347_vm1, %v7366_v5  ;;  %v8112_v57 = vpack.c.bf16 %v13324_v35, %v13323_v60  ;;  %v7332_v35 = vld [vmem:[%s16373_s9 + $0xb8] sm:$0xff] }
 0x43a   : > { %v19329_v34 = vadd.f32 %v6763_v37, %v6508_v24  ;;  %v15602_v2 = vpop.f32.mrf.mxu1  ;;  %15809 = vmatmul.mubr.msk.bf16.gmra.mxu1 %vm347_vm1, %v8110_v54  ;;  %15758 = vmatprep.mubr.msk.bf16.mxu0 %vm347_vm1, %v7367_v48  ;;  %v8115_v37 = vpack.c.bf16 %v13330_v12, %v13329_v63  ;;  %v13337_v12 = vld [vmem:[%s16373_s9 + $0x104] sm:$0xff] }
 0x43b   : > { %v6383_v42 = vpop.f32.mrf.mxu0  ;;  %15812 = vmatprep.mubr.msk.bf16.mxu1 %vm347_vm1, %v8111_v62  ;;  %v7371_v62 = vpack.c.bf16 %v7330_v33, %v7329_v22  ;;  %v13336_v33 = vld [vmem:[%s16373_s9 + $0xfc] sm:$0xff] }
 0x43c   : > { %v6775_v27 = vpop.f32.mrf.mxu1  ;;  %v7331_v42 = vld [vmem:[%s16373_s9 + $0xb0] sm:$0xff] }
 0x43d   : > { %v15549_v47 = vpop.f32.mrf.mxu0  ;;  %v7333_v27 = vld [vmem:[%s16373_s9 + $0xc0] sm:$0xff] }
 0x43e   : > { %v6510_v16 = vadd.f32 %v15549_v47, %v19109_v7  ;;  %v15603_v58 = vpop.f32.mrf.mxu1  ;;  %v7327_v7 = vld [vmem:[%s16373_s9 + $0x90] sm:$0xff] }
 0x43f   : > { %v6385_v50 = vpop.f32.mrf.mxu0  ;;  %v7370_v59 = vpack.c.bf16 %v7328_v29, %v7327_v7 }
 0x440   : > { %v19343_v51 = vadd.f32 %v15603_v58, %v6510_v16  ;;  %v6777_v20 = vpop.f32.mrf.mxu1  ;;  %v13334_v16 = vld [vmem:[%s16373_s9 + $0xec] sm:$0xff]  ;;  %v7372_v58 = vpack.c.bf16 %v7332_v35, %v7331_v42  ;;  %v8116_v50 = vpack.c.bf16 %v13332_v10, %v13331_v3  ;;  %v7340_v35 = vld [vmem:[%s16373_s9 + $0xf8] sm:$0xff] }
 0x441   : > { %v15552_v21 = vpop.f32.mrf.mxu0  ;;  %15759 = vmatmul.mubr.msk.bf16.gmra.mxu0 %vm347_vm1, %v7368_v18  ;;  %v13333_v18 = vld [vmem:[%s16373_s9 + $0xe4] sm:$0xff]  ;;  %v7339_v42 = vld [vmem:[%s16373_s9 + $0xf0] sm:$0xff]  ;;  %v13340_v10 = vld [vmem:[%s16373_s9 + $0x11c] sm:$0xff] }
 0x442   : > { %v15606_v36 = vpop.f32.mrf.mxu1  ;;  %15813 = vmatmul.mubr.msk.bf16.gmra.mxu1 %vm347_vm1, %v8112_v57  ;;  %15762 = vmatprep.mubr.msk.bf16.mxu0 %vm347_vm1, %v7369_v52  ;;  %v8117_v21 = vpack.c.bf16 %v13334_v16, %v13333_v18  ;;  %v13339_v3 = vld [vmem:[%s16373_s9 + $0x114] sm:$0xff]  ;;  %v13341_v16 = vld [vmem:[%s16373_s9 + $0x124] sm:$0xff] }
 0x443   : > { %v6396_v55 = vpop.f32.mrf.mxu0  ;;  %15816 = vmatprep.mubr.msk.bf16.mxu1 %vm347_vm1, %v8113_v56  ;;  %v7373_v56 = vpack.c.bf16 %v7334_v8, %v7333_v27  ;;  %v7341_v27 = vld [vmem:[%s16373_s9 + $0x100] sm:$0xff]  ;;  %v7342_v8 = vld [vmem:[%s16373_s9 + $0x108] sm:$0xff] }
 0x444   : > { %v6511_v6 = vadd.f32 %v6396_v55, %v19122_v15  ;;  %v6788_v40 = vpop.f32.mrf.mxu1  ;;  %v7336_v55 = vld [vmem:[%s16373_s9 + $0xd8] sm:$0xff] }
 0x445   : > { %v15553_v5 = vpop.f32.mrf.mxu0 }
 0x446   : > { %v19358_v54 = vadd.f32 %v6788_v40, %v6511_v6  ;;  %v15607_v48 = vpop.f32.mrf.mxu1  ;;  %v7337_v6 = vld [vmem:[%s16373_s9 + $0xe0] sm:$0xff]  ;;  %v7338_v40 = vld [vmem:[%s16373_s9 + $0xe8] sm:$0xff] }
 0x447   : > { %v6399_v24 = vpop.f32.mrf.mxu0  ;;  %v13338_v5 = vld [vmem:[%s16373_s9 + $0x10c] sm:$0xff] }
 0x448   : > { %v6512_v19 = vadd.f32 %v6399_v24, %v19128_v32  ;;  %v6791_v15 = vpop.f32.mrf.mxu1  ;;  %v7375_v24 = vpack.c.bf16 %v7338_v40, %v7337_v6  ;;  %v7345_v40 = vld [vmem:[%s16373_s9 + $0x120] sm:$0xff] }
 0x449   : > { %v15556_v2 = vpop.f32.mrf.mxu0  ;;  %15763 = vmatmul.mubr.msk.bf16.gmra.mxu0 %vm347_vm1, %v7370_v59 }
 0x44a   : > { %v19362_v4 = vadd.f32 %v6791_v15, %v6512_v19  ;;  %v6513_v43 = vadd.f32 %v15556_v2, %v19136_v49  ;;  %v15610_v60 = vpop.f32.mrf.mxu1  ;;  %15817 = vmatmul.mubr.msk.bf16.gmra.mxu1 %vm347_vm1, %v8114_v14  ;;  %15766 = vmatprep.mubr.msk.bf16.mxu0 %vm347_vm1, %v7371_v62  ;;  %v8118_v62 = vpack.c.bf16 %v13336_v33, %v13335_v44  ;;  %v7343_v44 = vld [vmem:[%s16373_s9 + $0x110] sm:$0xff] }
 0x44b   : > { %v6410_v32 = vpop.f32.mrf.mxu0  ;;  %15820 = vmatprep.mubr.msk.bf16.mxu1 %vm347_vm1, %v8115_v37  ;;  %v8119_v19 = vpack.c.bf16 %v13338_v5, %v13337_v12  ;;  %v13343_v33 = vld [vmem:[%s16373_s9 + $0x134] sm:$0xff]  ;;  %v13345_v5 = vld [vmem:[%s16373_s9 + $0x144] sm:$0xff] }
 0x44c   : > { %v19374_v1 = vadd.f32 %v15610_v60, %v6513_v43  ;;  %v6802_v47 = vpop.f32.mrf.mxu1 }
 0x44d   : > { %v15557_v49 = vpop.f32.mrf.mxu0 }
 0x44e   : > { %v6514_v57 = vadd.f32 %v15557_v49, %v19145_v23  ;;  %v15611_v52 = vpop.f32.mrf.mxu1  ;;  %v7335_v23 = vld [vmem:[%s16373_s9 + $0xd0] sm:$0xff] }
 0x44f   : > { %v6412_v20 = vpop.f32.mrf.mxu0  ;;  %v7374_v48 = vpack.c.bf16 %v7336_v55, %v7335_v23  ;;  %v13342_v49 = vld [vmem:[%s16373_s9 + $0x12c] sm:$0xff] }
 0x450   : > { %v19379_v36 = vadd.f32 %v15611_v52, %v6514_v57  ;;  %v6804_v7 = vpop.f32.mrf.mxu1  ;;  %v7376_v57 = vpack.c.bf16 %v7340_v35, %v7339_v42  ;;  %v7377_v20 = vpack.c.bf16 %v7342_v8, %v7341_v27  ;;  %v13348_v27 = vld [vmem:[%s16373_s9 + $0x15c] sm:$0xff] }
 0x451   : > { %v15560_v29 = vpop.f32.mrf.mxu0  ;;  %15767 = vmatmul.mubr.msk.bf16.gmra.mxu0 %vm347_vm1, %v7372_v58  ;;  %v8121_v7 = vpack.c.bf16 %v13342_v49, %v13341_v16  ;;  %v7349_v8 = vld [vmem:[%s16373_s9 + $0x140] sm:$0xff] }
 0x452   : > { %v15614_v45 = vpop.f32.mrf.mxu1  ;;  %15821 = vmatmul.mubr.msk.bf16.gmra.mxu1 %vm347_vm1, %v8116_v50  ;;  %15770 = vmatprep.mubr.msk.bf16.mxu0 %vm347_vm1, %v7373_v56  ;;  %v8120_v56 = vpack.c.bf16 %v13340_v10, %v13339_v3  ;;  %v7348_v3 = vld [vmem:[%s16373_s9 + $0x138] sm:$0xff]  ;;  %v13349_v49 = vld [vmem:[%s16373_s9 + $0x164] sm:$0xff] }
 0x453   : > { %v6424_v22 = vpop.f32.mrf.mxu0  ;;  %15824 = vmatprep.mubr.msk.bf16.mxu1 %vm347_vm1, %v8117_v21 }
 0x454   : > { %v6816_v63 = vpop.f32.mrf.mxu1  ;;  %v7344_v22 = vld [vmem:[%s16373_s9 + $0x118] sm:$0xff] }
 0x455   : > { %v15561_v59 = vpop.f32.mrf.mxu0  ;;  %v7346_v63 = vld [vmem:[%s16373_s9 + $0x128] sm:$0xff] }
 0x456   : > { %v15615_v14 = vpop.f32.mrf.mxu1  ;;  %v13346_v59 = vld [vmem:[%s16373_s9 + $0x14c] sm:$0xff] }
 0x457   : > { %v6426_v37 = vpop.f32.mrf.mxu0  ;;  %v7378_v14 = vpack.c.bf16 %v7344_v22, %v7343_v44  ;;  %v7351_v22 = vld [vmem:[%s16373_s9 + $0x150] sm:$0xff] }
 0x458   : > { %v6818_v15 = vpop.f32.mrf.mxu1 }
 0x459   : > { %v15564_v2 = vpop.f32.mrf.mxu0  ;;  %15771 = vmatmul.mubr.msk.bf16.gmra.mxu0 %vm347_vm1, %v7374_v48 }
 0x45a   : > { %v6517_v43 = vadd.f32 %v15564_v2, %v19166_v13  ;;  %v15618_v60 = vpop.f32.mrf.mxu1  ;;  %15825 = vmatmul.mubr.msk.bf16.gmra.mxu1 %vm347_vm1, %v8118_v62  ;;  %15774 = vmatprep.mubr.msk.bf16.mxu0 %vm347_vm1, %v7375_v24  ;;  %v8123_v2 = vpack.c.bf16 %v13346_v59, %v13345_v5 }
 0x45b   : > { %v6436_v32 = vpop.f32.mrf.mxu0  ;;  %15828 = vmatprep.mubr.msk.bf16.mxu1 %vm347_vm1, %v8119_v19  ;;  %v7379_v19 = vpack.c.bf16 %v7346_v63, %v7345_v40  ;;  %v13352_v40 = vld [vmem:[%s16373_s9 + $0x17c] sm:$0xff] }
 0x45c   : > { %v19404_v47 = vadd.f32 %v15618_v60, %v6517_v43  ;;  %v6515_v18 = vadd.f32 %v6436_v32, %v19173_v17  ;;  %v6828_v13 = vpop.f32.mrf.mxu1  ;;  %v13347_v32 = vld [vmem:[%s16373_s9 + $0x154] sm:$0xff]  ;;  %v7353_v63 = vld [vmem:[%s16373_s9 + $0x160] sm:$0xff] }
 0x45d   : > { %v15565_v58 = vpop.f32.mrf.mxu0 }
 0x45e   : > { %v19409_v52 = vadd.f32 %v6828_v13, %v6515_v18  ;;  %v15619_v50 = vpop.f32.mrf.mxu1  ;;  %v7350_v18 = vld [vmem:[%s16373_s9 + $0x148] sm:$0xff] }
 0x45f   : > { %v6439_v21 = vpop.f32.mrf.mxu0  ;;  %v13350_v58 = vld [vmem:[%s16373_s9 + $0x16c] sm:$0xff] }
 0x460   : > { %v6516_v17 = vadd.f32 %v6439_v21, %v19179_v0  ;;  %v6831_v29 = vpop.f32.mrf.mxu1  ;;  %v13344_v0 = vld [vmem:[%s16373_s9 + $0x13c] sm:$0xff]  ;;  %v8124_v21 = vpack.c.bf16 %v13348_v27, %v13347_v32 }
 0x461   : > { %v15568_v45 = vpop.f32.mrf.mxu0  ;;  %15775 = vmatmul.mubr.msk.bf16.gmra.mxu0 %vm347_vm1, %v7376_v57  ;;  %v8122_v37 = vpack.c.bf16 %v13344_v0, %v13343_v33  ;;  %v7352_v33 = vld [vmem:[%s16373_s9 + $0x158] sm:$0xff] }
 0x462   : > { %v19413_v23 = vadd.f32 %v6831_v29, %v6516_v17  ;;  %v15622_v55 = vpop.f32.mrf.mxu1  ;;  %15829 = vmatmul.mubr.msk.bf16.gmra.mxu1 %vm347_vm1, %v8120_v56  ;;  %15778 = vmatprep.mubr.msk.bf16.mxu0 %vm347_vm1, %v7377_v20  ;;  %v8125_v29 = vpack.c.bf16 %v13350_v58, %v13349_v49  ;;  %v7356_v27 = vld [vmem:[%s16373_s9 + $0x178] sm:$0xff]  ;;  %v13357_v58 = vld [vmem:[%s16373_s9 + $0x1a4] sm:$0xff] }
 0x463   : > { %v6451_v6 = vpop.f32.mrf.mxu0  ;;  %15832 = vmatprep.mubr.msk.bf16.mxu1 %vm347_vm1, %v8121_v7  ;;  %v7381_v7 = vpack.c.bf16 %v7350_v18, %v7349_v8  ;;  %v13355_v8 = vld [vmem:[%s16373_s9 + $0x194] sm:$0xff] }
 0x464   : > { %v6843_v12 = vpop.f32.mrf.mxu1  ;;  %v13351_v6 = vld [vmem:[%s16373_s9 + $0x174] sm:$0xff] }
 0x465   : > { %v15569_v48 = vpop.f32.mrf.mxu0  ;;  %v7354_v12 = vld [vmem:[%s16373_s9 + $0x168] sm:$0xff] }
 0x466   : > { %v6518_v62 = vadd.f32 %v15569_v48, %v19193_v26  ;;  %v15623_v24 = vpop.f32.mrf.mxu1  ;;  %v7347_v26 = vld [vmem:[%s16373_s9 + $0x130] sm:$0xff]  ;;  %v13353_v48 = vld [vmem:[%s16373_s9 + $0x184] sm:$0xff] }
 0x467   : > { %v6453_v15 = vpop.f32.mrf.mxu0  ;;  %v7380_v50 = vpack.c.bf16 %v7348_v3, %v7347_v26 }
 0x468   : > { %v19427_v43 = vadd.f32 %v15623_v24, %v6518_v62  ;;  %v6845_v60 = vpop.f32.mrf.mxu1  ;;  %v7382_v62 = vpack.c.bf16 %v7352_v33, %v7351_v22  ;;  %v7383_v15 = vpack.c.bf16 %v7354_v12, %v7353_v63  ;;  %v7359_v22 = vld [vmem:[%s16373_s9 + $0x190] sm:$0xff]  ;;  %v7360_v33 = vld [vmem:[%s16373_s9 + $0x198] sm:$0xff] }
 0x469   : > { %v15572_v42 = vpop.f32.mrf.mxu0  ;;  %15779 = vmatmul.mubr.msk.bf16.gmra.mxu0 %vm347_vm1, %v7378_v14  ;;  %v13354_v14 = vld [vmem:[%s16373_s9 + $0x18c] sm:$0xff] }
 0x46a   : > { %v15626_v35 = vpop.f32.mrf.mxu1  ;;  %15833 = vmatmul.mubr.msk.bf16.gmra.mxu1 %vm347_vm1, %v8122_v37  ;;  %15782 = vmatprep.mubr.msk.bf16.mxu0 %vm347_vm1, %v7379_v19  ;;  %v8126_v19 = vpack.c.bf16 %v13352_v40, %v13351_v6  ;;  %v8127_v60 = vpack.c.bf16 %v13354_v14, %v13353_v48  ;;  %v13360_v40 = vld [vmem:[%s16373_s9 + $0x1bc] sm:$0xff]  ;;  %v13391_v48 = vld [vmem:[%s16373_s9 + $0x3b0] sm:$0xff] }
 0x46b   : > { %v6464_v10 = vpop.f32.mrf.mxu0  ;;  %15836 = vmatprep.mubr.msk.bf16.mxu1 %vm347_vm1, %v8123_v2 }
 0x46c   : > { %v6519_v13 = vadd.f32 %v6464_v10, %v19206_v61  ;;  %v6856_v16 = vpop.f32.mrf.mxu1  ;;  %v7355_v10 = vld [vmem:[%s16373_s9 + $0x170] sm:$0xff] }
 0x46d   : > { %v15573_v57 = vpop.f32.mrf.mxu0 }
 0x46e   : > { %v19442_v56 = vadd.f32 %v6856_v16, %v6519_v13  ;;  %v15627_v20 = vpop.f32.mrf.mxu1  ;;  %v7357_v13 = vld [vmem:[%s16373_s9 + $0x180] sm:$0xff]  ;;  %v7358_v16 = vld [vmem:[%s16373_s9 + $0x188] sm:$0xff] }
 0x46f   : > { %v6467_v17 = vpop.f32.mrf.mxu0  ;;  %v13358_v57 = vld [vmem:[%s16373_s9 + $0x1ac] sm:$0xff]  ;;  %v7384_v20 = vpack.c.bf16 %v7356_v27, %v7355_v10 }
 0x470   : > { %v6859_v45 = vpop.f32.mrf.mxu1  ;;  %v7385_v17 = vpack.c.bf16 %v7358_v16, %v7357_v13  ;;  %v13394_v27 = vld [vmem:[%s16373_s9 + $0x3c8] sm:$0xff] }
 0x471   : > { %v15576_v61 = vpop.f32.mrf.mxu0  ;;  %15783 = vmatmul.mubr.msk.bf16.gmra.mxu0 %vm347_vm1, %v7380_v50  ;;  %v8129_v45 = vpack.c.bf16 %v13358_v57, %v13357_v58 }
 0x472   : > { %v6521_v55 = vadd.f32 %v15576_v61, %v19217_v11  ;;  %v15630_v44 = vpop.f32.mrf.mxu1  ;;  %15837 = vmatmul.mubr.msk.bf16.gmra.mxu1 %vm347_vm1, %v8124_v21  ;;  %15786 = vmatprep.mubr.msk.bf16.mxu0 %vm347_vm1, %v7381_v7 }
 0x473   : > { %v6477_v0 = vpop.f32.mrf.mxu0  ;;  %15840 = vmatprep.mubr.msk.bf16.mxu1 %vm347_vm1, %v8125_v29 }
 0x474   : > { %v19455_v5 = vadd.f32 %v15630_v44, %v6521_v55  ;;  %v6869_v59 = vpop.f32.mrf.mxu1  ;;  %v13359_v0 = vld [vmem:[%s16373_s9 + $0x1b4] sm:$0xff] }
 0x475   : > { %v15577_v11 = vpop.f32.mrf.mxu0  ;;  %v13390_v59 = vld [vmem:[%s16373_s9 + $0x3a8] sm:$0xff] }
 0x476   : > { %v6522_v24 = vadd.f32 %v15577_v11, %v19226_v38  ;;  %v15631_v37 = vpop.f32.mrf.mxu1  ;;  %v7386_v11 = vpack.c.bf16 %v7360_v33, %v7359_v22  ;;  %v20899_v22 = vld [vmem:[#allocation4_spill] sm:$0xff] }
 0x477   : > { %v6479_v2 = vpop.f32.mrf.mxu0 }
 0x478   : > { %v19460_v42 = vadd.f32 %v15631_v37, %v6522_v24  ;;  %v6520_v35 = vadd.f32 %v6479_v2, %v19230_v41  ;;  %v6871_v26 = vpop.f32.mrf.mxu1  ;;  %v13356_v41 = vld [vmem:[%s16373_s9 + $0x19c] sm:$0xff]  ;;  %v8130_v24 = vpack.c.bf16 %v13360_v40, %v13359_v0 }
 0x479   : > { %v15580_v3 = vpop.f32.mrf.mxu0  ;;  %15787 = vmatmul.mubr.msk.bf16.gmra.mxu0 %vm347_vm1, %v7382_v62  ;;  %v8128_v7 = vpack.c.bf16 %v13356_v41, %v13355_v8  ;;  %v13395_v8 = vld [vmem:[%s16373_s9 + $0x3d0] sm:$0xff] }
 0x47a   : > { %v19464_v38 = vadd.f32 %v6871_v26, %v6520_v35  ;;  %v15634_v32 = vpop.f32.mrf.mxu1  ;;  %15841 = vmatmul.mubr.msk.bf16.gmra.mxu1 %vm347_vm1, %v8126_v19  ;;  %15790 = vmatprep.mubr.msk.bf16.mxu0 %vm347_vm1, %v7383_v15  ;;  %v8496_v19 = vpack.c.bf16 %v13391_v48, %v13390_v59  ;;  %v13392_v26 = vld [vmem:[%s16373_s9 + $0x3b8] sm:$0xff]  ;;  %v13393_v3 = vld [vmem:[%s16373_s9 + $0x3c0] sm:$0xff]  ;;  %v8498_v58 = vpack.c.bf16 %v13395_v8, %v13394_v27 }
 0x47b   : > { %v6492_v18 = vpop.f32.mrf.mxu0  ;;  %15844 = vmatprep.mubr.msk.bf16.mxu1 %vm347_vm1, %v8127_v60 }
 0x47c   : > { %v6884_v49 = vpop.f32.mrf.mxu1  ;;  %v8497_v18 = vpack.c.bf16 %v13393_v3, %v13392_v26 }
 0x47d   : > { %v15581_v50 = vpop.f32.mrf.mxu0  ;;  %v9229_v49 = vsel %vm426_vm0, %v19288_v28, 0  ;;  %v13396_v28 = vld [vmem:[%s16373_s9 + $0x3d8] sm:$0xff] }
 0x47e   : > { %v15635_v21 = vpop.f32.mrf.mxu1  ;;  %v9622_v50 = vsel %vm426_vm0, %v19296_v46, 0 }
 0x47f   : > { %v6494_v29 = vpop.f32.mrf.mxu0 }
 0x480   : > { %v6886_v61 = vpop.f32.mrf.mxu1  ;;  %v19529_v29 = vld [vmem:[%s20641_s1 + $0x36] sm:$0x3] }
 0x481   : > { %v15640_v55 = vpop.f32.mrf.mxu0  ;;  %15791 = vmatmul.mubr.msk.bf16.gmra.mxu0 %vm347_vm1, %v7384_v20  ;;  %v13399_v61 = vld [vmem:[%s16373_s9 + $0x3f0] sm:$0xff] }
 0x482   : > { %v15694_v44 = vpop.f32.mrf.mxu1  ;;  %15845 = vmatmul.mubr.msk.bf16.gmra.mxu1 %vm347_vm1, %v8128_v7  ;;  %15794 = vmatprep.mubr.msk.bf16.mxu0 %vm347_vm1, %v7385_v17  ;;  %v20898_v7 = vld [vmem:[#allocation3_spill] sm:$0xff]  ;;  %v13397_v17 = vld [vmem:[%s16373_s9 + $0x3e0] sm:$0xff] }
 0x483   : > { %v7112_v6 = vpop.f32.mrf.mxu0  ;;  %15848 = vmatprep.mubr.msk.bf16.mxu1 %vm347_vm1, %v8129_v45  ;;  %v13398_v45 = vld [vmem:[%s16373_s9 + $0x3e8] sm:$0xff] }
 0x484   : > { %v7287_v63 = vadd.f32 %v7112_v6, %v19256_v30  ;;  %v19486_v12 = vpop.f32.mrf.mxu1  ;;  %v8499_v6 = vpack.c.bf16 %v13397_v17, %v13396_v28 }
 0x485   : > { %v15641_v14 = vpop.f32.mrf.mxu0 }
 0x486   : > { %v15695_v62 = vpop.f32.mrf.mxu1  ;;  %10737 = vrot.lane.b32.xlu1 %v7287_v63, %s16289_s26 }
 0x487   : > { %v7115_v37 = vpop.f32.mrf.mxu0  ;;  %v13400_v62 = vld [vmem:[%s16373_s9 + $0x3f8] sm:$0xff] }
 0x488   : > { %v7288_v15 = vadd.f32 %v7115_v37, %v19260_v25  ;;  %v19492_v30 = vpop.f32.mrf.mxu1  ;;  %v20897_v25 = vld [vmem:[#allocation2_spill] sm:$0xff] }
 0x489   : > { %v15644_v2 = vpop.f32.mrf.mxu0  ;;  %15795 = vmatmul.mubr.msk.bf16.gmra.mxu0 %vm347_vm1, %v7386_v11  ;;  %v20900_v11 = vld [vmem:[#allocation5_spill] sm:$0xff] }
 0x48a   : > { %v7289_v60 = vadd.f32 %v15644_v2, %v19270_v31  ;;  %v19496_v35 = vpop.f32.mrf.mxu1  ;;  %15849 = vmatmul.mubr.msk.bf16.gmra.mxu1 %vm347_vm1, %v8130_v24  ;;  %10739 = vrot.lane.b32.xlu0 %v7288_v15, %s16289_s26  ;;  %v13401_v24 = vld [vmem:[%s16373_s9 + $0x400] sm:$0xff]  ;;  %v13402_v2 = vld [vmem:[%s16373_s9 + $0x408] sm:$0xff] }
 0x48b   : > { %v7126_v32 = vpop.f32.mrf.mxu0  ;;  %15854 = vmatprep.mubr.msk.bf16.mxu0 %vm347_vm1, %v8496_v19  ;;  %15908 = vmatprep.mubr.msk.bf16.mxu1 %vm347_vm1, %v20897_v25  ;;  %v20901_v19 = vld [vmem:[#allocation6_spill] sm:$0xff]  ;;  %v8501_v26 = vpack.c.bf16 %v13401_v24, %v13400_v62 }
 0x48c   : > { %v7600_v10 = vpop.f32.mrf.mxu1  ;;  %10741 = vrot.lane.b32.xlu1 %v7289_v60, %s16289_s26 }
 0x48d   : > { %v15645_v31 = vpop.f32.mrf.mxu0 }
 0x48e   : > { %v7290_v41 = vadd.f32 %v15645_v31, %v19279_v39  ;;  %v19509_v13 = vpop.f32.mrf.mxu1  ;;  %v19520_v39 = vld [vmem:[%s20641_s1 + $0x34] sm:$0x3] }
 0x48f   : > { %v7128_v16 = vpop.f32.mrf.mxu0 }
 0x490   : > { %v7602_v57 = vpop.f32.mrf.mxu1  ;;  %10743 = vrot.lane.b32.xlu0 %v7290_v41, %s16289_s26  ;;  %v13404_v41 = vld [vmem:[%s16373_s9 + $0x418] sm:$0xff]  ;;  %v13405_v16 = vld [vmem:[%s16373_s9 + $0x420] sm:$0xff] }
 0x491   : > { %v15648_v20 = vpop.f32.mrf.mxu0  ;;  %15855 = vmatmul.mubr.msk.bf16.vlgmr.msra.gmra.mxu0 %vm347_vm1, %v8497_v18  ;;  %v20902_v18 = vld [vmem:[#allocation7_spill] sm:$0xff]  ;;  %v13407_v57 = vld [vmem:[%s16373_s9 + $0x430] sm:$0xff] }
 0x492   : > { %v15702_v21 = vpop.f32.mrf.mxu1  ;;  %15909 = vmatmul.mubr.msk.bf16.vlgmr.msra.gmra.mxu1 %vm347_vm1, %v20898_v7  ;;  %15961 = vmatpush3.bf16.msra.mxu0 %v9229_v49 }
 0x493   : > { %v7140_v46 = vpop.f32.mrf.mxu0  ;;  %16015 = vmatpush3.bf16.msra.mxu1 %v9622_v50  ;;  %15858 = vmatprep.mubr.msk.bf16.mxu0 %vm347_vm1, %v8498_v58  ;;  %v20903_v58 = vld [vmem:[#allocation8_spill] sm:$0xff]  ;;  %v8503_v21 = vpack.c.bf16 %v13405_v16, %v13404_v41 }
 0x494   : > { %v7291_v55 = vadd.f32 %v7140_v46, %v19310_v53  ;;  %v19535_v44 = vpop.f32.mrf.mxu1  ;;  %15912 = vmatprep.mubr.msk.bf16.mxu1 %vm347_vm1, %v20899_v22  ;;  %16202 = vmatprep.subr.msk.bf16.mxu0 %vm426_vm0, %v19520_v39  ;;  %v8500_v53 = vpack.c.bf16 %v13399_v61, %v13398_v45  ;;  %v20904_v22 = vld [vmem:[#allocation9_spill] sm:$0xff] }
 0x495   : > { %v15649_v33 = vpop.f32.mrf.mxu0  ;;  %16203 = vmatprep.subr.msk.bf16.mxu1 %vm426_vm0, %v19529_v29 }
 0x496   : > { %v15703_v0 = vpop.f32.mrf.mxu1  ;;  %10745 = vrot.lane.b32.xlu1 %v7291_v55, %s16289_s26  ;;  %v13408_v33 = vld [vmem:[%s16373_s9 + $0x438] sm:$0xff] }
 0x497   : > { %v7143_v40 = vpop.f32.mrf.mxu0  ;;  %v20905_v0 = vld [vmem:[#allocation10_spill] sm:$0xff] }
 0x498   : > { %v7617_v63 = vpop.f32.mrf.mxu1 }
 0x499   : > { %v15652_v59 = vpop.f32.mrf.mxu0  ;;  %15859 = vmatmul.mubr.msk.bf16.gmra.mxu0 %vm347_vm1, %v8499_v6  ;;  %v13410_v63 = vld [vmem:[%s16373_s9 + $0x448] sm:$0xff] }
 0x49a   : > { %v7293_v48 = vadd.f32 %v15652_v59, %v19323_v9  ;;  %v19546_v14 = vpop.f32.mrf.mxu1  ;;  %15913 = vmatmul.mubr.msk.bf16.gmra.mxu1 %vm347_vm1, %v20900_v11  ;;  %15862 = vmatprep.mubr.msk.bf16.mxu0 %vm347_vm1, %v8500_v53  ;;  %v13403_v9 = vld [vmem:[%s16373_s9 + $0x410] sm:$0xff] }
 0x49b   : > { %v7153_v37 = vpop.f32.mrf.mxu0  ;;  %15916 = vmatprep.mubr.msk.bf16.mxu1 %vm347_vm1, %v20901_v19  ;;  %v8502_v25 = vpack.c.bf16 %v13403_v9, %v13402_v2  ;;  %v13411_v59 = vld [vmem:[%s16373_s9 + $0x450] sm:$0xff] }
 0x49c   : > { %v7627_v15 = vpop.f32.mrf.mxu1  ;;  %10749 = vrot.lane.b32.xlu1 %v7293_v48, %s16289_s26  ;;  %v8506_v37 = vpack.c.bf16 %v13411_v59, %v13410_v63  ;;  %v20910_v59 = vld [vmem:[#allocation15_spill] sm:$0xff] }
 0x49d   : > { %v15653_v60 = vpop.f32.mrf.mxu0 }
 0x49e   : > { %v15707_v3 = vpop.f32.mrf.mxu1  ;;  %v20906_v60 = vld [vmem:[#allocation11_spill] sm:$0xff] }
 0x49f   : > { %v7155_v32 = vpop.f32.mrf.mxu0  ;;  %v13413_v3 = vld [vmem:[%s16373_s9 + $0x460] sm:$0xff] }
 0x4a0   : > { %v7292_v10 = vadd.f32 %v7155_v32, %v19329_v34  ;;  %v19559_v27 = vpop.f32.mrf.mxu1  ;;  %v13406_v34 = vld [vmem:[%s16373_s9 + $0x428] sm:$0xff] }
 0x4a1   : > { %v15656_v8 = vpop.f32.mrf.mxu0  ;;  %15863 = vmatmul.mubr.msk.bf16.gmra.mxu0 %vm347_vm1, %v8501_v26  ;;  %v8504_v17 = vpack.c.bf16 %v13407_v57, %v13406_v34  ;;  %v13412_v26 = vld [vmem:[%s16373_s9 + $0x458] sm:$0xff] }
 0x4a2   : > { %v15710_v31 = vpop.f32.mrf.mxu1  ;;  %15917 = vmatmul.mubr.msk.bf16.gmra.mxu1 %vm347_vm1, %v20902_v18  ;;  %10747 = vrot.lane.b32.xlu0 %v7292_v10, %s16289_s26  ;;  %v13415_v10 = vld [vmem:[%s16373_s9 + $0x470] sm:$0xff] }
 0x4a3   : > { %v7167_v49 = vpop.f32.mrf.mxu0  ;;  %15866 = vmatprep.mubr.msk.bf16.mxu0 %vm347_vm1, %v8502_v25  ;;  %15920 = vmatprep.mubr.msk.bf16.mxu1 %vm347_vm1, %v20903_v58  ;;  %v13414_v25 = vld [vmem:[%s16373_s9 + $0x468] sm:$0xff]  ;;  %v8507_v31 = vpack.c.bf16 %v13413_v3, %v13412_v26 }
 0x4a4   : > { %v7641_v50 = vpop.f32.mrf.mxu1  ;;  %v8508_v16 = vpack.c.bf16 %v13415_v10, %v13414_v25 }
 0x4a5   : > { %v15657_v20 = vpop.f32.mrf.mxu0  ;;  %v20908_v50 = vld [vmem:[#allocation13_spill] sm:$0xff] }
 0x4a6   : > { %v7294_v7 = vadd.f32 %v15657_v20, %v19343_v51  ;;  %v19573_v28 = vpop.f32.mrf.mxu1  ;;  %v13409_v51 = vld [vmem:[%s16373_s9 + $0x440] sm:$0xff]  ;;  %v13416_v20 = vld [vmem:[%s16373_s9 + $0x478] sm:$0xff] }
 0x4a7   : > { %v7169_v46 = vpop.f32.mrf.mxu0  ;;  %v8505_v11 = vpack.c.bf16 %v13409_v51, %v13408_v33 }
 0x4a8   : > { %v7643_v45 = vpop.f32.mrf.mxu1  ;;  %10751 = vrot.lane.b32.xlu1 %v7294_v7, %s16289_s26  ;;  %v20909_v7 = vld [vmem:[#allocation14_spill] sm:$0xff]  ;;  %v13419_v46 = vld [vmem:[%s16373_s9 + $0x490] sm:$0xff] }
 0x4a9   : > { %v15660_v61 = vpop.f32.mrf.mxu0  ;;  %15867 = vmatmul.mubr.msk.bf16.gmra.mxu0 %vm347_vm1, %v8503_v21  ;;  %v13417_v21 = vld [vmem:[%s16373_s9 + $0x480] sm:$0xff] }
 0x4aa   : > { %v15714_v55 = vpop.f32.mrf.mxu1  ;;  %15921 = vmatmul.mubr.msk.bf16.gmra.mxu1 %vm347_vm1, %v20904_v22  ;;  %15870 = vmatprep.mubr.msk.bf16.mxu0 %vm347_vm1, %v8504_v17  ;;  %v13418_v17 = vld [vmem:[%s16373_s9 + $0x488] sm:$0xff] }
 0x4ab   : > { %v7180_v6 = vpop.f32.mrf.mxu0  ;;  %15924 = vmatprep.mubr.msk.bf16.mxu1 %vm347_vm1, %v20905_v0  ;;  %v8509_v55 = vpack.c.bf16 %v13417_v21, %v13416_v20  ;;  %v8510_v33 = vpack.c.bf16 %v13419_v46, %v13418_v17 }
 0x4ac   : > { %v7295_v53 = vadd.f32 %v7180_v6, %v19358_v54  ;;  %v19585_v40 = vpop.f32.mrf.mxu1 }
 0x4ad   : > { %v15661_v48 = vpop.f32.mrf.mxu0 }
 0x4ae   : > { %v15715_v62 = vpop.f32.mrf.mxu1  ;;  %10753 = vrot.lane.b32.xlu0 %v7295_v53, %s16289_s26  ;;  %v13420_v48 = vld [vmem:[%s16373_s9 + $0x498] sm:$0xff] }
 0x4af   : > { %v7183_v24 = vpop.f32.mrf.mxu0 }
 0x4b0   : > { %v7296_v19 = vadd.f32 %v7183_v24, %v19362_v4  ;;  %v19591_v15 = vpop.f32.mrf.mxu1  ;;  %v20907_v4 = vld [vmem:[#allocation12_spill] sm:$0xff] }
 0x4b1   : > { %v15664_v54 = vpop.f32.mrf.mxu0  ;;  %15871 = vmatmul.mubr.msk.bf16.gmra.mxu0 %vm347_vm1, %v8505_v11  ;;  %v13421_v11 = vld [vmem:[%s16373_s9 + $0x4a0] sm:$0xff]  ;;  %v20911_v24 = vld [vmem:[#allocation16_spill] sm:$0xff] }
 0x4b2   : > { %v7297_v2 = vadd.f32 %v15664_v54, %v19374_v1  ;;  %v19595_v9 = vpop.f32.mrf.mxu1  ;;  %15925 = vmatmul.mubr.msk.bf16.gmra.mxu1 %vm347_vm1, %v20906_v60  ;;  %10755 = vrot.lane.b32.xlu1 %v7296_v19, %s16289_s26  ;;  %v13422_v19 = vld [vmem:[%s16373_s9 + $0x4a8] sm:$0xff] }
 0x4b3   : > { %v7194_v32 = vpop.f32.mrf.mxu0  ;;  %15874 = vmatprep.mubr.msk.bf16.mxu0 %vm347_vm1, %v8506_v37  ;;  %15928 = vmatprep.mubr.msk.bf16.mxu1 %vm347_vm1, %v20907_v4 }
 0x4b4   : > { %v7668_v8 = vpop.f32.mrf.mxu1  ;;  %10757 = vrot.lane.b32.xlu0 %v7297_v2, %s16289_s26  ;;  %v8511_v2 = vpack.c.bf16 %v13421_v11, %v13420_v48 }
 0x4b5   : > { %v15665_v1 = vpop.f32.mrf.mxu0 }
 0x4b6   : > { %v7298_v18 = vadd.f32 %v15665_v1, %v19379_v36  ;;  %v19609_v41 = vpop.f32.mrf.mxu1  ;;  %v20912_v1 = vld [vmem:[#allocation17_spill] sm:$0xff] }
 0x4b7   : > { %v7196_v49 = vpop.f32.mrf.mxu0 }
 0x4b8   : > { %v7670_v58 = vpop.f32.mrf.mxu1  ;;  %10759 = vrot.lane.b32.xlu1 %v7298_v18, %s16289_s26  ;;  %v13427_v49 = vld [vmem:[%s16373_s9 + $0x4d0] sm:$0xff] }
 0x4b9   : > { %v15668_v34 = vpop.f32.mrf.mxu0  ;;  %15875 = vmatmul.mubr.msk.bf16.gmra.mxu0 %vm347_vm1, %v8507_v31  ;;  %v13425_v31 = vld [vmem:[%s16373_s9 + $0x4c0] sm:$0xff] }
 0x4ba   : > { %v15722_v57 = vpop.f32.mrf.mxu1  ;;  %15929 = vmatmul.mubr.msk.bf16.gmra.mxu1 %vm347_vm1, %v20908_v50  ;;  %15878 = vmatprep.mubr.msk.bf16.mxu0 %vm347_vm1, %v8508_v16  ;;  %v20913_v16 = vld [vmem:[#allocation18_spill] sm:$0xff] }
 0x4bb   : > { %v7208_v36 = vpop.f32.mrf.mxu0  ;;  %15932 = vmatprep.mubr.msk.bf16.mxu1 %vm347_vm1, %v20909_v7 }
 0x4bc   : > { %v7682_v45 = vpop.f32.mrf.mxu1 }
 0x4bd   : > { %v15669_v61 = vpop.f32.mrf.mxu0  ;;  %v20914_v45 = vld [vmem:[#allocation19_spill] sm:$0xff] }
 0x4be   : > { %v15723_v22 = vpop.f32.mrf.mxu1  ;;  %v13428_v61 = vld [vmem:[%s16373_s9 + $0x4d8] sm:$0xff] }
 0x4bf   : > { %v7210_v51 = vpop.f32.mrf.mxu0  ;;  %v20915_v22 = vld [vmem:[#allocation20_spill] sm:$0xff] }
 0x4c0   : > { %v7684_v6 = vpop.f32.mrf.mxu1  ;;  %v13431_v51 = vld [vmem:[%s16373_s9 + $0x4f0] sm:$0xff] }
 0x4c1   : > { %v15672_v0 = vpop.f32.mrf.mxu0  ;;  %15879 = vmatmul.mubr.msk.bf16.gmra.mxu0 %vm347_vm1, %v8509_v55  ;;  %v13429_v55 = vld [vmem:[%s16373_s9 + $0x4e0] sm:$0xff] }
 0x4c2   : > { %v7301_v53 = vadd.f32 %v15672_v0, %v19404_v47  ;;  %v19624_v63 = vpop.f32.mrf.mxu1  ;;  %15933 = vmatmul.mubr.msk.bf16.gmra.mxu1 %vm347_vm1, %v20910_v59  ;;  %15882 = vmatprep.mubr.msk.bf16.mxu0 %vm347_vm1, %v8510_v33  ;;  %v13423_v47 = vld [vmem:[%s16373_s9 + $0x4b0] sm:$0xff]  ;;  %v13430_v33 = vld [vmem:[%s16373_s9 + $0x4e8] sm:$0xff]  ;;  %v8515_v59 = vpack.c.bf16 %v13429_v55, %v13428_v61 }
 0x4c3   : > { %v7220_v62 = vpop.f32.mrf.mxu0  ;;  %15936 = vmatprep.mubr.msk.bf16.mxu1 %vm347_vm1, %v20911_v24  ;;  %v8512_v32 = vpack.c.bf16 %v13423_v47, %v13422_v19  ;;  %v8516_v11 = vpack.c.bf16 %v13431_v51, %v13430_v33  ;;  %v19706_v33 = vpop.permute.xlu0 %10657 }
 0x4c4   : > { %v19633_v37 = vpop.f32.mrf.mxu1  ;;  %10765 = vrot.lane.b32.xlu1 %v7301_v53, %s16289_s26  ;;  %v7299_v60 = vadd.f32 %v7220_v62, %v19409_v52  ;;  %v13424_v52 = vld [vmem:[%s16373_s9 + $0x4b8] sm:$0xff] }
 0x4c5   : > { %v15673_v54 = vpop.f32.mrf.mxu0  ;;  %v8513_v57 = vpack.c.bf16 %v13425_v31, %v13424_v52 }
 0x4c6   : > { %v15727_v26 = vpop.f32.mrf.mxu1 }
 0x4c7   : > { %v7223_v3 = vpop.f32.mrf.mxu0 }
 0x4c8   : > { %v7300_v4 = vadd.f32 %v7223_v3, %v19413_v23  ;;  %v19640_v25 = vpop.f32.mrf.mxu1  ;;  %10761 = vrot.lane.b32.xlu1 %v7299_v60, %s16289_s26  ;;  %v13426_v23 = vld [vmem:[%s16373_s9 + $0x4c8] sm:$0xff]  ;;  %v13433_v60 = vld [vmem:[%s16373_s9 + $0x500] sm:$0xff] }
 0x4c9   : > { %v15676_v10 = vpop.f32.mrf.mxu0  ;;  %15883 = vmatmul.mubr.msk.bf16.gmra.mxu0 %vm347_vm1, %v8511_v2  ;;  %v8514_v21 = vpack.c.bf16 %v13427_v49, %v13426_v23  ;;  %v13432_v2 = vld [vmem:[%s16373_s9 + $0x4f8] sm:$0xff]  ;;  %v20917_v3 = vld [vmem:[#allocation22_spill] sm:$0xff] }
 0x4ca   : > { %v15730_v8 = vpop.f32.mrf.mxu1  ;;  %15937 = vmatmul.mubr.msk.bf16.gmra.mxu1 %vm347_vm1, %v20912_v1  ;;  %10763 = vrot.lane.b32.xlu0 %v7300_v4, %s16289_s26  ;;  %v13435_v4 = vld [vmem:[%s16373_s9 + $0x510] sm:$0xff] }
 0x4cb   : > { %v7235_v18 = vpop.f32.mrf.mxu0  ;;  %15886 = vmatprep.mubr.msk.bf16.mxu0 %vm347_vm1, %v8512_v32  ;;  %15940 = vmatprep.mubr.msk.bf16.mxu1 %vm347_vm1, %v20913_v16  ;;  %v13434_v32 = vld [vmem:[%s16373_s9 + $0x508] sm:$0xff]  ;;  %v8517_v8 = vpack.c.bf16 %v13433_v60, %v13432_v2  ;;  %v13579_v60 = vld [vmem:[%s16373_s9 + $0x750] sm:$0xff] }
 0x4cc   : > { %v7709_v58 = vpop.f32.mrf.mxu1  ;;  %v8518_v31 = vpack.c.bf16 %v13435_v4, %v13434_v32 }
 0x4cd   : > { %v15677_v34 = vpop.f32.mrf.mxu0 }
 0x4ce   : > { %v7302_v50 = vadd.f32 %v15677_v34, %v19427_v43  ;;  %v19655_v20 = vpop.f32.mrf.mxu1  ;;  %v20918_v34 = vld [vmem:[#allocation23_spill] sm:$0xff] }
 0x4cf   : > { %v7237_v36 = vpop.f32.mrf.mxu0 }
 0x4d0   : > { %v7711_v7 = vpop.f32.mrf.mxu1  ;;  %10767 = vrot.lane.b32.xlu1 %v7302_v50, %s16289_s26  ;;  %v13438_v36 = vld [vmem:[%s16373_s9 + $0x528] sm:$0xff] }
 0x4d1   : > { %v15680_v17 = vpop.f32.mrf.mxu0  ;;  %15887 = vmatmul.mubr.msk.bf16.gmra.mxu0 %vm347_vm1, %v8513_v57  ;;  %v13437_v57 = vld [vmem:[%s16373_s9 + $0x520] sm:$0xff]  ;;  %v13439_v7 = vld [vmem:[%s16373_s9 + $0x530] sm:$0xff] }
 0x4d2   : > { %v15734_v46 = vpop.f32.mrf.mxu1  ;;  %15941 = vmatmul.mubr.msk.bf16.gmra.mxu1 %vm347_vm1, %v20914_v45  ;;  %15890 = vmatprep.mubr.msk.bf16.mxu0 %vm347_vm1, %v8514_v21  ;;  %v20919_v21 = vld [vmem:[#allocation24_spill] sm:$0xff]  ;;  %v19703_v17 = vpop.permute.xlu1 %10661  ;;  %v8520_v55 = vpack.c.bf16 %v13439_v7, %v13438_v36  ;;  %v13581_v7 = vld [vmem:[%s16373_s9 + $0x760] sm:$0xff] }
 0x4d3   : > { %v7248_v43 = vpop.f32.mrf.mxu0  ;;  %15944 = vmatprep.mubr.msk.bf16.mxu1 %vm347_vm1, %v20915_v22 }
 0x4d4   : > { %v7303_v6 = vadd.f32 %v7248_v43, %v19442_v56  ;;  %v19669_v0 = vpop.f32.mrf.mxu1  ;;  %v20916_v56 = vld [vmem:[#allocation21_spill] sm:$0xff] }
 0x4d5   : > { %v15681_v53 = vpop.f32.mrf.mxu0 }
 0x4d6   : > { %v15735_v48 = vpop.f32.mrf.mxu1  ;;  %10769 = vrot.lane.b32.xlu0 %v7303_v6, %s16289_s26  ;;  %v19709_v6 = vpop.permute.xlu1 %10663 }
 0x4d7   : > { %v7251_v62 = vpop.f32.mrf.mxu0  ;;  %v13440_v48 = vld [vmem:[%s16373_s9 + $0x538] sm:$0xff] }
 0x4d8   : > { %v7725_v24 = vpop.f32.mrf.mxu1 }
 0x4d9   : > { %v15684_v19 = vpop.f32.mrf.mxu0  ;;  %15891 = vmatmul.mubr.msk.bf16.gmra.mxu0 %vm347_vm1, %v8515_v59  ;;  %v20920_v59 = vld [vmem:[#allocation25_spill] sm:$0xff]  ;;  %v20921_v24 = vld [vmem:[#allocation26_spill] sm:$0xff] }
 0x4da   : > { %v7305_v47 = vadd.f32 %v15684_v19, %v19455_v5  ;;  %v19674_v54 = vpop.f32.mrf.mxu1  ;;  %15945 = vmatmul.mubr.msk.bf16.gmra.mxu1 %vm347_vm1, %v20916_v56  ;;  %15894 = vmatprep.mubr.msk.bf16.mxu0 %vm347_vm1, %v8516_v11  ;;  %v13441_v11 = vld [vmem:[%s16373_s9 + $0x540] sm:$0xff]  ;;  %v13498_v19 = vld [vmem:[%s16373_s9 + $0x3cc] sm:$0xff]  ;;  %v19723_v4 = vpop.permute.xlu1 %10667 }
 0x4db   : > { %v7261_v26 = vpop.f32.mrf.mxu0  ;;  %15948 = vmatprep.mubr.msk.bf16.mxu1 %vm347_vm1, %v20917_v3  ;;  %v8521_v32 = vpack.c.bf16 %v13441_v11, %v13440_v48 }
 0x4dc   : > { %v7735_v10 = vpop.f32.mrf.mxu1  ;;  %10773 = vrot.lane.b32.xlu1 %v7305_v47, %s16289_s26  ;;  %v13499_v47 = vld [vmem:[%s16373_s9 + $0x3d4] sm:$0xff] }
 0x4dd   : > { %v15685_v5 = vpop.f32.mrf.mxu0  ;;  %v13580_v26 = vld [vmem:[%s16373_s9 + $0x758] sm:$0xff] }
 0x4de   : > { %v7306_v1 = vadd.f32 %v15685_v5, %v19460_v42  ;;  %v19687_v52 = vpop.f32.mrf.mxu1  ;;  %v13436_v42 = vld [vmem:[%s16373_s9 + $0x518] sm:$0xff] }
 0x4df   : > { %v7263_v18 = vpop.f32.mrf.mxu0  ;;  %v8519_v45 = vpack.c.bf16 %v13437_v57, %v13436_v42 }
 0x4e0   : > { %v19689_v16 = vpop.f32.mrf.mxu1  ;;  %10775 = vrot.lane.b32.xlu0 %v7306_v1, %s16289_s26  ;;  %v7304_v49 = vadd.f32 %v7263_v18, %v19464_v38  ;;  %v19727_v18 = vpop.permute.xlu0 %10659 }
 0x4e1   : > { %v15688_v23 = vpop.f32.mrf.mxu0  ;;  %15895 = vmatmul.mubr.msk.bf16.gmra.mxu0 %vm347_vm1, %v8517_v8  ;;  %v9122_v8 = vpack.c.bf16 %v13499_v47, %v13498_v19  ;;  %v10014_v19 = vsel %vm426_vm0, %v19520_v39, 0  ;;  %v13504_v39 = vld [vmem:[%s16373_s9 + $0x3fc] sm:$0xff] }
 0x4e2   : > { %v15742_v58 = vpop.f32.mrf.mxu1  ;;  %15949 = vmatmul.mubr.msk.bf16.gmra.mxu1 %vm347_vm1, %v20918_v34  ;;  %15898 = vmatprep.mubr.msk.bf16.mxu0 %vm347_vm1, %v8518_v31  ;;  %v9515_v31 = vpack.c.bf16 %v13580_v26, %v13579_v60 }
 0x4e3   : > { %v7276_v50 = vpop.f32.mrf.mxu0  ;;  %15952 = vmatprep.mubr.msk.bf16.mxu1 %vm347_vm1, %v20919_v21  ;;  %v19731_v58 = vpop.permute.xlu1 %10671  ;;  %v13501_v21 = vld [vmem:[%s16373_s9 + $0x3e4] sm:$0xff] }
 0x4e4   : > { %v7750_v46 = vpop.f32.mrf.mxu1  ;;  %10771 = vrot.lane.b32.xlu0 %v7304_v49, %s16289_s26  ;;  %20922 = vst [vmem:[#allocation50_spill] sm:$0xff] %v19731_v58  ;;  %v20923_v50 = vld [vmem:[#allocation27_spill] sm:$0xff] }
 0x4e5   : > { %v15689_v38 = vpop.f32.mrf.mxu0  ;;  %v13582_v46 = vld [vmem:[%s16373_s9 + $0x768] sm:$0xff] }
 0x4e6   : > { %v15743_v61 = vpop.f32.mrf.mxu1  ;;  %v19744_v38 = vpop.permute.xlu0 %10665 }
 0x4e7   : > { %v7278_v43 = vpop.f32.mrf.mxu0  ;;  %v13502_v61 = vld [vmem:[%s16373_s9 + $0x3ec] sm:$0xff] }
 0x4e8   : > { %v7752_v22 = vpop.f32.mrf.mxu1 }
 0x4e9   : > { %v15748_v51 = vpop.f32.mrf.mxu0  ;;  %15899 = vmatmul.mubr.msk.bf16.gmra.mxu0 %vm347_vm1, %v8519_v45 }
 0x4ea   : > { %v15802_v53 = vpop.f32.mrf.mxu1  ;;  %15953 = vmatmul.mubr.msk.bf16.gmra.mxu1 %vm347_vm1, %v20920_v59  ;;  %15902 = vmatprep.mubr.msk.bf16.mxu0 %vm347_vm1, %v8520_v55  ;;  %v13503_v55 = vld [vmem:[%s16373_s9 + $0x3f4] sm:$0xff]  ;;  %v19752_v59 = vpop.permute.xlu1 %10675 }
 0x4eb   : > { %v7876_v62 = vpop.f32.mrf.mxu0  ;;  %15956 = vmatprep.mubr.msk.bf16.mxu1 %vm347_vm1, %v20921_v24  ;;  %v13583_v51 = vld [vmem:[%s16373_s9 + $0x770] sm:$0xff]  ;;  %v13584_v53 = vld [vmem:[%s16373_s9 + $0x778] sm:$0xff]  ;;  %v9124_v47 = vpack.c.bf16 %v13503_v55, %v13502_v61 }
 0x4ec   : > { %v7877_v56 = vadd.f32 %v7876_v62, %v19486_v12  ;;  %v8248_v2 = vpop.f32.mrf.mxu1  ;;  %v9516_v62 = vpack.c.bf16 %v13582_v46, %v13581_v7  ;;  %v9517_v26 = vpack.c.bf16 %v13584_v53, %v13583_v51 }
 0x4ed   : > { %v15749_v3 = vpop.f32.mrf.mxu0 }
 0x4ee   : > { %v19725_v10 = vadd.f32 %v8248_v2, %v7877_v56  ;;  %v15803_v5 = vpop.f32.mrf.mxu1  ;;  %v19757_v56 = vpop.permute.xlu0 %10669 }
 0x4ef   : > { %v7879_v1 = vpop.f32.mrf.mxu0 }
 0x4f0   : > { %v7880_v12 = vadd.f32 %v7879_v1, %v19492_v30  ;;  %v8251_v23 = vpop.f32.mrf.mxu1  ;;  %v13500_v30 = vld [vmem:[%s16373_s9 + $0x3dc] sm:$0xff] }
 0x4f1   : > { %v15752_v49 = vpop.f32.mrf.mxu0  ;;  %15903 = vmatmul.mubr.msk.bf16.gmra.mxu0 %vm347_vm1, %v8521_v32  ;;  %v9123_v22 = vpack.c.bf16 %v13501_v21, %v13500_v30  ;;  %v19764_v32 = vpop.permute.xlu1 %10679  ;;  %v13585_v1 = vld [vmem:[%s16373_s9 + $0x780] sm:$0xff]  ;;  %v13588_v30 = vld [vmem:[%s16373_s9 + $0x798] sm:$0xff] }
 0x4f2   : > { %v19733_v34 = vadd.f32 %v8251_v23, %v7880_v12  ;;  %v7897_v42 = vadd.f32 %v15752_v49, %v19496_v35  ;;  %v15806_v57 = vpop.f32.mrf.mxu1  ;;  %15957 = vmatmul.mubr.msk.bf16.gmra.mxu1 %vm347_vm1, %v20923_v50  ;;  %15962 = vmatprep.mubr.msk.bf16.mxu0 %vm347_vm1, %v9122_v8  ;;  %v13505_v8 = vld [vmem:[%s16373_s9 + $0x404] sm:$0xff]  ;;  %v13506_v12 = vld [vmem:[%s16373_s9 + $0x40c] sm:$0xff]  ;;  %v13507_v23 = vld [vmem:[%s16373_s9 + $0x414] sm:$0xff]  ;;  %v19774_v49 = vpop.permute.xlu0 %10673 }
 0x4f3   : > { %v7890_v36 = vpop.f32.mrf.mxu0  ;;  %16016 = vmatprep.mubr.msk.bf16.mxu1 %vm347_vm1, %v9515_v31  ;;  %20924 = vst [vmem:[#allocation51_spill] sm:$0xff] %v19774_v49  ;;  %v13587_v50 = vld [vmem:[%s16373_s9 + $0x790] sm:$0xff]  ;;  %v9126_v55 = vpack.c.bf16 %v13507_v23, %v13506_v12 }
 0x4f4   : > { %v19746_v45 = vadd.f32 %v15806_v57, %v7897_v42  ;;  %v8262_v35 = vpop.f32.mrf.mxu1  ;;  %v9125_v36 = vpack.c.bf16 %v13505_v8, %v13504_v39  ;;  %v13591_v8 = vld [vmem:[%s16373_s9 + $0x7b0] sm:$0xff] }
 0x4f5   : > { %v15753_v43 = vpop.f32.mrf.mxu0  ;;  %v19780_v7 = vpop.permute.xlu1 %10683 }
 0x4f6   : > { %v7900_v48 = vadd.f32 %v15753_v43, %v19509_v13  ;;  %v15807_v11 = vpop.f32.mrf.mxu1  ;;  %v10406_v13 = vsel %vm426_vm0, %v19529_v29, 0  ;;  %v13586_v29 = vld [vmem:[%s16373_s9 + $0x788] sm:$0xff] }
 0x4f7   : > { %v7892_v24 = vpop.f32.mrf.mxu0  ;;  %v9518_v61 = vpack.c.bf16 %v13586_v29, %v13585_v1  ;;  %v13592_v1 = vld [vmem:[%s16373_s9 + $0x7b8] sm:$0xff] }
 0x4f8   : > { %v19759_v2 = vadd.f32 %v15807_v11, %v7900_v48  ;;  %v8264_v60 = vpop.f32.mrf.mxu1  ;;  %v13508_v24 = vld [vmem:[%s16373_s9 + $0x41c] sm:$0xff] }
 0x4f9   : > { %v15756_v3 = vpop.f32.mrf.mxu0  ;;  %15963 = vmatmul.mubr.msk.bf16.vlgmr.msra.gmra.mxu0 %vm347_vm1, %v9123_v22  ;;  %v19784_v22 = vpop.permute.xlu0 %10677 }
 0x4fa   : > { %v15810_v5 = vpop.f32.mrf.mxu1  ;;  %16017 = vmatmul.mubr.msk.bf16.vlgmr.msra.gmra.mxu1 %vm347_vm1, %v9516_v62  ;;  %16069 = vmatpush3.bf16.msra.mxu0 %v10014_v19  ;;  %v19787_v48 = vpop.permute.xlu1 %10689  ;;  %v13509_v19 = vld [vmem:[%s16373_s9 + $0x424] sm:$0xff]  ;;  %v13511_v3 = vld [vmem:[%s16373_s9 + $0x434] sm:$0xff] }
 0x4fb   : > { %v7904_v31 = vpop.f32.mrf.mxu0  ;;  %16123 = vmatpush3.bf16.msra.mxu1 %v10406_v13  ;;  %15966 = vmatprep.mubr.msk.bf16.mxu0 %vm347_vm1, %v9124_v47  ;;  %v13589_v47 = vld [vmem:[%s16373_s9 + $0x7a0] sm:$0xff]  ;;  %v13590_v13 = vld [vmem:[%s16373_s9 + $0x7a8] sm:$0xff]  ;;  %v9127_v29 = vpack.c.bf16 %v13509_v19, %v13508_v24  ;;  %v13515_v24 = vld [vmem:[%s16373_s9 + $0x454] sm:$0xff] }
 0x4fc   : > { %v7905_v42 = vadd.f32 %v7904_v31, %v19535_v44  ;;  %v8276_v57 = vpop.f32.mrf.mxu1  ;;  %16020 = vmatprep.mubr.msk.bf16.mxu1 %vm347_vm1, %v9517_v26  ;;  %v9519_v44 = vpack.c.bf16 %v13588_v30, %v13587_v50  ;;  %v13510_v26 = vld [vmem:[%s16373_s9 + $0x42c] sm:$0xff]  ;;  %v9521_v30 = vpack.c.bf16 %v13592_v1, %v13591_v8 }
 0x4fd   : > { %v15757_v21 = vpop.f32.mrf.mxu0  ;;  %v19799_v5 = vpop.permute.xlu0 %10685 }
 0x4fe   : > { %v19782_v46 = vadd.f32 %v8276_v57, %v7905_v42  ;;  %v15811_v35 = vpop.f32.mrf.mxu1  ;;  %v19805_v12 = vpop.permute.xlu1 %10695  ;;  %v9520_v42 = vpack.c.bf16 %v13590_v13, %v13589_v47  ;;  %v9128_v57 = vpack.c.bf16 %v13511_v3, %v13510_v26  ;;  %v13596_v13 = vld [vmem:[%s16373_s9 + $0x7d8] sm:$0xff] }
 0x4ff   : > { %v7907_v43 = vpop.f32.mrf.mxu0 }
 0x500   : > { %v8279_v51 = vpop.f32.mrf.mxu1 }
 0x501   : > { %v15760_v53 = vpop.f32.mrf.mxu0  ;;  %15967 = vmatmul.mubr.msk.bf16.gmra.mxu0 %vm347_vm1, %v9125_v36  ;;  %v13513_v51 = vld [vmem:[%s16373_s9 + $0x444] sm:$0xff] }
 0x502   : > { %v7925_v11 = vadd.f32 %v15760_v53, %v19546_v14  ;;  %v15814_v62 = vpop.f32.mrf.mxu1  ;;  %16021 = vmatmul.mubr.msk.bf16.gmra.mxu1 %vm347_vm1, %v9518_v61  ;;  %15970 = vmatprep.mubr.msk.bf16.mxu0 %vm347_vm1, %v9126_v55  ;;  %v19809_v61 = vpop.permute.xlu0 %10681  ;;  %v13593_v53 = vld [vmem:[%s16373_s9 + $0x7c0] sm:$0xff] }
 0x503   : > { %v7917_v60 = vpop.f32.mrf.mxu0  ;;  %16024 = vmatprep.mubr.msk.bf16.mxu1 %vm347_vm1, %v9519_v44  ;;  %v13512_v44 = vld [vmem:[%s16373_s9 + $0x43c] sm:$0xff]  ;;  %v19822_v19 = vpop.permute.xlu1 %10691 }
 0x504   : > { %v19801_v39 = vadd.f32 %v15814_v62, %v7925_v11  ;;  %v8289_v14 = vpop.f32.mrf.mxu1  ;;  %v13594_v11 = vld [vmem:[%s16373_s9 + $0x7c8] sm:$0xff]  ;;  %20925 = vst [vmem:[#allocation53_spill] sm:$0xff] %v19822_v19  ;;  %v13595_v60 = vld [vmem:[%s16373_s9 + $0x7d0] sm:$0xff]  ;;  %v9129_v3 = vpack.c.bf16 %v13513_v51, %v13512_v44  ;;  %v13597_v44 = vld [vmem:[%s16373_s9 + $0x7e0] sm:$0xff] }
 0x505   : > { %v15761_v31 = vpop.f32.mrf.mxu0  ;;  %v13514_v62 = vld [vmem:[%s16373_s9 + $0x44c] sm:$0xff] }
 0x506   : > { %v15815_v23 = vpop.f32.mrf.mxu1  ;;  %v19826_v14 = vpop.permute.xlu0 %10687  ;;  %v9522_v31 = vpack.c.bf16 %v13594_v11, %v13593_v53  ;;  %v13598_v53 = vld [vmem:[%s16373_s9 + $0x7e8] sm:$0xff]  ;;  %v13519_v11 = vld [vmem:[%s16373_s9 + $0x474] sm:$0xff] }
 0x507   : > { %v7919_v50 = vpop.f32.mrf.mxu0 }
 0x508   : > { %v7920_v21 = vadd.f32 %v7919_v50, %v19559_v27  ;;  %v8291_v36 = vpop.f32.mrf.mxu1 }
 0x509   : > { %v15764_v35 = vpop.f32.mrf.mxu0  ;;  %15971 = vmatmul.mubr.msk.bf16.gmra.mxu0 %vm347_vm1, %v9127_v29  ;;  %v9130_v29 = vpack.c.bf16 %v13515_v24, %v13514_v62 }
 0x50a   : > { %v19811_v55 = vadd.f32 %v8291_v36, %v7920_v21  ;;  %v15818_v43 = vpop.f32.mrf.mxu1  ;;  %16025 = vmatmul.mubr.msk.bf16.gmra.mxu1 %vm347_vm1, %v9520_v42  ;;  %15974 = vmatprep.mubr.msk.bf16.mxu0 %vm347_vm1, %v9128_v57  ;;  %v9523_v42 = vpack.c.bf16 %v13596_v13, %v13595_v60  ;;  %v19829_v57 = vpop.permute.xlu1 %10737  ;;  %v13516_v35 = vld [vmem:[%s16373_s9 + $0x45c] sm:$0xff]  ;;  %v13599_v60 = vld [vmem:[%s16373_s9 + $0x7f0] sm:$0xff] }
 0x50b   : > { %v7931_v27 = vpop.f32.mrf.mxu0  ;;  %16028 = vmatprep.mubr.msk.bf16.mxu1 %vm347_vm1, %v9521_v30  ;;  %v13517_v43 = vld [vmem:[%s16373_s9 + $0x464] sm:$0xff]  ;;  %v13600_v13 = vld [vmem:[%s16373_s9 + $0x7f8] sm:$0xff] }
 0x50c   : > { %v8303_v47 = vpop.f32.mrf.mxu1  ;;  %v13518_v27 = vld [vmem:[%s16373_s9 + $0x46c] sm:$0xff] }
 0x50d   : > { %v15765_v26 = vpop.f32.mrf.mxu0 }
 0x50e   : > { %v7940_v8 = vadd.f32 %v15765_v26, %v19573_v28  ;;  %v15819_v1 = vpop.f32.mrf.mxu1  ;;  %v19834_v28 = vpop.permute.xlu0 %10693 }
 0x50f   : > { %v7933_v23 = vpop.f32.mrf.mxu0  ;;  %20926 = vst [vmem:[#allocation52_spill] sm:$0xff] %v19834_v28  ;;  %v19845_v62 = vpop.permute.xlu1 %10741 }
 0x510   : > { %v19831_v50 = vadd.f32 %v15819_v1, %v7940_v8  ;;  %v8305_v30 = vpop.f32.mrf.mxu1  ;;  %v9132_v23 = vpack.c.bf16 %v13519_v11, %v13518_v27  ;;  %v13521_v27 = vld [vmem:[%s16373_s9 + $0x484] sm:$0xff] }
 0x511   : > { %v15768_v21 = vpop.f32.mrf.mxu0  ;;  %15975 = vmatmul.mubr.msk.bf16.gmra.mxu0 %vm347_vm1, %v9129_v3  ;;  %v9131_v3 = vpack.c.bf16 %v13517_v43, %v13516_v35  ;;  %v9525_v30 = vpack.c.bf16 %v13600_v13, %v13599_v60  ;;  %v13601_v11 = vld [vmem:[%s16373_s9 + $0x800] sm:$0xff]  ;;  %v13522_v60 = vld [vmem:[%s16373_s9 + $0x48c] sm:$0xff]  ;;  %v13523_v13 = vld [vmem:[%s16373_s9 + $0x494] sm:$0xff] }
 0x512   : > { %v15822_v36 = vpop.f32.mrf.mxu1  ;;  %16029 = vmatmul.mubr.msk.bf16.gmra.mxu1 %vm347_vm1, %v9522_v31  ;;  %15978 = vmatprep.mubr.msk.bf16.mxu0 %vm347_vm1, %v9130_v29  ;;  %v19850_v8 = vpop.permute.xlu0 %10739  ;;  %v9524_v29 = vpack.c.bf16 %v13598_v53, %v13597_v44 }
 0x513   : > { %v7944_v51 = vpop.f32.mrf.mxu0  ;;  %16032 = vmatprep.mubr.msk.bf16.mxu1 %vm347_vm1, %v9523_v42  ;;  %v19854_v21 = vpop.permute.xlu1 %10745 }
 0x514   : > { %v7945_v24 = vadd.f32 %v7944_v51, %v19585_v40  ;;  %v8316_v47 = vpop.f32.mrf.mxu1 }
 0x515   : > { %v15769_v26 = vpop.f32.mrf.mxu0 }
 0x516   : > { %v19852_v1 = vadd.f32 %v8316_v47, %v7945_v24  ;;  %v15823_v31 = vpop.f32.mrf.mxu1  ;;  %v19858_v43 = vpop.permute.xlu0 %10743  ;;  %v13602_v47 = vld [vmem:[%s16373_s9 + $0x808] sm:$0xff] }
 0x517   : > { %v7947_v42 = vpop.f32.mrf.mxu0  ;;  %v19872_v26 = vpop.permute.xlu1 %10749  ;;  %v13603_v31 = vld [vmem:[%s16373_s9 + $0x810] sm:$0xff] }
 0x518   : > { %v7948_v40 = vadd.f32 %v7947_v42, %v19591_v15  ;;  %v8319_v36 = vpop.f32.mrf.mxu1  ;;  %v13520_v15 = vld [vmem:[%s16373_s9 + $0x47c] sm:$0xff] }
 0x519   : > { %v15772_v35 = vpop.f32.mrf.mxu0  ;;  %15979 = vmatmul.mubr.msk.bf16.gmra.mxu0 %vm347_vm1, %v9131_v3  ;;  %v13604_v42 = vld [vmem:[%s16373_s9 + $0x818] sm:$0xff] }
 0x51a   : > { %v19860_v51 = vadd.f32 %v8319_v36, %v7948_v40  ;;  %v7965_v44 = vadd.f32 %v15772_v35, %v19595_v9  ;;  %v15826_v53 = vpop.f32.mrf.mxu1  ;;  %16033 = vmatmul.mubr.msk.bf16.gmra.mxu1 %vm347_vm1, %v9524_v29  ;;  %15982 = vmatprep.mubr.msk.bf16.mxu0 %vm347_vm1, %v9132_v23  ;;  %v9133_v29 = vpack.c.bf16 %v13521_v27, %v13520_v15  ;;  %v19878_v36 = vpop.permute.xlu0 %10747 }
 0x51b   : > { %v7958_v24 = vpop.f32.mrf.mxu0  ;;  %16036 = vmatprep.mubr.msk.bf16.mxu1 %vm347_vm1, %v9525_v30  ;;  %v9526_v30 = vpack.c.bf16 %v13602_v47, %v13601_v11  ;;  %v9527_v28 = vpack.c.bf16 %v13604_v42, %v13603_v31  ;;  %v13525_v11 = vld [vmem:[%s16373_s9 + $0x4a4] sm:$0xff]  ;;  %v13526_v31 = vld [vmem:[%s16373_s9 + $0x4ac] sm:$0xff]  ;;  %v13527_v42 = vld [vmem:[%s16373_s9 + $0x4b4] sm:$0xff] }
 0x51c   : > { %v19874_v3 = vadd.f32 %v15826_v53, %v7965_v44  ;;  %v8330_v9 = vpop.f32.mrf.mxu1  ;;  %v9134_v24 = vpack.c.bf16 %v13523_v13, %v13522_v60  ;;  %v19881_v44 = vpop.permute.xlu1 %10751  ;;  %v13605_v47 = vld [vmem:[%s16373_s9 + $0x820] sm:$0xff]  ;;  %v13606_v13 = vld [vmem:[%s16373_s9 + $0x828] sm:$0xff] }
 0x51d   : > { %v15773_v40 = vpop.f32.mrf.mxu0  ;;  %20927 = vst [vmem:[#allocation56_spill] sm:$0xff] %v19881_v44  ;;  %v9528_v44 = vpack.c.bf16 %v13606_v13, %v13605_v47  ;;  %v13528_v13 = vld [vmem:[%s16373_s9 + $0x4bc] sm:$0xff] }
 0x51e   : > { %v7968_v23 = vadd.f32 %v15773_v40, %v19609_v41  ;;  %v15827_v35 = vpop.f32.mrf.mxu1  ;;  %v20929_v40 = vld [vmem:[#allocation37_spill] sm:$0xff] }
 0x51f   : > { %v7960_v19 = vpop.f32.mrf.mxu0 }
 0x520   : > { %v19883_v53 = vadd.f32 %v15827_v35, %v7968_v23  ;;  %v8332_v15 = vpop.f32.mrf.mxu1  ;;  %v19886_v9 = vpop.permute.xlu0 %10753  ;;  %v13524_v19 = vld [vmem:[%s16373_s9 + $0x49c] sm:$0xff] }
 0x521   : > { %v15776_v27 = vpop.f32.mrf.mxu0  ;;  %15983 = vmatmul.mubr.msk.bf16.gmra.mxu0 %vm347_vm1, %v9133_v29  ;;  %20928 = vst [vmem:[#allocation57_spill] sm:$0xff] %v19886_v9  ;;  %v10887_v29 = vsel %vm10877_vm2, %v20929_v40, %v19752_v59  ;;  %v13608_v15 = vld [vmem:[%s16373_s9 + $0x838] sm:$0xff]  ;;  %v9136_v59 = vpack.c.bf16 %v13527_v42, %v13526_v31  ;;  %v13529_v31 = vld [vmem:[%s16373_s9 + $0x4c4] sm:$0xff] }
 0x522   : > { %v15830_v41 = vpop.f32.mrf.mxu1  ;;  %16037 = vmatmul.mubr.msk.bf16.gmra.mxu1 %vm347_vm1, %v9526_v30  ;;  %15986 = vmatprep.mubr.msk.bf16.mxu0 %vm347_vm1, %v9134_v24  ;;  %v13607_v30 = vld [vmem:[%s16373_s9 + $0x830] sm:$0xff]  ;;  %v13609_v42 = vld [vmem:[%s16373_s9 + $0x840] sm:$0xff] }
 0x523   : > { %v7972_v60 = vpop.f32.mrf.mxu0  ;;  %16040 = vmatprep.mubr.msk.bf16.mxu1 %vm347_vm1, %v9527_v28  ;;  %v9135_v41 = vpack.c.bf16 %v13525_v11, %v13524_v19  ;;  %v9529_v58 = vpack.c.bf16 %v13608_v15, %v13607_v30  ;;  %v13530_v15 = vld [vmem:[%s16373_s9 + $0x4cc] sm:$0xff] }
 0x524   : > { %v8344_v23 = vpop.f32.mrf.mxu1  ;;  %v10756_v35 = vpop.permute.xlu1 %10755  ;;  %v20930_v60 = vld [vmem:[#allocation38_spill] sm:$0xff] }
 0x525   : > { %v19903_v24 = vsel %vm10898_vm3, %v10887_v29, %v10756_v35  ;;  %v15777_v27 = vpop.f32.mrf.mxu0  ;;  %v10888_v28 = vsel %vm10877_vm2, %v20930_v60, %v19784_v22  ;;  %v20931_v22 = vld [vmem:[#allocation39_spill] sm:$0xff]  ;;  %v13611_v60 = vld [vmem:[%s16373_s9 + $0x850] sm:$0xff] }
 0x526   : > { %v15831_v9 = vpop.f32.mrf.mxu1  ;;  %v10758_v49 = vpop.permute.xlu0 %10757 }
 0x527   : > { %v19909_v40 = vsel %vm10898_vm3, %v10888_v28, %v10758_v49  ;;  %v7974_v23 = vpop.f32.mrf.mxu0  ;;  %v10889_v9 = vsel %vm10877_vm2, %v20931_v22, %v19764_v32  ;;  %v13610_v32 = vld [vmem:[%s16373_s9 + $0x848] sm:$0xff]  ;;  %v13612_v28 = vld [vmem:[%s16373_s9 + $0x858] sm:$0xff] }
 0x528   : > { %v8346_v29 = vpop.f32.mrf.mxu1  ;;  %v9137_v23 = vpack.c.bf16 %v13529_v31, %v13528_v13  ;;  %v9530_v22 = vpack.c.bf16 %v13610_v32, %v13609_v42  ;;  %v13532_v42 = vld [vmem:[%s16373_s9 + $0x4dc] sm:$0xff] }
 0x529   : > { %v15780_v19 = vpop.f32.mrf.mxu0  ;;  %15987 = vmatmul.mubr.msk.bf16.gmra.mxu0 %vm347_vm1, %v9135_v41  ;;  %v13613_v32 = vld [vmem:[%s16373_s9 + $0x860] sm:$0xff] }
 0x52a   : > { %v7993_v11 = vadd.f32 %v15780_v19, %v19624_v63  ;;  %v15834_v47 = vpop.f32.mrf.mxu1  ;;  %16041 = vmatmul.mubr.msk.bf16.gmra.mxu1 %vm347_vm1, %v9528_v44  ;;  %v10760_v49 = vpop.permute.xlu1 %10759  ;;  %15990 = vmatprep.mubr.msk.bf16.mxu0 %vm347_vm1, %v9136_v59  ;;  %v13531_v63 = vld [vmem:[%s16373_s9 + $0x4d4] sm:$0xff] }
 0x52b   : > { %v19922_v35 = vsel %vm10898_vm3, %v10889_v9, %v10760_v49  ;;  %v7984_v30 = vpop.f32.mrf.mxu0  ;;  %16044 = vmatprep.mubr.msk.bf16.mxu1 %vm347_vm1, %v9529_v58  ;;  %v9138_v58 = vpack.c.bf16 %v13531_v63, %v13530_v15  ;;  %v13534_v63 = vld [vmem:[%s16373_s9 + $0x4ec] sm:$0xff] }
 0x52c   : > { %v19928_v27 = vadd.f32 %v15834_v47, %v7993_v11  ;;  %v7985_v44 = vadd.f32 %v7984_v30, %v19633_v37  ;;  %v8356_v41 = vpop.f32.mrf.mxu1  ;;  %v9531_v11 = vpack.c.bf16 %v13612_v28, %v13611_v60  ;;  %v13533_v30 = vld [vmem:[%s16373_s9 + $0x4e4] sm:$0xff]  ;;  %v13615_v60 = vld [vmem:[%s16373_s9 + $0x870] sm:$0xff]  ;;  %v13616_v28 = vld [vmem:[%s16373_s9 + $0x878] sm:$0xff] }
 0x52d   : > { %v15781_v59 = vpop.f32.mrf.mxu0 }
 0x52e   : > { %v19933_v29 = vadd.f32 %v8356_v41, %v7985_v44  ;;  %v15835_v19 = vpop.f32.mrf.mxu1  ;;  %v13535_v44 = vld [vmem:[%s16373_s9 + $0x4f4] sm:$0xff] }
 0x52f   : > { %v7987_v9 = vpop.f32.mrf.mxu0  ;;  %v20932_v19 = vld [vmem:[#allocation40_spill] sm:$0xff] }
 0x530   : > { %v7988_v37 = vadd.f32 %v7987_v9, %v19640_v25  ;;  %v8359_v47 = vpop.f32.mrf.mxu1  ;;  %v13614_v25 = vld [vmem:[%s16373_s9 + $0x868] sm:$0xff] }
 0x531   : > { %v15784_v49 = vpop.f32.mrf.mxu0  ;;  %15991 = vmatmul.mubr.msk.bf16.gmra.mxu0 %vm347_vm1, %v9137_v23  ;;  %v9139_v23 = vpack.c.bf16 %v13533_v30, %v13532_v42 }
 0x532   : > { %v19937_v13 = vadd.f32 %v8359_v47, %v7988_v37  ;;  %v15838_v31 = vpop.f32.mrf.mxu1  ;;  %16045 = vmatmul.mubr.msk.bf16.gmra.mxu1 %vm347_vm1, %v9530_v22  ;;  %15994 = vmatprep.mubr.msk.bf16.mxu0 %vm347_vm1, %v9138_v58  ;;  %v10892_v22 = vsel %vm10877_vm2, %v20932_v19, %v19799_v5  ;;  %v9532_v47 = vpack.c.bf16 %v13614_v25, %v13613_v32  ;;  %v13538_v19 = vld [vmem:[%s16373_s9 + $0x50c] sm:$0xff] }
 0x533   : > { %v7999_v15 = vpop.f32.mrf.mxu0  ;;  %16048 = vmatprep.mubr.msk.bf16.mxu1 %vm347_vm1, %v9531_v11  ;;  %v9140_v11 = vpack.c.bf16 %v13535_v44, %v13534_v63  ;;  %v13536_v44 = vld [vmem:[%s16373_s9 + $0x4fc] sm:$0xff] }
 0x534   : > { %v8371_v41 = vpop.f32.mrf.mxu1  ;;  %v9533_v15 = vpack.c.bf16 %v13616_v28, %v13615_v60  ;;  %v13617_v60 = vld [vmem:[%s16373_s9 + $0x880] sm:$0xff] }
 0x535   : > { %v15785_v59 = vpop.f32.mrf.mxu0  ;;  %v13537_v41 = vld [vmem:[%s16373_s9 + $0x504] sm:$0xff] }
 0x536   : > { %v8008_v58 = vadd.f32 %v15785_v59, %v19655_v20  ;;  %v15839_v9 = vpop.f32.mrf.mxu1  ;;  %v10766_v37 = vpop.permute.xlu1 %10765  ;;  %v20933_v20 = vld [vmem:[#allocation41_spill] sm:$0xff] }
 0x537   : > { %v19955_v49 = vsel %vm10898_vm3, %v10892_v22, %v10766_v37  ;;  %v8001_v31 = vpop.f32.mrf.mxu0  ;;  %v10890_v32 = vsel %vm10877_vm2, %v20933_v20, %v19809_v61  ;;  %v13539_v61 = vld [vmem:[%s16373_s9 + $0x514] sm:$0xff]  ;;  %v20934_v22 = vld [vmem:[#allocation42_spill] sm:$0xff]  ;;  %v9141_v20 = vpack.c.bf16 %v13537_v41, %v13536_v44 }
 0x538   : > { %v19957_v42 = vadd.f32 %v15839_v9, %v8008_v58  ;;  %v8373_v30 = vpop.f32.mrf.mxu1  ;;  %v10891_v58 = vsel %vm10877_vm2, %v20934_v22, %v19780_v7  ;;  %v13620_v31 = vld [vmem:[%s16373_s9 + $0x898] sm:$0xff] }
 0x539   : > { %v15788_v5 = vpop.f32.mrf.mxu0  ;;  %15995 = vmatmul.mubr.msk.bf16.gmra.mxu0 %vm347_vm1, %v9139_v23  ;;  %v13618_v23 = vld [vmem:[%s16373_s9 + $0x888] sm:$0xff] }
 0x53a   : > { %v15842_v25 = vpop.f32.mrf.mxu1  ;;  %16049 = vmatmul.mubr.msk.bf16.gmra.mxu1 %vm347_vm1, %v9532_v47  ;;  %v10762_v63 = vpop.permute.xlu1 %10761  ;;  %15998 = vmatprep.mubr.msk.bf16.mxu0 %vm347_vm1, %v9140_v11  ;;  %v13619_v11 = vld [vmem:[%s16373_s9 + $0x890] sm:$0xff] }
 0x53b   : > { %v19969_v28 = vsel %vm10898_vm3, %v10890_v32, %v10762_v63  ;;  %v8012_v59 = vpop.f32.mrf.mxu0  ;;  %16052 = vmatprep.mubr.msk.bf16.mxu1 %vm347_vm1, %v9533_v15  ;;  %v9534_v25 = vpack.c.bf16 %v13618_v23, %v13617_v60  ;;  %v9142_v63 = vpack.c.bf16 %v13539_v61, %v13538_v19  ;;  %v9535_v22 = vpack.c.bf16 %v13620_v31, %v13619_v11  ;;  %v13540_v23 = vld [vmem:[%s16373_s9 + $0x51c] sm:$0xff]  ;;  %v13541_v19 = vld [vmem:[%s16373_s9 + $0x524] sm:$0xff]  ;;  %v13542_v11 = vld [vmem:[%s16373_s9 + $0x52c] sm:$0xff] }
 0x53c   : > { %v8013_v9 = vadd.f32 %v8012_v59, %v19669_v0  ;;  %v8384_v37 = vpop.f32.mrf.mxu1  ;;  %v10764_v47 = vpop.permute.xlu0 %10763  ;;  %v13621_v61 = vld [vmem:[%s16373_s9 + $0x8a0] sm:$0xff] }
 0x53d   : > { %v19982_v30 = vsel %vm10898_vm3, %v10891_v58, %v10764_v47  ;;  %v15789_v5 = vpop.f32.mrf.mxu0  ;;  %v20935_v58 = vld [vmem:[#allocation43_spill] sm:$0xff] }
 0x53e   : > { %v19984_v15 = vadd.f32 %v8384_v37, %v8013_v9  ;;  %v15843_v32 = vpop.f32.mrf.mxu1  ;;  %v10893_v44 = vsel %vm10877_vm2, %v20935_v58, %v19826_v14  ;;  %v13622_v14 = vld [vmem:[%s16373_s9 + $0x8a8] sm:$0xff] }
 0x53f   : > { %v8015_v7 = vpop.f32.mrf.mxu0  ;;  %v13624_v32 = vld [vmem:[%s16373_s9 + $0x8b8] sm:$0xff] }
 0x540   : > { %v8387_v0 = vpop.f32.mrf.mxu1  ;;  %v9143_v7 = vpack.c.bf16 %v13541_v19, %v13540_v23 }
 0x541   : > { %v15792_v59 = vpop.f32.mrf.mxu0  ;;  %15999 = vmatmul.mubr.msk.bf16.gmra.mxu0 %vm347_vm1, %v9141_v20  ;;  %v13623_v20 = vld [vmem:[%s16373_s9 + $0x8b0] sm:$0xff] }
 0x542   : > { %v8033_v41 = vadd.f32 %v15792_v59, %v19674_v54  ;;  %v15846_v9 = vpop.f32.mrf.mxu1  ;;  %16053 = vmatmul.mubr.msk.bf16.gmra.mxu1 %vm347_vm1, %v9534_v25  ;;  %v10768_v60 = vpop.permute.xlu1 %10767  ;;  %16002 = vmatprep.mubr.msk.bf16.mxu0 %vm347_vm1, %v9142_v63  ;;  %v13543_v54 = vld [vmem:[%s16373_s9 + $0x534] sm:$0xff]  ;;  %v9536_v59 = vpack.c.bf16 %v13622_v14, %v13621_v61 }
 0x543   : > { %v19997_v37 = vsel %vm10898_vm3, %v10893_v44, %v10768_v60  ;;  %v8025_v47 = vpop.f32.mrf.mxu0  ;;  %16056 = vmatprep.mubr.msk.bf16.mxu1 %vm347_vm1, %v9535_v22  ;;  %v9144_v58 = vpack.c.bf16 %v13543_v54, %v13542_v11  ;;  %v9537_v22 = vpack.c.bf16 %v13624_v32, %v13623_v20  ;;  %v20936_v60 = vld [vmem:[#allocation44_spill] sm:$0xff]  ;;  %v13545_v11 = vld [vmem:[%s16373_s9 + $0x544] sm:$0xff] }
 0x544   : > { %v20003_v31 = vadd.f32 %v15846_v9, %v8033_v41  ;;  %v8397_v5 = vpop.f32.mrf.mxu1  ;;  %v10894_v41 = vsel %vm10877_vm2, %v20936_v60, %v19787_v48  ;;  %v13625_v54 = vld [vmem:[%s16373_s9 + $0x8c0] sm:$0xff]  ;;  %v13626_v20 = vld [vmem:[%s16373_s9 + $0x8c8] sm:$0xff] }
 0x545   : > { %v15793_v25 = vpop.f32.mrf.mxu0  ;;  %v13546_v32 = vld [vmem:[%s16373_s9 + $0x54c] sm:$0xff] }
 0x546   : > { %v8036_v63 = vadd.f32 %v15793_v25, %v19687_v52  ;;  %v15847_v0 = vpop.f32.mrf.mxu1  ;;  %v13547_v25 = vld [vmem:[%s16373_s9 + $0x554] sm:$0xff] }
 0x547   : > { %v8027_v44 = vpop.f32.mrf.mxu0 }
 0x548   : > { %v20011_v9 = vadd.f32 %v15847_v0, %v8036_v63  ;;  %v8028_v47 = vadd.f32 %v8027_v44, %v19689_v16  ;;  %v8399_v23 = vpop.f32.mrf.mxu1  ;;  %v10770_v52 = vpop.permute.xlu0 %10769  ;;  %v13544_v16 = vld [vmem:[%s16373_s9 + $0x53c] sm:$0xff]  ;;  %v13627_v0 = vld [vmem:[%s16373_s9 + $0x8d0] sm:$0xff] }
 0x549   : > { %v20015_v19 = vsel %vm10898_vm3, %v10894_v41, %v10770_v52  ;;  %v15796_v61 = vpop.f32.mrf.mxu0  ;;  %16003 = vmatmul.mubr.msk.bf16.gmra.mxu0 %vm347_vm1, %v9143_v7  ;;  %v13628_v44 = vld [vmem:[%s16373_s9 + $0x8d8] sm:$0xff]  ;;  %v9145_v60 = vpack.c.bf16 %v13545_v11, %v13544_v16  ;;  %v9538_v41 = vpack.c.bf16 %v13626_v20, %v13625_v54  ;;  %v13549_v54 = vld [vmem:[%s16373_s9 + $0x564] sm:$0xff] }
 0x54a   : > { %v20018_v14 = vadd.f32 %v8399_v23, %v8028_v47  ;;  %v15850_v48 = vpop.f32.mrf.mxu1  ;;  %16057 = vmatmul.mubr.msk.bf16.gmra.mxu1 %vm347_vm1, %v9536_v59  ;;  %16006 = vmatprep.mubr.msk.bf16.mxu0 %vm347_vm1, %v9144_v58  ;;  %v9146_v58 = vpack.c.bf16 %v13547_v25, %v13546_v32  ;;  %v9539_v23 = vpack.c.bf16 %v13628_v44, %v13627_v0  ;;  %v20937_v61 = vld [vmem:[#allocation46_spill] sm:$0xff] }
 0x54b   : > { %v8040_v5 = vpop.f32.mrf.mxu0  ;;  %16060 = vmatprep.mubr.msk.bf16.mxu1 %vm347_vm1, %v9537_v22  ;;  %v10897_v48 = vsel %vm10877_vm2, %v20937_v61, %v19805_v12  ;;  %v13548_v11 = vld [vmem:[%s16373_s9 + $0x55c] sm:$0xff]  ;;  %v13661_v12 = vld [vmem:[%s16373_s9 + $0x76a] sm:$0xff] }
 0x54c   : > { %v8412_v63 = vpop.f32.mrf.mxu1  ;;  %v13629_v20 = vld [vmem:[%s16373_s9 + $0x8e0] sm:$0xff] }
 0x54d   : > { %v15797_v7 = vpop.f32.mrf.mxu0  ;;  %v13630_v63 = vld [vmem:[%s16373_s9 + $0x8e8] sm:$0xff] }
 0x54e   : > { %v15851_v59 = vpop.f32.mrf.mxu1  ;;  %v13660_v0 = vld [vmem:[%s16373_s9 + $0x762] sm:$0xff] }
 0x54f   : > { %v8042_v47 = vpop.f32.mrf.mxu0  ;;  %v13742_v59 = vld [vmem:[%s16373_s9 + $0x77c] sm:$0xff]  ;;  %v9907_v61 = vpack.c.bf16 %v13661_v12, %v13660_v0  ;;  %v13743_v0 = vld [vmem:[%s16373_s9 + $0x784] sm:$0xff]  ;;  %v13744_v12 = vld [vmem:[%s16373_s9 + $0x78c] sm:$0xff] }
 0x550   : > { %v8414_v52 = vpop.f32.mrf.mxu1  ;;  %v9147_v47 = vpack.c.bf16 %v13549_v54, %v13548_v11 }
 0x551   : > { %v15856_v22 = vpop.f32.mrf.mxu0  ;;  %16007 = vmatmul.mubr.msk.bf16.gmra.mxu0 %vm347_vm1, %v9145_v60  ;;  %v13741_v60 = vld [vmem:[%s16373_s9 + $0x774] sm:$0xff] }
 0x552   : > { %v15910_v5 = vpop.f32.mrf.mxu1  ;;  %16061 = vmatmul.mubr.msk.bf16.gmra.mxu1 %vm347_vm1, %v9538_v41  ;;  %v10776_v16 = vpop.permute.xlu0 %10775  ;;  %16010 = vmatprep.mubr.msk.bf16.mxu0 %vm347_vm1, %v9146_v58  ;;  %v9540_v22 = vpack.c.bf16 %v13630_v63, %v13629_v20  ;;  %v13662_v20 = vld [vmem:[%s16373_s9 + $0x772] sm:$0xff]  ;;  %v13663_v63 = vld [vmem:[%s16373_s9 + $0x77a] sm:$0xff] }
 0x553   : > { %v20041_v32 = vsel %vm10898_vm3, %v10897_v48, %v10776_v16  ;;  %v8639_v25 = vpop.f32.mrf.mxu0  ;;  %16064 = vmatprep.mubr.msk.bf16.mxu1 %vm347_vm1, %v9539_v23  ;;  %v10299_v23 = vpack.c.bf16 %v13742_v59, %v13741_v60 }
 0x554   : > { %v8814_v44 = vadd.f32 %v8639_v25, %v19725_v10  ;;  %v8873_v7 = vpop.f32.mrf.mxu1 }
 0x555   : > { %v15857_v41 = vpop.f32.mrf.mxu0 }
 0x556   : > { %v20050_v58 = vadd.f32 %v8873_v7, %v8814_v44  ;;  %v15911_v52 = vpop.f32.mrf.mxu1  ;;  %v13664_v44 = vld [vmem:[%s16373_s9 + $0x782] sm:$0xff]  ;;  %v13665_v7 = vld [vmem:[%s16373_s9 + $0x78a] sm:$0xff]  ;;  %v13745_v41 = vld [vmem:[%s16373_s9 + $0x794] sm:$0xff] }
 0x557   : > { %v8642_v48 = vpop.f32.mrf.mxu0  ;;  %v9908_v52 = vpack.c.bf16 %v13663_v63, %v13662_v20  ;;  %v13667_v63 = vld [vmem:[%s16373_s9 + $0x79a] sm:$0xff] }
 0x558   : > { %v8815_v5 = vadd.f32 %v8642_v48, %v19733_v34  ;;  %v8876_v10 = vpop.f32.mrf.mxu1  ;;  %v10300_v48 = vpack.c.bf16 %v13744_v12, %v13743_v0  ;;  %v13747_v0 = vld [vmem:[%s16373_s9 + $0x7a4] sm:$0xff]  ;;  %v13748_v12 = vld [vmem:[%s16373_s9 + $0x7ac] sm:$0xff] }
 0x559   : > { %v15860_v16 = vpop.f32.mrf.mxu0  ;;  %16011 = vmatmul.mubr.msk.bf16.gmra.mxu0 %vm347_vm1, %v9147_v47  ;;  %v13746_v47 = vld [vmem:[%s16373_s9 + $0x79c] sm:$0xff] }
 0x55a   : > { %v20054_v11 = vadd.f32 %v8876_v10, %v8815_v5  ;;  %v8816_v54 = vadd.f32 %v15860_v16, %v19746_v45  ;;  %v15914_v25 = vpop.f32.mrf.mxu1  ;;  %16065 = vmatmul.mubr.msk.bf16.gmra.mxu1 %vm347_vm1, %v9540_v22  ;;  %16070 = vmatprep.mubr.msk.bf16.mxu0 %vm347_vm1, %v9907_v61  ;;  %v9909_v5 = vpack.c.bf16 %v13665_v7, %v13664_v44  ;;  %v13668_v44 = vld [vmem:[%s16373_s9 + $0x7a2] sm:$0xff]  ;;  %v13669_v7 = vld [vmem:[%s16373_s9 + $0x7aa] sm:$0xff] }
 0x55b   : > { %v8653_v34 = vpop.f32.mrf.mxu0  ;;  %16124 = vmatprep.mubr.msk.bf16.mxu1 %vm347_vm1, %v10299_v23  ;;  %v10301_v10 = vpack.c.bf16 %v13746_v47, %v13745_v41  ;;  %v13749_v47 = vld [vmem:[%s16373_s9 + $0x7b4] sm:$0xff] }
 0x55c   : > { %v20066_v60 = vadd.f32 %v15914_v25, %v8816_v54  ;;  %v8887_v59 = vpop.f32.mrf.mxu1 }
 0x55d   : > { %v15861_v45 = vpop.f32.mrf.mxu0 }
 0x55e   : > { %v8817_v22 = vadd.f32 %v15861_v45, %v19759_v2  ;;  %v15915_v61 = vpop.f32.mrf.mxu1  ;;  %v13666_v2 = vld [vmem:[%s16373_s9 + $0x792] sm:$0xff]  ;;  %v13750_v45 = vld [vmem:[%s16373_s9 + $0x7bc] sm:$0xff] }
 0x55f   : > { %v8655_v23 = vpop.f32.mrf.mxu0 }
 0x560   : > { %v20071_v16 = vadd.f32 %v15915_v61, %v8817_v22  ;;  %v8889_v54 = vpop.f32.mrf.mxu1  ;;  %v9910_v22 = vpack.c.bf16 %v13667_v63, %v13666_v2  ;;  %v9911_v23 = vpack.c.bf16 %v13669_v7, %v13668_v44  ;;  %v13670_v63 = vld [vmem:[%s16373_s9 + $0x7b2] sm:$0xff]  ;;  %v13672_v7 = vld [vmem:[%s16373_s9 + $0x7c2] sm:$0xff] }
 0x561   : > { %v15864_v25 = vpop.f32.mrf.mxu0  ;;  %16071 = vmatmul.mubr.msk.bf16.vlgmr.msra.gmra.mxu0 %vm347_vm1, %v9908_v52  ;;  %v10303_v54 = vpack.c.bf16 %v13750_v45, %v13749_v47  ;;  %v13752_v44 = vld [vmem:[%s16373_s9 + $0x7cc] sm:$0xff]  ;;  %v13753_v45 = vld [vmem:[%s16373_s9 + $0x7d4] sm:$0xff] }
 0x562   : > { %v15918_v20 = vpop.f32.mrf.mxu1  ;;  %16125 = vmatmul.mubr.msk.bf16.vlgmr.msra.gmra.mxu1 %vm347_vm1, %v10300_v48  ;;  %16074 = vmatprep.mubr.msk.bf16.mxu0 %vm347_vm1, %v9909_v5  ;;  %v10302_v5 = vpack.c.bf16 %v13748_v12, %v13747_v0  ;;  %v13671_v0 = vld [vmem:[%s16373_s9 + $0x7ba] sm:$0xff] }
 0x563   : > { %v8667_v34 = vpop.f32.mrf.mxu0  ;;  %16128 = vmatprep.mubr.msk.bf16.mxu1 %vm347_vm1, %v10301_v10 }
 0x564   : > { %v8818_v59 = vadd.f32 %v8667_v34, %v19782_v46  ;;  %v8901_v41 = vpop.f32.mrf.mxu1  ;;  %v13751_v34 = vld [vmem:[%s16373_s9 + $0x7c4] sm:$0xff] }
 0x565   : > { %v15865_v52 = vpop.f32.mrf.mxu0 }
 0x566   : > { %v20086_v61 = vadd.f32 %v8901_v41, %v8818_v59  ;;  %v15919_v48 = vpop.f32.mrf.mxu1  ;;  %v13673_v59 = vld [vmem:[%s16373_s9 + $0x7ca] sm:$0xff]  ;;  %v13754_v52 = vld [vmem:[%s16373_s9 + $0x7dc] sm:$0xff] }
 0x567   : > { %v8670_v10 = vpop.f32.mrf.mxu0 }
 0x568   : > { %v8904_v25 = vpop.f32.mrf.mxu1 }
 0x569   : > { %v15868_v46 = vpop.f32.mrf.mxu0  ;;  %16075 = vmatmul.mubr.msk.bf16.gmra.mxu0 %vm347_vm1, %v9910_v22  ;;  %v9912_v22 = vpack.c.bf16 %v13671_v0, %v13670_v63  ;;  %v13674_v0 = vld [vmem:[%s16373_s9 + $0x7d2] sm:$0xff] }
 0x56a   : > { %v8820_v20 = vadd.f32 %v15868_v46, %v19801_v39  ;;  %v15922_v2 = vpop.f32.mrf.mxu1  ;;  %16129 = vmatmul.mubr.msk.bf16.gmra.mxu1 %vm347_vm1, %v10302_v5  ;;  %16078 = vmatprep.mubr.msk.bf16.mxu0 %vm347_vm1, %v9911_v23  ;;  %v10304_v5 = vpack.c.bf16 %v13752_v44, %v13751_v34  ;;  %v9913_v23 = vpack.c.bf16 %v13673_v59, %v13672_v7  ;;  %v13675_v34 = vld [vmem:[%s16373_s9 + $0x7da] sm:$0xff]  ;;  %v13676_v7 = vld [vmem:[%s16373_s9 + $0x7e2] sm:$0xff]  ;;  %v13677_v59 = vld [vmem:[%s16373_s9 + $0x7ea] sm:$0xff] }
 0x56b   : > { %v8680_v12 = vpop.f32.mrf.mxu0  ;;  %16132 = vmatprep.mubr.msk.bf16.mxu1 %vm347_vm1, %v10303_v54  ;;  %v10305_v54 = vpack.c.bf16 %v13754_v52, %v13753_v45  ;;  %v13757_v45 = vld [vmem:[%s16373_s9 + $0x7f4] sm:$0xff]  ;;  %v13758_v52 = vld [vmem:[%s16373_s9 + $0x7fc] sm:$0xff] }
 0x56c   : > { %v20099_v41 = vadd.f32 %v15922_v2, %v8820_v20  ;;  %v8914_v47 = vpop.f32.mrf.mxu1  ;;  %v13755_v12 = vld [vmem:[%s16373_s9 + $0x7e4] sm:$0xff] }
 0x56d   : > { %v15869_v39 = vpop.f32.mrf.mxu0 }
 0x56e   : > { %v15923_v48 = vpop.f32.mrf.mxu1 }
 0x56f   : > { %v8682_v10 = vpop.f32.mrf.mxu0 }
 0x570   : > { %v8819_v25 = vadd.f32 %v8682_v10, %v19811_v55  ;;  %v8916_v46 = vpop.f32.mrf.mxu1  ;;  %v13756_v55 = vld [vmem:[%s16373_s9 + $0x7ec] sm:$0xff]  ;;  %v9915_v10 = vpack.c.bf16 %v13677_v59, %v13676_v7  ;;  %v13680_v7 = vld [vmem:[%s16373_s9 + $0x802] sm:$0xff] }
 0x571   : > { %v15872_v20 = vpop.f32.mrf.mxu0  ;;  %16079 = vmatmul.mubr.msk.bf16.gmra.mxu0 %vm347_vm1, %v9912_v22  ;;  %v9914_v22 = vpack.c.bf16 %v13675_v34, %v13674_v0  ;;  %v13679_v34 = vld [vmem:[%s16373_s9 + $0x7fa] sm:$0xff]  ;;  %v13681_v59 = vld [vmem:[%s16373_s9 + $0x80a] sm:$0xff] }
 0x572   : > { %v20105_v2 = vadd.f32 %v8916_v46, %v8819_v25  ;;  %v15926_v63 = vpop.f32.mrf.mxu1  ;;  %16133 = vmatmul.mubr.msk.bf16.gmra.mxu1 %vm347_vm1, %v10304_v5  ;;  %16082 = vmatprep.mubr.msk.bf16.mxu0 %vm347_vm1, %v9913_v23  ;;  %v10306_v23 = vpack.c.bf16 %v13756_v55, %v13755_v12  ;;  %v13759_v12 = vld [vmem:[%s16373_s9 + $0x804] sm:$0xff]  ;;  %v13760_v55 = vld [vmem:[%s16373_s9 + $0x80c] sm:$0xff] }
 0x573   : > { %v8694_v44 = vpop.f32.mrf.mxu0  ;;  %16136 = vmatprep.mubr.msk.bf16.mxu1 %vm347_vm1, %v10305_v54  ;;  %v10307_v54 = vpack.c.bf16 %v13758_v52, %v13757_v45  ;;  %v13761_v52 = vld [vmem:[%s16373_s9 + $0x814] sm:$0xff] }
 0x574   : > { %v8928_v47 = vpop.f32.mrf.mxu1 }
 0x575   : > { %v15873_v39 = vpop.f32.mrf.mxu0 }
 0x576   : > { %v8821_v48 = vadd.f32 %v15873_v39, %v19831_v50  ;;  %v15927_v5 = vpop.f32.mrf.mxu1  ;;  %v13678_v50 = vld [vmem:[%s16373_s9 + $0x7f2] sm:$0xff]  ;;  %v13762_v39 = vld [vmem:[%s16373_s9 + $0x81c] sm:$0xff] }
 0x577   : > { %v8696_v25 = vpop.f32.mrf.mxu0 }
 0x578   : > { %v20119_v46 = vadd.f32 %v15927_v5, %v8821_v48  ;;  %v8930_v20 = vpop.f32.mrf.mxu1  ;;  %v9916_v48 = vpack.c.bf16 %v13679_v34, %v13678_v50  ;;  %v9917_v25 = vpack.c.bf16 %v13681_v59, %v13680_v7  ;;  %v13763_v7 = vld [vmem:[%s16373_s9 + $0x824] sm:$0xff]  ;;  %v13764_v59 = vld [vmem:[%s16373_s9 + $0x82c] sm:$0xff] }
 0x579   : > { %v15876_v63 = vpop.f32.mrf.mxu0  ;;  %16083 = vmatmul.mubr.msk.bf16.gmra.mxu0 %vm347_vm1, %v9914_v22 }
 0x57a   : > { %v15930_v0 = vpop.f32.mrf.mxu1  ;;  %16137 = vmatmul.mubr.msk.bf16.gmra.mxu1 %vm347_vm1, %v10306_v23  ;;  %16086 = vmatprep.mubr.msk.bf16.mxu0 %vm347_vm1, %v9915_v10  ;;  %v10308_v10 = vpack.c.bf16 %v13760_v55, %v13759_v12  ;;  %v13682_v12 = vld [vmem:[%s16373_s9 + $0x812] sm:$0xff]  ;;  %v13683_v55 = vld [vmem:[%s16373_s9 + $0x81a] sm:$0xff] }
 0x57b   : > { %v8707_v44 = vpop.f32.mrf.mxu0  ;;  %16140 = vmatprep.mubr.msk.bf16.mxu1 %vm347_vm1, %v10307_v54  ;;  %v10309_v54 = vpack.c.bf16 %v13762_v39, %v13761_v52 }
 0x57c   : > { %v8822_v47 = vadd.f32 %v8707_v44, %v19852_v1  ;;  %v8941_v45 = vpop.f32.mrf.mxu1 }
 0x57d   : > { %v15877_v22 = vpop.f32.mrf.mxu0 }
 0x57e   : > { %v20134_v5 = vadd.f32 %v8941_v45, %v8822_v47  ;;  %v15931_v23 = vpop.f32.mrf.mxu1  ;;  %v13684_v47 = vld [vmem:[%s16373_s9 + $0x822] sm:$0xff]  ;;  %v13685_v45 = vld [vmem:[%s16373_s9 + $0x82a] sm:$0xff]  ;;  %v13765_v22 = vld [vmem:[%s16373_s9 + $0x834] sm:$0xff] }
 0x57f   : > { %v8710_v20 = vpop.f32.mrf.mxu0  ;;  %v9918_v23 = vpack.c.bf16 %v13683_v55, %v13682_v12  ;;  %v13687_v55 = vld [vmem:[%s16373_s9 + $0x83a] sm:$0xff] }
 0x580   : > { %v8823_v63 = vadd.f32 %v8710_v20, %v19860_v51  ;;  %v8944_v1 = vpop.f32.mrf.mxu1  ;;  %v10310_v20 = vpack.c.bf16 %v13764_v59, %v13763_v7  ;;  %v13767_v7 = vld [vmem:[%s16373_s9 + $0x844] sm:$0xff]  ;;  %v13768_v59 = vld [vmem:[%s16373_s9 + $0x84c] sm:$0xff] }
 0x581   : > { %v15880_v0 = vpop.f32.mrf.mxu0  ;;  %16087 = vmatmul.mubr.msk.bf16.gmra.mxu0 %vm347_vm1, %v9916_v48  ;;  %v13766_v48 = vld [vmem:[%s16373_s9 + $0x83c] sm:$0xff] }
 0x582   : > { %v20138_v50 = vadd.f32 %v8944_v1, %v8823_v63  ;;  %v8824_v34 = vadd.f32 %v15880_v0, %v19874_v3  ;;  %v15934_v44 = vpop.f32.mrf.mxu1  ;;  %16141 = vmatmul.mubr.msk.bf16.gmra.mxu1 %vm347_vm1, %v10308_v10  ;;  %16090 = vmatprep.mubr.msk.bf16.mxu0 %vm347_vm1, %v9917_v25  ;;  %v9919_v63 = vpack.c.bf16 %v13685_v45, %v13684_v47  ;;  %v13688_v47 = vld [vmem:[%s16373_s9 + $0x842] sm:$0xff]  ;;  %v13689_v45 = vld [vmem:[%s16373_s9 + $0x84a] sm:$0xff] }
 0x583   : > { %v8721_v51 = vpop.f32.mrf.mxu0  ;;  %16144 = vmatprep.mubr.msk.bf16.mxu1 %vm347_vm1, %v10309_v54  ;;  %v10311_v1 = vpack.c.bf16 %v13766_v48, %v13765_v22  ;;  %v13769_v22 = vld [vmem:[%s16373_s9 + $0x854] sm:$0xff]  ;;  %v13770_v48 = vld [vmem:[%s16373_s9 + $0x85c] sm:$0xff] }
 0x584   : > { %v20150_v52 = vadd.f32 %v15934_v44, %v8824_v34  ;;  %v8955_v39 = vpop.f32.mrf.mxu1 }
 0x585   : > { %v15881_v3 = vpop.f32.mrf.mxu0 }
 0x586   : > { %v8825_v10 = vadd.f32 %v15881_v3, %v19883_v53  ;;  %v15935_v25 = vpop.f32.mrf.mxu1  ;;  %v13686_v53 = vld [vmem:[%s16373_s9 + $0x832] sm:$0xff] }
 0x587   : > { %v8723_v54 = vpop.f32.mrf.mxu0 }
 0x588   : > { %v20155_v0 = vadd.f32 %v15935_v25, %v8825_v10  ;;  %v8957_v34 = vpop.f32.mrf.mxu1  ;;  %v10312_v25 = vpack.c.bf16 %v13768_v59, %v13767_v7  ;;  %v10313_v54 = vpack.c.bf16 %v13770_v48, %v13769_v22  ;;  %v13771_v7 = vld [vmem:[%s16373_s9 + $0x864] sm:$0xff]  ;;  %v13772_v59 = vld [vmem:[%s16373_s9 + $0x86c] sm:$0xff]  ;;  %v13773_v48 = vld [vmem:[%s16373_s9 + $0x874] sm:$0xff] }
 0x589   : > { %v15884_v44 = vpop.f32.mrf.mxu0  ;;  %16091 = vmatmul.mubr.msk.bf16.gmra.mxu0 %vm347_vm1, %v9918_v23  ;;  %v9920_v23 = vpack.c.bf16 %v13687_v55, %v13686_v53  ;;  %v13690_v53 = vld [vmem:[%s16373_s9 + $0x852] sm:$0xff]  ;;  %v13691_v55 = vld [vmem:[%s16373_s9 + $0x85a] sm:$0xff] }
 0x58a   : > { %v15938_v12 = vpop.f32.mrf.mxu1  ;;  %16145 = vmatmul.mubr.msk.bf16.gmra.mxu1 %vm347_vm1, %v10310_v20  ;;  %16094 = vmatprep.mubr.msk.bf16.mxu0 %vm347_vm1, %v9919_v63  ;;  %v9921_v20 = vpack.c.bf16 %v13689_v45, %v13688_v47  ;;  %v13692_v47 = vld [vmem:[%s16373_s9 + $0x862] sm:$0xff]  ;;  %v13693_v45 = vld [vmem:[%s16373_s9 + $0x86a] sm:$0xff] }
 0x58b   : > { %v8735_v51 = vpop.f32.mrf.mxu0  ;;  %16148 = vmatprep.mubr.msk.bf16.mxu1 %vm347_vm1, %v10311_v1 }
 0x58c   : > { %v8969_v39 = vpop.f32.mrf.mxu1 }
 0x58d   : > { %v15885_v3 = vpop.f32.mrf.mxu0 }
 0x58e   : > { %v15939_v10 = vpop.f32.mrf.mxu1  ;;  %v13774_v3 = vld [vmem:[%s16373_s9 + $0x87c] sm:$0xff] }
 0x58f   : > { %v8737_v63 = vpop.f32.mrf.mxu0  ;;  %v9922_v10 = vpack.c.bf16 %v13691_v55, %v13690_v53 }
 0x590   : > { %v8971_v1 = vpop.f32.mrf.mxu1  ;;  %v10314_v63 = vpack.c.bf16 %v13772_v59, %v13771_v7  ;;  %v13694_v7 = vld [vmem:[%s16373_s9 + $0x872] sm:$0xff]  ;;  %v13775_v59 = vld [vmem:[%s16373_s9 + $0x884] sm:$0xff] }
 0x591   : > { %v15888_v34 = vpop.f32.mrf.mxu0  ;;  %16095 = vmatmul.mubr.msk.bf16.gmra.mxu0 %vm347_vm1, %v9920_v23 }
 0x592   : > { %v8828_v44 = vadd.f32 %v15888_v34, %v19928_v27  ;;  %v15942_v12 = vpop.f32.mrf.mxu1  ;;  %16149 = vmatmul.mubr.msk.bf16.gmra.mxu1 %vm347_vm1, %v10312_v25  ;;  %16098 = vmatprep.mubr.msk.bf16.mxu0 %vm347_vm1, %v9921_v20  ;;  %v10315_v34 = vpack.c.bf16 %v13774_v3, %v13773_v48  ;;  %v13777_v48 = vld [vmem:[%s16373_s9 + $0x894] sm:$0xff]  ;;  %v13778_v3 = vld [vmem:[%s16373_s9 + $0x89c] sm:$0xff] }
 0x593   : > { %v8747_v51 = vpop.f32.mrf.mxu0  ;;  %16152 = vmatprep.mubr.msk.bf16.mxu1 %vm347_vm1, %v10313_v54  ;;  %v9923_v54 = vpack.c.bf16 %v13693_v45, %v13692_v47  ;;  %v13696_v45 = vld [vmem:[%s16373_s9 + $0x882] sm:$0xff] }
 0x594   : > { %v20180_v39 = vadd.f32 %v15942_v12, %v8828_v44  ;;  %v8826_v22 = vadd.f32 %v8747_v51, %v19933_v29  ;;  %v8981_v27 = vpop.f32.mrf.mxu1  ;;  %v13695_v51 = vld [vmem:[%s16373_s9 + $0x87a] sm:$0xff] }
 0x595   : > { %v15889_v23 = vpop.f32.mrf.mxu0 }
 0x596   : > { %v20185_v25 = vadd.f32 %v8981_v27, %v8826_v22  ;;  %v15943_v20 = vpop.f32.mrf.mxu1  ;;  %v13697_v22 = vld [vmem:[%s16373_s9 + $0x88a] sm:$0xff] }
 0x597   : > { %v8750_v1 = vpop.f32.mrf.mxu0 }
 0x598   : > { %v8827_v29 = vadd.f32 %v8750_v1, %v19937_v13  ;;  %v8984_v44 = vpop.f32.mrf.mxu1  ;;  %v13776_v13 = vld [vmem:[%s16373_s9 + $0x88c] sm:$0xff]  ;;  %v9925_v1 = vpack.c.bf16 %v13697_v22, %v13696_v45  ;;  %v13700_v45 = vld [vmem:[%s16373_s9 + $0x8a2] sm:$0xff] }
 0x599   : > { %v15892_v12 = vpop.f32.mrf.mxu0  ;;  %16099 = vmatmul.mubr.msk.bf16.gmra.mxu0 %vm347_vm1, %v9922_v10  ;;  %v9924_v10 = vpack.c.bf16 %v13695_v51, %v13694_v7  ;;  %v13699_v51 = vld [vmem:[%s16373_s9 + $0x89a] sm:$0xff]  ;;  %v13701_v22 = vld [vmem:[%s16373_s9 + $0x8aa] sm:$0xff] }
 0x59a   : > { %v20189_v53 = vadd.f32 %v8984_v44, %v8827_v29  ;;  %v15946_v55 = vpop.f32.mrf.mxu1  ;;  %16153 = vmatmul.mubr.msk.bf16.gmra.mxu1 %vm347_vm1, %v10314_v63  ;;  %16102 = vmatprep.mubr.msk.bf16.mxu0 %vm347_vm1, %v9923_v54  ;;  %v10316_v54 = vpack.c.bf16 %v13776_v13, %v13775_v59  ;;  %v13779_v59 = vld [vmem:[%s16373_s9 + $0x8a4] sm:$0xff]  ;;  %v13780_v13 = vld [vmem:[%s16373_s9 + $0x8ac] sm:$0xff] }
 0x59b   : > { %v8762_v47 = vpop.f32.mrf.mxu0  ;;  %16156 = vmatprep.mubr.msk.bf16.mxu1 %vm347_vm1, %v10315_v34  ;;  %v10317_v34 = vpack.c.bf16 %v13778_v3, %v13777_v48  ;;  %v13781_v3 = vld [vmem:[%s16373_s9 + $0x8b4] sm:$0xff] }
 0x59c   : > { %v8996_v27 = vpop.f32.mrf.mxu1 }
 0x59d   : > { %v15893_v23 = vpop.f32.mrf.mxu0 }
 0x59e   : > { %v8829_v20 = vadd.f32 %v15893_v23, %v19957_v42  ;;  %v15947_v63 = vpop.f32.mrf.mxu1  ;;  %v13698_v42 = vld [vmem:[%s16373_s9 + $0x892] sm:$0xff]  ;;  %v13782_v23 = vld [vmem:[%s16373_s9 + $0x8bc] sm:$0xff] }
 0x59f   : > { %v8764_v29 = vpop.f32.mrf.mxu0 }
 0x5a0   : > { %v20203_v44 = vadd.f32 %v15947_v63, %v8829_v20  ;;  %v8998_v12 = vpop.f32.mrf.mxu1  ;;  %v9926_v20 = vpack.c.bf16 %v13699_v51, %v13698_v42  ;;  %v9927_v29 = vpack.c.bf16 %v13701_v22, %v13700_v45  ;;  %v13702_v51 = vld [vmem:[%s16373_s9 + $0x8b2] sm:$0xff]  ;;  %v13704_v22 = vld [vmem:[%s16373_s9 + $0x8c2] sm:$0xff] }
 0x5a1   : > { %v15896_v55 = vpop.f32.mrf.mxu0  ;;  %16103 = vmatmul.mubr.msk.bf16.gmra.mxu0 %vm347_vm1, %v9924_v10  ;;  %v10319_v12 = vpack.c.bf16 %v13782_v23, %v13781_v3  ;;  %v13784_v45 = vld [vmem:[%s16373_s9 + $0x8cc] sm:$0xff]  ;;  %v13785_v23 = vld [vmem:[%s16373_s9 + $0x8d4] sm:$0xff] }
 0x5a2   : > { %v15950_v7 = vpop.f32.mrf.mxu1  ;;  %16157 = vmatmul.mubr.msk.bf16.gmra.mxu1 %vm347_vm1, %v10316_v54  ;;  %16106 = vmatprep.mubr.msk.bf16.mxu0 %vm347_vm1, %v9925_v1  ;;  %v10318_v1 = vpack.c.bf16 %v13780_v13, %v13779_v59  ;;  %v13703_v59 = vld [vmem:[%s16373_s9 + $0x8ba] sm:$0xff] }
 0x5a3   : > { %v8775_v47 = vpop.f32.mrf.mxu0  ;;  %16160 = vmatprep.mubr.msk.bf16.mxu1 %vm347_vm1, %v10317_v34 }
 0x5a4   : > { %v8830_v27 = vadd.f32 %v8775_v47, %v19984_v15  ;;  %v9009_v48 = vpop.f32.mrf.mxu1  ;;  %v13783_v47 = vld [vmem:[%s16373_s9 + $0x8c4] sm:$0xff] }
 0x5a5   : > { %v15897_v10 = vpop.f32.mrf.mxu0 }
 0x5a6   : > { %v20218_v63 = vadd.f32 %v9009_v48, %v8830_v27  ;;  %v15951_v54 = vpop.f32.mrf.mxu1  ;;  %v13705_v27 = vld [vmem:[%s16373_s9 + $0x8ca] sm:$0xff]  ;;  %v13786_v10 = vld [vmem:[%s16373_s9 + $0x8dc] sm:$0xff] }
 0x5a7   : > { %v8778_v34 = vpop.f32.mrf.mxu0 }
 0x5a8   : > { %v9012_v55 = vpop.f32.mrf.mxu1  ;;  %v9929_v34 = vpack.c.bf16 %v13705_v27, %v13704_v22  ;;  %v13787_v22 = vld [vmem:[%s16373_s9 + $0x8e4] sm:$0xff]  ;;  %v13788_v27 = vld [vmem:[%s16373_s9 + $0x8ec] sm:$0xff] }
 0x5a9   : > { %v15900_v15 = vpop.f32.mrf.mxu0  ;;  %16107 = vmatmul.mubr.msk.bf16.gmra.mxu0 %vm347_vm1, %v9926_v20  ;;  %v9928_v20 = vpack.c.bf16 %v13703_v59, %v13702_v51 }
 0x5aa   : > { %v8832_v7 = vadd.f32 %v15900_v15, %v20003_v31  ;;  %v15954_v42 = vpop.f32.mrf.mxu1  ;;  %16161 = vmatmul.mubr.msk.bf16.gmra.mxu1 %vm347_vm1, %v10318_v1  ;;  %16110 = vmatprep.mubr.msk.bf16.mxu0 %vm347_vm1, %v9927_v29  ;;  %v10320_v29 = vpack.c.bf16 %v13784_v45, %v13783_v47  ;;  %v13707_v47 = vld [vmem:[%s16373_s9 + $0x8da] sm:$0xff] }
 0x5ab   : > { %v8788_v13 = vpop.f32.mrf.mxu0  ;;  %16164 = vmatprep.mubr.msk.bf16.mxu1 %vm347_vm1, %v10319_v12  ;;  %v10321_v12 = vpack.c.bf16 %v13786_v10, %v13785_v23 }
 0x5ac   : > { %v20231_v48 = vadd.f32 %v15954_v42, %v8832_v7  ;;  %v9022_v3 = vpop.f32.mrf.mxu1 }
 0x5ad   : > { %v15901_v31 = vpop.f32.mrf.mxu0 }
 0x5ae   : > { %v8833_v54 = vadd.f32 %v15901_v31, %v20011_v9  ;;  %v15955_v1 = vpop.f32.mrf.mxu1  ;;  %v13706_v9 = vld [vmem:[%s16373_s9 + $0x8d2] sm:$0xff]  ;;  %v10322_v31 = vpack.c.bf16 %v13788_v27, %v13787_v22 }
 0x5af   : > { %v8790_v55 = vpop.f32.mrf.mxu0  ;;  %v9930_v23 = vpack.c.bf16 %v13707_v47, %v13706_v9 }
 0x5b0   : > { %v20236_v15 = vadd.f32 %v15955_v1, %v8833_v54  ;;  %v8831_v7 = vadd.f32 %v8790_v55, %v20018_v14  ;;  %v9024_v42 = vpop.f32.mrf.mxu1 }
 0x5b1   : > { %v15904_v13 = vpop.f32.mrf.mxu0  ;;  %16111 = vmatmul.mubr.msk.bf16.gmra.mxu0 %vm347_vm1, %v9928_v20 }
 0x5b2   : > { %v20240_v51 = vadd.f32 %v9024_v42, %v8831_v7  ;;  %v15958_v59 = vpop.f32.mrf.mxu1  ;;  %16165 = vmatmul.mubr.msk.bf16.gmra.mxu1 %vm347_vm1, %v10320_v29  ;;  %16114 = vmatprep.mubr.msk.bf16.mxu0 %vm347_vm1, %v9929_v34 }
 0x5b3   : > { %v8803_v45 = vpop.f32.mrf.mxu0  ;;  %16168 = vmatprep.mubr.msk.bf16.mxu1 %vm347_vm1, %v10321_v12 }
 0x5b4   : > { %v9037_v3 = vpop.f32.mrf.mxu1 }
 0x5b5   : > { %v15905_v14 = vpop.f32.mrf.mxu0 }
 0x5b6   : > { %v15959_v10 = vpop.f32.mrf.mxu1 }
 0x5b7   : > { %v8805_v20 = vpop.f32.mrf.mxu0  ;;  %v13708_v10 = vld [vmem:[%s16373_s9 + $0x8e2] sm:$0xff] }
 0x5b8   : > { %v9039_v54 = vpop.f32.mrf.mxu1  ;;  %v13789_v20 = vld [vmem:[%s16373_s9 + $0x8f4] sm:$0xff] }
 0x5b9   : > { %v15964_v1 = vpop.f32.mrf.mxu0  ;;  %16115 = vmatmul.mubr.msk.bf16.gmra.mxu0 %vm347_vm1, %v9930_v23 }
 0x5ba   : > { %v16018_v29 = vpop.f32.mrf.mxu1  ;;  %16169 = vmatmul.mubr.msk.bf16.gmra.mxu1 %vm347_vm1, %v10322_v31  ;;  %v13709_v31 = vld [vmem:[%s16373_s9 + $0x8ea] sm:$0xff] }
 0x5bb   : > { %v9265_v34 = vpop.f32.mrf.mxu0  ;;  %v9931_v1 = vpack.c.bf16 %v13709_v31, %v13708_v10  ;;  %v13710_v29 = vld [vmem:[%s16373_s9 + $0x8f2] sm:$0xff] }
 0x5bc   : > { %v9440_v55 = vadd.f32 %v9265_v34, %v20050_v58  ;;  %v9658_v12 = vpop.f32.mrf.mxu1  ;;  %v13711_v34 = vld [vmem:[%s16373_s9 + $0x8fa] sm:$0xff] }
 0x5bd   : > { %v15965_v7 = vpop.f32.mrf.mxu0  ;;  %16118 = vmatprep.mubr.msk.bf16.mxu0 %vm347_vm1, %v9931_v1 }
 0x5be   : > { %v20252_v42 = vadd.f32 %v9658_v12, %v9440_v55  ;;  %v16019_v13 = vpop.f32.mrf.mxu1 }
 0x5bf   : > { %v9268_v59 = vpop.f32.mrf.mxu0  ;;  %v13791_v13 = vld [vmem:[%s16373_s9 + $0x904] sm:$0xff] }
 0x5c0   : > { %v9441_v9 = vadd.f32 %v9268_v59, %v20054_v11  ;;  %v9661_v47 = vpop.f32.mrf.mxu1  ;;  %v13790_v11 = vld [vmem:[%s16373_s9 + $0x8fc] sm:$0xff]  ;;  %v13792_v59 = vld [vmem:[%s16373_s9 + $0x90c] sm:$0xff] }
 0x5c1   : > { %v15968_v45 = vpop.f32.mrf.mxu0  ;;  %v10323_v7 = vpack.c.bf16 %v13790_v11, %v13789_v20 }
 0x5c2   : > { %v20255_v22 = vadd.f32 %v9661_v47, %v9441_v9  ;;  %v9442_v27 = vadd.f32 %v15968_v45, %v20066_v60  ;;  %v16022_v58 = vpop.f32.mrf.mxu1  ;;  %v9932_v60 = vpack.c.bf16 %v13711_v34, %v13710_v29  ;;  %v10324_v47 = vpack.c.bf16 %v13792_v59, %v13791_v13 }
 0x5c3   : > { %v9279_v3 = vpop.f32.mrf.mxu0  ;;  %16172 = vmatprep.mubr.msk.bf16.mxu1 %vm347_vm1, %v10323_v7 }
 0x5c4   : > { %v20258_v14 = vadd.f32 %v16022_v58, %v9442_v27  ;;  %v9672_v23 = vpop.f32.mrf.mxu1  ;;  %16119 = vmatmul.mubr.msk.bf16.gmra.mxu0 %vm347_vm1, %v9932_v60  ;;  %16173 = vmatmul.mubr.msk.bf16.gmra.mxu1 %vm347_vm1, %v10324_v47 }
 0x5c5   : > { %v15969_v54 = vpop.f32.mrf.mxu0 }
 0x5c6   : > { %v9443_v55 = vadd.f32 %v15969_v54, %v20071_v16  ;;  %v16023_v12 = vpop.f32.mrf.mxu1 }
 0x5c7   : > { %v9281_v9 = vpop.f32.mrf.mxu0 }
 0x5c8   : > { %v20270_v45 = vadd.f32 %v16023_v12, %v9443_v55  ;;  %v9674_v27 = vpop.f32.mrf.mxu1 }
 0x5c9   : > { %v15972_v58 = vpop.f32.mrf.mxu0 }
 0x5ca   : > { %v16026_v16 = vpop.f32.mrf.mxu1 }
 0x5cb   : > { %v9293_v3 = vpop.f32.mrf.mxu0 }
 0x5cc   : > { %v9444_v23 = vadd.f32 %v9293_v3, %v20086_v61  ;;  %v9686_v10 = vpop.f32.mrf.mxu1 }
 0x5cd   : > { %v15973_v31 = vpop.f32.mrf.mxu0 }
 0x5ce   : > { %v20276_v20 = vadd.f32 %v9686_v10, %v9444_v23  ;;  %v16027_v54 = vpop.f32.mrf.mxu1 }
 0x5cf   : > { %v9296_v1 = vpop.f32.mrf.mxu0 }
 0x5d0   : > { %v9689_v11 = vpop.f32.mrf.mxu1 }
 0x5d1   : > { %v15976_v29 = vpop.f32.mrf.mxu0 }
 0x5d2   : > { %v9446_v34 = vadd.f32 %v15976_v29, %v20099_v41  ;;  %v16030_v55 = vpop.f32.mrf.mxu1 }
 0x5d3   : > { %v9306_v12 = vpop.f32.mrf.mxu0 }
 0x5d4   : > { %v20279_v7 = vadd.f32 %v16030_v55, %v9446_v34  ;;  %v9699_v60 = vpop.f32.mrf.mxu1 }
 0x5d5   : > { %v15977_v13 = vpop.f32.mrf.mxu0 }
 0x5d6   : > { %v16031_v59 = vpop.f32.mrf.mxu1 }
 0x5d7   : > { %v9308_v9 = vpop.f32.mrf.mxu0 }
 0x5d8   : > { %v9445_v61 = vadd.f32 %v9308_v9, %v20105_v2  ;;  %v9701_v47 = vpop.f32.mrf.mxu1 }
 0x5d9   : > { %v15980_v27 = vpop.f32.mrf.mxu0 }
 0x5da   : > { %v20282_v58 = vadd.f32 %v9701_v47, %v9445_v61  ;;  %v16034_v16 = vpop.f32.mrf.mxu1 }
 0x5db   : > { %v9320_v3 = vpop.f32.mrf.mxu0 }
 0x5dc   : > { %v9713_v23 = vpop.f32.mrf.mxu1 }
 0x5dd   : > { %v15981_v10 = vpop.f32.mrf.mxu0 }
 0x5de   : > { %v9447_v41 = vadd.f32 %v15981_v10, %v20119_v46  ;;  %v16035_v31 = vpop.f32.mrf.mxu1 }
 0x5df   : > { %v9322_v54 = vpop.f32.mrf.mxu0 }
 0x5e0   : > { %v20285_v1 = vadd.f32 %v16035_v31, %v9447_v41  ;;  %v9715_v11 = vpop.f32.mrf.mxu1 }
 0x5e1   : > { %v15984_v29 = vpop.f32.mrf.mxu0 }
 0x5e2   : > { %v16038_v34 = vpop.f32.mrf.mxu1 }
 0x5e3   : > { %v9333_v55 = vpop.f32.mrf.mxu0 }
 0x5e4   : > { %v9448_v2 = vadd.f32 %v9333_v55, %v20134_v5  ;;  %v9726_v12 = vpop.f32.mrf.mxu1 }
 0x5e5   : > { %v15985_v60 = vpop.f32.mrf.mxu0 }
 0x5e6   : > { %v20288_v13 = vadd.f32 %v9726_v12, %v9448_v2  ;;  %v16039_v59 = vpop.f32.mrf.mxu1 }
 0x5e7   : > { %v9336_v9 = vpop.f32.mrf.mxu0 }
 0x5e8   : > { %v9449_v61 = vadd.f32 %v9336_v9, %v20138_v50  ;;  %v9729_v47 = vpop.f32.mrf.mxu1 }
 0x5e9   : > { %v15988_v46 = vpop.f32.mrf.mxu0 }
 0x5ea   : > { %v20291_v27 = vadd.f32 %v9729_v47, %v9449_v61  ;;  %v9450_v16 = vadd.f32 %v15988_v46, %v20150_v52  ;;  %v16042_v3 = vpop.f32.mrf.mxu1 }
 0x5eb   : > { %v9347_v23 = vpop.f32.mrf.mxu0 }
 0x5ec   : > { %v20294_v10 = vadd.f32 %v16042_v3, %v9450_v16  ;;  %v9740_v41 = vpop.f32.mrf.mxu1 }
 0x5ed   : > { %v15989_v5 = vpop.f32.mrf.mxu0 }
 0x5ee   : > { %v9451_v31 = vadd.f32 %v15989_v5, %v20155_v0  ;;  %v16043_v54 = vpop.f32.mrf.mxu1 }
 0x5ef   : > { %v9349_v11 = vpop.f32.mrf.mxu0 }
 0x5f0   : > { %v20297_v29 = vadd.f32 %v16043_v54, %v9451_v31  ;;  %v9742_v34 = vpop.f32.mrf.mxu1 }
 0x5f1   : > { %v15992_v50 = vpop.f32.mrf.mxu0 }
 0x5f2   : > { %v16046_v55 = vpop.f32.mrf.mxu1 }
 0x5f3   : > { %v9361_v2 = vpop.f32.mrf.mxu0 }
 0x5f4   : > { %v9754_v12 = vpop.f32.mrf.mxu1 }
 0x5f5   : > { %v15993_v60 = vpop.f32.mrf.mxu0 }
 0x5f6   : > { %v16047_v59 = vpop.f32.mrf.mxu1 }
 0x5f7   : > { %v9363_v52 = vpop.f32.mrf.mxu0 }
 0x5f8   : > { %v9756_v9 = vpop.f32.mrf.mxu1 }
 0x5f9   : > { %v15996_v61 = vpop.f32.mrf.mxu0 }
 0x5fa   : > { %v9454_v47 = vadd.f32 %v15996_v61, %v20180_v39  ;;  %v16050_v46 = vpop.f32.mrf.mxu1 }
 0x5fb   : > { %v9373_v16 = vpop.f32.mrf.mxu0 }
 0x5fc   : > { %v20300_v3 = vadd.f32 %v16050_v46, %v9454_v47  ;;  %v9452_v0 = vadd.f32 %v9373_v16, %v20185_v25  ;;  %v9766_v23 = vpop.f32.mrf.mxu1 }
 0x5fd   : > { %v15997_v41 = vpop.f32.mrf.mxu0 }
 0x5fe   : > { %v20303_v5 = vadd.f32 %v9766_v23, %v9452_v0  ;;  %v16051_v31 = vpop.f32.mrf.mxu1 }
 0x5ff   : > { %v9376_v54 = vpop.f32.mrf.mxu0 }
 0x600   : > { %v9453_v11 = vadd.f32 %v9376_v54, %v20189_v53  ;;  %v9769_v34 = vpop.f32.mrf.mxu1 }
 0x601   : > { %v16000_v50 = vpop.f32.mrf.mxu0 }
 0x602   : > { %v20306_v55 = vadd.f32 %v9769_v34, %v9453_v11  ;;  %v16054_v2 = vpop.f32.mrf.mxu1 }
 0x603   : > { %v9388_v39 = vpop.f32.mrf.mxu0 }
 0x604   : > { %v9781_v12 = vpop.f32.mrf.mxu1 }
 0x605   : > { %v16001_v60 = vpop.f32.mrf.mxu0 }
 0x606   : > { %v9455_v59 = vadd.f32 %v16001_v60, %v20203_v44  ;;  %v16055_v52 = vpop.f32.mrf.mxu1 }
 0x607   : > { %v9390_v25 = vpop.f32.mrf.mxu0 }
 0x608   : > { %v20309_v9 = vadd.f32 %v16055_v52, %v9455_v59  ;;  %v9783_v61 = vpop.f32.mrf.mxu1 }
 0x609   : > { %v16004_v47 = vpop.f32.mrf.mxu0 }
 0x60a   : > { %v16058_v46 = vpop.f32.mrf.mxu1 }
 0x60b   : > { %v9401_v16 = vpop.f32.mrf.mxu0 }
 0x60c   : > { %v9456_v53 = vadd.f32 %v9401_v16, %v20218_v63  ;;  %v9794_v0 = vpop.f32.mrf.mxu1 }
 0x60d   : > { %v16005_v23 = vpop.f32.mrf.mxu0 }
 0x60e   : > { %v20312_v41 = vadd.f32 %v9794_v0, %v9456_v53  ;;  %v16059_v31 = vpop.f32.mrf.mxu1 }
 0x60f   : > { %v9404_v54 = vpop.f32.mrf.mxu0 }
 0x610   : > { %v9797_v11 = vpop.f32.mrf.mxu1 }
 0x611   : > { %v16008_v34 = vpop.f32.mrf.mxu0 }
 0x612   : > { %v9458_v44 = vadd.f32 %v16008_v34, %v20231_v48  ;;  %v16062_v50 = vpop.f32.mrf.mxu1 }
 0x613   : > { %v9414_v2 = vpop.f32.mrf.mxu0 }
 0x614   : > { %v20315_v39 = vadd.f32 %v16062_v50, %v9458_v44  ;;  %v9807_v12 = vpop.f32.mrf.mxu1 }
 0x615   : > { %v16009_v60 = vpop.f32.mrf.mxu0 }
 0x616   : > { %v9459_v59 = vadd.f32 %v16009_v60, %v20236_v15  ;;  %v16063_v52 = vpop.f32.mrf.mxu1 }
 0x617   : > { %v9416_v63 = vpop.f32.mrf.mxu0 }
 0x618   : > { %v20318_v25 = vadd.f32 %v16063_v52, %v9459_v59  ;;  %v9457_v61 = vadd.f32 %v9416_v63, %v20240_v51  ;;  %v9809_v47 = vpop.f32.mrf.mxu1 }
 0x619   : > { %v16012_v46 = vpop.f32.mrf.mxu0 }
 0x61a   : > { %v20321_v16 = vadd.f32 %v9809_v47, %v9457_v61  ;;  %v16066_v53 = vpop.f32.mrf.mxu1 }
 0x61b   : > { %v9429_v48 = vpop.f32.mrf.mxu0 }
 0x61c   : > { %v9822_v0 = vpop.f32.mrf.mxu1 }
 0x61d   : > { %v16013_v23 = vpop.f32.mrf.mxu0 }
 0x61e   : > { %v16067_v31 = vpop.f32.mrf.mxu1 }
 0x61f   : > { %v9431_v54 = vpop.f32.mrf.mxu0 }
 0x620   : > { %v9824_v11 = vpop.f32.mrf.mxu1 }
 0x621   : > { %v16072_v34 = vpop.f32.mrf.mxu0 }
 0x622   : > { %v16126_v44 = vpop.f32.mrf.mxu1 }
 0x623   : > { %v10050_v15 = vpop.f32.mrf.mxu0 }
 0x624   : > { %v10225_v50 = vadd.f32 %v10050_v15, %v20252_v42  ;;  %v10442_v2 = vpop.f32.mrf.mxu1 }
 0x625   : > { %v16073_v12 = vpop.f32.mrf.mxu0 }
 0x626   : > { %v10617_v60 = vadd.f32 %v10442_v2, %v10225_v50  ;;  %v16127_v51 = vpop.f32.mrf.mxu1 }
 0x627   : > { %v10053_v59 = vpop.f32.mrf.mxu0 }
 0x628   : > { %v10226_v52 = vadd.f32 %v10053_v59, %v20255_v22  ;;  %v10445_v63 = vpop.f32.mrf.mxu1  ;;  %10817 = vrot.lane.b32.xlu0 %v10617_v60, %s16290_s5 }
 0x629   : > { %v16076_v61 = vpop.f32.mrf.mxu0 }
 0x62a   : > { %v10618_v47 = vadd.f32 %v10445_v63, %v10226_v52  ;;  %v10227_v46 = vadd.f32 %v16076_v61, %v20258_v14  ;;  %v16130_v53 = vpop.f32.mrf.mxu1 }
 0x62b   : > { %v10064_v48 = vpop.f32.mrf.mxu0 }
 0x62c   : > { %v10619_v0 = vadd.f32 %v16130_v53, %v10227_v46  ;;  %v10456_v23 = vpop.f32.mrf.mxu1  ;;  %10819 = vrot.lane.b32.xlu1 %v10618_v47, %s16290_s5 }
 0x62d   : > { %v16077_v42 = vpop.f32.mrf.mxu0 }
 0x62e   : > { %v10228_v31 = vadd.f32 %v16077_v42, %v20270_v45  ;;  %v16131_v54 = vpop.f32.mrf.mxu1  ;;  %10821 = vrot.lane.b32.xlu0 %v10619_v0, %s16290_s5 }
 0x62f   : > { %v10066_v22 = vpop.f32.mrf.mxu0 }
 0x630   : > { %v10620_v11 = vadd.f32 %v16131_v54, %v10228_v31  ;;  %v10458_v34 = vpop.f32.mrf.mxu1 }
 0x631   : > { %v16080_v44 = vpop.f32.mrf.mxu0 }
 0x632   : > { %v16134_v15 = vpop.f32.mrf.mxu1  ;;  %10823 = vrot.lane.b32.xlu1 %v10620_v11, %s16290_s5 }
 0x633   : > { %v10078_v14 = vpop.f32.mrf.mxu0 }
 0x634   : > { %v10229_v50 = vadd.f32 %v10078_v14, %v20276_v20  ;;  %v10470_v2 = vpop.f32.mrf.mxu1 }
 0x635   : > { %v16081_v12 = vpop.f32.mrf.mxu0 }
 0x636   : > { %v10621_v60 = vadd.f32 %v10470_v2, %v10229_v50  ;;  %v16135_v51 = vpop.f32.mrf.mxu1 }
 0x637   : > { %v10081_v59 = vpop.f32.mrf.mxu0 }
 0x638   : > { %v10473_v52 = vpop.f32.mrf.mxu1  ;;  %10825 = vrot.lane.b32.xlu0 %v10621_v60, %s16290_s5 }
 0x639   : > { %v16084_v45 = vpop.f32.mrf.mxu0 }
 0x63a   : > { %v10231_v63 = vadd.f32 %v16084_v45, %v20279_v7  ;;  %v16138_v61 = vpop.f32.mrf.mxu1 }
 0x63b   : > { %v10091_v47 = vpop.f32.mrf.mxu0 }
 0x63c   : > { %v10623_v46 = vadd.f32 %v16138_v61, %v10231_v63  ;;  %v10483_v53 = vpop.f32.mrf.mxu1 }
 0x63d   : > { %v16085_v48 = vpop.f32.mrf.mxu0 }
 0x63e   : > { %v16139_v0 = vpop.f32.mrf.mxu1  ;;  %10829 = vrot.lane.b32.xlu0 %v10623_v46, %s16290_s5 }
 0x63f   : > { %v10093_v20 = vpop.f32.mrf.mxu0 }
 0x640   : > { %v10230_v23 = vadd.f32 %v10093_v20, %v20282_v58  ;;  %v10485_v42 = vpop.f32.mrf.mxu1 }
 0x641   : > { %v16088_v31 = vpop.f32.mrf.mxu0 }
 0x642   : > { %v10622_v54 = vadd.f32 %v10485_v42, %v10230_v23  ;;  %v16142_v22 = vpop.f32.mrf.mxu1 }
 0x643   : > { %v10105_v11 = vpop.f32.mrf.mxu0 }
 0x644   : > { %v10497_v34 = vpop.f32.mrf.mxu1  ;;  %10827 = vrot.lane.b32.xlu1 %v10622_v54, %s16290_s5 }
 0x645   : > { %v16089_v7 = vpop.f32.mrf.mxu0 }
 0x646   : > { %v10232_v44 = vadd.f32 %v16089_v7, %v20285_v1  ;;  %v16143_v15 = vpop.f32.mrf.mxu1 }
 0x647   : > { %v10107_v14 = vpop.f32.mrf.mxu0 }
 0x648   : > { %v10624_v50 = vadd.f32 %v16143_v15, %v10232_v44  ;;  %v10499_v2 = vpop.f32.mrf.mxu1 }
 0x649   : > { %v16092_v12 = vpop.f32.mrf.mxu0 }
 0x64a   : > { %v16146_v60 = vpop.f32.mrf.mxu1  ;;  %10831 = vrot.lane.b32.xlu0 %v10624_v50, %s16290_s5 }
 0x64b   : > { %v10118_v58 = vpop.f32.mrf.mxu0 }
 0x64c   : > { %v10233_v51 = vadd.f32 %v10118_v58, %v20288_v13  ;;  %v10510_v59 = vpop.f32.mrf.mxu1 }
 0x64d   : > { %v16093_v52 = vpop.f32.mrf.mxu0 }
 0x64e   : > { %v10625_v45 = vadd.f32 %v10510_v59, %v10233_v51  ;;  %v16147_v63 = vpop.f32.mrf.mxu1 }
 0x64f   : > { %v10121_v61 = vpop.f32.mrf.mxu0 }
 0x650   : > { %v10234_v47 = vadd.f32 %v10121_v61, %v20291_v27  ;;  %v10513_v46 = vpop.f32.mrf.mxu1  ;;  %10833 = vrot.lane.b32.xlu1 %v10625_v45, %s16290_s5 }
 0x651   : > { %v16096_v1 = vpop.f32.mrf.mxu0 }
 0x652   : > { %v10626_v53 = vadd.f32 %v10513_v46, %v10234_v47  ;;  %v10235_v48 = vadd.f32 %v16096_v1, %v20294_v10  ;;  %v16150_v0 = vpop.f32.mrf.mxu1 }
 0x653   : > { %v10132_v20 = vpop.f32.mrf.mxu0 }
 0x654   : > { %v10627_v23 = vadd.f32 %v16150_v0, %v10235_v48  ;;  %v10524_v42 = vpop.f32.mrf.mxu1  ;;  %10835 = vrot.lane.b32.xlu0 %v10626_v53, %s16290_s5 }
 0x655   : > { %v16097_v13 = vpop.f32.mrf.mxu0 }
 0x656   : > { %v10236_v31 = vadd.f32 %v16097_v13, %v20297_v29  ;;  %v16151_v54 = vpop.f32.mrf.mxu1  ;;  %10837 = vrot.lane.b32.xlu1 %v10627_v23, %s16290_s5 }
 0x657   : > { %v10134_v27 = vpop.f32.mrf.mxu0 }
 0x658   : > { %v10628_v22 = vadd.f32 %v16151_v54, %v10236_v31  ;;  %v10526_v11 = vpop.f32.mrf.mxu1 }
 0x659   : > { %v16100_v34 = vpop.f32.mrf.mxu0 }
 0x65a   : > { %v16154_v7 = vpop.f32.mrf.mxu1  ;;  %10839 = vrot.lane.b32.xlu0 %v10628_v22, %s16290_s5 }
 0x65b   : > { %v10146_v10 = vpop.f32.mrf.mxu0 }
 0x65c   : > { %v10538_v44 = vpop.f32.mrf.mxu1  ;;  %v13822_v10 = vld [vmem:[%s16373_s9 + $0x3ba] sm:$0xff] }
 0x65d   : > { %v16101_v15 = vpop.f32.mrf.mxu0  ;;  %v13823_v44 = vld [vmem:[%s16373_s9 + $0x3c2] sm:$0xff] }
 0x65e   : > { %v16155_v14 = vpop.f32.mrf.mxu1  ;;  %v13832_v15 = vld [vmem:[%s16373_s9 + $0x3ee] sm:$0xff] }
 0x65f   : > { %v10148_v50 = vpop.f32.mrf.mxu0 }
 0x660   : > { %v10540_v2 = vpop.f32.mrf.mxu1  ;;  %v10976_v50 = vsel %vm347_vm1, %v13822_v10, 0.0 }
 0x661   : > { %v16104_v12 = vpop.f32.mrf.mxu0  ;;  %v10977_v2 = vsel %vm347_vm1, %v13823_v44, 0.0 }
 0x662   : > { %v10239_v60 = vadd.f32 %v16104_v12, %v20300_v3  ;;  %v16158_v29 = vpop.f32.mrf.mxu1  ;;  %v13833_v12 = vld [vmem:[%s16373_s9 + $0x3f6] sm:$0xff] }
 0x663   : > { %v10158_v58 = vpop.f32.mrf.mxu0 }
 0x664   : > { %v10631_v51 = vadd.f32 %v16158_v29, %v10239_v60  ;;  %v10237_v59 = vadd.f32 %v10158_v58, %v20303_v5  ;;  %v10550_v52 = vpop.f32.mrf.mxu1  ;;  %v11061_v60 = vsel %vm347_vm1, %v13832_v15, 0.0  ;;  %v10978_v58 = vadd.f32 %v10977_v2, %v10976_v50 }
 0x665   : > { %v16105_v45 = vpop.f32.mrf.mxu0 }
 0x666   : > { %v16159_v63 = vpop.f32.mrf.mxu1  ;;  %10845 = vrot.lane.b32.xlu0 %v10631_v51, %s16290_s5  ;;  %v10629_v47 = vadd.f32 %v10550_v52, %v10237_v59  ;;  %v11062_v51 = vsel %vm347_vm1, %v13833_v12, 0.0  ;;  %v13840_v59 = vld [vmem:[%s16373_s9 + $0x422] sm:$0xff] }
 0x667   : > { %v10161_v61 = vpop.f32.mrf.mxu0  ;;  %v11063_v63 = vadd.f32 %v11062_v51, %v11061_v60 }
 0x668   : > { %v10238_v46 = vadd.f32 %v10161_v61, %v20306_v55  ;;  %v10553_v1 = vpop.f32.mrf.mxu1  ;;  %v11110_v61 = vsel %vm347_vm1, %v13840_v59, 0.0 }
 0x669   : > { %v16108_v53 = vpop.f32.mrf.mxu0 }
 0x66a   : > { %v10630_v48 = vadd.f32 %v10553_v1, %v10238_v46  ;;  %v16162_v0 = vpop.f32.mrf.mxu1  ;;  %10841 = vrot.lane.b32.xlu0 %v10629_v47, %s16290_s5  ;;  %v10979_v53 = vrot.slane %v10978_v58, 4 }
 0x66b   : > { %v10173_v3 = vpop.f32.mrf.mxu0  ;;  %v13850_v0 = vld [vmem:[%s16373_s9 + $0x456] sm:$0xff] }
 0x66c   : > { %v10565_v20 = vpop.f32.mrf.mxu1  ;;  %10843 = vrot.lane.b32.xlu1 %v10630_v48, %s16290_s5  ;;  %v13851_v3 = vld [vmem:[%s16373_s9 + $0x45e] sm:$0xff] }
 0x66d   : > { %v16109_v5 = vpop.f32.mrf.mxu0 }
 0x66e   : > { %v16163_v23 = vpop.f32.mrf.mxu1  ;;  %v10240_v34 = vadd.f32 %v16109_v5, %v20309_v9  ;;  %v13841_v9 = vld [vmem:[%s16373_s9 + $0x42a] sm:$0xff] }
 0x66f   : > { %v10175_v42 = vpop.f32.mrf.mxu0  ;;  %v11111_v47 = vsel %vm347_vm1, %v13841_v9, 0.0 }
 0x670   : > { %v10567_v13 = vpop.f32.mrf.mxu1  ;;  %v10632_v46 = vadd.f32 %v16163_v23, %v10240_v34  ;;  %v11112_v48 = vadd.f32 %v11111_v47, %v11110_v61  ;;  %v11064_v42 = vrot.slane %v11063_v63, 4  ;;  %v13858_v34 = vld [vmem:[%s16373_s9 + $0x48a] sm:$0xff] }
 0x671   : > { %v16112_v31 = vpop.f32.mrf.mxu0  ;;  %v11191_v13 = vsel %vm347_vm1, %v13850_v0, 0.0 }
 0x672   : > { %v16166_v55 = vpop.f32.mrf.mxu1  ;;  %v11113_v23 = vrot.slane %v11112_v48, 4  ;;  %v11065_v15 = vadd.f32 %v11064_v42, %v11063_v63 }
 0x673   : > { %v10186_v54 = vpop.f32.mrf.mxu0 }
 0x674   : > { %v20353_v27 = vpop.f32.mrf.mxu1  ;;  %v10241_v31 = vadd.f32 %v10186_v54, %v20312_v41  ;;  %v11114_v54 = vadd.f32 %v11113_v23, %v11112_v48  ;;  %v11066_v59 = vrot.slane %v11065_v15, 2 }
 0x675   : > { %v16113_v22 = vpop.f32.mrf.mxu0 }
 0x676   : > { %v16167_v11 = vpop.f32.mrf.mxu1  ;;  %v10980_v22 = vadd.f32 %v10979_v53, %v10978_v58  ;;  %v13869_v58 = vld [vmem:[%s16373_s9 + $0x4c6] sm:$0xff]  ;;  %v11115_v63 = vrot.slane %v11114_v54, 2  ;;  %v13875_v53 = vld [vmem:[%s16373_s9 + $0x4fa] sm:$0xff]  ;;  %v11067_v0 = vadd.f32 %v11066_v59, %v11065_v15 }
 0x677   : > { %v10189_v7 = vpop.f32.mrf.mxu0 }
 0x678   : > { %v10581_v14 = vpop.f32.mrf.mxu1  ;;  %v13859_v7 = vld [vmem:[%s16373_s9 + $0x492] sm:$0xff]  ;;  %v10981_v41 = vrot.slane %v10980_v22, 2 }
 0x679   : > { %v16116_v29 = vpop.f32.mrf.mxu0  ;;  %v11240_v14 = vsel %vm347_vm1, %v13858_v34, 0.0  ;;  %v11241_v50 = vsel %vm347_vm1, %v13859_v7, 0.0 }
 0x67a   : > { %v10243_v52 = vadd.f32 %v16116_v29, %v20315_v39  ;;  %v16170_v45 = vpop.f32.mrf.mxu1  ;;  %v11192_v39 = vsel %vm347_vm1, %v13851_v3, 0.0  ;;  %v11242_v60 = vadd.f32 %v11241_v50, %v11240_v14  ;;  %v13868_v29 = vld [vmem:[%s16373_s9 + $0x4be] sm:$0xff] }
 0x67b   : > { %v10199_v1 = vpop.f32.mrf.mxu0  ;;  %v11193_v11 = vadd.f32 %v11192_v39, %v11191_v13  ;;  %v11321_v9 = vsel %vm347_vm1, %v13868_v29, 0.0  ;;  %v13884_v39 = vld [vmem:[%s16373_s9 + $0x526] sm:$0xff]  ;;  %v10633_v29 = vadd.f32 %v20353_v27, %v10241_v31 }
 0x67c   : > { %v10635_v20 = vadd.f32 %v16170_v45, %v10243_v52  ;;  %v10591_v5 = vpop.f32.mrf.mxu1  ;;  %v10982_v45 = vadd.f32 %v10981_v41, %v10980_v22  ;;  %v11243_v47 = vrot.slane %v11242_v60, 4  ;;  %v13874_v1 = vld [vmem:[%s16373_s9 + $0x4f2] sm:$0xff]  ;;  %v11068_v22 = vrot.slane %v11067_v0, 1 }
 0x67d   : > { %v16117_v55 = vpop.f32.mrf.mxu0  ;;  %v11194_v12 = vrot.slane %v11193_v11, 4  ;;  %v11366_v3 = vsel %vm347_vm1, %v13874_v1, 0.0  ;;  %v11116_v5 = vadd.f32 %v11115_v63, %v11114_v54  ;;  %v11447_v34 = vsel %vm347_vm1, %v13884_v39, 0.0 }
 0x67e   : > { %v10244_v10 = vadd.f32 %v16117_v55, %v20318_v25  ;;  %v16171_v44 = vpop.f32.mrf.mxu1  ;;  %10853 = vrot.lane.b32.xlu0 %v10635_v20, %s16290_s5  ;;  %v10983_v20 = vrot.slane %v10982_v45, 1  ;;  %v11244_v13 = vadd.f32 %v11243_v47, %v11242_v60  ;;  %v13885_v55 = vld [vmem:[%s16373_s9 + $0x52e] sm:$0xff]  ;;  %v11069_v15 = vadd.f32 %v11068_v22, %v11067_v0 }
 0x67f   : > { %v10201_v2 = vpop.f32.mrf.mxu0  ;;  %v11195_v61 = vadd.f32 %v11194_v12, %v11193_v11  ;;  %v11367_v11 = vsel %vm347_vm1, %v13875_v53, 0.0 }
 0x680   : > { %v10636_v51 = vadd.f32 %v16171_v44, %v10244_v10  ;;  %v10242_v25 = vadd.f32 %v10201_v2, %v20321_v16  ;;  %v10593_v52 = vpop.f32.mrf.mxu1  ;;  %v11322_v16 = vsel %vm347_vm1, %v13869_v58, 0.0  ;;  %v10984_v7 = vadd.f32 %v10983_v20, %v10982_v45 }
 0x681   : > { %v11196_v42 = vrot.slane %v11195_v61, 2  ;;  %v11323_v23 = vadd.f32 %v11322_v16, %v11321_v9  ;;  %v11245_v44 = vrot.slane %v11244_v13, 2  ;;  %v11368_v50 = vadd.f32 %v11367_v11, %v11366_v3 }
 0x682   : > { %v10634_v48 = vadd.f32 %v10593_v52, %v10242_v25  ;;  %10855 = vrot.lane.b32.xlu1 %v10636_v51, %s16290_s5  ;;  %10847 = vrot.lane.b32.xlu0 %v10632_v46, %s16290_s5  ;;  %v11117_v46 = vrot.slane %v11116_v5, 1  ;;  %v11448_v2 = vsel %vm347_vm1, %v13885_v55, 0.0  ;;  %v11070_v58 = vadd.f32 %v11069_v15, %v10984_v7 }
 0x683   : > { %v11197_v10 = vadd.f32 %v11196_v42, %v11195_v61  ;;  %v11324_v14 = vrot.slane %v11323_v23, 4  ;;  %v11246_v12 = vadd.f32 %v11245_v44, %v11244_v13  ;;  %v11449_v60 = vadd.f32 %v11448_v2, %v11447_v34 }
 0x684   : > { %v11118_v41 = vadd.f32 %v11117_v46, %v11116_v5  ;;  %v11369_v25 = vrot.slane %v11368_v50, 4  ;;  %v16120_v59 = vpop.f32.mrf.mxu0  ;;  %v16174_v63 = vpop.f32.mrf.mxu1 }
 0x685   : > { %v11198_v54 = vrot.slane %v11197_v10, 1  ;;  %v11325_v51 = vadd.f32 %v11324_v14, %v11323_v23  ;;  %v11247_v52 = vrot.slane %v11246_v12, 1  ;;  %v11450_v45 = vrot.slane %v11449_v60, 4 }
 0x686   : > { %10851 = vrot.lane.b32.xlu1 %v10634_v48, %s16290_s5  ;;  %v11119_v61 = vadd.f32 %v11118_v41, %v11070_v58  ;;  %v11370_v31 = vadd.f32 %v11369_v25, %v11368_v50  ;;  %v10214_v47 = vpop.f32.mrf.mxu0  ;;  %v10606_v48 = vpop.f32.mrf.mxu1  ;;  %v20939_v41 = vld [vmem:[#allocation28_spill] sm:$0xff]  ;;  %v20940_v25 = vld [vmem:[#allocation29_spill] sm:$0xff] }
 0x687   : > { %v11199_v9 = vadd.f32 %v11198_v54, %v11197_v10  ;;  %v11326_v27 = vrot.slane %v11325_v51, 2  ;;  %v11248_v1 = vadd.f32 %v11247_v52, %v11246_v12  ;;  %v11451_v53 = vadd.f32 %v11450_v45, %v11449_v60  ;;  %v20421_v50 = vpop.permute.xlu0 %10771  ;;  %v20428_v60 = vpop.permute.xlu1 %10773 }
 0x688   : > { %v11371_v3 = vrot.slane %v11370_v31, 2  ;;  %v16121_v20 = vpop.f32.mrf.mxu0  ;;  %v16175_v42 = vpop.f32.mrf.mxu1  ;;  %v10878_v54 = vsel %vm10877_vm2, %v20939_v41, %v19706_v33  ;;  %v10879_v33 = vsel %vm10877_vm2, %v20940_v25, %v19727_v18 }
 0x689   : > { %v11200_v0 = vadd.f32 %v11199_v9, %v11119_v61  ;;  %v11327_v16 = vadd.f32 %v11326_v27, %v11325_v51  ;;  %v11452_v5 = vrot.slane %v11451_v53, 2  ;;  %v10899_v12 = vsel %vm10898_vm3, %v10878_v54, %v19829_v57  ;;  %v20941_v57 = vld [vmem:[#allocation30_spill] sm:$0xff] }
 0x68a   : > { %10849 = vrot.lane.b32.xlu1 %v10633_v29, %s16290_s5  ;;  %v11372_v55 = vadd.f32 %v11371_v3, %v11370_v31  ;;  %v10216_v22 = vpop.f32.mrf.mxu0  ;;  %v10608_v11 = vpop.f32.mrf.mxu1  ;;  %v10880_v59 = vsel %vm10877_vm2, %v20941_v57, %v19703_v17  ;;  %v10900_v9 = vsel %vm10898_vm3, %v10879_v33, %v19850_v8 }
 0x68b   : > { %v11249_v13 = vadd.f32 %v11248_v1, %v11200_v0  ;;  %v11328_v39 = vrot.slane %v11327_v16, 1  ;;  %v11453_v23 = vadd.f32 %v11452_v5, %v11451_v53  ;;  %v10901_v63 = vsel %vm10898_vm3, %v10880_v59, %v19845_v62  ;;  %v20942_v62 = vld [vmem:[#allocation31_spill] sm:$0xff] }
 0x68c   : > { %v11373_v7 = vrot.slane %v11372_v55, 1  ;;  %v10881_v0 = vsel %vm10877_vm2, %v20942_v62, %v19709_v6 }
 0x68d   : > { %v11329_v34 = vadd.f32 %v11328_v39, %v11327_v16  ;;  %v11454_v46 = vrot.slane %v11453_v23, 1  ;;  %v10902_v20 = vsel %vm10898_vm3, %v10881_v0, %v19858_v43 }
 0x68e   : > { %v11374_v44 = vadd.f32 %v11373_v7, %v11372_v55 }
 0x68f   : > { %v11330_v10 = vadd.f32 %v11329_v34, %v11249_v13  ;;  %v11455_v15 = vadd.f32 %v11454_v46, %v11453_v23 }
 0x691   : > { %v11375_v14 = vadd.f32 %v11374_v44, %v11330_v10  ;;  %v20945_v44 = vld [vmem:[#allocation32_spill] sm:$0xff] }
 0x693   : > { %v11456_v2 = vadd.f32 %v11455_v15, %v11375_v14  ;;  %v10882_v15 = vsel %vm10877_vm2, %v20945_v44, %v19744_v38 }
 0x695   : > { %11461 = vst.msk [vmem:[%s261_s22] sm:$0x1] %vm11460_vm4, %v11456_v2  ;;  %v10903_v2 = vsel %vm10898_vm3, %v10882_v15, %v19854_v21 }
 0x69a   : > { %v10818_v29 = vpop.permute.xlu0 %10817 }
 0x69b   : > { %v10920_v58 = vsel %vm10919_vm5, %v10899_v12, %v10818_v29 }
 0x69c   : > { %v13888_v51 = vpack.c.bf16 %v10920_v58, %v10920_v58  ;;  %v10962_v52 = vmul.f32 %v10920_v58, %v10920_v58  ;;  %v10952_v18 = vsel %vm10951_vm7, %v10920_v58, 0.0 }
 0x69e   : > { %10949 = vst.msk [vmem:[%s20433_s24] sm:$0xf] %vm10948_vm6, %v13888_v51  ;;  %v10820_v45 = vpop.permute.xlu1 %10819  ;;  %v10964_v8 = vsel %vm10951_vm7, %v10962_v52, 0.0  ;;  %v20946_v52 = vld [vmem:[#allocation33_spill] sm:$0xff] }
 0x69f   : > { %v10921_v61 = vsel %vm10919_vm5, %v10900_v9, %v10820_v45  ;;  %v10884_v45 = vsel %vm10877_vm2, %v20946_v52, %v19757_v56 }
 0x6a0   : > { %v13889_v27 = vpack.c.bf16 %v10921_v61, %v10921_v61  ;;  %v10953_v31 = vsel %vm10951_vm7, %v10921_v61, 0.0  ;;  %v10963_v47 = vmul.f32 %v10921_v61, %v10921_v61  ;;  %v10822_v1 = vpop.permute.xlu0 %10821 }
 0x6a1   : > { %v10954_v17 = vadd.f32 %v10953_v31, %v10952_v18  ;;  %v10922_v53 = vsel %vm10919_vm5, %v10901_v63, %v10822_v1 }
 0x6a2   : > { %10950 = vst.msk [vmem:[%s20433_s24 + $0x4] sm:$0xf] %vm10948_vm6, %v13889_v27  ;;  %v10965_v48 = vsel %vm10951_vm7, %v10963_v47, 0.0  ;;  %v13890_v3 = vpack.c.bf16 %v10922_v53, %v10922_v53  ;;  %v11032_v5 = vmul.f32 %v10922_v53, %v10922_v53  ;;  %v11015_v39 = vrot.slane %v10922_v53, 4 }
 0x6a3   : > { %v10966_v16 = vadd.f32 %v10965_v48, %v10964_v8  ;;  %v10955_v11 = vrot.slane %v10954_v17, 4  ;;  %v10905_v27 = vsel %vm10898_vm3, %v10884_v45, %v19872_v26 }
 0x6a4   : > { %v10824_v42 = vpop.permute.xlu1 %10823  ;;  %v13827_v34 = vrot.slane %v13890_v3, 10  ;;  %v11038_v7 = vrot.slane %v11032_v5, 4  ;;  %v20947_v5 = vld [vmem:[#allocation34_spill] sm:$0xff] }
 0x6a5   : > { %v10923_v13 = vsel %vm10919_vm5, %v10902_v20, %v10824_v42  ;;  %v10967_v14 = vrot.slane %v10966_v16, 4  ;;  %v10956_v29 = vadd.f32 %v10955_v11, %v10954_v17  ;;  %v10883_v42 = vsel %vm10877_vm2, %v20947_v5, %v19723_v4 }
 0x6a6   : > { %v13891_v55 = vpack.c.bf16 %v10923_v13, %v10923_v13  ;;  %v11016_v22 = vrot.slane %v10923_v13, 4  ;;  %v11033_v23 = vmul.f32 %v10923_v13, %v10923_v13 }
 0x6a7   : > { %v10968_v57 = vadd.f32 %v10967_v14, %v10966_v16  ;;  %v10957_v63 = vrot.slane %v10956_v29, 2 }
 0x6a8   : > { %v11001_v43 = vrot.slane %v13891_v55, 6  ;;  %v11017_v46 = vsel %vm11014_vm9, %v11015_v39, %v11016_v22  ;;  %v11039_v10 = vrot.slane %v11033_v23, 4  ;;  %v10904_v39 = vsel %vm10898_vm3, %v10883_v42, %v19878_v36 }
 0x6a9   : > { %v11022_v61 = vsel %vm10951_vm7, %v11017_v46, 0.0  ;;  %v10969_v53 = vrot.slane %v10968_v57, 2  ;;  %v10958_v16 = vadd.f32 %v10957_v63, %v10956_v29 }
 0x6aa   : > { %v11002_v41 = vsel %vm20463_vm10, %v13827_v34, %v11001_v43  ;;  %v11040_v54 = vsel %vm11014_vm9, %v11038_v7, %v11039_v10  ;;  %v10826_v12 = vpop.permute.xlu0 %10825  ;;  %v11003_v38 = vrot.slane %v11001_v43, 4 }
 0x6ab   : > { %13828 = vst.msk [vmem:[%s20433_s24 + $0x8] sm:$0xf] %vm10948_vm6, %v11002_v41  ;;  %v10924_v58 = vsel %vm10919_vm5, %v10903_v2, %v10826_v12  ;;  %v11045_v8 = vsel %vm10951_vm7, %v11040_v54, 0.0  ;;  %v10970_v13 = vadd.f32 %v10969_v53, %v10968_v57  ;;  %v10959_v11 = vrot.slane %v10958_v16, 1  ;;  %v20948_v54 = vld [vmem:[#allocation50_spill] sm:$0xff]  ;;  %v20949_v12 = vld [vmem:[#allocation35_spill] sm:$0xff] }
 0x6ac   : > { %v13892_v51 = vpack.c.bf16 %v10924_v58, %v10924_v58  ;;  %v11018_v25 = vrot.slane %v10924_v58, 4  ;;  %v11034_v33 = vmul.f32 %v10924_v58, %v10924_v58  ;;  %v10885_v29 = vsel %vm10877_vm2, %v20949_v12, %v20948_v54  ;;  %v20951_v53 = vld [vmem:[#allocation51_spill] sm:$0xff] }
 0x6ad   : > { %v10971_v4 = vrot.slane %v10970_v13, 1 }
 0x6ae   : > { %v11004_v59 = vrot.slane %v13892_v51, 6  ;;  %v11019_v21 = vsel %vm11014_vm9, %v11016_v22, %v11018_v25  ;;  %v11041_v9 = vrot.slane %v11034_v33, 4  ;;  %v10960_v33 = vadd.f32 %v10959_v11, %v10958_v16 }
 0x6af   : > { %v11023_v18 = vsel %vm10951_vm7, %v11019_v21, 0.0  ;;  %v10972_v45 = vadd.f32 %v10971_v4, %v10970_v13 }
 0x6b0   : > { %v11005_v31 = vsel %vm20463_vm10, %v11003_v38, %v11004_v59  ;;  %v11024_v47 = vadd.f32 %v11023_v18, %v11022_v61  ;;  %v11042_v1 = vsel %vm11014_vm9, %v11039_v10, %v11041_v9  ;;  %v10830_v17 = vpop.permute.xlu0 %10829  ;;  %v20950_v9 = vld [vmem:[#allocation56_spill] sm:$0xff] }
 0x6b1   : > { %13829 = vst.msk [vmem:[%s20433_s24 + $0xc] sm:$0xf] %vm10948_vm6, %v11005_v31  ;;  %v11046_v56 = vsel %vm10951_vm7, %v11042_v1, 0.0  ;;  %v10926_v48 = vsel %vm10919_vm5, %v10905_v27, %v10830_v17  ;;  %v10906_v52 = vsel %vm10898_vm3, %v10885_v29, %v20950_v9 }
 0x6b2   : > { %v11025_v62 = vrot.slane %v11024_v47, 4  ;;  %v11047_v0 = vadd.f32 %v11046_v56, %v11045_v8  ;;  %v13894_v26 = vpack.c.bf16 %v10926_v48, %v10926_v48  ;;  %v11083_v34 = vsel %vm10951_vm7, %v10926_v48, 0.0  ;;  %v20952_v8 = vld [vmem:[#allocation36_spill] sm:$0xff] }
 0x6b3   : > { %v11093_v7 = vmul.f32 %v10926_v48, %v10926_v48  ;;  %v10886_v56 = vsel %vm10877_vm2, %v20952_v8, %v20951_v53 }
 0x6b4   : > { %v11026_v3 = vadd.f32 %v11025_v62, %v11024_v47  ;;  %v11048_v20 = vrot.slane %v11047_v0, 4  ;;  %13837 = vst.msk [vmem:[%s20433_s24 + $0x14] sm:$0xf] %vm10948_vm6, %v13894_v26  ;;  %v20953_v26 = vld [vmem:[#allocation57_spill] sm:$0xff] }
 0x6b5   : > { %v11095_v58 = vsel %vm10951_vm7, %v11093_v7, 0.0  ;;  %v10907_v16 = vsel %vm10898_vm3, %v10886_v56, %v20953_v26 }
 0x6b6   : > { %v11027_v55 = vrot.slane %v11026_v3, 2  ;;  %v11049_v22 = vadd.f32 %v11048_v20, %v11047_v0  ;;  %v10828_v23 = vpop.permute.xlu1 %10827 }
 0x6b7   : > { %v10925_v43 = vsel %vm10919_vm5, %v10904_v39, %v10828_v23 }
 0x6b8   : > { %v11028_v46 = vadd.f32 %v11027_v55, %v11026_v3  ;;  %v11050_v10 = vrot.slane %v11049_v22, 2  ;;  %v13893_v44 = vpack.c.bf16 %v10925_v43, %v10925_v43  ;;  %v11082_v15 = vsel %vm10951_vm7, %v10925_v43, 0.0 }
 0x6b9   : > { %v11084_v14 = vadd.f32 %v11083_v34, %v11082_v15  ;;  %v11092_v2 = vmul.f32 %v10925_v43, %v10925_v43 }
 0x6ba   : > { %v11029_v41 = vrot.slane %v11028_v46, 1  ;;  %v11051_v36 = vadd.f32 %v11050_v10, %v11049_v22  ;;  %13836 = vst.msk [vmem:[%s20433_s24 + $0x10] sm:$0xf] %vm10948_vm6, %v13893_v44 }
 0x6bb   : > { %v11085_v51 = vrot.slane %v11084_v14, 4  ;;  %v11094_v25 = vsel %vm10951_vm7, %v11092_v2, 0.0 }
 0x6bc   : > { %v11030_v57 = vadd.f32 %v11029_v41, %v11028_v46  ;;  %v11052_v38 = vrot.slane %v11051_v36, 1  ;;  %v11096_v59 = vadd.f32 %v11095_v58, %v11094_v25  ;;  %v10832_v21 = vpop.permute.xlu0 %10831 }
 0x6bd   : > { %v11086_v63 = vadd.f32 %v11085_v51, %v11084_v14  ;;  %v10927_v31 = vsel %vm10919_vm5, %v10906_v52, %v10832_v21 }
 0x6be   : > { %v11053_v61 = vadd.f32 %v11052_v38, %v11051_v36  ;;  %v11031_v18 = vadd.f32 %v11030_v57, %v10960_v33  ;;  %v11097_v27 = vrot.slane %v11096_v59, 4  ;;  %v13895_v62 = vpack.c.bf16 %v10927_v31, %v10927_v31 }
 0x6bf   : > { %v11087_v47 = vrot.slane %v11086_v63, 2  ;;  %v11162_v0 = vmul.f32 %v10927_v31, %v10927_v31  ;;  %v11145_v42 = vrot.slane %v10927_v31, 4 }
 0x6c0   : > { %v11054_v1 = vadd.f32 %v11053_v61, %v10972_v45  ;;  %v11098_v17 = vadd.f32 %v11097_v27, %v11096_v59  ;;  %v13845_v34 = vrot.slane %v13895_v62, 10 }
 0x6c1   : > { %v11088_v48 = vadd.f32 %v11087_v47, %v11086_v63  ;;  %v11168_v7 = vrot.slane %v11162_v0, 4 }
 0x6c2   : > { %v11099_v3 = vrot.slane %v11098_v17, 2  ;;  %v10834_v20 = vpop.permute.xlu1 %10833 }
 0x6c3   : > { %v11089_v5 = vrot.slane %v11088_v48, 1  ;;  %v10928_v13 = vsel %vm10919_vm5, %v10907_v16, %v10834_v20 }
 0x6c4   : > { %v11100_v39 = vadd.f32 %v11099_v3, %v11098_v17  ;;  %v13896_v55 = vpack.c.bf16 %v10928_v13, %v10928_v13  ;;  %v11146_v22 = vrot.slane %v10928_v13, 4  ;;  %v11163_v23 = vmul.f32 %v10928_v13, %v10928_v13 }
 0x6c5   : > { %v11090_v11 = vadd.f32 %v11089_v5, %v11088_v48 }
 0x6c6   : > { %v11101_v43 = vrot.slane %v11100_v39, 1  ;;  %v11132_v46 = vrot.slane %v13896_v55, 6  ;;  %v11147_v10 = vsel %vm11014_vm9, %v11145_v42, %v11146_v22  ;;  %v11169_v44 = vrot.slane %v11163_v23, 4  ;;  %v10836_v15 = vpop.permute.xlu0 %10835 }
 0x6c7   : > { %v11091_v4 = vadd.f32 %v11090_v11, %v11031_v18  ;;  %v10929_v14 = vsel %vm10919_vm5, %v19903_v24, %v10836_v15  ;;  %v11152_v21 = vsel %vm10951_vm7, %v11147_v10, 0.0 }
 0x6c8   : > { %v11102_v2 = vadd.f32 %v11101_v43, %v11100_v39  ;;  %v11133_v41 = vsel %vm20463_vm10, %v13845_v34, %v11132_v46  ;;  %v11170_v36 = vsel %vm11014_vm9, %v11168_v7, %v11169_v44  ;;  %v10838_v54 = vpop.permute.xlu1 %10837  ;;  %v13897_v12 = vpack.c.bf16 %v10929_v14, %v10929_v14 }
 0x6c9   : > { %13846 = vst.msk [vmem:[%s20433_s24 + $0x18] sm:$0xf] %vm10948_vm6, %v11133_v41  ;;  %v11148_v29 = vrot.slane %v10929_v14, 4  ;;  %v11164_v58 = vmul.f32 %v10929_v14, %v10929_v14  ;;  %v11134_v25 = vrot.slane %v11132_v46, 4  ;;  %v10930_v33 = vsel %vm10919_vm5, %v19909_v40, %v10838_v54 }
 0x6ca   : > { %v11103_v51 = vadd.f32 %v11102_v2, %v11054_v1  ;;  %v11135_v24 = vrot.slane %v13897_v12, 6  ;;  %v13898_v59 = vpack.c.bf16 %v10930_v33, %v10930_v33  ;;  %v11175_v9 = vsel %vm10951_vm7, %v11170_v36, 0.0 }
 0x6cb   : > { %v11149_v57 = vsel %vm11014_vm9, %v11146_v22, %v11148_v29  ;;  %v11171_v38 = vrot.slane %v11164_v58, 4  ;;  %v11222_v45 = vmul.f32 %v10930_v33, %v10930_v33  ;;  %v11212_v47 = vsel %vm10951_vm7, %v10930_v33, 0.0 }
 0x6cc   : > { %v11153_v52 = vsel %vm10951_vm7, %v11149_v57, 0.0  ;;  %v10840_v63 = vpop.permute.xlu0 %10839  ;;  %v11136_v61 = vsel %vm20463_vm10, %v11134_v25, %v11135_v24  ;;  %13854 = vst.msk [vmem:[%s20433_s24 + $0x20] sm:$0xf] %vm10948_vm6, %v13898_v59 }
 0x6cd   : > { %v11154_v18 = vadd.f32 %v11153_v52, %v11152_v21  ;;  %v11172_v40 = vsel %vm11014_vm9, %v11169_v44, %v11171_v38  ;;  %v10931_v27 = vsel %vm10919_vm5, %v19922_v35, %v10840_v63  ;;  %13847 = vst.msk [vmem:[%s20433_s24 + $0x1c] sm:$0xf] %vm10948_vm6, %v11136_v61  ;;  %v11224_v62 = vsel %vm10951_vm7, %v11222_v45, 0.0 }
 0x6ce   : > { %v11176_v31 = vsel %vm10951_vm7, %v11172_v40, 0.0  ;;  %v13899_v1 = vpack.c.bf16 %v10931_v27, %v10931_v27  ;;  %v11213_v17 = vsel %vm10951_vm7, %v10931_v27, 0.0  ;;  %v11223_v48 = vmul.f32 %v10931_v27, %v10931_v27 }
 0x6cf   : > { %v11155_v53 = vrot.slane %v11154_v18, 4  ;;  %v11177_v8 = vadd.f32 %v11176_v31, %v11175_v9  ;;  %v11214_v56 = vadd.f32 %v11213_v17, %v11212_v47 }
 0x6d0   : > { %13855 = vst.msk [vmem:[%s20433_s24 + $0x24] sm:$0xf] %vm10948_vm6, %v13899_v1  ;;  %v11225_v16 = vsel %vm10951_vm7, %v11223_v48, 0.0 }
 0x6d1   : > { %v11156_v0 = vadd.f32 %v11155_v53, %v11154_v18  ;;  %v11178_v26 = vrot.slane %v11177_v8, 4  ;;  %v11215_v35 = vrot.slane %v11214_v56, 4  ;;  %v11226_v3 = vadd.f32 %v11225_v16, %v11224_v62 }
 0x6d3   : > { %v11157_v20 = vrot.slane %v11156_v0, 2  ;;  %v11179_v5 = vadd.f32 %v11178_v26, %v11177_v8  ;;  %v11216_v42 = vadd.f32 %v11215_v35, %v11214_v56  ;;  %v11227_v13 = vrot.slane %v11226_v3, 4 }
 0x6d5   : > { %v11158_v39 = vadd.f32 %v11157_v20, %v11156_v0  ;;  %v11180_v55 = vrot.slane %v11179_v5, 2  ;;  %v11217_v22 = vrot.slane %v11216_v42, 2  ;;  %v11228_v23 = vadd.f32 %v11227_v13, %v11226_v3 }
 0x6d7   : > { %v11159_v11 = vrot.slane %v11158_v39, 1  ;;  %v11181_v34 = vadd.f32 %v11180_v55, %v11179_v5  ;;  %v11218_v7 = vadd.f32 %v11217_v22, %v11216_v42  ;;  %v11229_v43 = vrot.slane %v11228_v23, 2 }
 0x6d8   : > { %v10846_v46 = vpop.permute.xlu0 %10845 }
 0x6d9   : > { %v11160_v10 = vadd.f32 %v11159_v11, %v11158_v39  ;;  %v11182_v44 = vrot.slane %v11181_v34, 1  ;;  %v11219_v15 = vrot.slane %v11218_v7, 1  ;;  %v11230_v14 = vadd.f32 %v11229_v43, %v11228_v23  ;;  %v20954_v23 = vld [vmem:[#allocation52_spill] sm:$0xff]  ;;  %v20955_v11 = vld [vmem:[#allocation45_spill] sm:$0xff] }
 0x6da   : > { %v10934_v54 = vsel %vm10919_vm5, %v19955_v49, %v10846_v46 }
 0x6db   : > { %v11183_v2 = vadd.f32 %v11182_v44, %v11181_v34  ;;  %v11161_v41 = vadd.f32 %v11160_v10, %v11091_v4  ;;  %v11220_v36 = vadd.f32 %v11219_v15, %v11218_v7  ;;  %v11231_v12 = vrot.slane %v11230_v14, 1 }
 0x6dc   : > { %v10842_v29 = vpop.permute.xlu0 %10841  ;;  %v13902_v57 = vpack.c.bf16 %v10934_v54, %v10934_v54  ;;  %v11294_v38 = vmul.f32 %v10934_v54, %v10934_v54  ;;  %v11278_v63 = vrot.slane %v10934_v54, 4  ;;  %v10896_v34 = vsel %vm10877_vm2, %v20955_v11, %v20954_v23 }
 0x6dd   : > { %v11184_v58 = vadd.f32 %v11183_v2, %v11103_v51  ;;  %v11221_v25 = vadd.f32 %v11220_v36, %v11161_v41  ;;  %v10932_v33 = vsel %vm10919_vm5, %v19969_v28, %v10842_v29  ;;  %v11232_v24 = vadd.f32 %v11231_v12, %v11230_v14 }
 0x6de   : > { %v13900_v59 = vpack.c.bf16 %v10932_v33, %v10932_v33  ;;  %v10844_v21 = vpop.permute.xlu1 %10843  ;;  %v11292_v9 = vmul.f32 %v10932_v33, %v10932_v33  ;;  %v11275_v49 = vrot.slane %v10932_v33, 4  ;;  %v11265_v18 = vrot.slane %v13902_v57, 6 }
 0x6df   : > { %v10933_v4 = vsel %vm10919_vm5, %v19982_v30, %v10844_v21  ;;  %v11233_v52 = vadd.f32 %v11232_v24, %v11184_v58  ;;  %v11301_v40 = vrot.slane %v11294_v38, 4  ;;  %v10917_v46 = vsel %vm10898_vm3, %v10896_v34, %v20428_v60  ;;  %v20957_v21 = vld [vmem:[#allocation47_spill] sm:$0xff] }
 0x6e0   : > { %v13901_v45 = vpack.c.bf16 %v10933_v4, %v10933_v4  ;;  %v11276_v61 = vrot.slane %v10933_v4, 4  ;;  %v11293_v51 = vmul.f32 %v10933_v4, %v10933_v4  ;;  %v13863_v27 = vrot.slane %v13900_v59, 10  ;;  %v20956_v59 = vld [vmem:[#allocation53_spill] sm:$0xff] }
 0x6e1   : > { %v11298_v31 = vrot.slane %v11292_v9, 4 }
 0x6e2   : > { %v11262_v28 = vrot.slane %v13901_v45, 6  ;;  %v11277_v47 = vsel %vm11014_vm9, %v11275_v49, %v11276_v61  ;;  %v11279_v1 = vsel %vm11014_vm9, %v11276_v61, %v11278_v63  ;;  %v11299_v17 = vrot.slane %v11293_v51, 4 }
 0x6e3   : > { %v11282_v8 = vsel %vm10951_vm7, %v11277_v47, 0.0  ;;  %v11283_v56 = vsel %vm10951_vm7, %v11279_v1, 0.0 }
 0x6e4   : > { %v11263_v30 = vsel %vm20463_vm10, %v13863_v27, %v11262_v28  ;;  %v11264_v53 = vrot.slane %v11262_v28, 4  ;;  %v11284_v48 = vadd.f32 %v11283_v56, %v11282_v8  ;;  %v11300_v62 = vsel %vm11014_vm9, %v11298_v31, %v11299_v17 }
 0x6e5   : > { %13864 = vst.msk [vmem:[%s20433_s24 + $0x28] sm:$0xf] %vm10948_vm6, %v11263_v30  ;;  %v11302_v0 = vsel %vm11014_vm9, %v11299_v17, %v11301_v40  ;;  %v11305_v35 = vsel %vm10951_vm7, %v11300_v62, 0.0 }
 0x6e6   : > { %v11266_v26 = vsel %vm20463_vm10, %v11264_v53, %v11265_v18  ;;  %v11306_v16 = vsel %vm10951_vm7, %v11302_v0, 0.0  ;;  %v11285_v3 = vrot.slane %v11284_v48, 4 }
 0x6e7   : > { %13865 = vst.msk [vmem:[%s20433_s24 + $0x2c] sm:$0xf] %vm10948_vm6, %v11266_v26  ;;  %v11307_v20 = vadd.f32 %v11306_v16, %v11305_v35 }
 0x6e8   : > { %v11286_v5 = vadd.f32 %v11285_v3, %v11284_v48 }
 0x6e9   : > { %v11308_v42 = vrot.slane %v11307_v20, 4 }
 0x6ea   : > { %v11287_v13 = vrot.slane %v11286_v5, 2 }
 0x6eb   : > { %v11309_v39 = vadd.f32 %v11308_v42, %v11307_v20 }
 0x6ec   : > { %v11288_v55 = vadd.f32 %v11287_v13, %v11286_v5 }
 0x6ed   : > { %v11310_v22 = vrot.slane %v11309_v39, 2 }
 0x6ee   : > { %v11289_v7 = vrot.slane %v11288_v55, 1 }
 0x6ef   : > { %v11311_v43 = vadd.f32 %v11310_v22, %v11309_v39 }
 0x6f0   : > { %v10854_v10 = vpop.permute.xlu0 %10853  ;;  %v11290_v44 = vadd.f32 %v11289_v7, %v11288_v55 }
 0x6f1   : > { %v11312_v15 = vrot.slane %v11311_v43, 1  ;;  %v10938_v14 = vsel %vm10919_vm5, %v10917_v46, %v10854_v10 }
 0x6f2   : > { %v13906_v2 = vpack.c.bf16 %v10938_v14, %v10938_v14  ;;  %v20579_v36 = vadd.f32 %v11290_v44, %v11221_v25  ;;  %v10895_v25 = vsel %vm10877_vm2, %v20957_v21, %v20956_v59  ;;  %v11402_v9 = vrot.slane %v10938_v14, 4 }
 0x6f3   : > { %v11313_v41 = vadd.f32 %v11312_v15, %v11311_v43  ;;  %v11419_v4 = vmul.f32 %v10938_v14, %v10938_v14 }
 0x6f4   : > { %v11388_v54 = vrot.slane %v13906_v2, 6  ;;  %v10856_v12 = vpop.permute.xlu1 %10855  ;;  %v10848_v29 = vpop.permute.xlu0 %10847 }
 0x6f5   : > { %v10939_v58 = vsel %vm10919_vm5, %v20041_v32, %v10856_v12  ;;  %v10935_v33 = vsel %vm10919_vm5, %v19997_v37, %v10848_v29  ;;  %v20585_v60 = vadd.f32 %v11313_v41, %v11233_v52  ;;  %v10916_v32 = vsel %vm10898_vm3, %v10895_v25, %v20421_v50 }
 0x6f6   : > { %v13907_v24 = vpack.c.bf16 %v10939_v58, %v10939_v58  ;;  %v11404_v57 = vrot.slane %v10939_v58, 4  ;;  %v11420_v38 = vmul.f32 %v10939_v58, %v10939_v58  ;;  %v13903_v45 = vpack.c.bf16 %v10935_v33, %v10935_v33 }
 0x6f7   : > { %v11390_v63 = vrot.slane %v11388_v54, 4  ;;  %v11425_v28 = vrot.slane %v11419_v4, 4  ;;  %v11342_v50 = vsel %vm10951_vm7, %v10935_v33, 0.0  ;;  %v11352_v1 = vmul.f32 %v10935_v33, %v10935_v33 }
 0x6f8   : > { %v11391_v49 = vrot.slane %v13907_v24, 6  ;;  %v10852_v61 = vpop.permute.xlu1 %10851  ;;  %v11405_v37 = vsel %vm11014_vm9, %v11402_v9, %v11404_v57  ;;  %v11427_v52 = vrot.slane %v11420_v38, 4  ;;  %13872 = vst.msk [vmem:[%s20433_s24 + $0x30] sm:$0xf] %vm10948_vm6, %v13903_v45 }
 0x6f9   : > { %v10937_v51 = vsel %vm10919_vm5, %v10916_v32, %v10852_v61  ;;  %v11409_v47 = vsel %vm10951_vm7, %v11405_v37, 0.0 }
 0x6fa   : > { %v11392_v18 = vsel %vm20463_vm10, %v11390_v63, %v11391_v49  ;;  %v13905_v40 = vpack.c.bf16 %v10937_v51, %v10937_v51  ;;  %v11401_v27 = vrot.slane %v10937_v51, 4  ;;  %v11418_v31 = vmul.f32 %v10937_v51, %v10937_v51 }
 0x6fb   : > { %13881 = vst.msk [vmem:[%s20433_s24 + $0x3c] sm:$0xf] %vm10948_vm6, %v11392_v18  ;;  %v11428_v8 = vsel %vm11014_vm9, %v11425_v28, %v11427_v52 }
 0x6fc   : > { %v13879_v17 = vrot.slane %v13905_v40, 10  ;;  %v11403_v30 = vsel %vm11014_vm9, %v11401_v27, %v11402_v9  ;;  %v10850_v53 = vpop.permute.xlu1 %10849  ;;  %v11424_v48 = vrot.slane %v11418_v31, 4  ;;  %v11432_v42 = vsel %vm10951_vm7, %v11428_v8, 0.0 }
 0x6fd   : > { %v11408_v56 = vsel %vm10951_vm7, %v11403_v30, 0.0  ;;  %v10936_v62 = vsel %vm10919_vm5, %v20015_v19, %v10850_v53  ;;  %v11354_v19 = vsel %vm10951_vm7, %v11352_v1, 0.0 }
 0x6fe   : > { %v11389_v0 = vsel %vm20463_vm10, %v13879_v17, %v11388_v54  ;;  %v11410_v26 = vadd.f32 %v11409_v47, %v11408_v56  ;;  %v13904_v35 = vpack.c.bf16 %v10936_v62, %v10936_v62  ;;  %v11343_v16 = vsel %vm10951_vm7, %v10936_v62, 0.0 }
 0x6ff   : > { %13880 = vst.msk [vmem:[%s20433_s24 + $0x38] sm:$0xf] %vm10948_vm6, %v11389_v0  ;;  %v11426_v3 = vsel %vm11014_vm9, %v11424_v48, %v11425_v28  ;;  %v11344_v20 = vadd.f32 %v11343_v16, %v11342_v50  ;;  %v11353_v5 = vmul.f32 %v10936_v62, %v10936_v62 }
 0x700   : > { %v11411_v13 = vrot.slane %v11410_v26, 4  ;;  %v11431_v39 = vsel %vm10951_vm7, %v11426_v3, 0.0  ;;  %13873 = vst.msk [vmem:[%s20433_s24 + $0x34] sm:$0xf] %vm10948_vm6, %v13904_v35 }
 0x701   : > { %v11433_v6 = vadd.f32 %v11432_v42, %v11431_v39  ;;  %v11345_v55 = vrot.slane %v11344_v20, 4  ;;  %v11355_v22 = vsel %vm10951_vm7, %v11353_v5, 0.0 }
 0x702   : > { %v11412_v23 = vadd.f32 %v11411_v13, %v11410_v26  ;;  %v11356_v11 = vadd.f32 %v11355_v22, %v11354_v19 }
 0x703   : > { %v11434_v34 = vrot.slane %v11433_v6, 4  ;;  %v11346_v7 = vadd.f32 %v11345_v55, %v11344_v20 }
 0x704   : > { %v11413_v43 = vrot.slane %v11412_v23, 2  ;;  %v11357_v46 = vrot.slane %v11356_v11, 4 }
 0x705   : > { %v11435_v10 = vadd.f32 %v11434_v34, %v11433_v6  ;;  %v11347_v44 = vrot.slane %v11346_v7, 2 }
 0x706   : > { %v11414_v15 = vadd.f32 %v11413_v43, %v11412_v23  ;;  %v11358_v14 = vadd.f32 %v11357_v46, %v11356_v11 }
 0x707   : > { %v11436_v2 = vrot.slane %v11435_v10, 2  ;;  %v11348_v41 = vadd.f32 %v11347_v44, %v11346_v7 }
 0x708   : > { %v11359_v54 = vrot.slane %v11358_v14, 2  ;;  %v11415_v12 = vrot.slane %v11414_v15, 1 }
 0x709   : > { %v11437_v29 = vadd.f32 %v11436_v2, %v11435_v10  ;;  %v11349_v58 = vrot.slane %v11348_v41, 1 }
 0x70a   : > { %v11360_v33 = vadd.f32 %v11359_v54, %v11358_v14  ;;  %v11416_v59 = vadd.f32 %v11415_v12, %v11414_v15 }
 0x70b   : > { %v11350_v24 = vadd.f32 %v11349_v58, %v11348_v41  ;;  %v11438_v57 = vrot.slane %v11437_v29, 1 }
 0x70c   : > { %v11361_v38 = vrot.slane %v11360_v33, 1 }
 0x70d   : > { %v11351_v21 = vadd.f32 %v11350_v24, %v20579_v36  ;;  %v11439_v4 = vadd.f32 %v11438_v57, %v11437_v29 }
 0x70e   : > { %v11362_v25 = vadd.f32 %v11361_v38, %v11360_v33 }
 0x70f   : > { %v11417_v9 = vadd.f32 %v11416_v59, %v11351_v21 }
 0x710   : > { %v11363_v45 = vadd.f32 %v11362_v25, %v20585_v60 }
 0x711   : > { %11458 = vst.msk [vmem:[%s254_s28] sm:$0x1] %vm11457_vm11, %v11417_v9 }
 0x712   : > { %v11440_v32 = vadd.f32 %v11439_v4, %v11363_v45 }
 0x714   : > { %11459 = vst.msk [vmem:[%s254_s28 + $0x1] sm:$0x1] %vm11457_vm11, %v11440_v32 }
 0x715 PF: > { %s15_s19 = sadd.s32 1, %s16286_s19   ;;  %s20958_s15 = smov %s16278_s17 }
 0x716   : > { %p12_p8 = scmp.ge.s32.totalorder %s15_s19, 6   ;;  %s20959_s16 = smov %s16282_s18 }
 0x717   : > { %s20960_s17 = smov %s20963_s20  ;;  %s20961_s18 = smov %s20967_s21 }
 0x718   :  { %14 = sbr.rel (!%p12_p8) target bundleno = 3 (0x3), region = 147 }

</bundles_post_ra>
